<compile_context>
chip_gen: v7x
topology: tpu7x:2x2x1
jax: 0.10.0
libtpu: 0.0.40
codegen_flags: <defaults>
</compile_context>

<pallas_src>
import functools

import jax
import jax.numpy as jnp
from jax import lax
from jax.experimental import pallas as pl
from jax.experimental.pallas import tpu as pltpu


# ----------------------------------------------------------------------------
# Fused kernel: one grid step = one batch element.
# ----------------------------------------------------------------------------
def _attention_kernel(x_ref, wqkv_ref, wproj_ref, bproj_ref, o_ref, *,
                      num_heads, scale):
    # x_ref: (1,N,C) bf16 | wqkv_ref: (C,3C) bf16 | wproj_ref: (C,C) bf16
    # bproj_ref: (1,C) f32 | o_ref: (1,N,C) f32
    N, C = x_ref.shape[1], x_ref.shape[2]
    hd = C // num_heads

    x = x_ref[0]                                                     # (N, C) bf16

    # --- QKV projection: bf16 operands, f32 accumulation on the MXU ---
    qkv = jnp.dot(x, wqkv_ref[...],
                  preferred_element_type=jnp.float32)                # (N, 3C) f32

    # Fold the softmax scale into q once (instead of scaling each (N,N) tile).
    q = (qkv[:, 0 * C:1 * C] * scale).astype(jnp.bfloat16).reshape(N, num_heads, hd)
    k = qkv[:, 1 * C:2 * C].astype(jnp.bfloat16).reshape(N, num_heads, hd)
    v = qkv[:, 2 * C:3 * C].astype(jnp.bfloat16).reshape(N, num_heads, hd)

    # --- heads-batched scores; softmax math stays f32 ---
    s = jnp.einsum('nhd,mhd->hnm', q, k,
                   preferred_element_type=jnp.float32)               # (H, N, N) f32
    m = jnp.max(s, axis=-1, keepdims=True)                           # (H, N, 1)
    p = jnp.exp(s - m)                                               # (H, N, N) f32
    l = jnp.sum(p, axis=-1, keepdims=True)                           # (H, N, 1)

    # --- PV on unnormalized probabilities; deferred normalization via EUP rcp ---
    ctx = jnp.einsum('hnm,mhd->hnd', p.astype(jnp.bfloat16), v,
                     preferred_element_type=jnp.float32)             # (H, N, hd) f32
    ctx = ctx * pl.reciprocal(l, approx=True)                        # (H, N, hd)

    # Re-concatenate heads along channels -> lane-dense (N, C).
    ctx = jnp.swapaxes(ctx, 0, 1).reshape(N, C).astype(jnp.bfloat16)

    # --- output projection + bias, fused in the same kernel ---
    y = jnp.dot(ctx, wproj_ref[...],
                preferred_element_type=jnp.float32) + bproj_ref[0]
    o_ref[0] = y.astype(o_ref.dtype)


# ----------------------------------------------------------------------------
# Wrapper: grid/BlockSpecs, bf16 operand casting, cost estimate.
# ----------------------------------------------------------------------------
def attention_forward(x, w_qkv, w_proj, b_proj, *, num_heads, qk_scale=None):
    """x: (B,N,C) f32; w_qkv: (C,3C); w_proj: (C,C); b_proj: (C,).

    Returns (out, attn) with attn=None, matching the use_sdpa=True path.
    """
    B, N, C = x.shape
    head_dim = C // num_heads
    scale = qk_scale if qk_scale is not None else float(head_dim) ** -0.5

    # bf16 MXU operands (accumulation stays f32 inside the kernel); this also
    # halves the HBM->VMEM DMA traffic for x and the weights.
    x_bf = x.astype(jnp.bfloat16)
    wqkv_bf = w_qkv.astype(jnp.bfloat16)
    wproj_bf = w_proj.astype(jnp.bfloat16)
    bproj = b_proj.reshape(1, C).astype(jnp.float32)

    out_bytes = B * N * C * jnp.dtype(x.dtype).itemsize
    flops = 2 * B * (N * C * 3 * C                          # QKV projection
                     + 2 * num_heads * N * N * head_dim     # QK^T + PV
                     + N * C * C)                           # output projection
    transcendentals = B * num_heads * N * (N + 1)           # exp + reciprocal
    bytes_accessed = (x_bf.size * 2 + wqkv_bf.size * 2 + wproj_bf.size * 2
                      + bproj.size * 4 + out_bytes)

    kernel = functools.partial(_attention_kernel,
                               num_heads=num_heads, scale=scale)

    out = pl.pallas_call(
        kernel,
        out_shape=jax.ShapeDtypeStruct((B, N, C), x.dtype),
        grid=(B,),
        in_specs=[
            pl.BlockSpec((1, N, C), lambda b: (b, 0, 0)),    # x (one batch element)
            pl.BlockSpec((C, 3 * C), lambda b: (0, 0)),      # W_qkv (broadcast)
            pl.BlockSpec((C, C), lambda b: (0, 0)),          # W_proj (broadcast)
            pl.BlockSpec((1, C), lambda b: (0, 0)),          # proj bias
        ],
        out_specs=pl.BlockSpec((1, N, C), lambda b: (b, 0, 0)),
        compiler_params=pltpu.CompilerParams(
            dimension_semantics=("parallel",)),              # megacore over batch
        cost_estimate=pl.CostEstimate(
            flops=flops,
            transcendentals=transcendentals,
            bytes_accessed=bytes_accessed),
    )(x_bf, wqkv_bf, wproj_bf, bproj)
    return out, None


# ----------------------------------------------------------------------------
# Pure-JAX reference (mirrors the PyTorch math) for in-script validation.
# ----------------------------------------------------------------------------
def attention_reference(x, w_qkv, w_proj, b_proj, num_heads):
    B, N, C = x.shape
    hd = C // num_heads
    scale = float(hd) ** -0.5
    qkv = jnp.matmul(x, w_qkv, precision=lax.Precision.HIGHEST)
    qkv = qkv.reshape(B, N, 3, num_heads, hd).transpose(2, 0, 3, 1, 4)
    q, k, v = qkv[0], qkv[1], qkv[2]                                 # (B, H, N, hd)
    s = jnp.einsum('bhqd,bhkd->bhqk', q, k,
                   precision=lax.Precision.HIGHEST) * scale
    a = jax.nn.softmax(s, axis=-1)
    ctx = jnp.einsum('bhqk,bhkd->bhqd', a, v,
                     precision=lax.Precision.HIGHEST)
    ctx = ctx.transpose(0, 2, 1, 3).reshape(B, N, C)
    return jnp.matmul(ctx, w_proj, precision=lax.Precision.HIGHEST) + b_proj


if __name__ == "__main__":
    B, N, C, H = 2, 128, 128, 8          # batch, seq, dim, heads (head_dim = 16)

    key = jax.random.PRNGKey(0)
    kx, kq, kp, kb = jax.random.split(key, 4)
    x = jax.random.normal(kx, (B, N, C), jnp.float32)
    w_qkv = jax.random.normal(kq, (C, 3 * C), jnp.float32) / jnp.sqrt(float(C))
    w_proj = jax.random.normal(kp, (C, C), jnp.float32) / jnp.sqrt(float(C))
    b_proj = jax.random.normal(kb, (C,), jnp.float32) * 0.02

    fwd = jax.jit(functools.partial(attention_forward, num_heads=H))
    out, attn = fwd(x, w_qkv, w_proj, b_proj)
    out = jax.block_until_ready(out)

    ref = attention_reference(x, w_qkv, w_proj, b_proj, H)

    assert out.shape == (B, N, C) and out.dtype == jnp.float32
    assert attn is None                                  # sdpa path returns attn=None
    assert bool(jnp.all(jnp.isfinite(out)))
    # bf16 MXU operands => looser tolerance vs the HIGHEST-precision f32 reference.
    max_abs_err = float(jnp.max(jnp.abs(out - ref)))
    rel_fro_err = float(jnp.linalg.norm(out - ref) / jnp.linalg.norm(ref))
    assert max_abs_err < 8e-2, f"max abs err too large: {max_abs_err}"
    assert rel_fro_err < 5e-2, f"relative Frobenius err too large: {rel_fro_err}"
    print("KERNEL_OK")
</pallas_src>

<mosaic_0001>
module attributes {stable_mosaic.version = 11 : i64} {
  func.func @_attention_kernel(%arg0: i32, %arg1: memref<1x128x128xbf16, #tpu.memory_space<vmem>>, %arg2: memref<128x384xbf16, #tpu.memory_space<vmem>>, %arg3: memref<128x128xbf16, #tpu.memory_space<vmem>>, %arg4: memref<1x128xf32, #tpu.memory_space<vmem>>, %arg5: memref<1x128x128xf32, #tpu.memory_space<vmem>>) attributes {dimension_semantics = [#tpu.dimension_semantics<parallel>], iteration_bounds = array<i64: 2>, scalar_prefetch = 0 : i64, scratch_operands = 0 : i64, tpu.core_type = #tpu.core_type<tc>, window_params = [{transform_indices = @transform_0, window_bounds = array<i64: 1, 128, 128>}, {pipeline_mode = #tpu.pipeline_mode<synchronous>, transform_indices = @transform_1, window_bounds = array<i64: 128, 384>}, {pipeline_mode = #tpu.pipeline_mode<synchronous>, transform_indices = @transform_2, window_bounds = array<i64: 128, 128>}, {pipeline_mode = #tpu.pipeline_mode<synchronous>, transform_indices = @transform_3, window_bounds = array<i64: 1, 128>}, {transform_indices = @transform_4, window_bounds = array<i64: 1, 128, 128>}]} {
    %c0 = arith.constant 0 : index
    %c0_0 = arith.constant 0 : index
    %c0_1 = arith.constant 0 : index
    %0 = vector.load %arg1[%c0, %c0_0, %c0_1] : memref<1x128x128xbf16, #tpu.memory_space<vmem>>, vector<1x128x128xbf16>
    %1 = vector.shape_cast %0 : vector<1x128x128xbf16> to vector<128x128xbf16>
    %c0_2 = arith.constant 0 : index
    %c0_3 = arith.constant 0 : index
    %2 = vector.load %arg2[%c0_2, %c0_3] : memref<128x384xbf16, #tpu.memory_space<vmem>>, vector<128x384xbf16>
    %cst = arith.constant dense<0.000000e+00> : vector<128x384xf32>
    %3 = tpu.matmul %1, %2, %cst {dimension_numbers = #tpu.dot_dimension_numbers<[1], [0], [0], [1], [0, 0, 1, 1], [], []>} : vector<128x128xbf16>, vector<128x384xbf16>, vector<128x384xf32> -> vector<128x384xf32>
    %4 = vector.extract_strided_slice %3 {offsets = [0, 0], sizes = [128, 128], strides = [1, 1]} : vector<128x384xf32> to vector<128x128xf32>
    %cst_4 = arith.constant 2.500000e-01 : f32
    %5 = vector.broadcast %cst_4 : f32 to vector<128x128xf32>
    %6 = arith.mulf %4, %5 : vector<128x128xf32>
    %7 = arith.truncf %6 : vector<128x128xf32> to vector<128x128xbf16>
    %8 = vector.shape_cast %7 : vector<128x128xbf16> to vector<128x8x16xbf16>
    %9 = vector.extract_strided_slice %3 {offsets = [0, 128], sizes = [128, 128], strides = [1, 1]} : vector<128x384xf32> to vector<128x128xf32>
    %10 = arith.truncf %9 : vector<128x128xf32> to vector<128x128xbf16>
    %11 = vector.shape_cast %10 : vector<128x128xbf16> to vector<128x8x16xbf16>
    %12 = vector.extract_strided_slice %3 {offsets = [0, 256], sizes = [128, 128], strides = [1, 1]} : vector<128x384xf32> to vector<128x128xf32>
    %13 = arith.truncf %12 : vector<128x128xf32> to vector<128x128xbf16>
    %14 = vector.shape_cast %13 : vector<128x128xbf16> to vector<128x8x16xbf16>
    "tpu.trace_start"() <{level = 10 : i32, message = "nhd,mhd->hnm"}> : () -> ()
    %cst_5 = arith.constant dense<0.000000e+00> : vector<8x128x128xf32>
    %15 = tpu.matmul %8, %11, %cst_5 {dimension_numbers = #tpu.dot_dimension_numbers<[2], [2], [0], [0], [0, 1, 0, 0, 1, 0], [1], [1]>} : vector<128x8x16xbf16>, vector<128x8x16xbf16>, vector<8x128x128xf32> -> vector<8x128x128xf32>
    "tpu.trace_stop"() : () -> ()
    %cst_6 = arith.constant dense<0xFF800000> : vector<8x128xf32>
    %16 = vector.multi_reduction <maximumf>, %15, %cst_6 [2] : vector<8x128x128xf32> to vector<8x128xf32>
    %17 = vector.shape_cast %16 : vector<8x128xf32> to vector<8x128x1xf32>
    %18 = vector.broadcast %17 : vector<8x128x1xf32> to vector<8x128x128xf32>
    %19 = arith.subf %15, %18 : vector<8x128x128xf32>
    %20 = math.exp %19 : vector<8x128x128xf32>
    %cst_7 = arith.constant dense<0.000000e+00> : vector<8x128xf32>
    %21 = vector.multi_reduction <add>, %20, %cst_7 [2] : vector<8x128x128xf32> to vector<8x128xf32>
    %22 = vector.shape_cast %21 : vector<8x128xf32> to vector<8x128x1xf32>
    %23 = arith.truncf %20 : vector<8x128x128xf32> to vector<8x128x128xbf16>
    "tpu.trace_start"() <{level = 10 : i32, message = "hnm,mhd->hnd"}> : () -> ()
    %cst_8 = arith.constant dense<0.000000e+00> : vector<8x128x16xf32>
    %24 = tpu.matmul %23, %14, %cst_8 {dimension_numbers = #tpu.dot_dimension_numbers<[2], [0], [1], [2], [0, 0, 0, 1, 1, 2], [0], [1]>} : vector<8x128x128xbf16>, vector<128x8x16xbf16>, vector<8x128x16xf32> -> vector<8x128x16xf32>
    "tpu.trace_stop"() : () -> ()
    %25 = tpu.reciprocal %22 {approx = true} : vector<8x128x1xf32> -> vector<8x128x1xf32>
    %26 = vector.broadcast %25 : vector<8x128x1xf32> to vector<8x128x16xf32>
    %27 = arith.mulf %24, %26 : vector<8x128x16xf32>
    %28 = tpu.transpose %27, [1, 0, 2] : vector<8x128x16xf32> -> vector<128x8x16xf32>
    %29 = vector.shape_cast %28 : vector<128x8x16xf32> to vector<128x128xf32>
    %30 = arith.truncf %29 : vector<128x128xf32> to vector<128x128xbf16>
    %c0_9 = arith.constant 0 : index
    %c0_10 = arith.constant 0 : index
    %31 = vector.load %arg3[%c0_9, %c0_10] : memref<128x128xbf16, #tpu.memory_space<vmem>>, vector<128x128xbf16>
    %cst_11 = arith.constant dense<0.000000e+00> : vector<128x128xf32>
    %32 = tpu.matmul %30, %31, %cst_11 {dimension_numbers = #tpu.dot_dimension_numbers<[1], [0], [0], [1], [0, 0, 1, 1], [], []>} : vector<128x128xbf16>, vector<128x128xbf16>, vector<128x128xf32> -> vector<128x128xf32>
    %c0_12 = arith.constant 0 : index
    %c0_13 = arith.constant 0 : index
    %33 = vector.load %arg4[%c0_12, %c0_13] : memref<1x128xf32, #tpu.memory_space<vmem>>, vector<1x128xf32>
    %34 = vector.shape_cast %33 : vector<1x128xf32> to vector<128xf32>
    %35 = vector.shape_cast %34 : vector<128xf32> to vector<1x128xf32>
    %36 = vector.broadcast %35 : vector<1x128xf32> to vector<128x128xf32>
    %37 = arith.addf %32, %36 : vector<128x128xf32>
    %c0_14 = arith.constant 0 : index
    %c0_15 = arith.constant 0 : index
    %c0_16 = arith.constant 0 : index
    %38 = vector.load %arg5[%c0_14, %c0_15, %c0_16] : memref<1x128x128xf32, #tpu.memory_space<vmem>>, vector<1x128x128xf32>
    %39 = vector.shape_cast %38 : vector<1x128x128xf32> to vector<128x128xf32>
    %40 = vector.shape_cast %37 : vector<128x128xf32> to vector<1x128x128xf32>
    tpu.vector_store %arg5[%c0_14, %c0_15, %c0_16], %40 {strides = array<i32>} : memref<1x128x128xf32, #tpu.memory_space<vmem>>, vector<1x128x128xf32>,
    return
  }
  func.func @transform_0(%arg0: i32) -> (i32, i32, i32) {
    %c0_i32 = arith.constant 0 : i32
    %c0_i32_0 = arith.constant 0 : i32
    %c0_i32_1 = arith.constant 0 : i32
    return %arg0, %c0_i32, %c0_i32_0 : i32, i32, i32
  }
  func.func @transform_1(%arg0: i32) -> (i32, i32) {
    %c0_i32 = arith.constant 0 : i32
    %c0_i32_0 = arith.constant 0 : i32
    %c0_i32_1 = arith.constant 0 : i32
    return %c0_i32, %c0_i32_0 : i32, i32
  }
  func.func @transform_2(%arg0: i32) -> (i32, i32) {
    %c0_i32 = arith.constant 0 : i32
    %c0_i32_0 = arith.constant 0 : i32
    %c0_i32_1 = arith.constant 0 : i32
    return %c0_i32, %c0_i32_0 : i32, i32
  }
  func.func @transform_3(%arg0: i32) -> (i32, i32) {
    %c0_i32 = arith.constant 0 : i32
    %c0_i32_0 = arith.constant 0 : i32
    %c0_i32_1 = arith.constant 0 : i32
    return %c0_i32, %c0_i32_0 : i32, i32
  }
  func.func @transform_4(%arg0: i32) -> (i32, i32, i32) {
    %c0_i32 = arith.constant 0 : i32
    %c0_i32_0 = arith.constant 0 : i32
    %c0_i32_1 = arith.constant 0 : i32
    return %arg0, %c0_i32, %c0_i32_0 : i32, i32, i32
  }
}

</mosaic_0001>

<bundles_post_ra>
// kernel: attention_forward.1
= control target key start
LH: loop header
LB: loop body
LE: loop exit
PB: predicated region body
PF: predicated region fallthrough
CT: control target
= control target key end

     0   :  { %9 = vsyncpa [#allocation3], 0  ;;  %s16811_s0 = inlined_call_operand.vmem [shape: bf16[2,128,128], index: 0, kind: input, shape index: {}]   ;;  %s16812_s1 = inlined_call_operand.vmem [shape: bf16[128,384], index: 1, kind: input, shape index: {}]   ;;  %s16813_s2 = inlined_call_operand.vmem [shape: bf16[128,128], index: 2, kind: input, shape index: {}]   ;;  %s16814_s3 = inlined_call_operand.vmem [shape: f32[1,128], index: 3, kind: input, shape index: {}]   ;;  %s16815_s4 = inlined_call_operand.hbm [shape: f32[2,128,128], index: 4, kind: output, shape index: {}]  }
   0x1   :  { %11 = vsyncpa [#allocation3 + $0x1], 0  ;;  %s11354_s15 = smov 0   ;;  %s11356_s16 = smov 0  }
   0x2   :  { %s11358_s17 = smov 0   ;;  %s11360_s18 = smov 0  }
   0x3 LB: > { %s11375_s19 = sadd.s32 4294967295, %s11314_s18   ;;  %s9418_s20 = sadd.s32 4294967294, %s11314_s18   ;;  %s11314_s18 = sphi %s11360_s18, %s18131_s18   ;;  %s11310_s17 = sphi %s11358_s17, %s18130_s17   ;;  %s11306_s16 = sphi %s11356_s16, %s18129_s16   ;;  %s11302_s15 = sphi %s11354_s15, %s18128_s15  }
   0x4   : > { %s11379_s21 = sadd.s32 1, %s11314_s18   ;;  %s113_s22 = sadd.s32 1, %s11310_s17 }
   0x5   : > { %s110_s23 = ssub.s32 %s11314_s18, %s11379_s21  ;;  %p123_p0 = scmp.ne.s32.totalorder %s11310_s17, %s11306_s16 }
   0x6   : > { %p111_p1 = scmp.eq.s32.totalorder %s110_s23, 0  ;;  %p124_p2 = scmp.eq.s32.totalorder %s11375_s19, 1 }
   0x7   : > { %p129_p3 = scmp.ne.s32.totalorder %s11306_s16, %s11302_s15  ;;  %p130_p4 = scmp.eq.s32.totalorder %s9418_s20, 1 }
   0x8   : > { %s11390_s24 = scalar_select %p111_p1, %s11310_s17, %s113_s22  }
   0x9   : > { %p11392_p5 = por %p124_p2, %p123_p0  ;;  %p11396_p6 = por %p130_p4, %p129_p3 }
   0xa   : > { %p9421_p7 = scmp.ge.s32.totalorder %s11314_s18, 1  ;;  %p165_p8 = scmp.lt.s32.totalorder %s11314_s18, 3 }
   0xc   : > { %p166_p9 = pnand %p9421_p7, %p165_p8 }
   0xe   : > { %169 = sbr.rel (%p166_p9) target bundleno = 2108 (0x83c), region = 36 }
  0x15   : > { %v10692_v0 = vld [vmem:[%s16812_s1 + $0x4] ss:$12 sps:$4 sm:$0xff]   ;;  %v10694_v1 = vld [vmem:[%s16812_s1 + $0x8] ss:$12 sps:$4 sm:$0xff]   ;;  %v11316_v2 = vmov 0   ;;  %p191_p10 = scmp.lt.s32.totalorder %s11375_s19, 1 }
  0x16   : > { %453 = vmatprep.mubr.bf16.mxu0 %v11316_v2  ;;  %421 = vmatprep.subr.bf16.mxu0 %v10692_v0  ;;  %v10695_v3 = vld [vmem:[%s16812_s1] ss:$12 sps:$4 sm:$0xff]   ;;  %v10696_v4 = vld [vmem:[%s16812_s1 + $0x1c] ss:$12 sps:$4 sm:$0xff]   ;;  %v10699_v6 = vld [vmem:[%s16812_s1 + $0x18] ss:$12 sps:$4 sm:$0xff]  }
  0x17   : > { %9897 = vmatprep.subr.bf16.mxu1 %v10694_v1  ;;  %422 = vmatpush1.bf16.msra.mxu0 %v10695_v3  ;;  %v10698_v5 = vld [vmem:[%s16812_s1 + $0x20] ss:$12 sps:$4 sm:$0xff]   ;;  %v10702_v8 = vld [vmem:[%s16812_s1 + $0x38] ss:$12 sps:$4 sm:$0xff]   ;;  %v10703_v9 = vld [vmem:[%s16812_s1 + $0x30] ss:$12 sps:$4 sm:$0xff]  }
  0x18   : > { %9898 = vmatpush3.bf16.msra.mxu1 %v10694_v1  ;;  %423 = vmatprep.subr.bf16.mxu0 %v10696_v4  ;;  %v10700_v7 = vld [vmem:[%s16812_s1 + $0x34] ss:$12 sps:$4 sm:$0xff]   ;;  %s192_s28 = scalar_select %p191_p10, %s11375_s19, 1  ;;  %v10704_v10 = vld [vmem:[%s16812_s1 + $0x4c] ss:$12 sps:$4 sm:$0xff]   ;;  %vm1271_vm0 = vcmask 130048  }
  0x19   : > { %9899 = vmatprep.subr.bf16.mxu1 %v10698_v5  ;;  %v10706_v11 = vld [vmem:[%s16812_s1 + $0x50] ss:$12 sps:$4 sm:$0xff]   ;;  %v10707_v12 = vld [vmem:[%s16812_s1 + $0x48] ss:$12 sps:$4 sm:$0xff]   ;;  %v10711_v15 = vld [vmem:[%s16812_s1 + $0x60] ss:$12 sps:$4 sm:$0xff]  }
  0x1a   : > { %s9663_s9 = sshll.u32 %s192_s28, 6  ;;  %v10708_v13 = vld [vmem:[%s16812_s1 + $0x64] ss:$12 sps:$4 sm:$0xff]   ;;  %v10710_v14 = vld [vmem:[%s16812_s1 + $0x68] ss:$12 sps:$4 sm:$0xff]   ;;  %s11318_s30 = smov 112  }
  0x1b   : > { %424 = vmatpush1.bf16.msra.mxu0 %v10699_v6  ;;  %v10712_v16 = vld [vmem:[%s16812_s1 + $0x7c] ss:$12 sps:$4 sm:$0xff]   ;;  %s11456_s29 = scalar_lea.vmem %s16811_s0, %s9663_s9  ;;  %v10714_v17 = vld [vmem:[%s16812_s1 + $0x80] ss:$12 sps:$4 sm:$0xff]   ;;  %v10715_v18 = vld [vmem:[%s16812_s1 + $0x78] ss:$12 sps:$4 sm:$0xff]  }
  0x1c   : > { %9900 = vmatpush3.bf16.msra.mxu1 %v10698_v5  ;;  %425 = vmatprep.subr.bf16.mxu0 %v10700_v7  ;;  %v10724_v19 = vld [vmem:[%s11456_s29] sm:$0xff]   ;;  %v10719_v22 = vld [vmem:[%s16812_s1 + $0x90] ss:$12 sps:$4 sm:$0xff]   ;;  %v10720_v23 = vld [vmem:[%s16812_s1 + $0xac] ss:$12 sps:$4 sm:$0xff]   ;;  %s11319_s5 = smov 80  }
  0x1d   : > { %9901 = vmatprep.subr.bf16.mxu1 %v10702_v8  ;;  %v10716_v20 = vld [vmem:[%s16812_s1 + $0x94] ss:$12 sps:$4 sm:$0xff]   ;;  %v10718_v21 = vld [vmem:[%s16812_s1 + $0x98] ss:$12 sps:$4 sm:$0xff]   ;;  %9913 = vmatprep.mubr.bf16.mxu1 %v10724_v19  ;;  %v10722_v24 = vld [vmem:[%s16812_s1 + $0xb0] ss:$12 sps:$4 sm:$0xff]  }
  0x1e   : > { %v10723_v25 = vld [vmem:[%s16812_s1 + $0xa8] ss:$12 sps:$4 sm:$0xff]   ;;  %v10727_v28 = vld [vmem:[%s11456_s29 + $0x18] sm:$0xff]   ;;  %v10728_v29 = vld [vmem:[%s11456_s29 + $0x20] sm:$0xff]   ;;  %s11320_s6 = smov 64   ;;  %s11321_s7 = smov 48  }
  0x1f   : > { %426 = vmatpush1.bf16.msra.mxu0 %v10703_v9  ;;  %v10725_v26 = vld [vmem:[%s11456_s29 + $0x8] sm:$0xff]   ;;  %v10726_v27 = vld [vmem:[%s11456_s29 + $0x10] sm:$0xff]   ;;  %v10731_v32 = vld [vmem:[%s11456_s29 + $0x38] sm:$0xff]   ;;  %s11322_s8 = smov 32   ;;  %s11323_s10 = smov 16   ;;  %vm9048_vm1 = vcmask 261120  }
  0x20   : > { %9902 = vmatpush3.bf16.msra.mxu1 %v10702_v8  ;;  %427 = vmatprep.subr.bf16.mxu0 %v10704_v10  ;;  %v10729_v30 = vld [vmem:[%s11456_s29 + $0x28] sm:$0xff]   ;;  %v10730_v31 = vld [vmem:[%s11456_s29 + $0x30] sm:$0xff]   ;;  %s11317_s29 = smov 96   ;;  %vm9065_vm2 = vcmask 392192   ;;  %vm9082_vm3 = vcmask 523264   ;;  %vm9099_vm4 = vcmask 654336  }
  0x21   : > { %9903 = vmatprep.subr.bf16.mxu1 %v10706_v11  ;;  %vm9116_vm5 = vcmask 785408   ;;  %vm9133_vm6 = vcmask 916480   ;;  %s9664_s14 = sshll.u32 %s11375_s19, 11 }
  0x22   : > { %s16761_s27 = scalar_lea.hbm %s16815_s4, %s9664_s14 }
  0x23   : > { %428 = vmatpush1.bf16.msra.mxu0 %v10707_v12 }
  0x24   : > { %9904 = vmatpush3.bf16.msra.mxu1 %v10706_v11  ;;  %429 = vmatprep.subr.bf16.mxu0 %v10708_v13 }
  0x25   : > { %9905 = vmatprep.subr.bf16.mxu1 %v10710_v14 }
  0x27   : > { %430 = vmatpush1.bf16.msra.mxu0 %v10711_v15 }
  0x28   : > { %9906 = vmatpush3.bf16.msra.mxu1 %v10710_v14  ;;  %431 = vmatprep.subr.bf16.mxu0 %v10712_v16 }
  0x29   : > { %9907 = vmatprep.subr.bf16.mxu1 %v10714_v17 }
  0x2b   : > { %432 = vmatpush1.bf16.msra.mxu0 %v10715_v18 }
  0x2c   : > { %9908 = vmatpush3.bf16.msra.mxu1 %v10714_v17  ;;  %433 = vmatprep.subr.bf16.mxu0 %v10716_v20 }
  0x2d   : > { %9909 = vmatprep.subr.bf16.mxu1 %v10718_v21 }
  0x2f   : > { %434 = vmatpush1.bf16.msra.mxu0 %v10719_v22 }
  0x30   : > { %9910 = vmatpush3.bf16.msra.mxu1 %v10718_v21  ;;  %435 = vmatprep.subr.bf16.mxu0 %v10720_v23 }
  0x31   : > { %9911 = vmatprep.subr.bf16.mxu1 %v10722_v24 }
  0x33   : > { %436 = vmatpush1.bf16.msra.mxu0 %v10723_v25 }
  0x34   : > { %9912 = vmatpush3.bf16.msra.mxu1 %v10722_v24 }
  0x36   : > { %454 = vmatmul.mubr.bf16.vlgmr.msra.gmra.mrb[0].mxu0 %v10724_v19 }
  0x37   : > { %9914 = vmatmul.mubr.bf16.vlgmr.msra.gmra.mrb[0].mxu1 %v10725_v26  ;;  %463 = vmatprep.mubr.bf16.mxu0 %v11316_v2 }
  0x38   : > { %9917 = vmatprep.mubr.bf16.mxu1 %v10726_v27 }
  0x3e   : > { %464 = vmatmul.mubr.bf16.gmra.mrb[4].mxu0 %v10725_v26 }
  0x3f   : > { %9918 = vmatmul.mubr.bf16.gmra.mrb[4].mxu1 %v10727_v28  ;;  %473 = vmatprep.mubr.bf16.mxu0 %v11316_v2 }
  0x40   : > { %9921 = vmatprep.mubr.bf16.mxu1 %v10728_v29 }
  0x46   : > { %474 = vmatmul.mubr.bf16.gmra.mrb[8].mxu0 %v10726_v27 }
  0x47   : > { %9922 = vmatmul.mubr.bf16.gmra.mrb[8].mxu1 %v10729_v30  ;;  %483 = vmatprep.mubr.bf16.mxu0 %v11316_v2 }
  0x48   : > { %9925 = vmatprep.mubr.bf16.mxu1 %v10730_v31 }
  0x4e   : > { %484 = vmatmul.mubr.bf16.gmra.mrb[12].mxu0 %v10727_v28 }
  0x4f   : > { %9926 = vmatmul.mubr.bf16.gmra.mrb[12].mxu1 %v10731_v32  ;;  %493 = vmatprep.mubr.bf16.mxu0 %v11316_v2 }
  0x56   : > { %494 = vmatmul.mubr.bf16.gmra.mrb[16].mxu0 %v10728_v29 }
  0x57   : > { %503 = vmatprep.mubr.bf16.mxu0 %v11316_v2 }
  0x5e   : > { %504 = vmatmul.mubr.bf16.gmra.mrb[20].mxu0 %v10729_v30 }
  0x5f   : > { %513 = vmatprep.mubr.bf16.mxu0 %v11316_v2 }
  0x66   : > { %514 = vmatmul.mubr.bf16.gmra.mrb[24].mxu0 %v10730_v31 }
  0x67   : > { %523 = vmatprep.mubr.bf16.mxu0 %v11316_v2 }
  0x6e   : > { %524 = vmatmul.mubr.bf16.gmra.mrb[28].mxu0 %v10731_v32 }
 0x109   : > { %v455_v33 = vpop.f32.mrb[0].mxu0 }
 0x10a   : > { %v9915_v34 = vpop.f32.mrb[0].mxu1  ;;  %v631_v35 = vmul.f32 0.25, %v455_v33  ;;  %v457_v36 = vpop.f32.mrb[1].mxu0 }
 0x10b   : > { %v568_v37 = vpop.f32.mrb[1].mxu1  ;;  %v459_v38 = vpop.f32.mrb[2].mxu0 }
 0x10c   : > { %v9916_v39 = vpop.f32.mrb[2].mxu1  ;;  %v632_v40 = vmul.f32 0.25, %v459_v38  ;;  %v461_v42 = vpop.f32.mrb[3].mxu0 }
 0x10d   : > { %v11497_v41 = vpack.c.bf16 %v9916_v39, %v9915_v34  ;;  %v571_v43 = vpop.f32.mrb[3].mxu1  ;;  %v11499_v44 = vpack.c.bf16 %v461_v42, %v457_v36 }
 0x10e   : > { %v11501_v45 = vpack.c.bf16 %v571_v43, %v568_v37  ;;  %v11503_v46 = vpack.c.bf16 %v632_v40, %v631_v35 }
 0x10f   : > { %1001 = vrot.lane.b32.xlu0 %v11497_v41, %s11317_s29  ;;  %977 = vrot.lane.b32.xlu1 %v11497_v41, %s11318_s30 }
 0x110   : > { %9931 = vmatprep.mubr.msk.bf16.mxu1 %vm1271_vm0, %v11503_v46 }
 0x111   : > { %v465_v48 = vpop.f32.mrb[4].mxu0 }
 0x112   : > { %v9919_v47 = vpop.f32.mrb[4].mxu1  ;;  %v633_v50 = vmul.f32 0.25, %v465_v48  ;;  %v467_v51 = vpop.f32.mrb[5].mxu0 }
 0x113   : > { %v584_v49 = vpop.f32.mrb[5].mxu1  ;;  %791 = vrot.lane.b32.xlu0 %v11499_v44, %s11318_s30  ;;  %v469_v53 = vpop.f32.mrb[6].mxu0 }
 0x114   : > { %v9920_v52 = vpop.f32.mrb[6].mxu1  ;;  %v634_v56 = vmul.f32 0.25, %v469_v53  ;;  %v471_v57 = vpop.f32.mrb[7].mxu0 }
 0x115   : > { %v11513_v54 = vpack.c.bf16 %v9920_v52, %v9919_v47  ;;  %v587_v55 = vpop.f32.mrb[7].mxu1  ;;  %v11517_v59 = vpack.c.bf16 %v471_v57, %v467_v51 }
 0x116   : > { %v11515_v58 = vpack.c.bf16 %v587_v55, %v584_v49  ;;  %v11523_v60 = vpack.c.bf16 %v634_v56, %v633_v50 }
 0x117   : > { %17151 = vst [vmem:[#allocation5_spill] sm:$0xff] %v11513_v54  ;;  %981 = vrot.lane.b32.xlu1 %v11513_v54, %s11318_s30  ;;  %815 = vrot.lane.b32.xlu0 %v11499_v44, %s11317_s29 }
 0x118   : > { %17152 = vst [vmem:[#allocation6_spill] sm:$0xff] %v11515_v58 }
 0x119   : > { %v475_v61 = vpop.f32.mrb[8].mxu0 }
 0x11a   : > { %v9923_v62 = vpop.f32.mrb[8].mxu1  ;;  %v635_v63 = vmul.f32 0.25, %v475_v61  ;;  %v477_v1 = vpop.f32.mrb[9].mxu0 }
 0x11b   : > { %1005 = vrot.lane.b32.xlu1 %v11513_v54, %s11317_s29  ;;  %839 = vrot.lane.b32.xlu0 %v11499_v44, %s11319_s5  ;;  %v600_v0 = vpop.f32.mrb[9].mxu1  ;;  %v479_v2 = vpop.f32.mrb[10].mxu0 }
 0x11c   : > { %v9924_v3 = vpop.f32.mrb[10].mxu1  ;;  %v636_v4 = vmul.f32 0.25, %v479_v2  ;;  %v481_v6 = vpop.f32.mrb[11].mxu0 }
 0x11d   : > { %v11529_v5 = vpack.c.bf16 %v9924_v3, %v9923_v62  ;;  %v603_v7 = vpop.f32.mrb[11].mxu1  ;;  %v11531_v8 = vpack.c.bf16 %v481_v6, %v477_v1 }
 0x11e   : > { %v11533_v9 = vpack.c.bf16 %v603_v7, %v600_v0  ;;  %v11539_v10 = vpack.c.bf16 %v636_v4, %v635_v63 }
 0x11f   : > { %17153 = vst [vmem:[#allocation7_spill] sm:$0xff] %v11529_v5  ;;  %863 = vrot.lane.b32.xlu0 %v11499_v44, %s11320_s6  ;;  %793 = vrot.lane.b32.xlu1 %v11517_v59, %s11318_s30 }
 0x120   : > { %17154 = vst [vmem:[#allocation8_spill] sm:$0xff] %v11533_v9 }
 0x121   : > { %v485_v12 = vpop.f32.mrb[12].mxu0 }
 0x122   : > { %v9927_v11 = vpop.f32.mrb[12].mxu1  ;;  %v637_v14 = vmul.f32 0.25, %v485_v12  ;;  %v487_v15 = vpop.f32.mrb[13].mxu0 }
 0x123   : > { %887 = vrot.lane.b32.xlu0 %v11499_v44, %s11321_s7  ;;  %817 = vrot.lane.b32.xlu1 %v11517_v59, %s11317_s29  ;;  %v616_v13 = vpop.f32.mrb[13].mxu1  ;;  %v489_v17 = vpop.f32.mrb[14].mxu0 }
 0x124   : > { %v9928_v16 = vpop.f32.mrb[14].mxu1  ;;  %v638_v20 = vmul.f32 0.25, %v489_v17  ;;  %v491_v21 = vpop.f32.mrb[15].mxu0 }
 0x125   : > { %v11545_v18 = vpack.c.bf16 %v9928_v16, %v9927_v11  ;;  %v619_v19 = vpop.f32.mrb[15].mxu1  ;;  %v11549_v23 = vpack.c.bf16 %v491_v21, %v487_v15 }
 0x126   : > { %v11547_v22 = vpack.c.bf16 %v619_v19, %v616_v13  ;;  %v11555_v24 = vpack.c.bf16 %v638_v20, %v637_v14 }
 0x127   : > { %911 = vrot.lane.b32.xlu0 %v11499_v44, %s11322_s8  ;;  %841 = vrot.lane.b32.xlu1 %v11517_v59, %s11319_s5 }
 0x129   : > { %v495_v25 = vpop.f32.mrb[16].mxu0 }
 0x12a   : > { %v639_v26 = vmul.f32 0.25, %v495_v25  ;;  %v497_v27 = vpop.f32.mrb[17].mxu0 }
 0x12b   : > { %935 = vrot.lane.b32.xlu0 %v11499_v44, %s11323_s10  ;;  %865 = vrot.lane.b32.xlu1 %v11517_v59, %s11320_s6  ;;  %v499_v28 = vpop.f32.mrb[18].mxu0 }
 0x12c   : > { %v640_v29 = vmul.f32 0.25, %v499_v28  ;;  %v501_v30 = vpop.f32.mrb[19].mxu0 }
 0x12d   : > { %v11561_v31 = vpack.c.bf16 %v501_v30, %v497_v27 }
 0x12e   : > { %v11567_v32 = vpack.c.bf16 %v640_v29, %v639_v26 }
 0x12f   : > { %975 = vrot.lane.b32.xlu0 %v11501_v45, %s11318_s30  ;;  %889 = vrot.lane.b32.xlu1 %v11517_v59, %s11321_s7 }
 0x131   : > { %v505_v33 = vpop.f32.mrb[20].mxu0 }
 0x132   : > { %v641_v34 = vmul.f32 0.25, %v505_v33  ;;  %v507_v35 = vpop.f32.mrb[21].mxu0 }
 0x133   : > { %999 = vrot.lane.b32.xlu0 %v11501_v45, %s11317_s29  ;;  %913 = vrot.lane.b32.xlu1 %v11517_v59, %s11322_s8  ;;  %v509_v36 = vpop.f32.mrb[22].mxu0 }
 0x134   : > { %v642_v37 = vmul.f32 0.25, %v509_v36  ;;  %v511_v38 = vpop.f32.mrb[23].mxu0 }
 0x135   : > { %v11573_v39 = vpack.c.bf16 %v511_v38, %v507_v35 }
 0x136   : > { %v11579_v40 = vpack.c.bf16 %v642_v37, %v641_v34 }
 0x137   : > { %663 = vrot.lane.b32.xlu0 %v11503_v46, %s11318_s30  ;;  %937 = vrot.lane.b32.xlu1 %v11517_v59, %s11323_s10 }
 0x139   : > { %v515_v42 = vpop.f32.mrb[24].mxu0 }
 0x13a   : > { %v517_v43 = vpop.f32.mrb[25].mxu0  ;;  %v643_v48 = vmul.f32 0.25, %v515_v42 }
 0x13b   : > { %679 = vrot.lane.b32.xlu0 %v11503_v46, %s11317_s29  ;;  %1003 = vrot.lane.b32.xlu1 %v11515_v58, %s11317_s29  ;;  %v519_v47 = vpop.f32.mrb[26].mxu0 }
 0x13c   : > { %v521_v49 = vpop.f32.mrb[27].mxu0  ;;  %v644_v50 = vmul.f32 0.25, %v519_v47 }
 0x13d   : > { %v11593_v51 = vpack.c.bf16 %v521_v49, %v517_v43 }
 0x13e   : > { %v11599_v52 = vpack.c.bf16 %v644_v50, %v643_v48 }
 0x13f   : > { %695 = vrot.lane.b32.xlu0 %v11503_v46, %s11319_s5  ;;  %681 = vrot.lane.b32.xlu1 %v11523_v60, %s11317_s29 }
 0x141   : > { %v525_v53 = vpop.f32.mrb[28].mxu0 }
 0x142   : > { %v527_v55 = vpop.f32.mrb[29].mxu0  ;;  %v645_v57 = vmul.f32 0.25, %v525_v53 }
 0x143   : > { %711 = vrot.lane.b32.xlu0 %v11503_v46, %s11320_s6  ;;  %697 = vrot.lane.b32.xlu1 %v11523_v60, %s11319_s5  ;;  %v529_v56 = vpop.f32.mrb[30].mxu0 }
 0x144   : > { %v531_v61 = vpop.f32.mrb[31].mxu0  ;;  %v646_v62 = vmul.f32 0.25, %v529_v56 }
 0x145   : > { %v11605_v63 = vpack.c.bf16 %v531_v61, %v527_v55 }
 0x146   : > { %v11611_v0 = vpack.c.bf16 %v646_v62, %v645_v57 }
 0x147   : > { %727 = vrot.lane.b32.xlu0 %v11503_v46, %s11321_s7  ;;  %713 = vrot.lane.b32.xlu1 %v11523_v60, %s11320_s6 }
 0x14b   : > { %743 = vrot.lane.b32.xlu0 %v11503_v46, %s11322_s8  ;;  %729 = vrot.lane.b32.xlu1 %v11523_v60, %s11321_s7 }
 0x14f   : > { %759 = vrot.lane.b32.xlu0 %v11503_v46, %s11323_s10  ;;  %745 = vrot.lane.b32.xlu1 %v11523_v60, %s11322_s8 }
 0x153   : > { %979 = vrot.lane.b32.xlu0 %v11515_v58, %s11318_s30  ;;  %761 = vrot.lane.b32.xlu1 %v11523_v60, %s11323_s10 }
 0x157   : > { %665 = vrot.lane.b32.xlu0 %v11523_v60, %s11318_s30  ;;  %985 = vrot.lane.b32.xlu1 %v11529_v5, %s11318_s30 }
 0x15b   : > { %667 = vrot.lane.b32.xlu1 %v11539_v10, %s11318_s30  ;;  %795 = vrot.lane.b32.xlu0 %v11531_v8, %s11318_s30 }
 0x15f   : > { %989 = vrot.lane.b32.xlu1 %v11545_v18, %s11318_s30  ;;  %819 = vrot.lane.b32.xlu0 %v11531_v8, %s11317_s29 }
 0x163   : > { %843 = vrot.lane.b32.xlu0 %v11531_v8, %s11319_s5  ;;  %797 = vrot.lane.b32.xlu1 %v11549_v23, %s11318_s30 }
 0x167   : > { %867 = vrot.lane.b32.xlu0 %v11531_v8, %s11320_s6  ;;  %821 = vrot.lane.b32.xlu1 %v11549_v23, %s11317_s29 }
 0x16b   : > { %891 = vrot.lane.b32.xlu0 %v11531_v8, %s11321_s7  ;;  %845 = vrot.lane.b32.xlu1 %v11549_v23, %s11319_s5 }
 0x16f   : > { %915 = vrot.lane.b32.xlu0 %v11531_v8, %s11322_s8  ;;  %869 = vrot.lane.b32.xlu1 %v11549_v23, %s11320_s6 }
 0x173   : > { %939 = vrot.lane.b32.xlu0 %v11531_v8, %s11323_s10  ;;  %893 = vrot.lane.b32.xlu1 %v11549_v23, %s11321_s7 }
 0x177   : > { %983 = vrot.lane.b32.xlu0 %v11533_v9, %s11318_s30  ;;  %917 = vrot.lane.b32.xlu1 %v11549_v23, %s11322_s8 }
 0x17b   : > { %1007 = vrot.lane.b32.xlu0 %v11533_v9, %s11317_s29  ;;  %941 = vrot.lane.b32.xlu1 %v11549_v23, %s11323_s10 }
 0x17f   : > { %683 = vrot.lane.b32.xlu0 %v11539_v10, %s11317_s29  ;;  %669 = vrot.lane.b32.xlu1 %v11555_v24, %s11318_s30 }
 0x181   : > { %v11661_v46 = vpop.permute.xlu0 %1001  ;;  %v11667_v1 = vpop.permute.xlu1 %977 }
 0x182   : > { %17155 = vst [vmem:[#allocation9_spill] sm:$0xff] %v11661_v46  ;;  %17156 = vst [vmem:[#allocation10_spill] sm:$0xff] %v11667_v1 }
 0x183   : > { %699 = vrot.lane.b32.xlu0 %v11539_v10, %s11319_s5  ;;  %685 = vrot.lane.b32.xlu1 %v11555_v24, %s11317_s29 }
 0x185   : > { %v11669_v2 = vpop.permute.xlu0 %791 }
 0x187   : > { %715 = vrot.lane.b32.xlu0 %v11539_v10, %s11320_s6  ;;  %701 = vrot.lane.b32.xlu1 %v11555_v24, %s11319_s5 }
 0x189   : > { %v11675_v3 = vpop.permute.xlu1 %981  ;;  %v11677_v4 = vpop.permute.xlu0 %815 }
 0x18a   : > { %17157 = vst [vmem:[#allocation11_spill] sm:$0xff] %v11675_v3 }
 0x18b   : > { %731 = vrot.lane.b32.xlu0 %v11539_v10, %s11321_s7  ;;  %717 = vrot.lane.b32.xlu1 %v11555_v24, %s11320_s6 }
 0x18d   : > { %v11683_v6 = vpop.permute.xlu1 %1005  ;;  %v11685_v7 = vpop.permute.xlu0 %839 }
 0x18e   : > { %17158 = vst [vmem:[#allocation12_spill] sm:$0xff] %v11683_v6 }
 0x18f   : > { %747 = vrot.lane.b32.xlu0 %v11539_v10, %s11322_s8  ;;  %733 = vrot.lane.b32.xlu1 %v11555_v24, %s11321_s7 }
 0x191   : > { %v11691_v11 = vpop.permute.xlu0 %863  ;;  %v11693_v12 = vpop.permute.xlu1 %793 }
 0x193   : > { %763 = vrot.lane.b32.xlu0 %v11539_v10, %s11323_s10  ;;  %749 = vrot.lane.b32.xlu1 %v11555_v24, %s11322_s8 }
 0x195   : > { %v11699_v13 = vpop.permute.xlu0 %887  ;;  %v11701_v14 = vpop.permute.xlu1 %817 }
 0x197   : > { %987 = vrot.lane.b32.xlu0 %v11547_v22, %s11318_s30  ;;  %765 = vrot.lane.b32.xlu1 %v11555_v24, %s11323_s10 }
 0x199   : > { %v11707_v15 = vpop.permute.xlu0 %911  ;;  %v11709_v16 = vpop.permute.xlu1 %841 }
 0x19b   : > { %799 = vrot.lane.b32.xlu0 %v11561_v31, %s11318_s30  ;;  %801 = vrot.lane.b32.xlu1 %v11573_v39, %s11318_s30 }
 0x19d   : > { %v11715_v17 = vpop.permute.xlu0 %935  ;;  %v11717_v19 = vpop.permute.xlu1 %865 }
 0x19f   : > { %823 = vrot.lane.b32.xlu0 %v11561_v31, %s11317_s29  ;;  %825 = vrot.lane.b32.xlu1 %v11573_v39, %s11317_s29 }
 0x1a1   : > { %v11723_v20 = vpop.permute.xlu0 %975  ;;  %v11725_v21 = vpop.permute.xlu1 %889 }
 0x1a2   : > { %17159 = vst [vmem:[#allocation13_spill] sm:$0xff] %v11723_v20 }
 0x1a3   : > { %847 = vrot.lane.b32.xlu0 %v11561_v31, %s11319_s5  ;;  %849 = vrot.lane.b32.xlu1 %v11573_v39, %s11319_s5 }
 0x1a5   : > { %v11731_v25 = vpop.permute.xlu0 %999  ;;  %v11733_v26 = vpop.permute.xlu1 %913 }
 0x1a6   : > { %17160 = vst [vmem:[#allocation14_spill] sm:$0xff] %v11731_v25 }
 0x1a7   : > { %871 = vrot.lane.b32.xlu0 %v11561_v31, %s11320_s6  ;;  %873 = vrot.lane.b32.xlu1 %v11573_v39, %s11320_s6 }
 0x1a9   : > { %v664_v27 = vpop.permute.xlu0 %663  ;;  %v11739_v28 = vpop.permute.xlu1 %937 }
 0x1aa   : > { %17161 = vst [vmem:[#allocation15_spill] sm:$0xff] %v11739_v28  ;;  %9949 = vmatprep.mubr.msk.bf16.mxu0 %vm1271_vm0, %v664_v27 }
 0x1ab   : > { %895 = vrot.lane.b32.xlu0 %v11561_v31, %s11321_s7  ;;  %897 = vrot.lane.b32.xlu1 %v11573_v39, %s11321_s7 }
 0x1ad   : > { %v11746_v29 = vpop.permute.xlu0 %679  ;;  %v11748_v30 = vpop.permute.xlu1 %1003 }
 0x1ae   : > { %17162 = vst [vmem:[#allocation16_spill] sm:$0xff] %v11748_v30 }
 0x1af   : > { %919 = vrot.lane.b32.xlu0 %v11561_v31, %s11322_s8  ;;  %921 = vrot.lane.b32.xlu1 %v11573_v39, %s11322_s8 }
 0x1b1   : > { %v11754_v33 = vpop.permute.xlu0 %695  ;;  %v11756_v34 = vpop.permute.xlu1 %681 }
 0x1b2   : > { %17163 = vst [vmem:[#allocation17_spill] sm:$0xff] %v11756_v34 }
 0x1b3   : > { %943 = vrot.lane.b32.xlu0 %v11561_v31, %s11323_s10  ;;  %945 = vrot.lane.b32.xlu1 %v11573_v39, %s11323_s10 }
 0x1b5   : > { %v11762_v35 = vpop.permute.xlu0 %711  ;;  %v11764_v36 = vpop.permute.xlu1 %697 }
 0x1b6   : > { %17164 = vst [vmem:[#allocation18_spill] sm:$0xff] %v11762_v35  ;;  %17165 = vst [vmem:[#allocation19_spill] sm:$0xff] %v11764_v36 }
 0x1b7   : > { %671 = vrot.lane.b32.xlu0 %v11567_v32, %s11318_s30  ;;  %673 = vrot.lane.b32.xlu1 %v11579_v40, %s11318_s30 }
 0x1b9   : > { %v11770_v37 = vpop.permute.xlu0 %727  ;;  %v11772_v38 = vpop.permute.xlu1 %713 }
 0x1ba   : > { %17166 = vst [vmem:[#allocation20_spill] sm:$0xff] %v11770_v37  ;;  %17167 = vst [vmem:[#allocation21_spill] sm:$0xff] %v11772_v38 }
 0x1bb   : > { %687 = vrot.lane.b32.xlu0 %v11567_v32, %s11317_s29  ;;  %689 = vrot.lane.b32.xlu1 %v11579_v40, %s11317_s29 }
 0x1bd   : > { %v11778_v42 = vpop.permute.xlu0 %743  ;;  %v11780_v43 = vpop.permute.xlu1 %729 }
 0x1be   : > { %17168 = vst [vmem:[#allocation22_spill] sm:$0xff] %v11778_v42  ;;  %17169 = vst [vmem:[#allocation23_spill] sm:$0xff] %v11780_v43 }
 0x1bf   : > { %703 = vrot.lane.b32.xlu0 %v11567_v32, %s11319_s5  ;;  %705 = vrot.lane.b32.xlu1 %v11579_v40, %s11319_s5 }
 0x1c1   : > { %v11786_v47 = vpop.permute.xlu0 %759  ;;  %v11788_v48 = vpop.permute.xlu1 %745 }
 0x1c2   : > { %17170 = vst [vmem:[#allocation24_spill] sm:$0xff] %v11786_v47  ;;  %17171 = vst [vmem:[#allocation25_spill] sm:$0xff] %v11788_v48 }
 0x1c3   : > { %719 = vrot.lane.b32.xlu0 %v11567_v32, %s11320_s6  ;;  %721 = vrot.lane.b32.xlu1 %v11579_v40, %s11320_s6 }
 0x1c5   : > { %v11794_v49 = vpop.permute.xlu0 %979  ;;  %v11796_v50 = vpop.permute.xlu1 %761 }
 0x1c6   : > { %17172 = vst [vmem:[#allocation26_spill] sm:$0xff] %v11794_v49  ;;  %17173 = vst [vmem:[#allocation27_spill] sm:$0xff] %v11796_v50 }
 0x1c7   : > { %735 = vrot.lane.b32.xlu0 %v11567_v32, %s11321_s7  ;;  %737 = vrot.lane.b32.xlu1 %v11579_v40, %s11321_s7 }
 0x1c9   : > { %v11802_v53 = vpop.permute.xlu0 %665  ;;  %v11804_v55 = vpop.permute.xlu1 %985 }
 0x1ca   : > { %17174 = vst [vmem:[#allocation28_spill] sm:$0xff] %v11804_v55 }
 0x1cb   : > { %751 = vrot.lane.b32.xlu0 %v11567_v32, %s11322_s8  ;;  %753 = vrot.lane.b32.xlu1 %v11579_v40, %s11322_s8 }
 0x1cd   : > { %v11810_v56 = vpop.permute.xlu1 %667  ;;  %v11812_v57 = vpop.permute.xlu0 %795 }
 0x1cf   : > { %767 = vrot.lane.b32.xlu0 %v11567_v32, %s11323_s10  ;;  %769 = vrot.lane.b32.xlu1 %v11579_v40, %s11323_s10 }
 0x1d1   : > { %v11818_v61 = vpop.permute.xlu1 %989  ;;  %v11820_v62 = vpop.permute.xlu0 %819 }
 0x1d2   : > { %17175 = vst [vmem:[#allocation29_spill] sm:$0xff] %v11818_v61 }
 0x1d3   : > { %803 = vrot.lane.b32.xlu0 %v11593_v51, %s11318_s30  ;;  %805 = vrot.lane.b32.xlu1 %v11605_v63, %s11318_s30 }
 0x1d5   : > { %v11826_v27 = vpop.permute.xlu0 %843  ;;  %v11828_v6 = vpop.permute.xlu1 %797 }
 0x1d7   : > { %827 = vrot.lane.b32.xlu0 %v11593_v51, %s11317_s29  ;;  %829 = vrot.lane.b32.xlu1 %v11605_v63, %s11317_s29 }
 0x1d9   : > { %v11834_v30 = vpop.permute.xlu0 %867  ;;  %v11836_v46 = vpop.permute.xlu1 %821 }
 0x1db   : > { %851 = vrot.lane.b32.xlu0 %v11593_v51, %s11319_s5  ;;  %853 = vrot.lane.b32.xlu1 %v11605_v63, %s11319_s5 }
 0x1dd   : > { %v11842_v61 = vpop.permute.xlu0 %891  ;;  %v11844_v55 = vpop.permute.xlu1 %845 }
 0x1df   : > { %875 = vrot.lane.b32.xlu0 %v11593_v51, %s11320_s6  ;;  %877 = vrot.lane.b32.xlu1 %v11605_v63, %s11320_s6 }
 0x1e1   : > { %v11850_v3 = vpop.permute.xlu0 %915  ;;  %v11852_v49 = vpop.permute.xlu1 %869 }
 0x1e3   : > { %899 = vrot.lane.b32.xlu0 %v11593_v51, %s11321_s7  ;;  %901 = vrot.lane.b32.xlu1 %v11605_v63, %s11321_s7 }
 0x1e5   : > { %v11858_v1 = vpop.permute.xlu0 %939  ;;  %v11860_v50 = vpop.permute.xlu1 %893 }
 0x1e6   : > { %17176 = vst [vmem:[#allocation30_spill] sm:$0xff] %v11858_v1 }
 0x1e7   : > { %923 = vrot.lane.b32.xlu0 %v11593_v51, %s11322_s8  ;;  %925 = vrot.lane.b32.xlu1 %v11605_v63, %s11322_s8 }
 0x1e9   : > { %v11866_v20 = vpop.permute.xlu0 %983  ;;  %v11868_v47 = vpop.permute.xlu1 %917 }
 0x1ea   : > { %17177 = vst [vmem:[#allocation31_spill] sm:$0xff] %v11866_v20 }
 0x1eb   : > { %947 = vrot.lane.b32.xlu0 %v11593_v51, %s11323_s10  ;;  %949 = vrot.lane.b32.xlu1 %v11605_v63, %s11323_s10 }
 0x1ed   : > { %v11874_v25 = vpop.permute.xlu0 %1007  ;;  %v11876_v43 = vpop.permute.xlu1 %941 }
 0x1ee   : > { %17178 = vst [vmem:[#allocation32_spill] sm:$0xff] %v11874_v25  ;;  %17179 = vst [vmem:[#allocation33_spill] sm:$0xff] %v11876_v43 }
 0x1ef   : > { %675 = vrot.lane.b32.xlu0 %v11599_v52, %s11318_s30 }
 0x1f1   : > { %v11880_v37 = vpop.permute.xlu0 %683  ;;  %v11882_v48 = vpop.permute.xlu1 %669 }
 0x1f2   : > { %17180 = vst [vmem:[#allocation34_spill] sm:$0xff] %v11880_v37 }
 0x1f3   : > { %691 = vrot.lane.b32.xlu0 %v11599_v52, %s11317_s29 }
 0x1f5   : > { %v11886_v20 = vpop.permute.xlu0 %699  ;;  %v11888_v42 = vpop.permute.xlu1 %685 }
 0x1f6   : > { %17181 = vst [vmem:[#allocation35_spill] sm:$0xff] %v11886_v20  ;;  %17182 = vst [vmem:[#allocation36_spill] sm:$0xff] %v11888_v42 }
 0x1f7   : > { %707 = vrot.lane.b32.xlu0 %v11599_v52, %s11319_s5 }
 0x1f9   : > { %v11892_v25 = vpop.permute.xlu0 %715  ;;  %v11894_v36 = vpop.permute.xlu1 %701 }
 0x1fa   : > { %17183 = vst [vmem:[#allocation37_spill] sm:$0xff] %v11892_v25  ;;  %17184 = vst [vmem:[#allocation38_spill] sm:$0xff] %v11894_v36 }
 0x1fb   : > { %723 = vrot.lane.b32.xlu0 %v11599_v52, %s11320_s6 }
 0x1fd   : > { %v11898_v38 = vpop.permute.xlu0 %731  ;;  %v11900_v35 = vpop.permute.xlu1 %717 }
 0x1fe   : > { %17185 = vst [vmem:[#allocation39_spill] sm:$0xff] %v11898_v38  ;;  %17186 = vst [vmem:[#allocation40_spill] sm:$0xff] %v11900_v35 }
 0x1ff   : > { %739 = vrot.lane.b32.xlu0 %v11599_v52, %s11321_s7 }
 0x201   : > { %v11904_v20 = vpop.permute.xlu0 %747  ;;  %v11906_v43 = vpop.permute.xlu1 %733 }
 0x202   : > { %17187 = vst [vmem:[#allocation41_spill] sm:$0xff] %v11904_v20  ;;  %17188 = vst [vmem:[#allocation42_spill] sm:$0xff] %v11906_v43 }
 0x203   : > { %755 = vrot.lane.b32.xlu0 %v11599_v52, %s11322_s8 }
 0x205   : > { %v11910_v25 = vpop.permute.xlu0 %763  ;;  %v11912_v36 = vpop.permute.xlu1 %749 }
 0x206   : > { %17189 = vst [vmem:[#allocation43_spill] sm:$0xff] %v11910_v25  ;;  %17190 = vst [vmem:[#allocation44_spill] sm:$0xff] %v11912_v36 }
 0x207   : > { %771 = vrot.lane.b32.xlu0 %v11599_v52, %s11323_s10 }
 0x209   : > { %v11916_v38 = vpop.permute.xlu0 %987  ;;  %v11918_v35 = vpop.permute.xlu1 %765 }
 0x20a   : > { %17191 = vst [vmem:[#allocation45_spill] sm:$0xff] %v11916_v38  ;;  %17192 = vst [vmem:[#allocation46_spill] sm:$0xff] %v11918_v35 }
 0x20b   : > { %1011 = vrot.lane.b32.xlu0 %v11547_v22, %s11317_s29 }
 0x20d   : > { %v800_v20 = vpop.permute.xlu0 %799  ;;  %v802_v42 = vpop.permute.xlu1 %801 }
 0x20e   : > { %1143 = vxpose.xlu1.c.b16.start [1/8] (narrow) %v11499_v44, 16 }
 0x20f   : > { %1023 = vrot.lane.b32.xlu0 %v11501_v45, %s11319_s5 }
 0x211   : > { %v11925_v25 = vpop.permute.xlu0 %823  ;;  %v11927_v43 = vpop.permute.xlu1 %825 }
 0x212   : > { %1144 = vxpose.xlu1.c.b16.cont [2/8] (narrow) %v11517_v59, 16 }
 0x213   : > { %1027 = vrot.lane.b32.xlu0 %v11515_v58, %s11319_s5 }
 0x215   : > { %v11932_v38 = vpop.permute.xlu0 %847  ;;  %v11934_v35 = vpop.permute.xlu1 %849 }
 0x216   : > { %1145 = vxpose.xlu1.c.b16.cont [3/8] (narrow) %v11531_v8, 16 }
 0x217   : > { %1031 = vrot.lane.b32.xlu0 %v11533_v9, %s11319_s5 }
 0x219   : > { %v11939_v44 = vpop.permute.xlu0 %871  ;;  %v11941_v36 = vpop.permute.xlu1 %873 }
 0x21a   : > { %1146 = vxpose.xlu1.c.b16.cont [4/8] (narrow) %v11549_v23, 16 }
 0x21d   : > { %v11944_v1 = vpop.permute.xlu0 %895  ;;  %v11946_v59 = vpop.permute.xlu1 %897 }
 0x21e   : > { %1147 = vxpose.xlu1.c.b16.cont [5/8] (narrow) %v11561_v31, 16 }
 0x221   : > { %v11949_v58 = vpop.permute.xlu0 %919  ;;  %v11951_v37 = vpop.permute.xlu1 %921 }
 0x222   : > { %1148 = vxpose.xlu1.c.b16.cont [6/8] (narrow) %v11573_v39, 16 }
 0x225   : > { %v11954_v8 = vpop.permute.xlu0 %943  ;;  %v11956_v9 = vpop.permute.xlu1 %945 }
 0x226   : > { %17193 = vst [vmem:[#allocation47_spill] sm:$0xff] %v11954_v8  ;;  %17194 = vst [vmem:[#allocation48_spill] sm:$0xff] %v11956_v9  ;;  %1149 = vxpose.xlu1.c.b16.cont [7/8] (narrow) %v11593_v51, 16 }
 0x229   : > { %v11959_v28 = vpop.permute.xlu0 %671  ;;  %v11961_v23 = vpop.permute.xlu1 %673 }
 0x22a   : > { %1150 = vxpose.xlu1.c.b16.end [8/8] (narrow) %v11605_v63, 16 }
 0x22d   : > { %v11964_v34 = vpop.permute.xlu0 %687  ;;  %v11966_v31 = vpop.permute.xlu1 %689 }
 0x22e   : > { %17195 = vst [vmem:[#allocation49_spill] sm:$0xff] %v11966_v31  ;;  %677 = vrot.lane.b32.xlu1 %v11611_v0, %s11318_s30 }
 0x231   : > { %v11970_v39 = vpop.permute.xlu0 %703  ;;  %v11972_v8 = vpop.permute.xlu1 %705 }
 0x232   : > { %17196 = vst [vmem:[#allocation50_spill] sm:$0xff] %v11970_v39  ;;  %17197 = vst [vmem:[#allocation51_spill] sm:$0xff] %v11972_v8  ;;  %693 = vrot.lane.b32.xlu1 %v11611_v0, %s11317_s29 }
 0x235   : > { %v11976_v51 = vpop.permute.xlu0 %719  ;;  %v11978_v9 = vpop.permute.xlu1 %721  ;;  %1159 = vxpose.xlu0.c.b16.start [1/8] (narrow) %v11669_v2, 16 }
 0x236   : > { %17198 = vst [vmem:[#allocation52_spill] sm:$0xff] %v11976_v51  ;;  %17199 = vst [vmem:[#allocation53_spill] sm:$0xff] %v11978_v9  ;;  %709 = vrot.lane.b32.xlu1 %v11611_v0, %s11319_s5 }
 0x239   : > { %v11983_v63 = vpop.permute.xlu0 %735  ;;  %1160 = vxpose.xlu0.c.b16.cont [2/8] (narrow) %v11693_v12, 16  ;;  %v11986_v31 = vpop.permute.xlu1 %737 }
 0x23a   : > { %17200 = vst [vmem:[#allocation54_spill] sm:$0xff] %v11983_v63  ;;  %17201 = vst [vmem:[#allocation55_spill] sm:$0xff] %v11986_v31  ;;  %725 = vrot.lane.b32.xlu1 %v11611_v0, %s11320_s6 }
 0x23d   : > { %v11990_v8 = vpop.permute.xlu0 %751  ;;  %1161 = vxpose.xlu0.c.b16.cont [3/8] (narrow) %v11812_v57, 16  ;;  %v11995_v2 = vpop.permute.xlu1 %753 }
 0x23e   : > { %17202 = vst [vmem:[#allocation56_spill] sm:$0xff] %v11990_v8  ;;  %741 = vrot.lane.b32.xlu1 %v11611_v0, %s11321_s7  ;;  %17203 = vst [vmem:[#allocation57_spill] sm:$0xff] %v11995_v2 }
 0x241   : > { %v11997_v39 = vpop.permute.xlu0 %767  ;;  %1162 = vxpose.xlu0.c.b16.cont [4/8] (narrow) %v11828_v6, 16  ;;  %v12002_v31 = vpop.permute.xlu1 %769 }
 0x242   : > { %17204 = vst [vmem:[#allocation58_spill] sm:$0xff] %v11997_v39  ;;  %757 = vrot.lane.b32.xlu1 %v11611_v0, %s11322_s8  ;;  %17205 = vst [vmem:[#allocation59_spill] sm:$0xff] %v12002_v31 }
 0x245   : > { %1163 = vxpose.xlu0.c.b16.cont [5/8] (narrow) %v800_v20, 16  ;;  %v804_v12 = vpop.permute.xlu0 %803  ;;  %v806_v63 = vpop.permute.xlu1 %805 }
 0x246   : > { %773 = vrot.lane.b32.xlu1 %v11611_v0, %s11323_s10 }
 0x249   : > { %1164 = vxpose.xlu0.c.b16.cont [6/8] (narrow) %v802_v42, 16  ;;  %v828_v57 = vpop.permute.xlu0 %827  ;;  %v830_v20 = vpop.permute.xlu1 %829 }
 0x24a   : > { %1009 = vrot.lane.b32.xlu1 %v11529_v5, %s11317_s29 }
 0x24d   : > { %1165 = vxpose.xlu0.c.b16.cont [7/8] (narrow) %v804_v12, 16  ;;  %v852_v39 = vpop.permute.xlu0 %851  ;;  %v854_v42 = vpop.permute.xlu1 %853 }
 0x24e   : > { %1013 = vrot.lane.b32.xlu1 %v11545_v18, %s11317_s29 }
 0x251   : > { %v876_v6 = vpop.permute.xlu0 %875  ;;  %1166 = vxpose.xlu0.c.b16.end [8/8] (narrow) %v806_v63, 16  ;;  %v878_v12 = vpop.permute.xlu1 %877 }
 0x252   : > { %1025 = vrot.lane.b32.xlu1 %v11497_v41, %s11319_s5 }
 0x255   : > { %v12012_v31 = vpop.permute.xlu0 %899  ;;  %1175 = vxpose.xlu0.c.b16.start [1/8] (narrow) %v11677_v4, 16  ;;  %v12028_v4 = vpop.permute.xlu1 %901 }
 0x256   : > { %1029 = vrot.lane.b32.xlu1 %v11513_v54, %s11319_s5 }
 0x259   : > { %v12017_v2 = vpop.permute.xlu0 %923  ;;  %1176 = vxpose.xlu0.c.b16.cont [2/8] (narrow) %v11701_v14, 16  ;;  %v12036_v14 = vpop.permute.xlu1 %925 }
 0x25a   : > { %1033 = vrot.lane.b32.xlu1 %v11529_v5, %s11319_s5 }
 0x25d   : > { %v12022_v63 = vpop.permute.xlu0 %947  ;;  %1177 = vxpose.xlu0.c.b16.cont [3/8] (narrow) %v11820_v62, 16  ;;  %v12040_v62 = vpop.permute.xlu1 %949 }
 0x261   : > { %v12025_v8 = vpop.permute.xlu0 %675  ;;  %1178 = vxpose.xlu0.c.b16.cont [4/8] (narrow) %v11836_v46, 16 }
 0x265   : > { %v12030_v9 = vpop.permute.xlu0 %691  ;;  %1179 = vxpose.xlu0.c.b16.cont [5/8] (narrow) %v11925_v25, 16 }
 0x269   : > { %v12033_v51 = vpop.permute.xlu0 %707  ;;  %1180 = vxpose.xlu0.c.b16.cont [6/8] (narrow) %v11927_v43, 16 }
 0x26d   : > { %v12038_v5 = vpop.permute.xlu0 %723  ;;  %1181 = vxpose.xlu0.c.b16.cont [7/8] (narrow) %v828_v57, 16  ;;  %v17237_v57 = vld [vmem:[#allocation25_spill] sm:$0xff] }
 0x271   : > { %1182 = vxpose.xlu0.c.b16.end [8/8] (narrow) %v830_v20, 16  ;;  %v12042_v54 = vpop.permute.xlu0 %739 }
 0x274   : > { %v1151_v46 = vpop.trf.xlu1 }
 0x275   : > { %1207 = vxpose.xlu0.c.b16.start [1/8] (narrow) %v11691_v11, 16  ;;  %9929 = vmatprep.subr.bf16.mxu1 %v1151_v46  ;;  %v12045_v25 = vpop.permute.xlu0 %755 }
 0x276   : > { %9930 = vmatpush3.bf16.msra.mxu1 %v1151_v46  ;;  %v17247_v46 = vld [vmem:[#allocation55_spill] sm:$0xff] }
 0x279   : > { %1208 = vxpose.xlu0.c.b16.cont [2/8] (narrow) %v11717_v19, 16  ;;  %9932 = vmatmul.mubr.msk.bf16.vlgmr.msra.gmra.mrb[16].mxu1 %vm1271_vm0, %v11523_v60  ;;  %v12054_v43 = vpop.permute.xlu0 %771  ;;  %v17211_v19 = vld [vmem:[#allocation34_spill] sm:$0xff] }
 0x27a   : > { %9935 = vmatprep.mubr.msk.bf16.mxu1 %vm1271_vm0, %v11539_v10 }
 0x27d   : > { %1191 = vxpose.xlu1.c.b16.start [1/8] (narrow) %v11685_v7, 16  ;;  %1209 = vxpose.xlu0.c.b16.cont [3/8] (narrow) %v11834_v30, 16  ;;  %v12062_v60 = vpop.permute.xlu0 %1011  ;;  %v17216_v30 = vld [vmem:[#allocation33_spill] sm:$0xff] }
 0x281   : > { %1192 = vxpose.xlu1.c.b16.cont [2/8] (narrow) %v11709_v16, 16  ;;  %1210 = vxpose.xlu0.c.b16.cont [4/8] (narrow) %v11852_v49, 16  ;;  %v12070_v10 = vpop.permute.xlu0 %1023  ;;  %v17210_v16 = vld [vmem:[#allocation15_spill] sm:$0xff]  ;;  %v17224_v49 = vld [vmem:[#allocation21_spill] sm:$0xff] }
 0x282   : > { %9936 = vmatmul.mubr.msk.bf16.gmra.mrb[20].mxu1 %vm1271_vm0, %v11555_v24  ;;  %17206 = vst [vmem:[#allocation60_spill] sm:$0xff] %v12070_v10 }
 0x283   : > { %9939 = vmatprep.mubr.msk.bf16.mxu1 %vm1271_vm0, %v11567_v32 }
 0x285   : > { %1193 = vxpose.xlu1.c.b16.cont [3/8] (narrow) %v11826_v27, 16  ;;  %1211 = vxpose.xlu0.c.b16.cont [5/8] (narrow) %v11939_v44, 16  ;;  %v12075_v24 = vpop.permute.xlu0 %1027  ;;  %v17229_v27 = vld [vmem:[#allocation7_spill] sm:$0xff] }
 0x286   : > { %17207 = vst [vmem:[#allocation61_spill] sm:$0xff] %v12075_v24  ;;  %v17230_v44 = vld [vmem:[#allocation35_spill] sm:$0xff] }
 0x289   : > { %1194 = vxpose.xlu1.c.b16.cont [4/8] (narrow) %v11844_v55, 16  ;;  %1212 = vxpose.xlu0.c.b16.cont [6/8] (narrow) %v11941_v36, 16  ;;  %v12083_v32 = vpop.permute.xlu0 %1031  ;;  %v17218_v36 = vld [vmem:[#allocation49_spill] sm:$0xff] }
 0x28a   : > { %9940 = vmatmul.mubr.msk.bf16.gmra.mrb[24].mxu1 %vm1271_vm0, %v11579_v40  ;;  %17208 = vst [vmem:[#allocation62_spill] sm:$0xff] %v12083_v32  ;;  %v17226_v55 = vld [vmem:[#allocation5_spill] sm:$0xff] }
 0x28b   : > { %9943 = vmatprep.mubr.msk.bf16.mxu1 %vm1271_vm0, %v11599_v52 }
 0x28d   : > { %1195 = vxpose.xlu1.c.b16.cont [5/8] (narrow) %v11932_v38, 16  ;;  %1213 = vxpose.xlu0.c.b16.cont [7/8] (narrow) %v876_v6, 16  ;;  %v17239_v6 = vld [vmem:[#allocation41_spill] sm:$0xff] }
 0x291   : > { %1196 = vxpose.xlu1.c.b16.cont [6/8] (narrow) %v11934_v35, 16  ;;  %1214 = vxpose.xlu0.c.b16.end [8/8] (narrow) %v878_v12, 16  ;;  %v17217_v35 = vld [vmem:[#allocation47_spill] sm:$0xff]  ;;  %v17243_v12 = vld [vmem:[#allocation56_spill] sm:$0xff] }
 0x292   : > { %9944 = vmatmul.mubr.msk.bf16.gmra.mrb[28].mxu1 %vm1271_vm0, %v11611_v0 }
 0x293   : > { %9967 = vmatprep.mubr.msk.bf16.mxu1 %vm1271_vm0, %v11746_v29  ;;  %v17215_v29 = vld [vmem:[#allocation36_spill] sm:$0xff] }
 0x295   : > { %1197 = vxpose.xlu1.c.b16.cont [7/8] (narrow) %v852_v39, 16  ;;  %1239 = vxpose.xlu0.c.b16.start [1/8] (narrow) %v11707_v15, 16  ;;  %v17235_v39 = vld [vmem:[#allocation51_spill] sm:$0xff] }
 0x299   : > { %1198 = vxpose.xlu1.c.b16.end [8/8] (narrow) %v854_v42, 16  ;;  %1240 = vxpose.xlu0.c.b16.cont [2/8] (narrow) %v11733_v26, 16  ;;  %v17213_v26 = vld [vmem:[#allocation30_spill] sm:$0xff]  ;;  %v17240_v42 = vld [vmem:[#allocation23_spill] sm:$0xff] }
 0x29b   : > { %v1167_v40 = vpop.trf.xlu0 }
 0x29c   : > { %9947 = vmatprep.subr.bf16.mxu0 %v1167_v40 }
 0x29d   : > { %9948 = vmatpush3.bf16.msra.mxu0 %v1167_v40  ;;  %1223 = vxpose.xlu1.c.b16.start [1/8] (narrow) %v11699_v13, 16  ;;  %v17209_v13 = vld [vmem:[#allocation17_spill] sm:$0xff] }
 0x29e   : > { %1241 = vxpose.xlu0.c.b16.cont [3/8] (narrow) %v11850_v3, 16 }
 0x2a0   : > { %9950 = vmatmul.mubr.msk.bf16.vlgmr.msra.gmra.mrb[32].mxu0 %vm1271_vm0, %v11802_v53  ;;  %v678_v52 = vpop.permute.xlu1 %677 }
 0x2a1   : > { %9953 = vmatprep.mubr.msk.bf16.mxu0 %vm1271_vm0, %v11810_v56  ;;  %1224 = vxpose.xlu1.c.b16.cont [2/8] (narrow) %v11725_v21, 16  ;;  %v17212_v21 = vld [vmem:[#allocation6_spill] sm:$0xff]  ;;  %v17227_v56 = vld [vmem:[#allocation19_spill] sm:$0xff] }
 0x2a2   : > { %1242 = vxpose.xlu0.c.b16.cont [4/8] (narrow) %v11868_v47, 16  ;;  %v17222_v47 = vld [vmem:[#allocation18_spill] sm:$0xff] }
 0x2a4   : > { %v694_v0 = vpop.permute.xlu1 %693 }
 0x2a5   : > { %1225 = vxpose.xlu1.c.b16.cont [3/8] (narrow) %v11842_v61, 16  ;;  %v17228_v61 = vld [vmem:[#allocation40_spill] sm:$0xff] }
 0x2a6   : > { %1243 = vxpose.xlu0.c.b16.cont [5/8] (narrow) %v11949_v58, 16 }
 0x2a8   : > { %9954 = vmatmul.mubr.msk.bf16.gmra.mrb[36].mxu0 %vm1271_vm0, %v11882_v48  ;;  %v12098_v3 = vpop.permute.xlu1 %709 }
 0x2a9   : > { %9957 = vmatprep.mubr.msk.bf16.mxu0 %vm1271_vm0, %v11959_v28  ;;  %1226 = vxpose.xlu1.c.b16.cont [4/8] (narrow) %v11860_v50, 16  ;;  %v17214_v28 = vld [vmem:[#allocation8_spill] sm:$0xff]  ;;  %v17225_v50 = vld [vmem:[#allocation37_spill] sm:$0xff] }
 0x2aa   : > { %1244 = vxpose.xlu0.c.b16.cont [6/8] (narrow) %v11951_v37, 16  ;;  %v17219_v37 = vld [vmem:[#allocation48_spill] sm:$0xff] }
 0x2ac   : > { %v12106_v7 = vpop.permute.xlu1 %725 }
 0x2ad   : > { %1227 = vxpose.xlu1.c.b16.cont [5/8] (narrow) %v11944_v1, 16 }
 0x2ae   : > { %1245 = vxpose.xlu0.c.b16.cont [7/8] (narrow) %v12017_v2, 16 }
 0x2b0   : > { %9958 = vmatmul.mubr.msk.bf16.gmra.mrb[40].mxu0 %vm1271_vm0, %v11961_v23  ;;  %v12114_v58 = vpop.permute.xlu1 %741  ;;  %v17233_v23 = vld [vmem:[#allocation53_spill] sm:$0xff] }
 0x2b1   : > { %9961 = vmatprep.mubr.msk.bf16.mxu0 %vm1271_vm0, %v12025_v8  ;;  %1228 = vxpose.xlu1.c.b16.cont [6/8] (narrow) %v11946_v59, 16  ;;  %v17231_v59 = vld [vmem:[#allocation52_spill] sm:$0xff]  ;;  %v17232_v8 = vld [vmem:[#allocation38_spill] sm:$0xff] }
 0x2b2   : > { %1246 = vxpose.xlu0.c.b16.end [8/8] (narrow) %v12036_v14, 16  ;;  %v17245_v14 = vld [vmem:[#allocation57_spill] sm:$0xff] }
 0x2b4   : > { %v12121_v1 = vpop.permute.xlu1 %757 }
 0x2b5   : > { %1229 = vxpose.xlu1.c.b16.cont [7/8] (narrow) %v12012_v31, 16  ;;  %v17234_v31 = vld [vmem:[#allocation50_spill] sm:$0xff] }
 0x2b8   : > { %9962 = vmatmul.mubr.msk.bf16.gmra.mrb[44].mxu0 %vm1271_vm0, %v678_v52  ;;  %v12130_v15 = vpop.permute.xlu1 %773  ;;  %v17252_v52 = vld [vmem:[#allocation43_spill] sm:$0xff] }
 0x2b9   : > { %1230 = vxpose.xlu1.c.b16.end [8/8] (narrow) %v12028_v4, 16  ;;  %9985 = vmatprep.mubr.msk.bf16.mxu0 %vm1271_vm0, %v11754_v33  ;;  %v17244_v4 = vld [vmem:[#allocation42_spill] sm:$0xff] }
 0x2bb   : > { %1035 = vrot.lane.b32.xlu0 %v11547_v22, %s11319_s5  ;;  %v1183_v11 = vpop.trf.xlu0 }
 0x2bc   : > { %9965 = vmatprep.subr.bf16.mxu1 %v1183_v11 }
 0x2bd   : > { %1255 = vxpose.xlu1.c.b16.start [1/8] (narrow) %v11715_v17, 16  ;;  %9966 = vmatpush3.bf16.msra.mxu1 %v1183_v11  ;;  %v12138_v17 = vpop.permute.xlu1 %1009  ;;  %v17259_v11 = vld [vmem:[#allocation59_spill] sm:$0xff] }
 0x2bf   : > { %1047 = vrot.lane.b32.xlu0 %v11501_v45, %s11320_s6 }
 0x2c0   : > { %9968 = vmatmul.mubr.msk.bf16.vlgmr.msra.gmra.mrb[32].mxu1 %vm1271_vm0, %v17209_v13  ;;  %v17260_v13 = vld [vmem:[#allocation28_spill] sm:$0xff] }
 0x2c1   : > { %1256 = vxpose.xlu1.c.b16.cont [2/8] (narrow) %v17210_v16, 16  ;;  %9971 = vmatprep.mubr.msk.bf16.mxu1 %vm1271_vm0, %v17211_v19  ;;  %v12149_v33 = vpop.permute.xlu1 %1013  ;;  %v17261_v16 = vld [vmem:[#allocation45_spill] sm:$0xff] }
 0x2c2   : > { %v17262_v19 = vld [vmem:[#allocation29_spill] sm:$0xff] }
 0x2c3   : > { %1051 = vrot.lane.b32.xlu0 %v17212_v21, %s11320_s6 }
 0x2c5   : > { %1257 = vxpose.xlu1.c.b16.cont [3/8] (narrow) %v17213_v26, 16  ;;  %v12159_v38 = vpop.permute.xlu1 %1025 }
 0x2c6   : > { %17220 = vst [vmem:[#allocation17_spill] sm:$0xff] %v12159_v38 }
 0x2c7   : > { %1055 = vrot.lane.b32.xlu0 %v17214_v28, %s11320_s6 }
 0x2c8   : > { %9972 = vmatmul.mubr.msk.bf16.gmra.mrb[36].mxu1 %vm1271_vm0, %v17215_v29 }
 0x2c9   : > { %1258 = vxpose.xlu1.c.b16.cont [4/8] (narrow) %v17216_v30, 16  ;;  %9975 = vmatprep.mubr.msk.bf16.mxu1 %vm1271_vm0, %v11964_v34  ;;  %v12167_v34 = vpop.permute.xlu1 %1029 }
 0x2ca   : > { %17221 = vst [vmem:[#allocation15_spill] sm:$0xff] %v12167_v34 }
 0x2cb   : > { %1059 = vrot.lane.b32.xlu0 %v11547_v22, %s11320_s6 }
 0x2cd   : > { %1259 = vxpose.xlu1.c.b16.cont [5/8] (narrow) %v17217_v35, 16  ;;  %v12176_v48 = vpop.permute.xlu1 %1033 }
 0x2ce   : > { %17223 = vst [vmem:[#allocation34_spill] sm:$0xff] %v12176_v48 }
 0x2cf   : > { %1071 = vrot.lane.b32.xlu0 %v11501_v45, %s11321_s7 }
 0x2d0   : > { %9976 = vmatmul.mubr.msk.bf16.gmra.mrb[40].mxu1 %vm1271_vm0, %v17218_v36 }
 0x2d1   : > { %1260 = vxpose.xlu1.c.b16.cont [6/8] (narrow) %v17219_v37, 16  ;;  %9979 = vmatprep.mubr.msk.bf16.mxu1 %vm1271_vm0, %v12030_v9 }
 0x2d3   : > { %1075 = vrot.lane.b32.xlu0 %v17212_v21, %s11321_s7 }
 0x2d5   : > { %1261 = vxpose.xlu1.c.b16.cont [7/8] (narrow) %v12022_v63, 16  ;;  %v17241_v63 = vld [vmem:[#allocation44_spill] sm:$0xff] }
 0x2d7   : > { %1079 = vrot.lane.b32.xlu0 %v17214_v28, %s11321_s7 }
 0x2d8   : > { %9980 = vmatmul.mubr.msk.bf16.gmra.mrb[44].mxu1 %vm1271_vm0, %v694_v0  ;;  %v17254_v0 = vld [vmem:[#allocation26_spill] sm:$0xff] }
 0x2d9   : > { %1262 = vxpose.xlu1.c.b16.end [8/8] (narrow) %v12040_v62, 16  ;;  %10003 = vmatprep.mubr.msk.bf16.mxu1 %vm1271_vm0, %v17222_v47  ;;  %v17246_v62 = vld [vmem:[#allocation54_spill] sm:$0xff] }
 0x2db   : > { %1083 = vrot.lane.b32.xlu0 %v11547_v22, %s11321_s7  ;;  %v1215_v9 = vpop.trf.xlu0 }
 0x2dc   : > { %10001 = vmatprep.subr.bf16.mxu1 %v1215_v9 }
 0x2dd   : > { %1037 = vrot.lane.b32.xlu1 %v11545_v18, %s11319_s5  ;;  %10002 = vmatpush3.bf16.msra.mxu1 %v1215_v9 }
 0x2df   : > { %1095 = vrot.lane.b32.xlu0 %v11501_v45, %s11322_s8 }
 0x2e0   : > { %10004 = vmatmul.mubr.msk.bf16.vlgmr.msra.gmra.mrb[48].mxu1 %vm1271_vm0, %v17224_v49 }
 0x2e1   : > { %1049 = vrot.lane.b32.xlu1 %v11497_v41, %s11320_s6  ;;  %10007 = vmatprep.mubr.msk.bf16.mxu1 %vm1271_vm0, %v17225_v50 }
 0x2e3   : > { %1099 = vrot.lane.b32.xlu0 %v17212_v21, %s11322_s8  ;;  %v1199_v53 = vpop.trf.xlu1 }
 0x2e4   : > { %9983 = vmatprep.subr.bf16.mxu0 %v1199_v53 }
 0x2e5   : > { %1053 = vrot.lane.b32.xlu1 %v17226_v55, %s11320_s6  ;;  %9984 = vmatpush3.bf16.msra.mxu0 %v1199_v53 }
 0x2e7   : > { %1103 = vrot.lane.b32.xlu0 %v17214_v28, %s11322_s8 }
 0x2e8   : > { %9986 = vmatmul.mubr.msk.bf16.vlgmr.msra.gmra.mrb[48].mxu0 %vm1271_vm0, %v17227_v56  ;;  %10008 = vmatmul.mubr.msk.bf16.gmra.mrb[52].mxu1 %vm1271_vm0, %v17228_v61 }
 0x2e9   : > { %1057 = vrot.lane.b32.xlu1 %v17229_v27, %s11320_s6  ;;  %9989 = vmatprep.mubr.msk.bf16.mxu0 %vm1271_vm0, %v17230_v44 }
 0x2ea   : > { %10011 = vmatprep.mubr.msk.bf16.mxu1 %vm1271_vm0, %v17231_v59 }
 0x2eb   : > { %1107 = vrot.lane.b32.xlu0 %v11547_v22, %s11322_s8 }
 0x2ed   : > { %1061 = vrot.lane.b32.xlu1 %v11545_v18, %s11320_s6 }
 0x2ef   : > { %1119 = vrot.lane.b32.xlu0 %v11501_v45, %s11323_s10 }
 0x2f0   : > { %9990 = vmatmul.mubr.msk.bf16.gmra.mrb[52].mxu0 %vm1271_vm0, %v17232_v8  ;;  %10012 = vmatmul.mubr.msk.bf16.gmra.mrb[56].mxu1 %vm1271_vm0, %v17233_v23 }
 0x2f1   : > { %1073 = vrot.lane.b32.xlu1 %v11497_v41, %s11321_s7  ;;  %9993 = vmatprep.mubr.msk.bf16.mxu0 %vm1271_vm0, %v17234_v31 }
 0x2f2   : > { %10015 = vmatprep.mubr.msk.bf16.mxu1 %vm1271_vm0, %v12038_v5  ;;  %v17236_v5 = vld [vmem:[#allocation22_spill] sm:$0xff] }
 0x2f3   : > { %1123 = vrot.lane.b32.xlu0 %v17212_v21, %s11323_s10 }
 0x2f5   : > { %1077 = vrot.lane.b32.xlu1 %v17226_v55, %s11321_s7 }
 0x2f7   : > { %1127 = vrot.lane.b32.xlu0 %v17214_v28, %s11323_s10 }
 0x2f8   : > { %9994 = vmatmul.mubr.msk.bf16.gmra.mrb[56].mxu0 %vm1271_vm0, %v17235_v39  ;;  %10016 = vmatmul.mubr.msk.bf16.gmra.mrb[60].mxu1 %vm1271_vm0, %v12106_v7  ;;  %v17256_v7 = vld [vmem:[#allocation58_spill] sm:$0xff] }
 0x2f9   : > { %1081 = vrot.lane.b32.xlu1 %v17229_v27, %s11321_s7  ;;  %9997 = vmatprep.mubr.msk.bf16.mxu0 %vm1271_vm0, %v12033_v51  ;;  %v17238_v51 = vld [vmem:[#allocation20_spill] sm:$0xff] }
 0x2fa   : > { %10039 = vmatprep.mubr.msk.bf16.mxu1 %vm1271_vm0, %v17236_v5 }
 0x2fb   : > { %1131 = vrot.lane.b32.xlu0 %v11547_v22, %s11323_s10 }
 0x2fc   : > { %v1247_v2 = vpop.trf.xlu0 }
 0x2fd   : > { %10037 = vmatprep.subr.bf16.mxu1 %v1247_v2  ;;  %1085 = vrot.lane.b32.xlu1 %v11545_v18, %s11321_s7 }
 0x2fe   : > { %10038 = vmatpush3.bf16.msra.mxu1 %v1247_v2 }
 0x2ff   : > { %10073 = vmatprep.subr.bf16.mxu1 %v11501_v45 }
 0x300   : > { %9998 = vmatmul.mubr.msk.bf16.gmra.mrb[60].mxu0 %vm1271_vm0, %v12098_v3  ;;  %v17255_v3 = vld [vmem:[#allocation46_spill] sm:$0xff] }
 0x301   : > { %10040 = vmatmul.mubr.msk.bf16.vlgmr.msra.gmra.mrb[64].mxu1 %vm1271_vm0, %v17237_v57  ;;  %1097 = vrot.lane.b32.xlu1 %v11497_v41, %s11322_s8 }
 0x302   : > { %10021 = vmatprep.mubr.msk.bf16.mxu0 %vm1271_vm0, %v17238_v51  ;;  %10043 = vmatprep.mubr.msk.bf16.mxu1 %vm1271_vm0, %v17239_v6 }
 0x303   : > { %10074 = vmatpush3.bf16.msra.mxu1 %v11501_v45  ;;  %v1231_v20 = vpop.trf.xlu1  ;;  %v17242_v45 = vld [vmem:[#allocation39_spill] sm:$0xff] }
 0x304   : > { %10075 = vmatprep.subr.bf16.mxu1 %v11497_v41  ;;  %10019 = vmatprep.subr.bf16.mxu0 %v1231_v20 }
 0x305   : > { %1101 = vrot.lane.b32.xlu1 %v17226_v55, %s11322_s8  ;;  %10020 = vmatpush3.bf16.msra.mxu0 %v1231_v20 }
 0x307   : > { %10076 = vmatpush3.bf16.msra.mxu1 %v11497_v41 }
 0x308   : > { %10077 = vmatprep.subr.bf16.mxu1 %v17212_v21  ;;  %10022 = vmatmul.mubr.msk.bf16.vlgmr.msra.gmra.mrb[64].mxu0 %vm1271_vm0, %v17240_v42 }
 0x309   : > { %10044 = vmatmul.mubr.msk.bf16.gmra.mrb[68].mxu1 %vm1271_vm0, %v17241_v63  ;;  %1105 = vrot.lane.b32.xlu1 %v17229_v27, %s11322_s8 }
 0x30a   : > { %10025 = vmatprep.mubr.msk.bf16.mxu0 %vm1271_vm0, %v17242_v45  ;;  %10047 = vmatprep.mubr.msk.bf16.mxu1 %vm1271_vm0, %v17243_v12 }
 0x30b   : > { %10078 = vmatpush3.bf16.msra.mxu1 %v17212_v21 }
 0x30c   : > { %10079 = vmatprep.subr.bf16.mxu1 %v17226_v55 }
 0x30d   : > { %1109 = vrot.lane.b32.xlu1 %v11545_v18, %s11322_s8 }
 0x30f   : > { %10080 = vmatpush3.bf16.msra.mxu1 %v17226_v55 }
 0x310   : > { %10081 = vmatprep.subr.bf16.mxu1 %v17214_v28  ;;  %10026 = vmatmul.mubr.msk.bf16.gmra.mrb[68].mxu0 %vm1271_vm0, %v17244_v4 }
 0x311   : > { %10048 = vmatmul.mubr.msk.bf16.gmra.mrb[72].mxu1 %vm1271_vm0, %v17245_v14  ;;  %1121 = vrot.lane.b32.xlu1 %v11497_v41, %s11323_s10  ;;  %v17248_v41 = vld [vmem:[#allocation14_spill] sm:$0xff] }
 0x312   : > { %10029 = vmatprep.mubr.msk.bf16.mxu0 %vm1271_vm0, %v17246_v62  ;;  %10051 = vmatprep.mubr.msk.bf16.mxu1 %vm1271_vm0, %v12045_v25  ;;  %v17249_v25 = vld [vmem:[#allocation24_spill] sm:$0xff] }
 0x313   : > { %10082 = vmatpush3.bf16.msra.mxu1 %v17214_v28 }
 0x314   : > { %10083 = vmatprep.subr.bf16.mxu1 %v17229_v27 }
 0x315   : > { %1125 = vrot.lane.b32.xlu1 %v17226_v55, %s11323_s10 }
 0x317   : > { %10084 = vmatpush3.bf16.msra.mxu1 %v17229_v27 }
 0x318   : > { %10085 = vmatprep.subr.bf16.mxu1 %v11547_v22  ;;  %10030 = vmatmul.mubr.msk.bf16.gmra.mrb[72].mxu0 %vm1271_vm0, %v17247_v46 }
 0x319   : > { %10052 = vmatmul.mubr.msk.bf16.gmra.mrb[76].mxu1 %vm1271_vm0, %v12121_v1  ;;  %1129 = vrot.lane.b32.xlu1 %v17229_v27, %s11323_s10  ;;  %v17258_v1 = vld [vmem:[#allocation31_spill] sm:$0xff] }
 0x31a   : > { %10033 = vmatprep.mubr.msk.bf16.mxu0 %vm1271_vm0, %v12042_v54  ;;  %v17250_v54 = vld [vmem:[#allocation13_spill] sm:$0xff] }
 0x31b   : > { %10086 = vmatpush3.bf16.msra.mxu1 %v11547_v22  ;;  %v17251_v22 = vld [vmem:[#allocation27_spill] sm:$0xff] }
 0x31c   : > { %10087 = vmatprep.subr.bf16.mxu1 %v11545_v18 }
 0x31d   : > { %1133 = vrot.lane.b32.xlu1 %v11545_v18, %s11323_s10 }
 0x31f   : > { %10088 = vmatpush3.bf16.msra.mxu1 %v11545_v18  ;;  %v17253_v18 = vld [vmem:[#allocation10_spill] sm:$0xff] }
 0x320   : > { %10137 = vmatprep.subr.bf16.mxu1 %v17248_v41  ;;  %10034 = vmatmul.mubr.msk.bf16.gmra.mrb[76].mxu0 %vm1271_vm0, %v12114_v58  ;;  %v17257_v58 = vld [vmem:[#allocation11_spill] sm:$0xff] }
 0x321   : > { %10057 = vmatprep.mubr.msk.bf16.mxu0 %vm1271_vm0, %v17249_v25 }
 0x323   : > { %v1263_v40 = vpop.trf.xlu1 }
 0x324   : > { %10055 = vmatprep.subr.bf16.mxu0 %v1263_v40 }
 0x325   : > { %10056 = vmatpush3.bf16.msra.mxu0 %v1263_v40 }
 0x326   : > { %10105 = vmatprep.subr.bf16.mxu0 %v17250_v54 }
 0x328   : > { %10058 = vmatmul.mubr.msk.bf16.vlgmr.msra.gmra.mrb[80].mxu0 %vm1271_vm0, %v17251_v22 }
 0x329   : > { %10061 = vmatprep.mubr.msk.bf16.mxu0 %vm1271_vm0, %v17252_v52  ;;  %10106 = vmatpush3.bf16.msra.mxu0 %v17250_v54 }
 0x32a   : > { %10107 = vmatprep.subr.bf16.mxu0 %v17253_v18 }
 0x32d   : > { %10108 = vmatpush3.bf16.msra.mxu0 %v17253_v18  ;;  %v12383_v56 = vpop.permute.xlu0 %1035 }
 0x32e   : > { %10109 = vmatprep.subr.bf16.mxu0 %v17254_v0  ;;  %17263 = vst [vmem:[#allocation6_spill] sm:$0xff] %v12383_v56 }
 0x330   : > { %10062 = vmatmul.mubr.msk.bf16.gmra.mrb[84].mxu0 %vm1271_vm0, %v17255_v3 }
 0x331   : > { %10065 = vmatprep.mubr.msk.bf16.mxu0 %vm1271_vm0, %v17256_v7  ;;  %10110 = vmatpush3.bf16.msra.mxu0 %v17254_v0  ;;  %v12386_v61 = vpop.permute.xlu0 %1047 }
 0x332   : > { %10111 = vmatprep.subr.bf16.mxu0 %v17257_v58 }
 0x335   : > { %10112 = vmatpush3.bf16.msra.mxu0 %v17257_v58  ;;  %v12400_v31 = vpop.permute.xlu0 %1051 }
 0x336   : > { %10113 = vmatprep.subr.bf16.mxu0 %v17258_v1  ;;  %17266 = vst [vmem:[#allocation36_spill] sm:$0xff] %v12400_v31 }
 0x338   : > { %10066 = vmatmul.mubr.msk.bf16.gmra.mrb[88].mxu0 %vm1271_vm0, %v17259_v11 }
 0x339   : > { %10069 = vmatprep.mubr.msk.bf16.mxu0 %vm1271_vm0, %v12054_v43  ;;  %10114 = vmatpush3.bf16.msra.mxu0 %v17258_v1  ;;  %v12409_v57 = vpop.permute.xlu0 %1055 }
 0x33a   : > { %10115 = vmatprep.subr.bf16.mxu0 %v17260_v13  ;;  %17270 = vst [vmem:[#allocation48_spill] sm:$0xff] %v12409_v57 }
 0x33d   : > { %10116 = vmatpush3.bf16.msra.mxu0 %v17260_v13  ;;  %v12417_v42 = vpop.permute.xlu0 %1059 }
 0x33e   : > { %10117 = vmatprep.subr.bf16.mxu0 %v17261_v16  ;;  %17274 = vst [vmem:[#allocation5_spill] sm:$0xff] %v12417_v42 }
 0x340   : > { %10070 = vmatmul.mubr.msk.bf16.gmra.mrb[92].mxu0 %vm1271_vm0, %v12130_v15 }
 0x341   : > { %10118 = vmatpush3.bf16.msra.mxu0 %v17261_v16  ;;  %v12429_v62 = vpop.permute.xlu0 %1071 }
 0x342   : > { %10119 = vmatprep.subr.bf16.mxu0 %v17262_v19  ;;  %17280 = vst [vmem:[#allocation38_spill] sm:$0xff] %v12429_v62 }
 0x345   : > { %10120 = vmatpush3.bf16.msra.mxu0 %v17262_v19  ;;  %v12441_v52 = vpop.permute.xlu0 %1075 }
 0x346   : > { %10169 = vmatprep.subr.bf16.mxu0 %v12070_v10  ;;  %17286 = vst [vmem:[#allocation20_spill] sm:$0xff] %v12441_v52 }
 0x349   : > { %v12450_v7 = vpop.permute.xlu0 %1079 }
 0x34a   : > { %17288 = vst [vmem:[#allocation23_spill] sm:$0xff] %v12450_v7 }
 0x34c   : > { %v12336_v43 = vpop.f32.mrb[16].mxu1 }
 0x34d   : > { %2244 = vmax.xlane.f32.xlu0 %v12336_v43  ;;  %v12339_v21 = vpop.f32.mrb[17].mxu1  ;;  %v12461_v13 = vpop.permute.xlu0 %1083 }
 0x34e   : > { %v12341_v26 = vpop.f32.mrb[18].mxu1  ;;  %17290 = vst [vmem:[#allocation39_spill] sm:$0xff] %v12461_v13 }
 0x34f   : > { %v12343_v28 = vpop.f32.mrb[19].mxu1  ;;  %v12388_v27 = vpop.permute.xlu1 %1037 }
 0x350   : > { %2242 = vmax.xlane.f32.xlu1 %v12343_v28  ;;  %17264 = vst [vmem:[#allocation30_spill] sm:$0xff] %v12388_v27 }
 0x351   : > { %2240 = vmax.xlane.f32.xlu0 %v12339_v21 }
 0x353   : > { %v12402_v39 = vpop.permute.xlu1 %1049 }
 0x354   : > { %17267 = vst [vmem:[#allocation33_spill] sm:$0xff] %v12402_v39 }
 0x355   : > { %v12347_v15 = vpop.f32.mrb[20].mxu1  ;;  %2246 = vmax.xlane.f32.xlu0 %v12341_v26 }
 0x356   : > { %2252 = vmax.xlane.f32.xlu1 %v12347_v15  ;;  %v12351_v29 = vpop.f32.mrb[21].mxu1 }
 0x357   : > { %v12353_v30 = vpop.f32.mrb[22].mxu1  ;;  %v12413_v6 = vpop.permute.xlu1 %1053 }
 0x358   : > { %v12355_v35 = vpop.f32.mrb[23].mxu1  ;;  %17272 = vst [vmem:[#allocation21_spill] sm:$0xff] %v12413_v6 }
 0x359   : > { %2254 = vmax.xlane.f32.xlu0 %v12353_v30 }
 0x35a   : > { %2248 = vmax.xlane.f32.xlu1 %v12351_v29 }
 0x35b   : > { %v12421_v45 = vpop.permute.xlu1 %1057 }
 0x35c   : > { %17276 = vst [vmem:[#allocation40_spill] sm:$0xff] %v12421_v45 }
 0x35d   : > { %v12359_v36 = vpop.f32.mrb[24].mxu1  ;;  %2250 = vmax.xlane.f32.xlu0 %v12355_v35 }
 0x35e   : > { %2260 = vmax.xlane.f32.xlu1 %v12359_v36  ;;  %v12363_v37 = vpop.f32.mrb[25].mxu1 }
 0x35f   : > { %v12365_v47 = vpop.f32.mrb[26].mxu1  ;;  %v12431_v46 = vpop.permute.xlu1 %1061 }
 0x360   : > { %v12367_v9 = vpop.f32.mrb[27].mxu1  ;;  %17281 = vst [vmem:[#allocation53_spill] sm:$0xff] %v12431_v46 }
 0x361   : > { %2262 = vmax.xlane.f32.xlu0 %v12365_v47 }
 0x362   : > { %2256 = vmax.xlane.f32.xlu1 %v12363_v37 }
 0x363   : > { %v12443_v18 = vpop.permute.xlu1 %1073 }
 0x364   : > { %17287 = vst [vmem:[#allocation41_spill] sm:$0xff] %v12443_v18  ;;  %v12476_v18 = vpop.permute.xlu0 %1095 }
 0x365   : > { %v12371_v49 = vpop.f32.mrb[28].mxu1  ;;  %2258 = vmax.xlane.f32.xlu0 %v12367_v9  ;;  %17296 = vst [vmem:[#allocation14_spill] sm:$0xff] %v12476_v18 }
 0x366   : > { %2268 = vmax.xlane.f32.xlu1 %v12371_v49  ;;  %v12375_v50 = vpop.f32.mrb[29].mxu1 }
 0x367   : > { %v12377_v53 = vpop.f32.mrb[30].mxu1  ;;  %v12454_v1 = vpop.permute.xlu1 %1077 }
 0x368   : > { %v12379_v55 = vpop.f32.mrb[31].mxu1  ;;  %17289 = vst [vmem:[#allocation44_spill] sm:$0xff] %v12454_v1  ;;  %v12491_v56 = vpop.permute.xlu0 %1099 }
 0x369   : > { %2270 = vmax.xlane.f32.xlu0 %v12377_v53  ;;  %17302 = vst [vmem:[#allocation26_spill] sm:$0xff] %v12491_v56 }
 0x36a   : > { %2264 = vmax.xlane.f32.xlu1 %v12375_v50 }
 0x36b   : > { %v12465_v19 = vpop.permute.xlu1 %1081 }
 0x36c   : > { %17292 = vst [vmem:[#allocation42_spill] sm:$0xff] %v12465_v19  ;;  %v12502_v48 = vpop.permute.xlu0 %1103 }
 0x36d   : > { %2266 = vmax.xlane.f32.xlu0 %v12379_v55  ;;  %17306 = vst [vmem:[#allocation31_spill] sm:$0xff] %v12502_v48 }
 0x36f   : > { %v12478_v62 = vpop.permute.xlu1 %1085 }
 0x370   : > { %17297 = vst [vmem:[#allocation24_spill] sm:$0xff] %v12478_v62 }
 0x373   : > { %v12390_v44 = vpop.f32.mrb[32].mxu0  ;;  %v12493_v42 = vpop.permute.xlu1 %1097 }
 0x374   : > { %v12392_v59 = vpop.f32.mrb[33].mxu0  ;;  %2276 = vmax.xlane.f32.xlu1 %v12390_v44  ;;  %17303 = vst [vmem:[#allocation46_spill] sm:$0xff] %v12493_v42  ;;  %v12513_v42 = vpop.permute.xlu0 %1107 }
 0x375   : > { %v12395_v8 = vpop.f32.mrb[34].mxu0  ;;  %2272 = vmax.xlane.f32.xlu0 %v12392_v59  ;;  %17310 = vst [vmem:[#allocation29_spill] sm:$0xff] %v12513_v42 }
 0x376   : > { %v12398_v23 = vpop.f32.mrb[35].mxu0 }
 0x377   : > { %17265 = vst [vmem:[#allocation8_spill] sm:$0xff] %v12398_v23  ;;  %v12506_v32 = vpop.permute.xlu1 %1101 }
 0x378   : > { %17308 = vst [vmem:[#allocation28_spill] sm:$0xff] %v12506_v32  ;;  %v12528_v24 = vpop.permute.xlu0 %1119 }
 0x379   : > { %2278 = vmax.xlane.f32.xlu0 %v12395_v8  ;;  %17316 = vst [vmem:[#allocation68_spill] sm:$0xff] %v12528_v24 }
 0x37b   : > { %v12405_v5 = vpop.f32.mrb[36].mxu0  ;;  %v12517_v34 = vpop.permute.xlu1 %1105 }
 0x37c   : > { %17268 = vst [vmem:[#allocation47_spill] sm:$0xff] %v12405_v5  ;;  %v12407_v2 = vpop.f32.mrb[37].mxu0  ;;  %17312 = vst [vmem:[#allocation64_spill] sm:$0xff] %v12517_v34 }
 0x37d   : > { %17269 = vst [vmem:[#allocation49_spill] sm:$0xff] %v12407_v2  ;;  %v12411_v51 = vpop.f32.mrb[38].mxu0 }
 0x37e   : > { %17271 = vst [vmem:[#allocation18_spill] sm:$0xff] %v12411_v51  ;;  %v12415_v20 = vpop.f32.mrb[39].mxu0 }
 0x37f   : > { %17273 = vst [vmem:[#allocation37_spill] sm:$0xff] %v12415_v20 }
 0x383   : > { %v12419_v63 = vpop.f32.mrb[40].mxu0 }
 0x384   : > { %17275 = vst [vmem:[#allocation19_spill] sm:$0xff] %v12419_v63  ;;  %v12423_v12 = vpop.f32.mrb[41].mxu0 }
 0x385   : > { %17277 = vst [vmem:[#allocation7_spill] sm:$0xff] %v12423_v12  ;;  %v12425_v4 = vpop.f32.mrb[42].mxu0 }
 0x386   : > { %17278 = vst [vmem:[#allocation35_spill] sm:$0xff] %v12425_v4  ;;  %v12427_v14 = vpop.f32.mrb[43].mxu0 }
 0x387   : > { %17279 = vst [vmem:[#allocation52_spill] sm:$0xff] %v12427_v14 }
 0x38b   : > { %v12433_v25 = vpop.f32.mrb[44].mxu0 }
 0x38c   : > { %17282 = vst [vmem:[#allocation50_spill] sm:$0xff] %v12433_v25  ;;  %v12435_v40 = vpop.f32.mrb[45].mxu0 }
 0x38d   : > { %17283 = vst [vmem:[#allocation51_spill] sm:$0xff] %v12435_v40  ;;  %v12437_v54 = vpop.f32.mrb[46].mxu0 }
 0x38e   : > { %17284 = vst [vmem:[#allocation22_spill] sm:$0xff] %v12437_v54  ;;  %v12439_v22 = vpop.f32.mrb[47].mxu0 }
 0x38f   : > { %17285 = vst [vmem:[#allocation25_spill] sm:$0xff] %v12439_v22 }
 0x393   : > { %v12445_v0 = vpop.f32.mrb[32].mxu1 }
 0x394   : > { %2308 = vmax.xlane.f32.xlu1 %v12445_v0  ;;  %v12448_v3 = vpop.f32.mrb[33].mxu1 }
 0x395   : > { %v12452_v58 = vpop.f32.mrb[34].mxu1 }
 0x396   : > { %2310 = vmax.xlane.f32.xlu0 %v12452_v58  ;;  %v12457_v11 = vpop.f32.mrb[35].mxu1 }
 0x398   : > { %2304 = vmax.xlane.f32.xlu1 %v12448_v3 }
 0x39a   : > { %2306 = vmax.xlane.f32.xlu0 %v12457_v11 }
 0x39b   : > { %v12463_v16 = vpop.f32.mrb[36].mxu1 }
 0x39c   : > { %17291 = vst [vmem:[#allocation56_spill] sm:$0xff] %v12463_v16  ;;  %2274 = vmax.xlane.f32.xlu1 %v12398_v23  ;;  %v12468_v7 = vpop.f32.mrb[37].mxu1 }
 0x39d   : > { %17293 = vst [vmem:[#allocation57_spill] sm:$0xff] %v12468_v7  ;;  %v12470_v52 = vpop.f32.mrb[38].mxu1 }
 0x39e   : > { %17294 = vst [vmem:[#allocation54_spill] sm:$0xff] %v12470_v52  ;;  %2286 = vmax.xlane.f32.xlu0 %v12411_v51  ;;  %v12473_v1 = vpop.f32.mrb[39].mxu1 }
 0x39f   : > { %17295 = vst [vmem:[#allocation55_spill] sm:$0xff] %v12473_v1 }
 0x3a0   : > { %2284 = vmax.xlane.f32.xlu1 %v12405_v5 }
 0x3a2   : > { %2318 = vmax.xlane.f32.xlu0 %v12470_v52 }
 0x3a3   : > { %v12481_v13 = vpop.f32.mrb[40].mxu1 }
 0x3a4   : > { %17298 = vst [vmem:[#allocation13_spill] sm:$0xff] %v12481_v13  ;;  %2316 = vmax.xlane.f32.xlu1 %v12463_v16  ;;  %v12484_v19 = vpop.f32.mrb[41].mxu1 }
 0x3a5   : > { %17299 = vst [vmem:[#allocation27_spill] sm:$0xff] %v12484_v19  ;;  %v12486_v27 = vpop.f32.mrb[42].mxu1 }
 0x3a6   : > { %17300 = vst [vmem:[#allocation43_spill] sm:$0xff] %v12486_v27  ;;  %2282 = vmax.xlane.f32.xlu0 %v12415_v20  ;;  %v12489_v46 = vpop.f32.mrb[43].mxu1 }
 0x3a7   : > { %17301 = vst [vmem:[#allocation10_spill] sm:$0xff] %v12489_v46 }
 0x3a8   : > { %2280 = vmax.xlane.f32.xlu1 %v12407_v2 }
 0x3aa   : > { %2314 = vmax.xlane.f32.xlu0 %v12473_v1 }
 0x3ab   : > { %v12497_v62 = vpop.f32.mrb[44].mxu1 }
 0x3ac   : > { %17304 = vst [vmem:[#allocation58_spill] sm:$0xff] %v12497_v62  ;;  %2312 = vmax.xlane.f32.xlu1 %v12468_v7  ;;  %v12500_v18 = vpop.f32.mrb[45].mxu1 }
 0x3ad   : > { %17305 = vst [vmem:[#allocation11_spill] sm:$0xff] %v12500_v18  ;;  %v12504_v45 = vpop.f32.mrb[46].mxu1 }
 0x3ae   : > { %17307 = vst [vmem:[#allocation59_spill] sm:$0xff] %v12504_v45  ;;  %2294 = vmax.xlane.f32.xlu0 %v12425_v4  ;;  %v12509_v56 = vpop.f32.mrb[47].mxu1 }
 0x3af   : > { %17309 = vst [vmem:[#allocation45_spill] sm:$0xff] %v12509_v56 }
 0x3b0   : > { %2292 = vmax.xlane.f32.xlu1 %v12419_v63 }
 0x3b2   : > { %2326 = vmax.xlane.f32.xlu0 %v12486_v27  ;;  %v12530_v27 = vpop.permute.xlu1 %1109 }
 0x3b3   : > { %v12515_v57 = vpop.f32.mrb[48].mxu1  ;;  %17317 = vst [vmem:[#allocation69_spill] sm:$0xff] %v12530_v27 }
 0x3b4   : > { %17311 = vst [vmem:[#allocation63_spill] sm:$0xff] %v12515_v57  ;;  %2324 = vmax.xlane.f32.xlu1 %v12481_v13  ;;  %v12520_v48 = vpop.f32.mrb[49].mxu1 }
 0x3b5   : > { %17313 = vst [vmem:[#allocation65_spill] sm:$0xff] %v12520_v48  ;;  %v12522_v6 = vpop.f32.mrb[50].mxu1 }
 0x3b6   : > { %17314 = vst [vmem:[#allocation66_spill] sm:$0xff] %v12522_v6  ;;  %2290 = vmax.xlane.f32.xlu0 %v12427_v14  ;;  %v12525_v32 = vpop.f32.mrb[51].mxu1 }
 0x3b7   : > { %17315 = vst [vmem:[#allocation67_spill] sm:$0xff] %v12525_v32 }
 0x3b8   : > { %2288 = vmax.xlane.f32.xlu1 %v12423_v12  ;;  %v12554_v12 = vpop.permute.xlu1 %1121 }
 0x3b9   : > { %17327 = vst [vmem:[#allocation79_spill] sm:$0xff] %v12554_v12 }
 0x3ba   : > { %2322 = vmax.xlane.f32.xlu0 %v12489_v46  ;;  %v12552_v46 = vpop.permute.xlu0 %1123 }
 0x3bb   : > { %v12533_v42 = vpop.f32.mrb[48].mxu0  ;;  %v12535_v34 = vpop.f32.mrb[52].mxu1  ;;  %17326 = vst [vmem:[#allocation78_spill] sm:$0xff] %v12552_v46 }
 0x3bc   : > { %17318 = vst [vmem:[#allocation70_spill] sm:$0xff] %v12533_v42  ;;  %17319 = vst [vmem:[#allocation71_spill] sm:$0xff] %v12535_v34  ;;  %v12537_v13 = vpop.f32.mrb[53].mxu1  ;;  %2320 = vmax.xlane.f32.xlu1 %v12484_v19  ;;  %v12540_v4 = vpop.f32.mrb[49].mxu0 }
 0x3bd   : > { %17320 = vst [vmem:[#allocation72_spill] sm:$0xff] %v12537_v13  ;;  %17321 = vst [vmem:[#allocation73_spill] sm:$0xff] %v12540_v4  ;;  %v12542_v14 = vpop.f32.mrb[50].mxu0  ;;  %v12544_v31 = vpop.f32.mrb[54].mxu1 }
 0x3be   : > { %17322 = vst [vmem:[#allocation74_spill] sm:$0xff] %v12542_v14  ;;  %17323 = vst [vmem:[#allocation75_spill] sm:$0xff] %v12544_v31  ;;  %2302 = vmax.xlane.f32.xlu0 %v12437_v54  ;;  %v12547_v24 = vpop.f32.mrb[51].mxu0  ;;  %v12549_v27 = vpop.f32.mrb[55].mxu1 }
 0x3bf   : > { %17324 = vst [vmem:[#allocation76_spill] sm:$0xff] %v12547_v24  ;;  %17325 = vst [vmem:[#allocation77_spill] sm:$0xff] %v12549_v27 }
 0x3c0   : > { %2300 = vmax.xlane.f32.xlu1 %v12433_v25  ;;  %v12578_v25 = vpop.permute.xlu1 %1125 }
 0x3c1   : > { %17337 = vst [vmem:[#allocation89_spill] sm:$0xff] %v12578_v25 }
 0x3c2   : > { %2334 = vmax.xlane.f32.xlu0 %v12504_v45  ;;  %v12576_v45 = vpop.permute.xlu0 %1127 }
 0x3c3   : > { %v12557_v19 = vpop.f32.mrb[52].mxu0  ;;  %v12559_v63 = vpop.f32.mrb[56].mxu1  ;;  %17336 = vst [vmem:[#allocation88_spill] sm:$0xff] %v12576_v45 }
 0x3c4   : > { %17328 = vst [vmem:[#allocation80_spill] sm:$0xff] %v12557_v19  ;;  %17329 = vst [vmem:[#allocation81_spill] sm:$0xff] %v12559_v63  ;;  %v12561_v38 = vpop.f32.mrb[57].mxu1  ;;  %2332 = vmax.xlane.f32.xlu1 %v12497_v62  ;;  %v12564_v54 = vpop.f32.mrb[53].mxu0 }
 0x3c5   : > { %17330 = vst [vmem:[#allocation82_spill] sm:$0xff] %v12561_v38  ;;  %17331 = vst [vmem:[#allocation83_spill] sm:$0xff] %v12564_v54  ;;  %v12566_v10 = vpop.f32.mrb[54].mxu0  ;;  %v12568_v39 = vpop.f32.mrb[58].mxu1 }
 0x3c6   : > { %17332 = vst [vmem:[#allocation84_spill] sm:$0xff] %v12566_v10  ;;  %17333 = vst [vmem:[#allocation85_spill] sm:$0xff] %v12568_v39  ;;  %2298 = vmax.xlane.f32.xlu0 %v12439_v22  ;;  %v12571_v46 = vpop.f32.mrb[55].mxu0  ;;  %v12573_v12 = vpop.f32.mrb[59].mxu1 }
 0x3c7   : > { %17334 = vst [vmem:[#allocation86_spill] sm:$0xff] %v12571_v46  ;;  %17335 = vst [vmem:[#allocation87_spill] sm:$0xff] %v12573_v12  ;;  %v12600_v25 = vpop.permute.xlu0 %1131 }
 0x3c8   : > { %2296 = vmax.xlane.f32.xlu1 %v12435_v40  ;;  %17342 = vst [vmem:[#allocation94_spill] sm:$0xff] %v12600_v25 }
 0x3ca   : > { %2330 = vmax.xlane.f32.xlu0 %v12509_v56  ;;  %v12603_v56 = vpop.permute.xlu1 %1129 }
 0x3cb   : > { %v12581_v62 = vpop.f32.mrb[56].mxu0  ;;  %v12583_v7 = vpop.f32.mrb[60].mxu1  ;;  %17343 = vst [vmem:[#allocation95_spill] sm:$0xff] %v12603_v56 }
 0x3cc   : > { %17338 = vst [vmem:[#allocation90_spill] sm:$0xff] %v12583_v7  ;;  %v12585_v52 = vpop.f32.mrb[61].mxu1  ;;  %2328 = vmax.xlane.f32.xlu1 %v12500_v18  ;;  %v12588_v22 = vpop.f32.mrb[57].mxu0 }
 0x3cd   : > { %17339 = vst [vmem:[#allocation91_spill] sm:$0xff] %v12585_v52  ;;  %v12590_v1 = vpop.f32.mrb[58].mxu0  ;;  %v12592_v16 = vpop.f32.mrb[62].mxu1 }
 0x3ce   : > { %17340 = vst [vmem:[#allocation92_spill] sm:$0xff] %v12592_v16  ;;  %v12594_v40 = vpop.f32.mrb[63].mxu1  ;;  %2342 = vmax.xlane.f32.xlu0 %v12542_v14  ;;  %v12597_v45 = vpop.f32.mrb[59].mxu0 }
 0x3cf   : > { %17341 = vst [vmem:[#allocation93_spill] sm:$0xff] %v12597_v45  ;;  %v12624_v56 = vpop.permute.xlu1 %1133 }
 0x3d0   : > { %2340 = vmax.xlane.f32.xlu1 %v12533_v42  ;;  %17352 = vst [vmem:[#allocation104_spill] sm:$0xff] %v12624_v56 }
 0x3d2   : > { %2374 = vmax.xlane.f32.xlu0 %v12522_v6 }
 0x3d3   : > { %v12605_v18 = vpop.f32.mrb[60].mxu0 }
 0x3d4   : > { %17344 = vst [vmem:[#allocation96_spill] sm:$0xff] %v12605_v18  ;;  %v12607_v2 = vpop.f32.mrb[64].mxu1  ;;  %2372 = vmax.xlane.f32.xlu1 %v12515_v57  ;;  %v12610_v20 = vpop.f32.mrb[61].mxu0 }
 0x3d5   : > { %17345 = vst [vmem:[#allocation97_spill] sm:$0xff] %v12607_v2  ;;  %17346 = vst [vmem:[#allocation98_spill] sm:$0xff] %v12610_v20  ;;  %v12612_v51 = vpop.f32.mrb[65].mxu1  ;;  %v12614_v14 = vpop.f32.mrb[62].mxu0 }
 0x3d6   : > { %17347 = vst [vmem:[#allocation99_spill] sm:$0xff] %v12612_v51  ;;  %17348 = vst [vmem:[#allocation100_spill] sm:$0xff] %v12614_v14  ;;  %v12616_v5 = vpop.f32.mrb[66].mxu1  ;;  %2338 = vmax.xlane.f32.xlu0 %v12547_v24  ;;  %v12619_v25 = vpop.f32.mrb[63].mxu0 }
 0x3d7   : > { %17349 = vst [vmem:[#allocation101_spill] sm:$0xff] %v12616_v5  ;;  %17350 = vst [vmem:[#allocation102_spill] sm:$0xff] %v12619_v25  ;;  %v12621_v6 = vpop.f32.mrb[67].mxu1 }
 0x3d8   : > { %17351 = vst [vmem:[#allocation103_spill] sm:$0xff] %v12621_v6  ;;  %2336 = vmax.xlane.f32.xlu1 %v12540_v4 }
 0x3da   : > { %v2245_v42 = vpop.xlane.xlu0 %2244  ;;  %2370 = vmax.xlane.f32.xlu0 %v12525_v32 }
 0x3db   : > { %v12627_v57 = vpop.f32.mrb[64].mxu0  ;;  %v2498_v24 = vsub.f32 %v12336_v43, %v2245_v42 }
 0x3dc   : > { %17353 = vst [vmem:[#allocation105_spill] sm:$0xff] %v12627_v57  ;;  %v12629_v51 = vpop.f32.mrb[68].mxu1  ;;  %2368 = vmax.xlane.f32.xlu1 %v12520_v48  ;;  %v12632_v5 = vpop.f32.mrb[65].mxu0 }
 0x3dd   : > { %17354 = vst [vmem:[#allocation106_spill] sm:$0xff] %v12629_v51  ;;  %17355 = vst [vmem:[#allocation107_spill] sm:$0xff] %v12632_v5  ;;  %v12635_v2 = vpop.f32.mrb[69].mxu1  ;;  %v12637_v6 = vpop.f32.mrb[66].mxu0  ;;  %v2628_v43 = vmul.f32 1.442695, %v2498_v24 }
 0x3de   : > { %17356 = vst [vmem:[#allocation108_spill] sm:$0xff] %v12635_v2  ;;  %17357 = vst [vmem:[#allocation109_spill] sm:$0xff] %v12637_v6  ;;  %v12639_v4 = vpop.f32.mrb[70].mxu1  ;;  %v2243_v56 = vpop.xlane.xlu1 %2242  ;;  %2350 = vmax.xlane.f32.xlu0 %v12566_v10 }
 0x3df   : > { %17358 = vst [vmem:[#allocation110_spill] sm:$0xff] %v12639_v4  ;;  %v2497_v32 = vsub.f32 %v12343_v28, %v2243_v56  ;;  %v2241_v23 = vpop.xlane.xlu0 %2240  ;;  %v12643_v57 = vpop.f32.mrb[71].mxu1 }
 0x3e0   : > { %17359 = vst [vmem:[#allocation111_spill] sm:$0xff] %v12643_v57  ;;  %v2496_v48 = vsub.f32 %v12339_v21, %v2241_v23  ;;  %v12646_v51 = vpop.f32.mrb[67].mxu0  ;;  %2348 = vmax.xlane.f32.xlu1 %v12557_v19 }
 0x3e1   : > { %17360 = vst [vmem:[#allocation112_spill] sm:$0xff] %v12646_v51  ;;  %v2626_v42 = vmul.f32 1.442695, %v2497_v32 }
 0x3e2   : > { %v2624_v2 = vmul.f32 1.442695, %v2496_v48  ;;  %2382 = vmax.xlane.f32.xlu0 %v12544_v31 }
 0x3e3   : > { %10740 = vpow2.f32 %v2626_v42  ;;  %v2247_v4 = vpop.xlane.xlu0 %2246  ;;  %v2253_v5 = vpop.xlane.xlu1 %2252 }
 0x3e4   : > { %10742 = vpow2.f32 %v2624_v2  ;;  %v2499_v28 = vsub.f32 %v12341_v26, %v2247_v4  ;;  %v2502_v56 = vsub.f32 %v12347_v15, %v2253_v5  ;;  %v12652_v10 = vpop.f32.mrb[68].mxu0  ;;  %v12654_v21 = vpop.f32.mrb[72].mxu1  ;;  %2380 = vmax.xlane.f32.xlu1 %v12535_v34 }
 0x3e5   : > { %17361 = vst [vmem:[#allocation113_spill] sm:$0xff] %v12652_v10  ;;  %17362 = vst [vmem:[#allocation114_spill] sm:$0xff] %v12654_v21  ;;  %10744 = vpow2.f32 %v2628_v43  ;;  %v12657_v24 = vpop.f32.mrb[73].mxu1  ;;  %v12659_v32 = vpop.f32.mrb[69].mxu0 }
 0x3e6   : > { %17363 = vst [vmem:[#allocation115_spill] sm:$0xff] %v12657_v24  ;;  %17364 = vst [vmem:[#allocation116_spill] sm:$0xff] %v12659_v32  ;;  %v2630_v48 = vmul.f32 1.442695, %v2499_v28  ;;  %v12661_v23 = vpop.f32.mrb[70].mxu0  ;;  %v12663_v42 = vpop.f32.mrb[74].mxu1  ;;  %2346 = vmax.xlane.f32.xlu0 %v12571_v46 }
 0x3e7   : > { %17365 = vst [vmem:[#allocation117_spill] sm:$0xff] %v12661_v23  ;;  %17366 = vst [vmem:[#allocation118_spill] sm:$0xff] %v12663_v42  ;;  %v2636_v26 = vmul.f32 1.442695, %v2502_v56  ;;  %v2255_v15 = vpop.xlane.xlu0 %2254  ;;  %v12666_v5 = vpop.f32.mrb[75].mxu1 }
 0x3e8   : > { %17367 = vst [vmem:[#allocation119_spill] sm:$0xff] %v12666_v5  ;;  %10746 = vpow2.f32 %v2630_v48  ;;  %v2503_v2 = vsub.f32 %v12353_v30, %v2255_v15  ;;  %v12669_v4 = vpop.f32.mrb[71].mxu0  ;;  %v2249_v43 = vpop.xlane.xlu1 %2248  ;;  %2344 = vmax.xlane.f32.xlu1 %v12564_v54 }
 0x3e9   : > { %17368 = vst [vmem:[#allocation120_spill] sm:$0xff] %v12669_v4  ;;  %v2500_v28 = vsub.f32 %v12351_v29, %v2249_v43  ;;  %10748 = vpow2.f32 %v2636_v26 }
 0x3ea   : > { %v2638_v31 = vmul.f32 1.442695, %v2503_v2  ;;  %2378 = vmax.xlane.f32.xlu0 %v12549_v27 }
 0x3eb   : > { %v2632_v34 = vmul.f32 1.442695, %v2500_v28  ;;  %v2251_v46 = vpop.xlane.xlu0 %2250  ;;  %v12674_v56 = vpop.f32.mrb[72].mxu0 }
 0x3ec   : > { %17369 = vst [vmem:[#allocation121_spill] sm:$0xff] %v12674_v56  ;;  %10750 = vpow2.f32 %v2638_v31  ;;  %v2501_v48 = vsub.f32 %v12355_v35, %v2251_v46  ;;  %v2261_v19 = vpop.xlane.xlu1 %2260  ;;  %v12677_v30 = vpop.f32.mrb[76].mxu1  ;;  %2376 = vmax.xlane.f32.xlu1 %v12537_v13 }
 0x3ed   : > { %17370 = vst [vmem:[#allocation122_spill] sm:$0xff] %v12677_v30  ;;  %v10741_v15 = vpop.eup %10740  ;;  %v2506_v54 = vsub.f32 %v12359_v36, %v2261_v19  ;;  %v12681_v29 = vpop.f32.mrb[73].mxu0  ;;  %10752 = vpow2.f32 %v2632_v34 }
 0x3ee   : > { %17371 = vst [vmem:[#allocation123_spill] sm:$0xff] %v12681_v29  ;;  %v12683_v2 = vpop.f32.mrb[77].mxu1  ;;  %v10743_v26 = vpop.eup %10742  ;;  %v2634_v43 = vmul.f32 1.442695, %v2501_v48 }
 0x3ef   : > { %17372 = vst [vmem:[#allocation124_spill] sm:$0xff] %v12683_v2  ;;  %v12685_v28 = vpop.f32.mrb[74].mxu0  ;;  %v12687_v27 = vpop.f32.mrb[78].mxu1  ;;  %v2644_v35 = vmul.f32 1.442695, %v2506_v54  ;;  %v3136_v13 = vpack.c.bf16 %v10741_v15, %v10743_v26 }
 0x3f0   : > { %17373 = vst [vmem:[#allocation125_spill] sm:$0xff] %v12685_v28  ;;  %17374 = vst [vmem:[#allocation126_spill] sm:$0xff] %v12687_v27  ;;  %v10745_v31 = vpop.eup %10744  ;;  %v2263_v46 = vpop.xlane.xlu0 %2262  ;;  %10754 = vpow2.f32 %v2634_v43 }
 0x3f1   : > { %v12689_v30 = vpop.f32.mrb[75].mxu0  ;;  %v2507_v36 = vsub.f32 %v12365_v47, %v2263_v46  ;;  %v12692_v19 = vpop.f32.mrb[79].mxu1  ;;  %2884 = vadd.xlane.f32.xlu1 %v10745_v31  ;;  %10089 = vmatprep.mubr.bf16.mxu1 %v3136_v13  ;;  %10756 = vpow2.f32 %v2644_v35 }
 0x3f2   : > { %17375 = vst [vmem:[#allocation127_spill] sm:$0xff] %v12689_v30  ;;  %17376 = vst [vmem:[#allocation128_spill] sm:$0xff] %v12692_v19  ;;  %v2257_v5 = vpop.xlane.xlu1 %2256  ;;  %v10747_v2 = vpop.eup %10746 }
 0x3f3   : > { %v2504_v48 = vsub.f32 %v12363_v37, %v2257_v5  ;;  %v2646_v24 = vmul.f32 1.442695, %v2507_v36  ;;  %2886 = vadd.xlane.f32.xlu0 %v10747_v2  ;;  %v12695_v54 = vpop.f32.mrb[76].mxu0  ;;  %v3137_v30 = vpack.c.bf16 %v10747_v2, %v10745_v31  ;;  %v12700_v19 = vpop.eup %10748 }
 0x3f4   : > { %v2259_v34 = vpop.xlane.xlu0 %2258  ;;  %17377 = vst [vmem:[#allocation129_spill] sm:$0xff] %v12695_v54  ;;  %v12698_v46 = vpop.f32.mrb[77].mxu0 }
 0x3f5   : > { %v2640_v27 = vmul.f32 1.442695, %v2504_v48  ;;  %10758 = vpow2.f32 %v2646_v24  ;;  %v2505_v43 = vsub.f32 %v12367_v9, %v2259_v34  ;;  %17378 = vst [vmem:[#allocation130_spill] sm:$0xff] %v12698_v46  ;;  %2880 = vadd.xlane.f32.xlu1 %v10743_v26  ;;  %10090 = vmatmul.mubr.bf16.vlgmr.msra.gmra.mrb[80].mxu1 %v3137_v30  ;;  %v12703_v13 = vpop.f32.mrb[78].mxu0  ;;  %v17381_v24 = vld [vmem:[#allocation9_spill] sm:$0xff] }
 0x3f6   : > { %v2269_v47 = vpop.xlane.xlu1 %2268  ;;  %17379 = vst [vmem:[#allocation131_spill] sm:$0xff] %v12703_v13  ;;  %v12705_v5 = vpop.eup %10750  ;;  %10138 = vmatpush3.bf16.msra.mxu1 %v17248_v41 }
 0x3f7   : > { %v2510_v37 = vsub.f32 %v12371_v49, %v2269_v47  ;;  %v2642_v35 = vmul.f32 1.442695, %v2505_v43  ;;  %v12708_v2 = vpop.f32.mrb[79].mxu0  ;;  %10760 = vpow2.f32 %v2640_v27  ;;  %10139 = vmatprep.subr.bf16.mxu1 %v17381_v24  ;;  %2882 = vadd.xlane.f32.xlu0 %v10741_v15  ;;  %v3139_v26 = vpack.c.bf16 %v12705_v5, %v12700_v19  ;;  %v10753_v36 = vpop.eup %10752  ;;  %v17382_v43 = vld [vmem:[#allocation16_spill] sm:$0xff] }
 0x3f8   : > { %17380 = vst [vmem:[#allocation132_spill] sm:$0xff] %v12708_v2  ;;  %v2271_v31 = vpop.xlane.xlu0 %2270 }
 0x3f9   : > { %v2652_v9 = vmul.f32 1.442695, %v2510_v37  ;;  %10762 = vpow2.f32 %v2642_v35  ;;  %v2511_v49 = vsub.f32 %v12377_v53, %v2271_v31  ;;  %2356 = vmax.xlane.f32.xlu1 %v12581_v62 }
 0x3fa   : > { %v2265_v30 = vpop.xlane.xlu1 %2264  ;;  %v10755_v48 = vpop.eup %10754  ;;  %10140 = vmatpush3.bf16.msra.mxu1 %v17381_v24 }
 0x3fb   : > { %v2508_v41 = vsub.f32 %v12375_v50, %v2265_v30  ;;  %v2654_v34 = vmul.f32 1.442695, %v2511_v49  ;;  %10764 = vpow2.f32 %v2652_v9  ;;  %10141 = vmatprep.subr.bf16.mxu1 %v17382_v43  ;;  %2358 = vmax.xlane.f32.xlu0 %v12590_v1  ;;  %v12719_v47 = vpop.f32.mrb[80].mxu0  ;;  %v3138_v53 = vpack.c.bf16 %v10755_v48, %v10753_v36  ;;  %v12725_v50 = vpop.eup %10756  ;;  %v17387_v30 = vld [vmem:[#allocation12_spill] sm:$0xff] }
 0x3fc   : > { %v2267_v15 = vpop.xlane.xlu0 %2266  ;;  %17383 = vst [vmem:[#allocation9_spill] sm:$0xff] %v12719_v47  ;;  %v12722_v35 = vpop.f32.mrb[81].mxu0 }
 0x3fd   : > { %v2648_v27 = vmul.f32 1.442695, %v2508_v41  ;;  %10766 = vpow2.f32 %v2654_v34  ;;  %v2509_v37 = vsub.f32 %v12379_v55, %v2267_v15  ;;  %17384 = vst [vmem:[#allocation16_spill] sm:$0xff] %v12722_v35  ;;  %2388 = vmax.xlane.f32.xlu1 %v12559_v63  ;;  %10093 = vmatprep.mubr.bf16.mxu1 %v3138_v53  ;;  %v12727_v9 = vpop.f32.mrb[82].mxu0 }
 0x3fe   : > { %17385 = vst [vmem:[#allocation133_spill] sm:$0xff] %v12727_v9  ;;  %10142 = vmatpush3.bf16.msra.mxu1 %v17382_v43  ;;  %v12732_v49 = vpop.f32.mrb[83].mxu0  ;;  %v17388_v43 = vld [vmem:[#allocation32_spill] sm:$0xff] }
 0x3ff   : > { %v12729_v24 = vpop.eup %10758  ;;  %v2650_v31 = vmul.f32 1.442695, %v2509_v37  ;;  %17386 = vst [vmem:[#allocation134_spill] sm:$0xff] %v12732_v49  ;;  %10768 = vpow2.f32 %v2648_v27  ;;  %10094 = vmatmul.mubr.bf16.gmra.mrb[84].mxu1 %v3139_v26  ;;  %10143 = vmatprep.subr.bf16.mxu1 %v17387_v30 }
 0x400   : > { %v3141_v55 = vpack.c.bf16 %v12729_v24, %v12725_v50  ;;  %2390 = vmax.xlane.f32.xlu0 %v12568_v39 }
 0x401   : > { %10770 = vpow2.f32 %v2650_v31  ;;  %2352 = vmax.xlane.f32.xlu1 %v12588_v22  ;;  %v10761_v41 = vpop.eup %10760 }
 0x402   : > { %10144 = vmatpush3.bf16.msra.mxu1 %v17387_v30 }
 0x403   : > { %v12739_v34 = vpop.eup %10762  ;;  %10145 = vmatprep.subr.bf16.mxu1 %v17388_v43  ;;  %v12743_v15 = vpop.f32.mrb[84].mxu0 }
 0x404   : > { %17389 = vst [vmem:[#allocation12_spill] sm:$0xff] %v12743_v15  ;;  %v3140_v26 = vpack.c.bf16 %v12739_v34, %v10761_v41  ;;  %2354 = vmax.xlane.f32.xlu0 %v12597_v45  ;;  %v12747_v27 = vpop.f32.mrb[85].mxu0 }
 0x405   : > { %17390 = vst [vmem:[#allocation32_spill] sm:$0xff] %v12747_v27  ;;  %2384 = vmax.xlane.f32.xlu1 %v12561_v38  ;;  %v12750_v53 = vpop.eup %10764  ;;  %v12752_v37 = vpop.f32.mrb[86].mxu0 }
 0x406   : > { %10097 = vmatprep.mubr.bf16.mxu1 %v3140_v26  ;;  %17391 = vst [vmem:[#allocation135_spill] sm:$0xff] %v12752_v37  ;;  %10146 = vmatpush3.bf16.msra.mxu1 %v17388_v43  ;;  %v12757_v30 = vpop.f32.mrb[87].mxu0 }
 0x407   : > { %v12754_v31 = vpop.eup %10766  ;;  %17392 = vst [vmem:[#allocation136_spill] sm:$0xff] %v12757_v30  ;;  %10098 = vmatmul.mubr.bf16.gmra.mrb[88].mxu1 %v3141_v55  ;;  %10147 = vmatprep.subr.bf16.mxu1 %v12138_v17 }
 0x408   : > { %v3143_v63 = vpack.c.bf16 %v12754_v31, %v12750_v53  ;;  %2386 = vmax.xlane.f32.xlu0 %v12573_v12 }
 0x409   : > { %2892 = vadd.xlane.f32.xlu1 %v12700_v19  ;;  %v12764_v38 = vpop.eup %10768 }
 0x40a   : > { %10148 = vmatpush3.bf16.msra.mxu1 %v12138_v17 }
 0x40b   : > { %v12766_v26 = vpop.eup %10770  ;;  %10149 = vmatprep.subr.bf16.mxu1 %v12062_v60  ;;  %v12770_v43 = vpop.f32.mrb[88].mxu0 }
 0x40c   : > { %17393 = vst [vmem:[#allocation137_spill] sm:$0xff] %v12770_v43  ;;  %v3142_v55 = vpack.c.bf16 %v12766_v26, %v12764_v38  ;;  %2894 = vadd.xlane.f32.xlu0 %v12705_v5  ;;  %v12775_v45 = vpop.f32.mrb[89].mxu0 }
 0x40d   : > { %17394 = vst [vmem:[#allocation138_spill] sm:$0xff] %v12775_v45  ;;  %2888 = vadd.xlane.f32.xlu1 %v10753_v36  ;;  %v12777_v19 = vpop.f32.mrb[90].mxu0  ;;  %v2273_v36 = vpop.xlane.xlu0 %2272 }
 0x40e   : > { %10101 = vmatprep.mubr.bf16.mxu1 %v3142_v55  ;;  %17395 = vst [vmem:[#allocation139_spill] sm:$0xff] %v12777_v19  ;;  %10150 = vmatpush3.bf16.msra.mxu1 %v12062_v60  ;;  %v12780_v12 = vpop.f32.mrb[91].mxu0  ;;  %v2512_v55 = vsub.f32 %v12392_v59, %v2273_v36 }
 0x40f   : > { %17396 = vst [vmem:[#allocation140_spill] sm:$0xff] %v12780_v12  ;;  %10102 = vmatmul.mubr.bf16.gmra.mrb[92].mxu1 %v3143_v63  ;;  %10151 = vmatprep.subr.bf16.mxu1 %v12149_v33 }
 0x410   : > { %2890 = vadd.xlane.f32.xlu0 %v10755_v48 }
 0x411   : > { %2364 = vmax.xlane.f32.xlu1 %v12605_v18  ;;  %v2279_v48 = vpop.xlane.xlu0 %2278 }
 0x412   : > { %10152 = vmatpush3.bf16.msra.mxu1 %v12149_v33  ;;  %v2277_v33 = vpop.xlane.xlu1 %2276 }
 0x413   : > { %10201 = vmatprep.subr.bf16.mxu1 %v12386_v61  ;;  %v12786_v17 = vpop.f32.mrb[92].mxu0 }
 0x414   : > { %17397 = vst [vmem:[#allocation141_spill] sm:$0xff] %v12786_v17  ;;  %2366 = vmax.xlane.f32.xlu0 %v12614_v14  ;;  %v12789_v5 = vpop.f32.mrb[93].mxu0 }
 0x415   : > { %17398 = vst [vmem:[#allocation142_spill] sm:$0xff] %v12789_v5  ;;  %2396 = vmax.xlane.f32.xlu1 %v12583_v7  ;;  %v12792_v60 = vpop.f32.mrb[94].mxu0  ;;  %v2515_v7 = vsub.f32 %v12395_v8, %v2279_v48 }
 0x416   : > { %17399 = vst [vmem:[#allocation143_spill] sm:$0xff] %v12792_v60  ;;  %v12794_v63 = vpop.f32.mrb[95].mxu0 }
 0x417   : > { %17400 = vst [vmem:[#allocation144_spill] sm:$0xff] %v12794_v63  ;;  %v2656_v63 = vmul.f32 1.442695, %v2512_v55 }
 0x418   : > { %2398 = vmax.xlane.f32.xlu0 %v12592_v16 }
 0x419   : > { %2360 = vmax.xlane.f32.xlu1 %v12610_v20  ;;  %10772 = vpow2.f32 %v2656_v63 }
 0x41c   : > { %2362 = vmax.xlane.f32.xlu0 %v12619_v25  ;;  %v2662_v25 = vmul.f32 1.442695, %v2515_v7 }
 0x41d   : > { %2392 = vmax.xlane.f32.xlu1 %v12585_v52 }
 0x41e   : > { %10774 = vpow2.f32 %v2662_v25  ;;  %v17404_v25 = vld [vmem:[#allocation47_spill] sm:$0xff] }
 0x420   : > { %2394 = vmax.xlane.f32.xlu0 %v12594_v40 }
 0x421   : > { %2900 = vadd.xlane.f32.xlu1 %v12725_v50  ;;  %v2309_v18 = vpop.xlane.xlu1 %2308  ;;  %v2514_v50 = vsub.f32 %v12390_v44, %v2277_v33 }
 0x422   : > { %v2530_v52 = vsub.f32 %v12445_v0, %v2309_v18  ;;  %v17402_v0 = vld [vmem:[#allocation8_spill] sm:$0xff] }
 0x423   : > { %v2311_v14 = vpop.xlane.xlu0 %2310  ;;  %v12818_v33 = vpop.eup %10772 }
 0x424   : > { %2902 = vadd.xlane.f32.xlu0 %v12729_v24  ;;  %v2531_v16 = vsub.f32 %v12452_v58, %v2311_v14  ;;  %v17401_v24 = vld [vmem:[#allocation105_spill] sm:$0xff]  ;;  %v2692_v14 = vmul.f32 1.442695, %v2530_v52 }
 0x425   : > { %2896 = vadd.xlane.f32.xlu1 %v10761_v41  ;;  %v2305_v20 = vpop.xlane.xlu1 %2304 }
 0x426   : > { %v2694_v39 = vmul.f32 1.442695, %v2531_v16  ;;  %v2528_v59 = vsub.f32 %v12448_v3, %v2305_v20  ;;  %v2660_v3 = vmul.f32 1.442695, %v2514_v50  ;;  %v17403_v16 = vld [vmem:[#allocation97_spill] sm:$0xff] }
 0x427   : > { %v2307_v36 = vpop.xlane.xlu0 %2306 }
 0x428   : > { %v2688_v8 = vmul.f32 1.442695, %v2528_v59  ;;  %2898 = vadd.xlane.f32.xlu0 %v12739_v34  ;;  %v2529_v48 = vsub.f32 %v12457_v11, %v2307_v36  ;;  %10776 = vpow2.f32 %v2694_v39  ;;  %v17405_v39 = vld [vmem:[#allocation101_spill] sm:$0xff]  ;;  %v17406_v34 = vld [vmem:[#allocation107_spill] sm:$0xff]  ;;  %v12820_v55 = vpop.eup %10774  ;;  %v17407_v59 = vld [vmem:[#allocation18_spill] sm:$0xff] }
 0x429   : > { %2404 = vmax.xlane.f32.xlu1 %v17401_v24  ;;  %v2275_v7 = vpop.xlane.xlu1 %2274  ;;  %v17430_v24 = vld [vmem:[#allocation110_spill] sm:$0xff] }
 0x42a   : > { %v2690_v18 = vmul.f32 1.442695, %v2529_v48  ;;  %v2513_v58 = vsub.f32 %v17402_v0, %v2275_v7  ;;  %10778 = vpow2.f32 %v2688_v8 }
 0x42b   : > { %v2287_v20 = vpop.xlane.xlu0 %2286 }
 0x42c   : > { %10780 = vpow2.f32 %v2690_v18  ;;  %v2658_v44 = vmul.f32 1.442695, %v2513_v58  ;;  %2406 = vmax.xlane.f32.xlu0 %v12637_v6  ;;  %v2519_v36 = vsub.f32 %v17407_v59, %v2287_v20  ;;  %v17409_v18 = vld [vmem:[#allocation99_spill] sm:$0xff]  ;;  %v17411_v59 = vld [vmem:[#allocation56_spill] sm:$0xff] }
 0x42d   : > { %2436 = vmax.xlane.f32.xlu1 %v17403_v16  ;;  %10782 = vpow2.f32 %v2692_v14  ;;  %v2285_v11 = vpop.xlane.xlu1 %2284  ;;  %v17408_v14 = vld [vmem:[#allocation37_spill] sm:$0xff]  ;;  %v17413_v16 = vld [vmem:[#allocation55_spill] sm:$0xff] }
 0x42e   : > { %10784 = vpow2.f32 %v2658_v44  ;;  %v2518_v52 = vsub.f32 %v17404_v25, %v2285_v11  ;;  %v17410_v11 = vld [vmem:[#allocation49_spill] sm:$0xff]  ;;  %v2670_v20 = vmul.f32 1.442695, %v2519_v36  ;;  %v17414_v36 = vld [vmem:[#allocation54_spill] sm:$0xff] }
 0x42f   : > { %v2319_v41 = vpop.xlane.xlu0 %2318  ;;  %10786 = vpow2.f32 %v2660_v3 }
 0x430   : > { %2438 = vmax.xlane.f32.xlu0 %v17405_v39  ;;  %v2668_v48 = vmul.f32 1.442695, %v2518_v52 }
 0x431   : > { %2400 = vmax.xlane.f32.xlu1 %v17406_v34  ;;  %v2317_v63 = vpop.xlane.xlu1 %2316 }
 0x432   : > { %v12823_v8 = vpop.eup %10776  ;;  %v2534_v39 = vsub.f32 %v17411_v59, %v2317_v63  ;;  %10788 = vpow2.f32 %v2668_v48 }
 0x433   : > { %v2283_v50 = vpop.xlane.xlu0 %2282 }
 0x434   : > { %2402 = vmax.xlane.f32.xlu0 %v12646_v51  ;;  %v2517_v7 = vsub.f32 %v17408_v14, %v2283_v50  ;;  %v12828_v0 = vpop.eup %10778 }
 0x435   : > { %2432 = vmax.xlane.f32.xlu1 %v17409_v18  ;;  %v2281_v58 = vpop.xlane.xlu1 %2280  ;;  %v17412_v18 = vld [vmem:[#allocation103_spill] sm:$0xff] }
 0x436   : > { %v12830_v3 = vpop.eup %10780  ;;  %v2666_v44 = vmul.f32 1.442695, %v2517_v7  ;;  %v2516_v25 = vsub.f32 %v17410_v11, %v2281_v58  ;;  %v2535_v58 = vsub.f32 %v17414_v36, %v2319_v41 }
 0x437   : > { %v12833_v34 = vpop.eup %10782  ;;  %v2315_v52 = vpop.xlane.xlu0 %2314  ;;  %v3152_v51 = vpack.c.bf16 %v12830_v3, %v12828_v0 }
 0x438   : > { %v12838_v50 = vpop.eup %10784  ;;  %v2664_v14 = vmul.f32 1.442695, %v2516_v25  ;;  %2434 = vmax.xlane.f32.xlu0 %v17412_v18  ;;  %v2533_v6 = vsub.f32 %v17413_v16, %v2315_v52  ;;  %v3153_v7 = vpack.c.bf16 %v12823_v8, %v12833_v34  ;;  %10790 = vpow2.f32 %v2666_v44  ;;  %v17415_v25 = vld [vmem:[#allocation57_spill] sm:$0xff] }
 0x439   : > { %2908 = vadd.xlane.f32.xlu1 %v12750_v53  ;;  %10153 = vmatprep.mubr.bf16.mxu1 %v3152_v51  ;;  %v2313_v63 = vpop.xlane.xlu1 %2312  ;;  %v3144_v11 = vpack.c.bf16 %v12838_v50, %v12818_v33  ;;  %v12848_v59 = vpop.eup %10786  ;;  %v2700_v16 = vmul.f32 1.442695, %v2534_v39  ;;  %v17416_v44 = vld [vmem:[#allocation33_spill] sm:$0xff]  ;;  %v2702_v52 = vmul.f32 1.442695, %v2535_v58  ;;  %v17417_v39 = vld [vmem:[#allocation60_spill] sm:$0xff] }
 0x43a   : > { %10792 = vpow2.f32 %v2664_v14  ;;  %v2698_v48 = vmul.f32 1.442695, %v2533_v6  ;;  %v2532_v18 = vsub.f32 %v17415_v25, %v2313_v63  ;;  %10154 = vmatmul.mubr.bf16.vlgmr.msra.gmra.mrb[96].mxu1 %v3153_v7  ;;  %v3145_v41 = vpack.c.bf16 %v12820_v55, %v12848_v59  ;;  %v17421_v58 = vld [vmem:[#allocation35_spill] sm:$0xff] }
 0x43b   : > { %10202 = vmatpush3.bf16.msra.mxu1 %v12386_v61  ;;  %v2295_v53 = vpop.xlane.xlu0 %2294  ;;  %10121 = vmatprep.mubr.bf16.mxu0 %v3144_v11  ;;  %10794 = vpow2.f32 %v2670_v20  ;;  %v17418_v61 = vld [vmem:[#allocation17_spill] sm:$0xff] }
 0x43c   : > { %v2696_v51 = vmul.f32 1.442695, %v2532_v18  ;;  %2910 = vadd.xlane.f32.xlu0 %v12754_v31  ;;  %10203 = vmatprep.subr.bf16.mxu1 %v17416_v44  ;;  %10796 = vpow2.f32 %v2698_v48  ;;  %v17419_v18 = vld [vmem:[#allocation19_spill] sm:$0xff]  ;;  %v17420_v31 = vld [vmem:[#allocation36_spill] sm:$0xff]  ;;  %v12864_v7 = vpop.eup %10788  ;;  %v2523_v63 = vsub.f32 %v17421_v58, %v2295_v53  ;;  %v17422_v11 = vld [vmem:[#allocation61_spill] sm:$0xff] }
 0x43d   : > { %2904 = vadd.xlane.f32.xlu1 %v12764_v38  ;;  %10122 = vmatmul.mubr.bf16.vlgmr.msra.gmra.mrb[96].mxu0 %v3145_v41  ;;  %v2293_v6 = vpop.xlane.xlu1 %2292 }
 0x43e   : > { %10798 = vpow2.f32 %v2696_v51  ;;  %10170 = vmatpush3.bf16.msra.mxu0 %v17417_v39  ;;  %v2522_v14 = vsub.f32 %v17419_v18, %v2293_v6  ;;  %v17424_v51 = vld [vmem:[#allocation52_spill] sm:$0xff]  ;;  %v17426_v6 = vld [vmem:[#allocation106_spill] sm:$0xff]  ;;  %v2678_v58 = vmul.f32 1.442695, %v2523_v63 }
 0x43f   : > { %10800 = vpow2.f32 %v2700_v16  ;;  %10171 = vmatprep.subr.bf16.mxu0 %v17418_v61  ;;  %10204 = vmatpush3.bf16.msra.mxu1 %v17416_v44  ;;  %v2327_v20 = vpop.xlane.xlu0 %2326  ;;  %v17423_v16 = vld [vmem:[#allocation13_spill] sm:$0xff] }
 0x440   : > { %2906 = vadd.xlane.f32.xlu0 %v12766_v26  ;;  %10205 = vmatprep.subr.bf16.mxu1 %v17420_v31  ;;  %10802 = vpow2.f32 %v2702_v52  ;;  %v2676_v25 = vmul.f32 1.442695, %v2522_v14  ;;  %v17425_v52 = vld [vmem:[#allocation21_spill] sm:$0xff]  ;;  %v17427_v14 = vld [vmem:[#allocation7_spill] sm:$0xff] }
 0x441   : > { %2412 = vmax.xlane.f32.xlu1 %v12652_v10  ;;  %v2325_v38 = vpop.xlane.xlu1 %2324 }
 0x442   : > { %10172 = vmatpush3.bf16.msra.mxu0 %v17418_v61  ;;  %v12867_v36 = vpop.eup %10790  ;;  %v2538_v41 = vsub.f32 %v17423_v16, %v2325_v38  ;;  %v17428_v16 = vld [vmem:[#allocation43_spill] sm:$0xff]  ;;  %10804 = vpow2.f32 %v2676_v25 }
 0x443   : > { %10173 = vmatprep.subr.bf16.mxu0 %v17422_v11  ;;  %10206 = vmatpush3.bf16.msra.mxu1 %v17420_v31  ;;  %v2291_v48 = vpop.xlane.xlu0 %2290 }
 0x444   : > { %v12872_v26 = vpop.eup %10792  ;;  %2414 = vmax.xlane.f32.xlu0 %v12661_v23  ;;  %v2521_v44 = vsub.f32 %v17424_v51, %v2291_v48  ;;  %10207 = vmatprep.subr.bf16.mxu1 %v17425_v52  ;;  %v2539_v48 = vsub.f32 %v17428_v16, %v2327_v20  ;;  %v17429_v51 = vld [vmem:[#allocation15_spill] sm:$0xff]  ;;  %v17432_v20 = vld [vmem:[#allocation48_spill] sm:$0xff] }
 0x445   : > { %2444 = vmax.xlane.f32.xlu1 %v17426_v6  ;;  %v2289_v39 = vpop.xlane.xlu1 %2288  ;;  %v3146_v53 = vpack.c.bf16 %v12867_v36, %v12872_v26  ;;  %v12881_v61 = vpop.eup %10794 }
 0x446   : > { %v2674_v18 = vmul.f32 1.442695, %v2521_v44  ;;  %10174 = vmatpush3.bf16.msra.mxu0 %v17422_v11  ;;  %v2520_v31 = vsub.f32 %v17427_v14, %v2289_v39  ;;  %v12885_v38 = vpop.eup %10796  ;;  %v3147_v23 = vpack.c.bf16 %v12881_v61, %v12864_v7  ;;  %v2708_v44 = vmul.f32 1.442695, %v2538_v41  ;;  %v17431_v39 = vld [vmem:[#allocation10_spill] sm:$0xff]  ;;  %v17433_v41 = vld [vmem:[#allocation27_spill] sm:$0xff] }
 0x447   : > { %10175 = vmatprep.subr.bf16.mxu0 %v17429_v51  ;;  %10208 = vmatpush3.bf16.msra.mxu1 %v17425_v52  ;;  %v2323_v6 = vpop.xlane.xlu0 %2322 }
 0x448   : > { %v12892_v10 = vpop.eup %10798  ;;  %v2672_v11 = vmul.f32 1.442695, %v2520_v31  ;;  %2446 = vmax.xlane.f32.xlu0 %v17430_v24  ;;  %v2537_v14 = vsub.f32 %v17431_v39, %v2323_v6  ;;  %10125 = vmatprep.mubr.bf16.mxu0 %v3146_v53  ;;  %10806 = vpow2.f32 %v2674_v18  ;;  %v2710_v53 = vmul.f32 1.442695, %v2539_v48  ;;  %v17434_v18 = vld [vmem:[#allocation62_spill] sm:$0xff] }
 0x449   : > { %v12896_v63 = vpop.eup %10800  ;;  %10209 = vmatprep.subr.bf16.mxu1 %v17432_v20  ;;  %2408 = vmax.xlane.f32.xlu1 %v12659_v32  ;;  %v2321_v52 = vpop.xlane.xlu1 %2320  ;;  %v3154_v16 = vpack.c.bf16 %v12885_v38, %v12892_v10 }
 0x44a   : > { %10808 = vpow2.f32 %v2672_v11  ;;  %v2706_v25 = vmul.f32 1.442695, %v2537_v14  ;;  %10126 = vmatmul.mubr.bf16.gmra.mrb[100].mxu0 %v3147_v23  ;;  %v2536_v31 = vsub.f32 %v17433_v41, %v2321_v52  ;;  %v12903_v24 = vpop.eup %10802  ;;  %v17435_v11 = vld [vmem:[#allocation40_spill] sm:$0xff]  ;;  %v17438_v14 = vld [vmem:[#allocation50_spill] sm:$0xff]  ;;  %v17439_v52 = vld [vmem:[#allocation5_spill] sm:$0xff] }
 0x44b   : > { %10810 = vpow2.f32 %v2678_v58  ;;  %10176 = vmatpush3.bf16.msra.mxu0 %v17429_v51  ;;  %10210 = vmatpush3.bf16.msra.mxu1 %v17432_v20  ;;  %v2303_v6 = vpop.xlane.xlu0 %2302  ;;  %v3155_v23 = vpack.c.bf16 %v12903_v24, %v12896_v63  ;;  %v17436_v51 = vld [vmem:[#allocation108_spill] sm:$0xff] }
 0x44c   : > { %10812 = vpow2.f32 %v2708_v44  ;;  %10177 = vmatprep.subr.bf16.mxu0 %v17434_v18  ;;  %v2704_v39 = vmul.f32 1.442695, %v2536_v31  ;;  %2410 = vmax.xlane.f32.xlu0 %v12669_v4  ;;  %v17437_v44 = vld [vmem:[#allocation34_spill] sm:$0xff]  ;;  %v17447_v4 = vld [vmem:[#allocation53_spill] sm:$0xff] }
 0x44d   : > { %10814 = vpow2.f32 %v2706_v25  ;;  %10157 = vmatprep.mubr.bf16.mxu1 %v3154_v16  ;;  %10211 = vmatprep.subr.bf16.mxu1 %v17435_v11  ;;  %v2301_v58 = vpop.xlane.xlu1 %2300  ;;  %v12919_v25 = vpop.eup %10804  ;;  %v17441_v31 = vld [vmem:[#allocation22_spill] sm:$0xff] }
 0x44e   : > { %10816 = vpow2.f32 %v2704_v39  ;;  %2440 = vmax.xlane.f32.xlu1 %v17436_v51  ;;  %10158 = vmatmul.mubr.bf16.gmra.mrb[100].mxu1 %v3155_v23  ;;  %v2526_v20 = vsub.f32 %v17438_v14, %v2301_v58  ;;  %v17444_v58 = vld [vmem:[#allocation58_spill] sm:$0xff] }
 0x44f   : > { %10178 = vmatpush3.bf16.msra.mxu0 %v17434_v18  ;;  %10212 = vmatpush3.bf16.msra.mxu1 %v17435_v11  ;;  %v2335_v48 = vpop.xlane.xlu0 %2334  ;;  %10818 = vpow2.f32 %v2710_v53  ;;  %v2527_v18 = vsub.f32 %v17441_v31, %v2303_v6  ;;  %v17443_v11 = vld [vmem:[#allocation6_spill] sm:$0xff] }
 0x450   : > { %10179 = vmatprep.subr.bf16.mxu0 %v17437_v44  ;;  %2442 = vmax.xlane.f32.xlu0 %v12643_v57  ;;  %v2684_v23 = vmul.f32 1.442695, %v2526_v20  ;;  %v17445_v57 = vld [vmem:[#allocation25_spill] sm:$0xff]  ;;  %v17449_v20 = vld [vmem:[#allocation51_spill] sm:$0xff] }
 0x451   : > { %10213 = vmatprep.subr.bf16.mxu1 %v17439_v52  ;;  %v2333_v16 = vpop.xlane.xlu1 %2332 }
 0x452   : > { %2420 = vmax.xlane.f32.xlu1 %v12674_v56  ;;  %v12922_v41 = vpop.eup %10806  ;;  %v2542_v14 = vsub.f32 %v17444_v58, %v2333_v16  ;;  %v2686_v58 = vmul.f32 1.442695, %v2527_v18  ;;  %10820 = vpow2.f32 %v2684_v23  ;;  %v17454_v18 = vld [vmem:[#allocation45_spill] sm:$0xff] }
 0x453   : > { %17440 = vst [vmem:[#allocation8_spill] sm:$0xff] %v12922_v41  ;;  %10180 = vmatpush3.bf16.msra.mxu0 %v17437_v44  ;;  %10214 = vmatpush3.bf16.msra.mxu1 %v17439_v52  ;;  %v2299_v53 = vpop.xlane.xlu0 %2298 }
 0x454   : > { %v12927_v39 = vpop.eup %10808  ;;  %10181 = vmatprep.subr.bf16.mxu0 %v17443_v11  ;;  %2422 = vmax.xlane.f32.xlu0 %v12685_v28  ;;  %v2525_v56 = vsub.f32 %v17445_v57, %v2299_v53  ;;  %v17451_v28 = vld [vmem:[#allocation59_spill] sm:$0xff] }
 0x455   : > { %17442 = vst [vmem:[#allocation47_spill] sm:$0xff] %v12927_v39  ;;  %v12933_v51 = vpop.eup %10810  ;;  %10215 = vmatprep.subr.bf16.mxu1 %v17447_v4  ;;  %v2297_v6 = vpop.xlane.xlu1 %2296  ;;  %v3148_v44 = vpack.c.bf16 %v12922_v41, %v12927_v39  ;;  %v2543_v57 = vsub.f32 %v17451_v28, %v2335_v48  ;;  %v17455_v28 = vld [vmem:[#allocation14_spill] sm:$0xff] }
 0x456   : > { %17446 = vst [vmem:[#allocation18_spill] sm:$0xff] %v12933_v51  ;;  %v12938_v52 = vpop.eup %10812  ;;  %v2682_v31 = vmul.f32 1.442695, %v2525_v56  ;;  %2452 = vmax.xlane.f32.xlu1 %v12654_v21  ;;  %v2524_v32 = vsub.f32 %v17449_v20, %v2297_v6  ;;  %v3149_v41 = vpack.c.bf16 %v12933_v51, %v12919_v25  ;;  %v2716_v56 = vmul.f32 1.442695, %v2542_v14  ;;  %v17453_v21 = vld [vmem:[#allocation30_spill] sm:$0xff] }
 0x457   : > { %17448 = vst [vmem:[#allocation37_spill] sm:$0xff] %v12938_v52  ;;  %v12942_v16 = vpop.eup %10814  ;;  %10182 = vmatpush3.bf16.msra.mxu0 %v17443_v11  ;;  %10216 = vmatpush3.bf16.msra.mxu1 %v17447_v4  ;;  %v2331_v53 = vpop.xlane.xlu0 %2330 }
 0x458   : > { %17450 = vst [vmem:[#allocation49_spill] sm:$0xff] %v12942_v16  ;;  %v12949_v39 = vpop.eup %10816  ;;  %10183 = vmatprep.subr.bf16.mxu0 %v17453_v21  ;;  %v2680_v6 = vmul.f32 1.442695, %v2524_v32  ;;  %2454 = vmax.xlane.f32.xlu0 %v12663_v42  ;;  %v2541_v20 = vsub.f32 %v17454_v18, %v2331_v53  ;;  %10822 = vpow2.f32 %v2682_v31  ;;  %v17457_v32 = vld [vmem:[#allocation11_spill] sm:$0xff]  ;;  %v2718_v42 = vmul.f32 1.442695, %v2543_v57 }
 0x459   : > { %17452 = vst [vmem:[#allocation56_spill] sm:$0xff] %v12949_v39  ;;  %10129 = vmatprep.mubr.bf16.mxu0 %v3148_v44  ;;  %10265 = vmatprep.subr.bf16.mxu1 %v17455_v28  ;;  %v2329_v4 = vpop.xlane.xlu1 %2328  ;;  %v3156_v48 = vpack.c.bf16 %v12942_v16, %v12949_v39  ;;  %v12957_v11 = vpop.eup %10818  ;;  %v17458_v53 = vld [vmem:[#allocation38_spill] sm:$0xff] }
 0x45a   : > { %17456 = vst [vmem:[#allocation55_spill] sm:$0xff] %v12957_v11  ;;  %10824 = vpow2.f32 %v2680_v6  ;;  %v2714_v23 = vmul.f32 1.442695, %v2541_v20  ;;  %2416 = vmax.xlane.f32.xlu1 %v12681_v29  ;;  %10130 = vmatmul.mubr.bf16.gmra.mrb[104].mxu0 %v3149_v41  ;;  %v2540_v14 = vsub.f32 %v17457_v32, %v2329_v4  ;;  %v3157_v31 = vpack.c.bf16 %v12957_v11, %v12938_v52  ;;  %v17459_v6 = vld [vmem:[#allocation127_spill] sm:$0xff] }
 0x45b   : > { %10826 = vpow2.f32 %v2686_v58  ;;  %10184 = vmatpush3.bf16.msra.mxu0 %v17453_v21  ;;  %v2343_v44 = vpop.xlane.xlu0 %2342  ;;  %10161 = vmatprep.mubr.bf16.mxu1 %v3156_v48  ;;  %v17460_v20 = vld [vmem:[#allocation115_spill] sm:$0xff]  ;;  %v17461_v21 = vld [vmem:[#allocation70_spill] sm:$0xff] }
 0x45c   : > { %10828 = vpow2.f32 %v2716_v56  ;;  %10233 = vmatprep.subr.bf16.mxu0 %v17458_v53  ;;  %v2712_v18 = vmul.f32 1.442695, %v2540_v14  ;;  %2418 = vmax.xlane.f32.xlu0 %v17459_v6  ;;  %v17462_v4 = vld [vmem:[#allocation119_spill] sm:$0xff]  ;;  %v12969_v32 = vpop.eup %10820  ;;  %v17464_v14 = vld [vmem:[#allocation74_spill] sm:$0xff] }
 0x45d   : > { %10830 = vpow2.f32 %v2714_v23  ;;  %10162 = vmatmul.mubr.bf16.gmra.mrb[104].mxu1 %v3157_v31  ;;  %v2341_v41 = vpop.xlane.xlu1 %2340  ;;  %v2547_v23 = vsub.f32 %v17464_v14, %v2343_v44  ;;  %v17469_v44 = vld [vmem:[#allocation122_spill] sm:$0xff]  ;;  %v17470_v14 = vld [vmem:[#allocation73_spill] sm:$0xff] }
 0x45e   : > { %10832 = vpow2.f32 %v2712_v18  ;;  %2448 = vmax.xlane.f32.xlu1 %v17460_v20  ;;  %v2546_v57 = vsub.f32 %v17461_v21, %v2341_v41  ;;  %v17466_v20 = vld [vmem:[#allocation63_spill] sm:$0xff]  ;;  %v17467_v41 = vld [vmem:[#allocation76_spill] sm:$0xff] }
 0x45f   : > { %10834 = vpow2.f32 %v2718_v42  ;;  %v2375_v58 = vpop.xlane.xlu0 %2374 }
 0x460   : > { %2450 = vmax.xlane.f32.xlu0 %v17462_v4  ;;  %v2724_v18 = vmul.f32 1.442695, %v2546_v57 }
 0x461   : > { %v2373_v48 = vpop.xlane.xlu1 %2372 }
 0x462   : > { %2428 = vmax.xlane.f32.xlu1 %v12695_v54  ;;  %v12972_v56 = vpop.eup %10822  ;;  %v2562_v42 = vsub.f32 %v17466_v20, %v2373_v48  ;;  %v2726_v48 = vmul.f32 1.442695, %v2547_v23  ;;  %10836 = vpow2.f32 %v2724_v18 }
 0x463   : > { %17463 = vst [vmem:[#allocation54_spill] sm:$0xff] %v12972_v56  ;;  %v2339_v31 = vpop.xlane.xlu0 %2338 }
 0x464   : > { %v12975_v6 = vpop.eup %10824  ;;  %2430 = vmax.xlane.f32.xlu0 %v12703_v13  ;;  %v2545_v21 = vsub.f32 %v17467_v41, %v2339_v31  ;;  %v17472_v31 = vld [vmem:[#allocation66_spill] sm:$0xff] }
 0x465   : > { %17465 = vst [vmem:[#allocation57_spill] sm:$0xff] %v12975_v6  ;;  %v12980_v4 = vpop.eup %10826  ;;  %v2337_v29 = vpop.xlane.xlu1 %2336  ;;  %v3150_v54 = vpack.c.bf16 %v12972_v56, %v12975_v6  ;;  %v2563_v41 = vsub.f32 %v17472_v31, %v2375_v58  ;;  %v2756_v56 = vmul.f32 1.442695, %v2562_v42 }
 0x466   : > { %v12984_v16 = vpop.eup %10828  ;;  %v2722_v39 = vmul.f32 1.442695, %v2545_v21  ;;  %2460 = vmax.xlane.f32.xlu1 %v17469_v44  ;;  %v2544_v11 = vsub.f32 %v17470_v14, %v2337_v29  ;;  %v3151_v20 = vpack.c.bf16 %v12980_v4, %v12969_v32  ;;  %v17474_v21 = vld [vmem:[#allocation126_spill] sm:$0xff]  ;;  %v17475_v44 = vld [vmem:[#allocation67_spill] sm:$0xff] }
 0x467   : > { %17468 = vst [vmem:[#allocation33_spill] sm:$0xff] %v12984_v16  ;;  %v12990_v57 = vpop.eup %10830  ;;  %v2371_v13 = vpop.xlane.xlu0 %2370  ;;  %10133 = vmatprep.mubr.bf16.mxu0 %v3150_v54  ;;  %v17477_v54 = vld [vmem:[#allocation65_spill] sm:$0xff]  ;;  %v2758_v42 = vmul.f32 1.442695, %v2563_v41 }
 0x468   : > { %17471 = vst [vmem:[#allocation60_spill] sm:$0xff] %v12990_v57  ;;  %v12993_v52 = vpop.eup %10832  ;;  %v2720_v6 = vmul.f32 1.442695, %v2544_v11  ;;  %2462 = vmax.xlane.f32.xlu0 %v17474_v21  ;;  %v2561_v51 = vsub.f32 %v17475_v44, %v2371_v13  ;;  %10134 = vmatmul.mubr.bf16.gmra.mrb[108].mxu0 %v3151_v20  ;;  %10838 = vpow2.f32 %v2722_v39  ;;  %v17479_v20 = vld [vmem:[#allocation80_spill] sm:$0xff] }
 0x469   : > { %17473 = vst [vmem:[#allocation17_spill] sm:$0xff] %v12993_v52  ;;  %v12997_v29 = vpop.eup %10834  ;;  %v2369_v14 = vpop.xlane.xlu1 %2368  ;;  %v3158_v23 = vpack.c.bf16 %v12990_v57, %v12993_v52 }
 0x46a   : > { %17476 = vst [vmem:[#allocation19_spill] sm:$0xff] %v12997_v29  ;;  %10840 = vpow2.f32 %v2720_v6  ;;  %v2754_v58 = vmul.f32 1.442695, %v2561_v51  ;;  %2424 = vmax.xlane.f32.xlu1 %v12698_v46  ;;  %v2560_v18 = vsub.f32 %v17477_v54, %v2369_v14  ;;  %v3159_v11 = vpack.c.bf16 %v12997_v29, %v12984_v16  ;;  %v17478_v51 = vld [vmem:[#allocation124_spill] sm:$0xff] }
 0x46b   : > { %10842 = vpow2.f32 %v2726_v48  ;;  %v2351_v13 = vpop.xlane.xlu0 %2350  ;;  %10165 = vmatprep.mubr.bf16.mxu1 %v3158_v23  ;;  %v17480_v14 = vld [vmem:[#allocation128_spill] sm:$0xff] }
 0x46c   : > { %10844 = vpow2.f32 %v2756_v56  ;;  %v2752_v44 = vmul.f32 1.442695, %v2560_v18  ;;  %2426 = vmax.xlane.f32.xlu0 %v12708_v2  ;;  %10166 = vmatmul.mubr.bf16.gmra.mrb[108].mxu1 %v3159_v11  ;;  %v13009_v41 = vpop.eup %10836  ;;  %v17481_v23 = vld [vmem:[#allocation84_spill] sm:$0xff] }
 0x46d   : > { %10846 = vpow2.f32 %v2754_v58  ;;  %v2349_v39 = vpop.xlane.xlu1 %2348  ;;  %v2551_v54 = vsub.f32 %v17481_v23, %v2351_v13  ;;  %v17484_v13 = vld [vmem:[#allocation83_spill] sm:$0xff] }
 0x46e   : > { %10848 = vpow2.f32 %v2752_v44  ;;  %2456 = vmax.xlane.f32.xlu1 %v17478_v51  ;;  %v2550_v31 = vsub.f32 %v17479_v20, %v2349_v39  ;;  %v17482_v44 = vld [vmem:[#allocation71_spill] sm:$0xff]  ;;  %v17483_v39 = vld [vmem:[#allocation86_spill] sm:$0xff] }
 0x46f   : > { %10850 = vpow2.f32 %v2758_v42  ;;  %v2383_v6 = vpop.xlane.xlu0 %2382 }
 0x470   : > { %2458 = vmax.xlane.f32.xlu0 %v17480_v14  ;;  %v2732_v11 = vmul.f32 1.442695, %v2550_v31 }
 0x471   : > { %v2381_v48 = vpop.xlane.xlu1 %2380 }
 0x472   : > { %2468 = vmax.xlane.f32.xlu1 %v12719_v47  ;;  %v13012_v56 = vpop.eup %10838  ;;  %v2566_v42 = vsub.f32 %v17482_v44, %v2381_v48  ;;  %v2734_v44 = vmul.f32 1.442695, %v2551_v54  ;;  %10852 = vpow2.f32 %v2732_v11  ;;  %v17487_v11 = vld [vmem:[#allocation41_spill] sm:$0xff] }
 0x473   : > { %v2347_v58 = vpop.xlane.xlu0 %2346 }
 0x474   : > { %v13015_v18 = vpop.eup %10840  ;;  %2470 = vmax.xlane.f32.xlu0 %v12727_v9  ;;  %v2549_v20 = vsub.f32 %v17483_v39, %v2347_v58  ;;  %v17485_v58 = vld [vmem:[#allocation75_spill] sm:$0xff]  ;;  %v2764_v51 = vmul.f32 1.442695, %v2566_v42  ;;  %v17488_v42 = vld [vmem:[#allocation72_spill] sm:$0xff] }
 0x475   : > { %v13020_v29 = vpop.eup %10842  ;;  %v2345_v16 = vpop.xlane.xlu1 %2344  ;;  %v3160_v57 = vpack.c.bf16 %v13012_v56, %v13015_v18  ;;  %v2567_v39 = vsub.f32 %v17485_v58, %v2383_v6 }
 0x476   : > { %v13024_v52 = vpop.eup %10844  ;;  %v2730_v47 = vmul.f32 1.442695, %v2549_v20  ;;  %2464 = vmax.xlane.f32.xlu1 %v12722_v35  ;;  %v2548_v23 = vsub.f32 %v17484_v13, %v2345_v16  ;;  %v3161_v31 = vpack.c.bf16 %v13020_v29, %v13009_v41  ;;  %v17486_v20 = vld [vmem:[#allocation77_spill] sm:$0xff] }
 0x477   : > { %v13030_v48 = vpop.eup %10846  ;;  %v2379_v9 = vpop.xlane.xlu0 %2378  ;;  %10185 = vmatprep.mubr.bf16.mxu0 %v3160_v57 }
 0x478   : > { %v13033_v14 = vpop.eup %10848  ;;  %v2728_v2 = vmul.f32 1.442695, %v2548_v23  ;;  %2466 = vmax.xlane.f32.xlu0 %v12732_v49  ;;  %v2565_v35 = vsub.f32 %v17486_v20, %v2379_v9  ;;  %10186 = vmatmul.mubr.bf16.vlgmr.msra.gmra.mrb[112].mxu0 %v3161_v31  ;;  %10854 = vpow2.f32 %v2730_v47  ;;  %v2766_v23 = vmul.f32 1.442695, %v2567_v39  ;;  %v17492_v39 = vld [vmem:[#allocation26_spill] sm:$0xff] }
 0x479   : > { %v13037_v16 = vpop.eup %10850  ;;  %10234 = vmatpush3.bf16.msra.mxu0 %v17458_v53  ;;  %v2377_v54 = vpop.xlane.xlu1 %2376  ;;  %v3168_v6 = vpack.c.bf16 %v13030_v48, %v13033_v14  ;;  %v17490_v53 = vld [vmem:[#allocation46_spill] sm:$0xff] }
 0x47a   : > { %10856 = vpow2.f32 %v2728_v2  ;;  %v2762_v57 = vmul.f32 1.442695, %v2565_v35  ;;  %2476 = vmax.xlane.f32.xlu1 %v12743_v15  ;;  %10235 = vmatprep.subr.bf16.mxu0 %v17487_v11  ;;  %v2564_v13 = vsub.f32 %v17488_v42, %v2377_v54  ;;  %v3169_v9 = vpack.c.bf16 %v13037_v16, %v13024_v52  ;;  %v17489_v35 = vld [vmem:[#allocation20_spill] sm:$0xff]  ;;  %v17514_v15 = vld [vmem:[#allocation102_spill] sm:$0xff] }
 0x47b   : > { %10858 = vpow2.f32 %v2734_v44  ;;  %10217 = vmatprep.mubr.bf16.mxu1 %v3168_v6  ;;  %v17491_v44 = vld [vmem:[#allocation44_spill] sm:$0xff] }
 0x47c   : > { %10860 = vpow2.f32 %v2764_v51  ;;  %v2760_v47 = vmul.f32 1.442695, %v2564_v13  ;;  %2478 = vmax.xlane.f32.xlu0 %v12752_v37  ;;  %10218 = vmatmul.mubr.bf16.vlgmr.msra.gmra.mrb[112].mxu1 %v3169_v9  ;;  %v17493_v13 = vld [vmem:[#allocation23_spill] sm:$0xff] }
 0x47d   : > { %10862 = vpow2.f32 %v2762_v57  ;;  %10236 = vmatpush3.bf16.msra.mxu0 %v17487_v11  ;;  %10266 = vmatpush3.bf16.msra.mxu1 %v17455_v28  ;;  %v13062_v28 = vpop.eup %10852 }
 0x47e   : > { %v13050_v2 = vpop.xlane.xlu1 %2884  ;;  %10864 = vpow2.f32 %v2760_v47  ;;  %2472 = vmax.xlane.f32.xlu1 %v12747_v27  ;;  %10237 = vmatprep.subr.bf16.mxu0 %v17489_v35  ;;  %v17494_v47 = vld [vmem:[#allocation28_spill] sm:$0xff] }
 0x47f   : > { %10866 = vpow2.f32 %v2766_v23  ;;  %10267 = vmatprep.subr.bf16.mxu1 %v17490_v53 }
 0x480   : > { %2474 = vmax.xlane.f32.xlu0 %v12757_v30  ;;  %v13056_v51 = vpop.xlane.xlu0 %2886 }
 0x481   : > { %10238 = vmatpush3.bf16.msra.mxu0 %v17489_v35  ;;  %10268 = vmatpush3.bf16.msra.mxu1 %v17490_v53 }
 0x482   : > { %v13060_v31 = vpop.xlane.xlu1 %2880  ;;  %2484 = vmax.xlane.f32.xlu1 %v12770_v43  ;;  %10239 = vmatprep.subr.bf16.mxu0 %v17491_v44  ;;  %v13066_v58 = vpop.eup %10854 }
 0x483   : > { %10269 = vmatprep.subr.bf16.mxu1 %v17492_v39 }
 0x484   : > { %v13069_v20 = vpop.eup %10856  ;;  %2486 = vmax.xlane.f32.xlu0 %v12777_v19  ;;  %v13072_v54 = vpop.xlane.xlu0 %2882  ;;  %v17495_v19 = vld [vmem:[#allocation42_spill] sm:$0xff] }
 0x485   : > { %v13074_v6 = vpop.eup %10858  ;;  %10240 = vmatpush3.bf16.msra.mxu0 %v17491_v44  ;;  %10270 = vmatpush3.bf16.msra.mxu1 %v17492_v39  ;;  %v3162_v11 = vpack.c.bf16 %v13066_v58, %v13069_v20 }
 0x486   : > { %v2357_v57 = vpop.xlane.xlu1 %2356  ;;  %v13080_v42 = vpop.eup %10860  ;;  %2480 = vmax.xlane.f32.xlu1 %v12775_v45  ;;  %10241 = vmatprep.subr.bf16.mxu0 %v17493_v13  ;;  %v3163_v9 = vpack.c.bf16 %v13074_v6, %v13062_v28 }
 0x487   : > { %v13086_v23 = vpop.eup %10862  ;;  %10271 = vmatprep.subr.bf16.mxu1 %v17494_v47  ;;  %10189 = vmatprep.mubr.bf16.mxu0 %v3162_v11  ;;  %v2554_v30 = vsub.f32 %v12581_v62, %v2357_v57  ;;  %v17503_v62 = vld [vmem:[#allocation82_spill] sm:$0xff] }
 0x488   : > { %v13089_v35 = vpop.eup %10864  ;;  %2482 = vmax.xlane.f32.xlu0 %v12780_v12  ;;  %v2359_v53 = vpop.xlane.xlu0 %2358  ;;  %10190 = vmatmul.mubr.bf16.gmra.mrb[116].mxu0 %v3163_v9  ;;  %v17496_v12 = vld [vmem:[#allocation31_spill] sm:$0xff] }
 0x489   : > { %v13092_v44 = vpop.eup %10866  ;;  %10242 = vmatpush3.bf16.msra.mxu0 %v17493_v13  ;;  %10272 = vmatpush3.bf16.msra.mxu1 %v17494_v47  ;;  %v3170_v45 = vpack.c.bf16 %v13086_v23, %v13089_v35  ;;  %v2555_v9 = vsub.f32 %v12590_v1, %v2359_v53  ;;  %v17499_v53 = vld [vmem:[#allocation85_spill] sm:$0xff] }
 0x48a   : > { %v2389_v39 = vpop.xlane.xlu1 %2388  ;;  %2492 = vmax.xlane.f32.xlu1 %v12786_v17  ;;  %10243 = vmatprep.subr.bf16.mxu0 %v17495_v19  ;;  %v3171_v11 = vpack.c.bf16 %v13092_v44, %v13080_v42  ;;  %v17497_v17 = vld [vmem:[#allocation39_spill] sm:$0xff] }
 0x48b   : > { %10273 = vmatprep.subr.bf16.mxu1 %v17496_v12  ;;  %10221 = vmatprep.mubr.bf16.mxu1 %v3170_v45  ;;  %v17498_v45 = vld [vmem:[#allocation64_spill] sm:$0xff]  ;;  %v2742_v1 = vmul.f32 1.442695, %v2555_v9  ;;  %v2740_v9 = vmul.f32 1.442695, %v2554_v30  ;;  %v17506_v30 = vld [vmem:[#allocation87_spill] sm:$0xff] }
 0x48c   : > { %2494 = vmax.xlane.f32.xlu0 %v12792_v60  ;;  %10222 = vmatmul.mubr.bf16.gmra.mrb[116].mxu1 %v3171_v11  ;;  %v17500_v11 = vld [vmem:[#allocation144_spill] sm:$0xff] }
 0x48d   : > { %v2391_v13 = vpop.xlane.xlu0 %2390  ;;  %10244 = vmatpush3.bf16.msra.mxu0 %v17495_v19  ;;  %10274 = vmatpush3.bf16.msra.mxu1 %v17496_v12  ;;  %10868 = vpow2.f32 %v2742_v1 }
 0x48e   : > { %v2353_v47 = vpop.xlane.xlu1 %2352  ;;  %2488 = vmax.xlane.f32.xlu1 %v12789_v5  ;;  %10245 = vmatprep.subr.bf16.mxu0 %v17497_v17  ;;  %v2571_v60 = vsub.f32 %v17499_v53, %v2391_v13  ;;  %v17501_v5 = vld [vmem:[#allocation93_spill] sm:$0xff] }
 0x48f   : > { %v2552_v43 = vsub.f32 %v12588_v22, %v2353_v47  ;;  %10275 = vmatprep.subr.bf16.mxu1 %v17498_v45  ;;  %v17502_v22 = vld [vmem:[#allocation24_spill] sm:$0xff]  ;;  %v17504_v47 = vld [vmem:[#allocation81_spill] sm:$0xff] }
 0x490   : > { %2490 = vmax.xlane.f32.xlu0 %v17500_v11  ;;  %v2570_v13 = vsub.f32 %v17504_v47, %v2389_v39  ;;  %v17505_v53 = vld [vmem:[#allocation29_spill] sm:$0xff] }
 0x491   : > { %v2736_v27 = vmul.f32 1.442695, %v2552_v43  ;;  %v2355_v19 = vpop.xlane.xlu0 %2354  ;;  %10246 = vmatpush3.bf16.msra.mxu0 %v17497_v17  ;;  %10276 = vmatpush3.bf16.msra.mxu1 %v17498_v45  ;;  %v2774_v43 = vmul.f32 1.442695, %v2571_v60  ;;  %v17507_v39 = vld [vmem:[#allocation69_spill] sm:$0xff]  ;;  %v17508_v60 = vld [vmem:[#allocation68_spill] sm:$0xff] }
 0x492   : > { %v2385_v12 = vpop.xlane.xlu1 %2384  ;;  %v2553_v37 = vsub.f32 %v17501_v5, %v2355_v19  ;;  %2916 = vadd.xlane.f32.xlu1 %v12848_v59  ;;  %10247 = vmatprep.subr.bf16.mxu0 %v17502_v22 }
 0x493   : > { %v2568_v57 = vsub.f32 %v17503_v62, %v2385_v12  ;;  %10277 = vmatprep.subr.bf16.mxu1 %v17505_v53  ;;  %10870 = vpow2.f32 %v2736_v27 }
 0x494   : > { %v2738_v11 = vmul.f32 1.442695, %v2553_v37  ;;  %2918 = vadd.xlane.f32.xlu0 %v12820_v55  ;;  %v2772_v37 = vmul.f32 1.442695, %v2570_v13 }
 0x495   : > { %v2768_v17 = vmul.f32 1.442695, %v2568_v57  ;;  %v2387_v45 = vpop.xlane.xlu0 %2386  ;;  %10248 = vmatpush3.bf16.msra.mxu0 %v17502_v22  ;;  %10278 = vmatpush3.bf16.msra.mxu1 %v17505_v53 }
 0x496   : > { %v13125_v5 = vpop.xlane.xlu1 %2892  ;;  %10872 = vpow2.f32 %v2738_v11  ;;  %v2569_v59 = vsub.f32 %v17506_v30, %v2387_v45  ;;  %2948 = vadd.xlane.f32.xlu1 %v12833_v34  ;;  %10279 = vmatprep.subr.bf16.mxu1 %v17507_v39  ;;  %v17511_v45 = vld [vmem:[#allocation98_spill] sm:$0xff] }
 0x497   : > { %10874 = vpow2.f32 %v2740_v9  ;;  %10297 = vmatprep.subr.bf16.mxu0 %v17508_v60  ;;  %v13141_v19 = vpop.eup %10868 }
 0x498   : > { %10876 = vpow2.f32 %v2774_v43  ;;  %v2770_v27 = vmul.f32 1.442695, %v2569_v59  ;;  %2950 = vadd.xlane.f32.xlu0 %v12823_v8 }
 0x499   : > { %10878 = vpow2.f32 %v2768_v17  ;;  %v13132_v55 = vpop.xlane.xlu0 %2894  ;;  %10280 = vmatpush3.bf16.msra.mxu1 %v17507_v39  ;;  %v17512_v39 = vld [vmem:[#allocation96_spill] sm:$0xff] }
 0x49a   : > { %v13135_v1 = vpop.xlane.xlu1 %2888  ;;  %10880 = vpow2.f32 %v2770_v27  ;;  %2912 = vadd.xlane.f32.xlu1 %v12818_v33 }
 0x49b   : > { %10882 = vpow2.f32 %v2772_v37 }
 0x49c   : > { %2914 = vadd.xlane.f32.xlu0 %v12838_v50 }
 0x49d   : > { %v13139_v34 = vpop.xlane.xlu0 %2890  ;;  %v13144_v8 = vpop.eup %10870 }
 0x49e   : > { %v2365_v11 = vpop.xlane.xlu1 %2364  ;;  %2944 = vadd.xlane.f32.xlu1 %v12828_v0 }
 0x49f   : > { %v2558_v37 = vsub.f32 %v17512_v39, %v2365_v11 }
 0x4a0   : > { %v13146_v12 = vpop.eup %10872  ;;  %2946 = vadd.xlane.f32.xlu0 %v12830_v3  ;;  %v17510_v3 = vld [vmem:[#allocation100_spill] sm:$0xff] }
 0x4a1   : > { %v13149_v22 = vpop.eup %10874  ;;  %v2367_v62 = vpop.xlane.xlu0 %2366  ;;  %v3164_v33 = vpack.c.bf16 %v13146_v12, %v13144_v8 }
 0x4a2   : > { %v2397_v50 = vpop.xlane.xlu1 %2396  ;;  %v13153_v57 = vpop.eup %10876  ;;  %2924 = vadd.xlane.f32.xlu1 %v12864_v7  ;;  %v3165_v0 = vpack.c.bf16 %v13141_v19, %v13149_v22  ;;  %v2559_v13 = vsub.f32 %v17510_v3, %v2367_v62 }
 0x4a3   : > { %v13158_v9 = vpop.eup %10878  ;;  %10193 = vmatprep.mubr.bf16.mxu0 %v3164_v33 }
 0x4a4   : > { %v13160_v47 = vpop.eup %10880  ;;  %2926 = vadd.xlane.f32.xlu0 %v12881_v61  ;;  %10194 = vmatmul.mubr.bf16.gmra.mrb[120].mxu0 %v3165_v0  ;;  %v2750_v27 = vmul.f32 1.442695, %v2559_v13  ;;  %v17513_v61 = vld [vmem:[#allocation92_spill] sm:$0xff] }
 0x4a5   : > { %17509 = vst [vmem:[#allocation36_spill] sm:$0xff] %v13160_v47  ;;  %v13164_v53 = vpop.eup %10882  ;;  %v2399_v43 = vpop.xlane.xlu0 %2398  ;;  %v3172_v17 = vpack.c.bf16 %v13160_v47, %v13158_v9  ;;  %v17516_v47 = vld [vmem:[#allocation90_spill] sm:$0xff] }
 0x4a6   : > { %v2361_v7 = vpop.xlane.xlu1 %2360  ;;  %2956 = vadd.xlane.f32.xlu1 %v12896_v63  ;;  %v3173_v59 = vpack.c.bf16 %v13153_v57, %v13164_v53  ;;  %v2575_v62 = vsub.f32 %v17513_v61, %v2399_v43  ;;  %v17515_v63 = vld [vmem:[#allocation91_spill] sm:$0xff]  ;;  %v2574_v46 = vsub.f32 %v17516_v47, %v2397_v50  ;;  %10884 = vpow2.f32 %v2750_v27  ;;  %v17517_v50 = vld [vmem:[#allocation18_spill] sm:$0xff] }
 0x4a7   : > { %v2556_v30 = vsub.f32 %v17511_v45, %v2361_v7  ;;  %10225 = vmatprep.mubr.bf16.mxu1 %v3172_v17  ;;  %v2748_v45 = vmul.f32 1.442695, %v2558_v37  ;;  %v17520_v27 = vld [vmem:[#allocation55_spill] sm:$0xff] }
 0x4a8   : > { %2958 = vadd.xlane.f32.xlu0 %v12903_v24  ;;  %10226 = vmatmul.mubr.bf16.gmra.mrb[120].mxu1 %v3173_v59  ;;  %v2782_v11 = vmul.f32 1.442695, %v2575_v62  ;;  %v17519_v59 = vld [vmem:[#allocation105_spill] sm:$0xff] }
 0x4a9   : > { %v2744_v33 = vmul.f32 1.442695, %v2556_v30  ;;  %v2363_v0 = vpop.xlane.xlu0 %2362 }
 0x4aa   : > { %v2393_v3 = vpop.xlane.xlu1 %2392  ;;  %v2557_v49 = vsub.f32 %v17514_v15, %v2363_v0  ;;  %2920 = vadd.xlane.f32.xlu1 %v12872_v26  ;;  %v2780_v26 = vmul.f32 1.442695, %v2574_v46  ;;  %v17518_v46 = vld [vmem:[#allocation37_spill] sm:$0xff] }
 0x4ab   : > { %v2572_v7 = vsub.f32 %v17515_v63, %v2393_v3  ;;  %10886 = vpow2.f32 %v2744_v33  ;;  %v17522_v63 = vld [vmem:[#allocation109_spill] sm:$0xff] }
 0x4ac   : > { %v2746_v13 = vmul.f32 1.442695, %v2557_v49  ;;  %2922 = vadd.xlane.f32.xlu0 %v12867_v36 }
 0x4ad   : > { %v2776_v24 = vmul.f32 1.442695, %v2572_v7  ;;  %v2395_v43 = vpop.xlane.xlu0 %2394 }
 0x4ae   : > { %v13180_v17 = vpop.xlane.xlu1 %2900  ;;  %10888 = vpow2.f32 %v2746_v13  ;;  %v2573_v15 = vsub.f32 %v12594_v40, %v2395_v43  ;;  %2952 = vadd.xlane.f32.xlu1 %v12892_v10 }
 0x4af   : > { %10890 = vpow2.f32 %v2748_v45  ;;  %v17523_v45 = vld [vmem:[#allocation47_spill] sm:$0xff] }
 0x4b0   : > { %10892 = vpow2.f32 %v2782_v11  ;;  %v2778_v30 = vmul.f32 1.442695, %v2573_v15  ;;  %2954 = vadd.xlane.f32.xlu0 %v12885_v38  ;;  %v13193_v47 = vpop.eup %10884  ;;  %v17524_v11 = vld [vmem:[#allocation97_spill] sm:$0xff] }
 0x4b1   : > { %10894 = vpow2.f32 %v2776_v24  ;;  %v13185_v49 = vpop.xlane.xlu0 %2902 }
 0x4b2   : > { %v13187_v36 = vpop.xlane.xlu1 %2896  ;;  %10896 = vpow2.f32 %v2778_v30  ;;  %2932 = vadd.xlane.f32.xlu1 %v12919_v25  ;;  %v17525_v30 = vld [vmem:[#allocation8_spill] sm:$0xff] }
 0x4b3   : > { %10898 = vpow2.f32 %v2780_v26 }
 0x4b4   : > { %2934 = vadd.xlane.f32.xlu0 %v17517_v50  ;;  %10900 = vrcp.f32 %v13050_v2  ;;  %v17527_v2 = vld [vmem:[#allocation101_spill] sm:$0xff] }
 0x4b5   : > { %v13191_v40 = vpop.xlane.xlu0 %2898  ;;  %v13197_v39 = vpop.eup %10886  ;;  %10902 = vrcp.f32 %v13056_v51 }
 0x4b6   : > { %v2405_v10 = vpop.xlane.xlu1 %2404  ;;  %2964 = vadd.xlane.f32.xlu1 %v17518_v46 }
 0x4b7   : > { %v2578_v38 = vsub.f32 %v17519_v59, %v2405_v10 }
 0x4b8   : > { %v13199_v37 = vpop.eup %10888  ;;  %2966 = vadd.xlane.f32.xlu0 %v17520_v27 }
 0x4b9   : > { %v13202_v61 = vpop.eup %10890  ;;  %v2788_v25 = vmul.f32 1.442695, %v2578_v38  ;;  %v2407_v62 = vpop.xlane.xlu0 %2406  ;;  %v3166_v33 = vpack.c.bf16 %v13199_v37, %v13197_v39 }
 0x4ba   : > { %v2437_v0 = vpop.xlane.xlu1 %2436  ;;  %v13206_v3 = vpop.eup %10892  ;;  %v2579_v7 = vsub.f32 %v17522_v63, %v2407_v62  ;;  %2928 = vadd.xlane.f32.xlu1 %v17523_v45  ;;  %v3167_v24 = vpack.c.bf16 %v13193_v47, %v13202_v61  ;;  %v17528_v62 = vld [vmem:[#allocation56_spill] sm:$0xff]  ;;  %v17530_v63 = vld [vmem:[#allocation49_spill] sm:$0xff] }
 0x4bb   : > { %17521 = vst [vmem:[#allocation35_spill] sm:$0xff] %v13206_v3  ;;  %v2594_v13 = vsub.f32 %v17524_v11, %v2437_v0  ;;  %v13213_v43 = vpop.eup %10894  ;;  %10197 = vmatprep.mubr.bf16.mxu0 %v3166_v33  ;;  %10904 = vpow2.f32 %v2788_v25  ;;  %v17529_v33 = vld [vmem:[#allocation107_spill] sm:$0xff] }
 0x4bc   : > { %v13216_v15 = vpop.eup %10896  ;;  %v2790_v26 = vmul.f32 1.442695, %v2579_v7  ;;  %2930 = vadd.xlane.f32.xlu0 %v17525_v30  ;;  %10198 = vmatmul.mubr.bf16.gmra.mrb[124].mxu0 %v3167_v24 }
 0x4bd   : > { %v13220_v50 = vpop.eup %10898  ;;  %v2820_v10 = vmul.f32 1.442695, %v2594_v13  ;;  %v2439_v46 = vpop.xlane.xlu0 %2438  ;;  %v3174_v59 = vpack.c.bf16 %v13216_v15, %v13213_v43  ;;  %v17531_v13 = vld [vmem:[#allocation112_spill] sm:$0xff] }
 0x4be   : > { %17526 = vst [vmem:[#allocation61_spill] sm:$0xff] %v13220_v50  ;;  %v2401_v38 = vpop.xlane.xlu1 %2400  ;;  %10906 = vpow2.f32 %v2790_v26  ;;  %v2595_v27 = vsub.f32 %v17527_v2, %v2439_v46  ;;  %2960 = vadd.xlane.f32.xlu1 %v17528_v62  ;;  %v3175_v0 = vpack.c.bf16 %v13206_v3, %v13220_v50  ;;  %v17532_v26 = vld [vmem:[#allocation99_spill] sm:$0xff]  ;;  %v17534_v62 = vld [vmem:[#allocation57_spill] sm:$0xff] }
 0x4bf   : > { %v2576_v51 = vsub.f32 %v17529_v33, %v2401_v38  ;;  %10908 = vrcp.f32 %v13060_v31  ;;  %10229 = vmatprep.mubr.bf16.mxu1 %v3174_v59  ;;  %v17533_v2 = vld [vmem:[#allocation103_spill] sm:$0xff] }
 0x4c0   : > { %10910 = vrcp.f32 %v13072_v54  ;;  %v2822_v25 = vmul.f32 1.442695, %v2595_v27  ;;  %2962 = vadd.xlane.f32.xlu0 %v17530_v63  ;;  %10230 = vmatmul.mubr.bf16.gmra.mrb[124].mxu1 %v3175_v0  ;;  %v10901_v54 = vpop.eup %10900 }
 0x4c1   : > { %10912 = vpow2.f32 %v2820_v10  ;;  %v2784_v7 = vmul.f32 1.442695, %v2576_v51  ;;  %v2403_v45 = vpop.xlane.xlu0 %2402  ;;  %v10903_v38 = vpop.eup %10902 }
 0x4c2   : > { %v2433_v11 = vpop.xlane.xlu1 %2432  ;;  %10914 = vpow2.f32 %v2822_v25  ;;  %v2577_v24 = vsub.f32 %v17531_v13, %v2403_v45  ;;  %2940 = vadd.xlane.f32.xlu1 %v12969_v32 }
 0x4c3   : > { %v2592_v30 = vsub.f32 %v17532_v26, %v2433_v11  ;;  %10916 = vrcp.f32 %v13125_v5  ;;  %v17535_v5 = vld [vmem:[#allocation54_spill] sm:$0xff] }
 0x4c4   : > { %v2786_v31 = vmul.f32 1.442695, %v2577_v24  ;;  %2942 = vadd.xlane.f32.xlu0 %v12980_v4  ;;  %10918 = vpow2.f32 %v2784_v7 }
 0x4c5   : > { %v2816_v46 = vmul.f32 1.442695, %v2592_v30  ;;  %v2435_v59 = vpop.xlane.xlu0 %2434  ;;  %v13239_v33 = vpop.eup %10904 }
 0x4c6   : > { %v2909_v10 = vpop.xlane.xlu1 %2908  ;;  %10920 = vpow2.f32 %v2786_v31  ;;  %v2593_v27 = vsub.f32 %v17533_v2, %v2435_v59  ;;  %2936 = vadd.xlane.f32.xlu1 %v17534_v62 }
 0x4c7   : > { %10922 = vrcp.f32 %v13132_v55 }
 0x4c8   : > { %v13242_v32 = vpop.eup %10906  ;;  %10924 = vrcp.f32 %v13135_v1  ;;  %v2818_v4 = vmul.f32 1.442695, %v2593_v27  ;;  %2938 = vadd.xlane.f32.xlu0 %v17535_v5  ;;  %v10091_v51 = vpop.f32.mrb[80].mxu1 }
 0x4c9   : > { %v10909_v0 = vpop.eup %10908  ;;  %10926 = vpow2.f32 %v2816_v46  ;;  %v13246_v25 = vpop.xlane.xlu0 %2910  ;;  %v13248_v63 = vmul.f32 %v10901_v54, %v10091_v51  ;;  %v3177_v45 = vpack.c.bf16 %v13242_v32, %v13239_v33 }
 0x4ca   : > { %v3234_v7 = vpop.f32.mrb[81].mxu1  ;;  %v10911_v11 = vpop.eup %10910  ;;  %10928 = vpow2.f32 %v2818_v4  ;;  %2980 = vadd.xlane.f32.xlu1 %v13009_v41 }
 0x4cb   : > { %v13252_v55 = vmul.f32 %v10909_v0, %v3234_v7  ;;  %v10092_v1 = vpop.f32.mrb[82].mxu1  ;;  %v2905_v13 = vpop.xlane.xlu1 %2904  ;;  %10930 = vrcp.f32 %v13139_v34  ;;  %v17536_v34 = vld [vmem:[#allocation113_spill] sm:$0xff] }
 0x4cc   : > { %v13255_v24 = vpop.eup %10912  ;;  %v13258_v26 = vmul.f32 %v10903_v38, %v10092_v1  ;;  %v3237_v30 = vpop.f32.mrb[83].mxu1  ;;  %2982 = vadd.xlane.f32.xlu0 %v13020_v29  ;;  %10932 = vrcp.f32 %v13180_v17  ;;  %v17537_v0 = vld [vmem:[#allocation117_spill] sm:$0xff] }
 0x4cd   : > { %v13260_v31 = vpop.eup %10914  ;;  %v13262_v54 = vmul.f32 %v10911_v11, %v3237_v30  ;;  %v13265_v46 = vpop.xlane.xlu0 %2906  ;;  %10934 = vrcp.f32 %v13187_v36  ;;  %v17538_v30 = vld [vmem:[#allocation106_spill] sm:$0xff] }
 0x4ce   : > { %v3185_v41 = vpack.c.bf16 %v13260_v31, %v13255_v24  ;;  %v10917_v59 = vpop.eup %10916  ;;  %3012 = vadd.xlane.f32.xlu1 %v13024_v52  ;;  %10936 = vrcp.f32 %v13185_v49 }
 0x4cf   : > { %v2413_v2 = vpop.xlane.xlu1 %2412  ;;  %v13270_v27 = vpop.eup %10918  ;;  %10938 = vrcp.f32 %v13191_v40 }
 0x4d0   : > { %v2582_v38 = vsub.f32 %v17536_v34, %v2413_v2  ;;  %v13273_v62 = vpop.eup %10920  ;;  %3014 = vadd.xlane.f32.xlu0 %v13037_v16  ;;  %10940 = vrcp.f32 %v2909_v10  ;;  %v17539_v10 = vld [vmem:[#allocation110_spill] sm:$0xff] }
 0x4d1   : > { %v10923_v29 = vpop.eup %10922  ;;  %v2415_v5 = vpop.xlane.xlu0 %2414  ;;  %v3176_v51 = vpack.c.bf16 %v13273_v62, %v13270_v27 }
 0x4d2   : > { %v2796_v4 = vmul.f32 1.442695, %v2582_v38  ;;  %v10925_v52 = vpop.eup %10924  ;;  %v2583_v7 = vsub.f32 %v17537_v0, %v2415_v5  ;;  %v10095_v11 = vpop.f32.mrb[84].mxu1  ;;  %2976 = vadd.xlane.f32.xlu1 %v13015_v18 }
 0x4d3   : > { %v2445_v1 = vpop.xlane.xlu1 %2444  ;;  %v13283_v17 = vpop.eup %10926  ;;  %v13286_v16 = vmul.f32 %v10917_v59, %v10095_v11  ;;  %10249 = vmatprep.mubr.bf16.mxu0 %v3176_v51 }
 0x4d4   : > { %v3250_v36 = vpop.f32.mrb[85].mxu1  ;;  %v2598_v2 = vsub.f32 %v17538_v30, %v2445_v1  ;;  %v13289_v34 = vpop.eup %10928  ;;  %v2798_v49 = vmul.f32 1.442695, %v2583_v7  ;;  %2978 = vadd.xlane.f32.xlu0 %v13012_v56  ;;  %10250 = vmatmul.mubr.bf16.vlgmr.msra.gmra.mrb[128].mxu0 %v3177_v45  ;;  %10942 = vpow2.f32 %v2796_v4  ;;  %v17540_v1 = vld [vmem:[#allocation79_spill] sm:$0xff]  ;;  %v17541_v45 = vld [vmem:[#allocation116_spill] sm:$0xff] }
 0x4d5   : > { %v13291_v38 = vmul.f32 %v10925_v52, %v3250_v36  ;;  %v10096_v5 = vpop.f32.mrb[86].mxu1  ;;  %v10931_v18 = vpop.eup %10930  ;;  %10298 = vmatpush3.bf16.msra.mxu0 %v17508_v60  ;;  %v3184_v11 = vpack.c.bf16 %v13289_v34, %v13283_v17 }
 0x4d6   : > { %v2828_v0 = vmul.f32 1.442695, %v2598_v2  ;;  %v13294_v40 = vmul.f32 %v10923_v29, %v10096_v5  ;;  %v2447_v59 = vpop.xlane.xlu0 %2446  ;;  %v3253_v51 = vpop.f32.mrb[87].mxu1  ;;  %10944 = vpow2.f32 %v2798_v49  ;;  %10299 = vmatprep.subr.bf16.mxu0 %v17540_v1  ;;  %3008 = vadd.xlane.f32.xlu1 %v13033_v14  ;;  %v17542_v2 = vld [vmem:[#allocation120_spill] sm:$0xff]  ;;  %v17543_v49 = vld [vmem:[#allocation78_spill] sm:$0xff] }
 0x4d7   : > { %v2599_v52 = vsub.f32 %v17539_v10, %v2447_v59  ;;  %v13300_v7 = vmul.f32 %v10931_v18, %v3253_v51  ;;  %v2409_v56 = vpop.xlane.xlu1 %2408  ;;  %10946 = vrcp.f32 %v13246_v25  ;;  %10281 = vmatprep.mubr.bf16.mxu1 %v3184_v11  ;;  %v10933_v30 = vpop.eup %10932  ;;  %v17544_v51 = vld [vmem:[#allocation108_spill] sm:$0xff] }
 0x4d8   : > { %v2580_v60 = vsub.f32 %v17541_v45, %v2409_v56  ;;  %10948 = vrcp.f32 %v2905_v13  ;;  %3010 = vadd.xlane.f32.xlu0 %v13030_v48  ;;  %10282 = vmatmul.mubr.bf16.vlgmr.msra.gmra.mrb[128].mxu1 %v3185_v41  ;;  %v10935_v5 = vpop.eup %10934 }
 0x4d9   : > { %v2830_v29 = vmul.f32 1.442695, %v2599_v52  ;;  %10950 = vpow2.f32 %v2828_v0  ;;  %10300 = vmatpush3.bf16.msra.mxu0 %v17540_v1  ;;  %v10937_v18 = vpop.eup %10936 }
 0x4da   : > { %v2792_v4 = vmul.f32 1.442695, %v2580_v60  ;;  %v2411_v36 = vpop.xlane.xlu0 %2410  ;;  %10301 = vmatprep.subr.bf16.mxu0 %v17543_v49  ;;  %v10099_v25 = vpop.f32.mrb[88].mxu1  ;;  %2988 = vadd.xlane.f32.xlu1 %v13062_v28  ;;  %v17545_v60 = vld [vmem:[#allocation111_spill] sm:$0xff] }
 0x4db   : > { %10952 = vpow2.f32 %v2830_v29  ;;  %v2581_v14 = vsub.f32 %v17542_v2, %v2411_v36  ;;  %v13312_v13 = vmul.f32 %v10933_v30, %v10099_v25  ;;  %v3266_v48 = vpop.f32.mrb[89].mxu1  ;;  %v2441_v41 = vpop.xlane.xlu1 %2440  ;;  %v17546_v30 = vld [vmem:[#allocation89_spill] sm:$0xff] }
 0x4dc   : > { %10954 = vrcp.f32 %v13265_v46  ;;  %v13314_v59 = vmul.f32 %v10935_v5, %v3266_v48  ;;  %v2596_v11 = vsub.f32 %v17544_v51, %v2441_v41  ;;  %v10100_v10 = vpop.f32.mrb[90].mxu1  ;;  %2990 = vadd.xlane.f32.xlu0 %v13074_v6  ;;  %v10939_v52 = vpop.eup %10938 }
 0x4dd   : > { %v2794_v0 = vmul.f32 1.442695, %v2581_v14  ;;  %10956 = vpow2.f32 %v2792_v4  ;;  %v13318_v1 = vmul.f32 %v10937_v18, %v10100_v10  ;;  %10302 = vmatpush3.bf16.msra.mxu0 %v17543_v49  ;;  %v3269_v46 = vpop.f32.mrb[91].mxu1  ;;  %v10941_v56 = vpop.eup %10940  ;;  %v17547_v49 = vld [vmem:[#allocation121_spill] sm:$0xff] }
 0x4de   : > { %v2443_v28 = vpop.xlane.xlu0 %2442  ;;  %v2824_v45 = vmul.f32 1.442695, %v2596_v11  ;;  %v13322_v36 = vmul.f32 %v10939_v52, %v3269_v46  ;;  %10303 = vmatprep.subr.bf16.mxu0 %v17546_v30  ;;  %3020 = vadd.xlane.f32.xlu1 %v13080_v42  ;;  %v13326_v6 = vpop.eup %10942  ;;  %v17549_v11 = vld [vmem:[#allocation88_spill] sm:$0xff] }
 0x4df   : > { %10958 = vpow2.f32 %v2794_v0  ;;  %v2597_v29 = vsub.f32 %v17545_v60, %v2443_v28  ;;  %v2421_v4 = vpop.xlane.xlu1 %2420  ;;  %v17548_v0 = vld [vmem:[#allocation125_spill] sm:$0xff] }
 0x4e0   : > { %v13328_v2 = vpop.eup %10944  ;;  %v2586_v25 = vsub.f32 %v17547_v49, %v2421_v4  ;;  %3022 = vadd.xlane.f32.xlu0 %v13092_v44  ;;  %10960 = vpow2.f32 %v2824_v45 }
 0x4e1   : > { %v2826_v14 = vmul.f32 1.442695, %v2597_v29  ;;  %v10947_v5 = vpop.eup %10946  ;;  %10304 = vmatpush3.bf16.msra.mxu0 %v17546_v30  ;;  %v3179_v41 = vpack.c.bf16 %v13328_v2, %v13326_v6  ;;  %v17552_v30 = vld [vmem:[#allocation114_spill] sm:$0xff] }
 0x4e2   : > { %v2423_v48 = vpop.xlane.xlu0 %2422  ;;  %v10949_v18 = vpop.eup %10948  ;;  %v2804_v42 = vmul.f32 1.442695, %v2586_v25  ;;  %10305 = vmatprep.subr.bf16.mxu0 %v17549_v11  ;;  %2984 = vadd.xlane.f32.xlu1 %v13069_v20 }
 0x4e3   : > { %10962 = vpow2.f32 %v2826_v14  ;;  %v2587_v51 = vsub.f32 %v17548_v0, %v2423_v48  ;;  %v10103_v10 = vpop.f32.mrb[92].mxu1  ;;  %v13338_v52 = vpop.eup %10950 }
 0x4e4   : > { %v13340_v44 = vmul.f32 %v10941_v56, %v10103_v10  ;;  %v3282_v28 = vpop.f32.mrb[93].mxu1  ;;  %v2453_v46 = vpop.xlane.xlu1 %2452  ;;  %2986 = vadd.xlane.f32.xlu0 %v13066_v58  ;;  %10964 = vpow2.f32 %v2804_v42 }
 0x4e5   : > { %v13342_v45 = vpop.eup %10952  ;;  %v2806_v60 = vmul.f32 1.442695, %v2587_v51  ;;  %v13344_v29 = vmul.f32 %v10949_v18, %v3282_v28  ;;  %v2602_v4 = vsub.f32 %v17552_v30, %v2453_v46  ;;  %v10104_v14 = vpop.f32.mrb[94].mxu1  ;;  %10306 = vmatpush3.bf16.msra.mxu0 %v17549_v11  ;;  %v17554_v18 = vld [vmem:[#allocation118_spill] sm:$0xff]  ;;  %v17556_v28 = vld [vmem:[#allocation95_spill] sm:$0xff] }
 0x4e6   : > { %17550 = vst [vmem:[#allocation13_spill] sm:$0xff] %v13340_v44  ;;  %v10955_v49 = vpop.eup %10954  ;;  %v13348_v25 = vmul.f32 %v10947_v5, %v10104_v14  ;;  %v2455_v20 = vpop.xlane.xlu0 %2454  ;;  %v3187_v48 = vpack.c.bf16 %v13342_v45, %v13338_v52  ;;  %10307 = vmatprep.subr.bf16.mxu0 %v17556_v28  ;;  %3016 = vadd.xlane.f32.xlu1 %v13089_v35  ;;  %v17557_v46 = vld [vmem:[#allocation123_spill] sm:$0xff] }
 0x4e7   : > { %17551 = vst [vmem:[#allocation52_spill] sm:$0xff] %v13344_v29  ;;  %v3285_v56 = vpop.f32.mrb[95].mxu1  ;;  %10966 = vpow2.f32 %v2806_v60  ;;  %v2836_v0 = vmul.f32 1.442695, %v2602_v4  ;;  %v2603_v51 = vsub.f32 %v17554_v18, %v2455_v20  ;;  %v13358_v58 = vpop.eup %10956  ;;  %v17558_v35 = vld [vmem:[#allocation127_spill] sm:$0xff]  ;;  %v17559_v20 = vld [vmem:[#allocation94_spill] sm:$0xff] }
 0x4e8   : > { %17553 = vst [vmem:[#allocation21_spill] sm:$0xff] %v13348_v25  ;;  %v13354_v10 = vmul.f32 %v10955_v49, %v3285_v56  ;;  %v2417_v5 = vpop.xlane.xlu1 %2416  ;;  %3018 = vadd.xlane.f32.xlu0 %v13086_v23 }
 0x4e9   : > { %v13360_v42 = vpop.eup %10958  ;;  %v2838_v11 = vmul.f32 1.442695, %v2603_v51  ;;  %v2584_v30 = vsub.f32 %v17557_v46, %v2417_v5  ;;  %10968 = vpow2.f32 %v2836_v0  ;;  %10308 = vmatpush3.bf16.msra.mxu0 %v17556_v28  ;;  %v17560_v51 = vld [vmem:[#allocation115_spill] sm:$0xff] }
 0x4ea   : > { %17555 = vst [vmem:[#allocation7_spill] sm:$0xff] %v13354_v10  ;;  %v2419_v60 = vpop.xlane.xlu0 %2418  ;;  %v3178_v4 = vpack.c.bf16 %v13360_v42, %v13358_v58  ;;  %10309 = vmatprep.subr.bf16.mxu0 %v17559_v20  ;;  %2996 = vadd.xlane.f32.xlu1 %v13149_v22  ;;  %v13370_v56 = vpop.eup %10960  ;;  %v17561_v46 = vld [vmem:[#allocation119_spill] sm:$0xff]  ;;  %v17568_v10 = vld [vmem:[#allocation122_spill] sm:$0xff] }
 0x4eb   : > { %10970 = vpow2.f32 %v2838_v11  ;;  %v2800_v14 = vmul.f32 1.442695, %v2584_v30  ;;  %v2585_v49 = vsub.f32 %v17558_v35, %v2419_v60  ;;  %v17562_v60 = vld [vmem:[#allocation104_spill] sm:$0xff] }
 0x4ec   : > { %10253 = vmatprep.mubr.bf16.mxu0 %v3178_v4  ;;  %v2449_v18 = vpop.xlane.xlu1 %2448  ;;  %2998 = vadd.xlane.f32.xlu0 %v13141_v19 }
 0x4ed   : > { %v13372_v23 = vpop.eup %10962  ;;  %v2802_v0 = vmul.f32 1.442695, %v2585_v49  ;;  %v2600_v28 = vsub.f32 %v17560_v51, %v2449_v18  ;;  %10254 = vmatmul.mubr.bf16.gmra.mrb[132].mxu0 %v3179_v41  ;;  %10972 = vpow2.f32 %v2800_v14 }
 0x4ee   : > { %10310 = vmatpush3.bf16.msra.mxu0 %v17559_v20  ;;  %v2451_v5 = vpop.xlane.xlu0 %2450  ;;  %v3186_v11 = vpack.c.bf16 %v13372_v23, %v13370_v56  ;;  %3028 = vadd.xlane.f32.xlu1 %v13164_v53  ;;  %v13382_v4 = vpop.eup %10964 }
 0x4ef   : > { %10974 = vpow2.f32 %v2802_v0  ;;  %v2832_v22 = vmul.f32 1.442695, %v2600_v28  ;;  %v2601_v30 = vsub.f32 %v17561_v46, %v2451_v5  ;;  %10311 = vmatprep.subr.bf16.mxu0 %v17562_v60  ;;  %v17563_v0 = vld [vmem:[#allocation131_spill] sm:$0xff]  ;;  %v17564_v5 = vld [vmem:[#allocation129_spill] sm:$0xff] }
 0x4f0   : > { %10285 = vmatprep.mubr.bf16.mxu1 %v3186_v11  ;;  %v2429_v19 = vpop.xlane.xlu1 %2428  ;;  %3030 = vadd.xlane.f32.xlu0 %v13153_v57 }
 0x4f1   : > { %v13384_v41 = vpop.eup %10966  ;;  %v2834_v14 = vmul.f32 1.442695, %v2601_v30  ;;  %10286 = vmatmul.mubr.bf16.gmra.mrb[132].mxu1 %v3187_v48  ;;  %10976 = vpow2.f32 %v2832_v22  ;;  %v2590_v11 = vsub.f32 %v17564_v5, %v2429_v19 }
 0x4f2   : > { %10312 = vmatpush3.bf16.msra.mxu0 %v17562_v60  ;;  %v2431_v35 = vpop.xlane.xlu0 %2430  ;;  %v3181_v49 = vpack.c.bf16 %v13384_v41, %v13382_v4  ;;  %2992 = vadd.xlane.f32.xlu1 %v13144_v8  ;;  %v17565_v60 = vld [vmem:[#allocation130_spill] sm:$0xff] }
 0x4f3   : > { %10978 = vpow2.f32 %v2834_v14  ;;  %v13391_v53 = vpop.eup %10968  ;;  %v2591_v51 = vsub.f32 %v17563_v0, %v2431_v35  ;;  %v17566_v35 = vld [vmem:[#allocation36_spill] sm:$0xff]  ;;  %v2812_v5 = vmul.f32 1.442695, %v2590_v11 }
 0x4f4   : > { %v2461_v20 = vpop.xlane.xlu1 %2460  ;;  %2994 = vadd.xlane.f32.xlu0 %v13146_v12 }
 0x4f5   : > { %v13393_v18 = vpop.eup %10970  ;;  %v2814_v46 = vmul.f32 1.442695, %v2591_v51  ;;  %v2606_v51 = vsub.f32 %v17568_v10, %v2461_v20  ;;  %v17570_v10 = vld [vmem:[#allocation128_spill] sm:$0xff] }
 0x4f6   : > { %v2463_v57 = vpop.xlane.xlu0 %2462  ;;  %v3189_v48 = vpack.c.bf16 %v13393_v18, %v13391_v53  ;;  %3024 = vadd.xlane.f32.xlu1 %v13158_v9  ;;  %v17567_v9 = vld [vmem:[#allocation132_spill] sm:$0xff] }
 0x4f7   : > { %v13400_v28 = vpop.eup %10972  ;;  %v2607_v30 = vsub.f32 %v17474_v21, %v2463_v57  ;;  %10980 = vpow2.f32 %v2814_v46  ;;  %v2844_v46 = vmul.f32 1.442695, %v2606_v51 }
 0x4f8   : > { %v2425_v8 = vpop.xlane.xlu1 %2424  ;;  %3026 = vadd.xlane.f32.xlu0 %v17566_v35  ;;  %v17569_v35 = vld [vmem:[#allocation124_spill] sm:$0xff] }
 0x4f9   : > { %v13403_v22 = vpop.eup %10974  ;;  %v2588_v14 = vsub.f32 %v17565_v60, %v2425_v8  ;;  %v2846_v8 = vmul.f32 1.442695, %v2607_v30 }
 0x4fa   : > { %v2427_v12 = vpop.xlane.xlu0 %2426  ;;  %v3180_v0 = vpack.c.bf16 %v13403_v22, %v13400_v28  ;;  %3044 = vadd.xlane.f32.xlu1 %v13239_v33 }
 0x4fb   : > { %v2808_v25 = vmul.f32 1.442695, %v2588_v14  ;;  %v2589_v44 = vsub.f32 %v17567_v9, %v2427_v12  ;;  %v13412_v19 = vpop.eup %10976  ;;  %v17571_v12 = vld [vmem:[#allocation9_spill] sm:$0xff] }
 0x4fc   : > { %10257 = vmatprep.mubr.bf16.mxu0 %v3180_v0  ;;  %v2457_v21 = vpop.xlane.xlu1 %2456  ;;  %3046 = vadd.xlane.f32.xlu0 %v13242_v32 }
 0x4fd   : > { %v13415_v57 = vpop.eup %10978  ;;  %v2810_v60 = vmul.f32 1.442695, %v2589_v44  ;;  %v2604_v29 = vsub.f32 %v17569_v35, %v2457_v21  ;;  %10258 = vmatmul.mubr.bf16.gmra.mrb[136].mxu0 %v3181_v49  ;;  %10982 = vpow2.f32 %v2808_v25 }
 0x4fe   : > { %v2459_v14 = vpop.xlane.xlu0 %2458  ;;  %v3188_v33 = vpack.c.bf16 %v13415_v57, %v13412_v19  ;;  %3076 = vadd.xlane.f32.xlu1 %v13255_v24 }
 0x4ff   : > { %10984 = vpow2.f32 %v2810_v60  ;;  %v2840_v11 = vmul.f32 1.442695, %v2604_v29  ;;  %v2605_v20 = vsub.f32 %v17570_v10, %v2459_v14  ;;  %v17572_v29 = vld [vmem:[#allocation133_spill] sm:$0xff] }
 0x500   : > { %10986 = vpow2.f32 %v2812_v5  ;;  %10289 = vmatprep.mubr.bf16.mxu1 %v3188_v33  ;;  %v2469_v44 = vpop.xlane.xlu1 %2468  ;;  %3078 = vadd.xlane.f32.xlu0 %v13260_v31  ;;  %v17573_v5 = vld [vmem:[#allocation16_spill] sm:$0xff] }
 0x501   : > { %10988 = vpow2.f32 %v2846_v8  ;;  %v2842_v30 = vmul.f32 1.442695, %v2605_v20  ;;  %v2610_v32 = vsub.f32 %v17571_v12, %v2469_v44  ;;  %10290 = vmatmul.mubr.bf16.gmra.mrb[136].mxu1 %v3189_v48  ;;  %v13429_v8 = vpop.eup %10980  ;;  %v17575_v48 = vld [vmem:[#allocation134_spill] sm:$0xff] }
 0x502   : > { %10990 = vpow2.f32 %v2840_v11  ;;  %v2471_v25 = vpop.xlane.xlu0 %2470  ;;  %3040 = vadd.xlane.f32.xlu1 %v13270_v27  ;;  %17574 = vst [vmem:[#allocation43_spill] sm:$0xff] %v13429_v8  ;;  %v17576_v11 = vld [vmem:[#allocation12_spill] sm:$0xff] }
 0x503   : > { %10992 = vpow2.f32 %v2842_v30  ;;  %v2852_v49 = vmul.f32 1.442695, %v2610_v32  ;;  %v2611_v0 = vsub.f32 %v17572_v29, %v2471_v25  ;;  %v17579_v30 = vld [vmem:[#allocation135_spill] sm:$0xff] }
 0x504   : > { %10994 = vpow2.f32 %v2844_v46  ;;  %v2465_v24 = vpop.xlane.xlu1 %2464  ;;  %3042 = vadd.xlane.f32.xlu0 %v13273_v62 }
 0x505   : > { %v2854_v9 = vmul.f32 1.442695, %v2611_v0  ;;  %v2608_v51 = vsub.f32 %v17573_v5, %v2465_v24  ;;  %10996 = vpow2.f32 %v2852_v49  ;;  %v17580_v0 = vld [vmem:[#allocation32_spill] sm:$0xff] }
 0x506   : > { %v2467_v21 = vpop.xlane.xlu0 %2466  ;;  %3072 = vadd.xlane.f32.xlu1 %v13283_v17 }
 0x507   : > { %10998 = vpow2.f32 %v2854_v9  ;;  %v2848_v31 = vmul.f32 1.442695, %v2608_v51  ;;  %v2609_v60 = vsub.f32 %v17575_v48, %v2467_v21  ;;  %v13433_v35 = vpop.eup %10982 }
 0x508   : > { %v2477_v27 = vpop.xlane.xlu1 %2476  ;;  %3074 = vadd.xlane.f32.xlu0 %v13289_v34 }
 0x509   : > { %v13435_v14 = vpop.eup %10984  ;;  %v2850_v33 = vmul.f32 1.442695, %v2609_v60  ;;  %v2614_v10 = vsub.f32 %v17576_v11, %v2477_v27  ;;  %11000 = vpow2.f32 %v2848_v31  ;;  %v17582_v31 = vld [vmem:[#allocation136_spill] sm:$0xff] }
 0x50a   : > { %v13439_v62 = vpop.eup %10986  ;;  %v2479_v20 = vpop.xlane.xlu0 %2478  ;;  %v3182_v46 = vpack.c.bf16 %v13435_v14, %v13433_v35  ;;  %3052 = vadd.xlane.f32.xlu1 %v13326_v6 }
 0x50b   : > { %17577 = vst [vmem:[#allocation15_spill] sm:$0xff] %v13439_v62  ;;  %v13443_v44 = vpop.eup %10988  ;;  %11002 = vpow2.f32 %v2850_v33  ;;  %v2860_v17 = vmul.f32 1.442695, %v2614_v10  ;;  %v2615_v12 = vsub.f32 %v17579_v30, %v2479_v20  ;;  %v3183_v32 = vpack.c.bf16 %v13429_v8, %v13439_v62 }
 0x50c   : > { %17578 = vst [vmem:[#allocation10_spill] sm:$0xff] %v13443_v44  ;;  %v13449_v25 = vpop.eup %10990  ;;  %10261 = vmatprep.mubr.bf16.mxu0 %v3182_v46  ;;  %v2473_v34 = vpop.xlane.xlu1 %2472  ;;  %3054 = vadd.xlane.f32.xlu0 %v13328_v2  ;;  %v17583_v46 = vld [vmem:[#allocation137_spill] sm:$0xff] }
 0x50d   : > { %v13451_v49 = vpop.eup %10992  ;;  %v2862_v29 = vmul.f32 1.442695, %v2615_v12  ;;  %v2612_v24 = vsub.f32 %v17580_v0, %v2473_v34  ;;  %10262 = vmatmul.mubr.bf16.gmra.mrb[140].mxu0 %v3183_v32  ;;  %11004 = vpow2.f32 %v2860_v17  ;;  %v13457_v6 = vpop.f32.mrb[96].mxu1  ;;  %v17584_v0 = vld [vmem:[#allocation139_spill] sm:$0xff] }
 0x50e   : > { %v13455_v9 = vpop.eup %10994  ;;  %v2475_v5 = vpop.xlane.xlu0 %2474  ;;  %v3190_v51 = vpack.c.bf16 %v13451_v49, %v13449_v25  ;;  %3084 = vadd.xlane.f32.xlu1 %v13338_v52 }
 0x50f   : > { %17581 = vst [vmem:[#allocation48_spill] sm:$0xff] %v13455_v9  ;;  %11006 = vpow2.f32 %v2862_v29  ;;  %v2856_v21 = vmul.f32 1.442695, %v2612_v24  ;;  %v2613_v48 = vsub.f32 %v17582_v31, %v2475_v5  ;;  %v13463_v60 = vpop.f32.mrb[97].mxu1  ;;  %v3191_v2 = vpack.c.bf16 %v13443_v44, %v13455_v9  ;;  %v13467_v27 = vpop.eup %10996 }
 0x510   : > { %10293 = vmatprep.mubr.bf16.mxu1 %v3190_v51  ;;  %v2485_v33 = vpop.xlane.xlu1 %2484  ;;  %v13469_v11 = vpop.f32.mrb[98].mxu1  ;;  %3086 = vadd.xlane.f32.xlu0 %v13342_v45 }
 0x511   : > { %v13471_v10 = vpop.eup %10998  ;;  %v2858_v20 = vmul.f32 1.442695, %v2613_v48  ;;  %v2618_v17 = vsub.f32 %v17583_v46, %v2485_v33  ;;  %10294 = vmatmul.mubr.bf16.gmra.mrb[140].mxu1 %v3191_v2  ;;  %v13475_v52 = vpop.f32.mrb[96].mxu0  ;;  %11008 = vpow2.f32 %v2856_v21  ;;  %v17585_v2 = vld [vmem:[#allocation138_spill] sm:$0xff] }
 0x512   : > { %v13477_v30 = vpop.f32.mrb[99].mxu1  ;;  %v2487_v12 = vpop.xlane.xlu0 %2486  ;;  %v3193_v34 = vpack.c.bf16 %v13471_v10, %v13467_v27  ;;  %3048 = vadd.xlane.f32.xlu1 %v13358_v58 }
 0x513   : > { %v13479_v32 = vpop.f32.mrb[97].mxu0  ;;  %11010 = vpow2.f32 %v2858_v20  ;;  %v2868_v29 = vmul.f32 1.442695, %v2618_v17  ;;  %v2619_v24 = vsub.f32 %v17584_v0, %v2487_v12  ;;  %v13487_v45 = vpop.eup %11000  ;;  %v17586_v17 = vld [vmem:[#allocation140_spill] sm:$0xff] }
 0x514   : > { %v13485_v5 = vpop.f32.mrb[98].mxu0  ;;  %v2481_v51 = vpop.xlane.xlu1 %2480  ;;  %3050 = vadd.xlane.f32.xlu0 %v13360_v42 }
 0x515   : > { %v13489_v31 = vpop.f32.mrb[99].mxu0  ;;  %v13491_v21 = vpop.eup %11002  ;;  %v2870_v48 = vmul.f32 1.442695, %v2619_v24  ;;  %v2616_v33 = vsub.f32 %v17585_v2, %v2481_v51  ;;  %11012 = vpow2.f32 %v2868_v29 }
 0x516   : > { %v2483_v20 = vpop.xlane.xlu0 %2482  ;;  %v3192_v46 = vpack.c.bf16 %v13491_v21, %v13487_v45  ;;  %3080 = vadd.xlane.f32.xlu1 %v13370_v56 }
 0x517   : > { %11014 = vpow2.f32 %v2870_v48  ;;  %v2864_v58 = vmul.f32 1.442695, %v2616_v33  ;;  %v2617_v12 = vsub.f32 %v17586_v17, %v2483_v20  ;;  %v13499_v0 = vpop.eup %11004  ;;  %v17587_v48 = vld [vmem:[#allocation143_spill] sm:$0xff]  ;;  %v17588_v33 = vld [vmem:[#allocation141_spill] sm:$0xff] }
 0x518   : > { %10313 = vmatprep.mubr.bf16.mxu0 %v3192_v46  ;;  %v2493_v44 = vpop.xlane.xlu1 %2492  ;;  %3082 = vadd.xlane.f32.xlu0 %v13372_v23  ;;  %v17589_v23 = vld [vmem:[#allocation142_spill] sm:$0xff] }
 0x519   : > { %v13501_v24 = vpop.eup %11006  ;;  %v2866_v51 = vmul.f32 1.442695, %v2617_v12  ;;  %10314 = vmatmul.mubr.bf16.vlgmr.msra.gmra.mrb[144].mxu0 %v3193_v34  ;;  %11016 = vpow2.f32 %v2864_v58  ;;  %v2622_v20 = vsub.f32 %v17588_v33, %v2493_v44 }
 0x51a   : > { %v2495_v42 = vpop.xlane.xlu0 %2494  ;;  %v3195_v29 = vpack.c.bf16 %v13501_v24, %v13499_v0  ;;  %3056 = vadd.xlane.f32.xlu1 %v13400_v28  ;;  %v17590_v28 = vld [vmem:[#allocation144_spill] sm:$0xff] }
 0x51b   : > { %11018 = vpow2.f32 %v2866_v51  ;;  %v2623_v2 = vsub.f32 %v17587_v48, %v2495_v42  ;;  %v13508_v56 = vpop.eup %11008 }
 0x51c   : > { %v2489_v46 = vpop.xlane.xlu1 %2488  ;;  %3058 = vadd.xlane.f32.xlu0 %v13403_v22 }
 0x51d   : > { %v13511_v17 = vpop.eup %11010  ;;  %v2878_v12 = vmul.f32 1.442695, %v2623_v2  ;;  %v2620_v34 = vsub.f32 %v17589_v23, %v2489_v46  ;;  %v13515_v9 = vpop.f32.mrb[100].mxu0  ;;  %v2876_v2 = vmul.f32 1.442695, %v2622_v20 }
 0x51e   : > { %v2491_v58 = vpop.xlane.xlu0 %2490  ;;  %v3194_v51 = vpack.c.bf16 %v13511_v17, %v13508_v56  ;;  %v13520_v8 = vpop.f32.mrb[101].mxu0  ;;  %3088 = vadd.xlane.f32.xlu1 %v13412_v19 }
 0x51f   : > { %v2872_v42 = vmul.f32 1.442695, %v2620_v34  ;;  %v2621_v48 = vsub.f32 %v17590_v28, %v2491_v58  ;;  %v13523_v44 = vpop.eup %11012  ;;  %v13525_v33 = vpop.f32.mrb[102].mxu0  ;;  %11020 = vpow2.f32 %v2878_v12 }
 0x520   : > { %10317 = vmatprep.mubr.bf16.mxu0 %v3194_v51  ;;  %v13527_v22 = vpop.xlane.xlu1 %2916  ;;  %3090 = vadd.xlane.f32.xlu0 %v13415_v57  ;;  %v13532_v34 = vpop.f32.mrb[103].mxu0 }
 0x521   : > { %v13529_v46 = vpop.eup %11014  ;;  %v2874_v23 = vmul.f32 1.442695, %v2621_v48  ;;  %10318 = vmatmul.mubr.bf16.gmra.mrb[148].mxu0 %v3195_v29  ;;  %11022 = vpow2.f32 %v2872_v42  ;;  %v13536_v19 = vpop.f32.mrb[100].mxu1 }
 0x522   : > { %v13534_v58 = vpop.xlane.xlu0 %2918  ;;  %v3197_v20 = vpack.c.bf16 %v13529_v46, %v13523_v44  ;;  %v13540_v51 = vpop.f32.mrb[101].mxu1  ;;  %3060 = vadd.xlane.f32.xlu1 %v13382_v4 }
 0x523   : > { %11024 = vpow2.f32 %v2874_v23  ;;  %v13543_v12 = vpop.eup %11016  ;;  %v13545_v57 = vpop.f32.mrb[102].mxu1 }
 0x524   : > { %11026 = vpow2.f32 %v2876_v2  ;;  %v2949_v28 = vpop.xlane.xlu1 %2948  ;;  %3062 = vadd.xlane.f32.xlu0 %v13384_v41  ;;  %v13550_v42 = vpop.f32.mrb[103].mxu1 }
 0x525   : > { %v13547_v29 = vpop.eup %11018  ;;  %11028 = vrcp.f32 %v2949_v28 }
 0x526   : > { %v2951_v48 = vpop.xlane.xlu0 %2950  ;;  %v3196_v23 = vpack.c.bf16 %v13547_v29, %v13543_v12  ;;  %3092 = vadd.xlane.f32.xlu1 %v13391_v53 }
 0x527   : > { %11030 = vrcp.f32 %v2951_v48 }
 0x528   : > { %10321 = vmatprep.mubr.bf16.mxu0 %v3196_v23  ;;  %v2913_v4 = vpop.xlane.xlu1 %2912  ;;  %3094 = vadd.xlane.f32.xlu0 %v13393_v18 }
 0x529   : > { %11032 = vrcp.f32 %v2913_v4  ;;  %10322 = vmatmul.mubr.bf16.gmra.mrb[152].mxu0 %v3197_v20  ;;  %v13556_v62 = vpop.eup %11020 }
 0x52a   : > { %v2915_v2 = vpop.xlane.xlu0 %2914  ;;  %17591 = vst [vmem:[#allocation27_spill] sm:$0xff] %v13556_v62  ;;  %3108 = vadd.xlane.f32.xlu1 %v13467_v27 }
 0x52b   : > { %11034 = vrcp.f32 %v2915_v2  ;;  %v13559_v41 = vpop.eup %11022 }
 0x52c   : > { %v2945_v28 = vpop.xlane.xlu1 %2944  ;;  %3110 = vadd.xlane.f32.xlu0 %v13471_v10 }
 0x52d   : > { %v13561_v3 = vpop.eup %11024  ;;  %11036 = vrcp.f32 %v2945_v28  ;;  %v13566_v23 = vpop.f32.mrb[104].mxu0 }
 0x52e   : > { %v13564_v53 = vpop.eup %11026  ;;  %v2947_v48 = vpop.xlane.xlu0 %2946  ;;  %17593 = vst [vmem:[#allocation40_spill] sm:$0xff] %v13566_v23  ;;  %v3198_v18 = vpack.c.bf16 %v13561_v3, %v13559_v41  ;;  %3104 = vadd.xlane.f32.xlu1 %v13487_v45 }
 0x52f   : > { %17592 = vst [vmem:[#allocation62_spill] sm:$0xff] %v13564_v53  ;;  %v11029_v20 = vpop.eup %11028  ;;  %11038 = vrcp.f32 %v2947_v48  ;;  %v13570_v4 = vpop.f32.mrb[105].mxu0  ;;  %v3199_v27 = vpack.c.bf16 %v13556_v62, %v13564_v53 }
 0x530   : > { %17594 = vst [vmem:[#allocation34_spill] sm:$0xff] %v13570_v4  ;;  %v13576_v2 = vmul.f32 %v11029_v20, %v13457_v6  ;;  %v13578_v10 = vpop.f32.mrb[106].mxu0  ;;  %10325 = vmatprep.mubr.bf16.mxu0 %v3198_v18  ;;  %v2925_v28 = vpop.xlane.xlu1 %2924  ;;  %3106 = vadd.xlane.f32.xlu0 %v13491_v21 }
 0x531   : > { %v11031_v23 = vpop.eup %11030  ;;  %11040 = vrcp.f32 %v2925_v28  ;;  %v13581_v50 = vpop.f32.mrb[107].mxu0  ;;  %10326 = vmatmul.mubr.bf16.gmra.mrb[156].mxu0 %v3199_v27 }
 0x532   : > { %17595 = vst [vmem:[#allocation50_spill] sm:$0xff] %v13581_v50  ;;  %v13583_v48 = vpop.f32.mrb[104].mxu1  ;;  %v13590_v20 = vmul.f32 %v11031_v23, %v13469_v11  ;;  %v2927_v18 = vpop.xlane.xlu0 %2926  ;;  %3116 = vadd.xlane.f32.xlu1 %v13499_v0 }
 0x533   : > { %v13592_v62 = vpop.f32.mrb[105].mxu1  ;;  %v11033_v28 = vpop.eup %11032  ;;  %11042 = vrcp.f32 %v2927_v18 }
 0x534   : > { %v13595_v21 = vpop.f32.mrb[106].mxu1  ;;  %v2957_v53 = vpop.xlane.xlu1 %2956  ;;  %v13604_v23 = vmul.f32 %v11033_v28, %v13479_v32  ;;  %3118 = vadd.xlane.f32.xlu0 %v13501_v24 }
 0x535   : > { %v13601_v6 = vpop.f32.mrb[107].mxu1  ;;  %v11035_v11 = vpop.eup %11034  ;;  %11044 = vrcp.f32 %v2957_v53 }
 0x536   : > { %v13608_v0 = vmul.f32 %v11035_v11, %v13489_v31  ;;  %v2959_v18 = vpop.xlane.xlu0 %2958  ;;  %3112 = vadd.xlane.f32.xlu1 %v13508_v56  ;;  %v17603_v31 = vld [vmem:[#allocation17_spill] sm:$0xff] }
 0x537   : > { %v11037_v50 = vpop.eup %11036  ;;  %11046 = vrcp.f32 %v2959_v18 }
 0x538   : > { %v13612_v45 = vmul.f32 %v11037_v50, %v13463_v60  ;;  %v2921_v27 = vpop.xlane.xlu1 %2920  ;;  %3114 = vadd.xlane.f32.xlu0 %v13511_v17 }
 0x539   : > { %v11039_v4 = vpop.eup %11038  ;;  %11048 = vrcp.f32 %v2921_v27 }
 0x53a   : > { %v13620_v24 = vmul.f32 %v11039_v4, %v13477_v30  ;;  %v2923_v53 = vpop.xlane.xlu0 %2922  ;;  %3124 = vadd.xlane.f32.xlu1 %v13523_v44 }
 0x53b   : > { %v11041_v28 = vpop.eup %11040  ;;  %11050 = vrcp.f32 %v2923_v53  ;;  %v13627_v17 = vpop.f32.mrb[108].mxu0 }
 0x53c   : > { %v2953_v56 = vpop.xlane.xlu1 %2952  ;;  %17596 = vst [vmem:[#allocation5_spill] sm:$0xff] %v13627_v17  ;;  %v13630_v11 = vmul.f32 %v11041_v28, %v13515_v9  ;;  %3126 = vadd.xlane.f32.xlu0 %v13529_v46  ;;  %v13633_v30 = vpop.f32.mrb[109].mxu0  ;;  %v4237_v17 = vlaneseq }
 0x53d   : > { %v11043_v27 = vpop.eup %11042  ;;  %11052 = vrcp.f32 %v2953_v56  ;;  %17597 = vst [vmem:[#allocation22_spill] sm:$0xff] %v13633_v30  ;;  %v13638_v18 = vpop.f32.mrb[110].mxu0 }
 0x53e   : > { %v13636_v44 = vmul.f32 %v11043_v27, %v13525_v33  ;;  %v2955_v4 = vpop.xlane.xlu0 %2954  ;;  %17598 = vst [vmem:[#allocation6_spill] sm:$0xff] %v13638_v18  ;;  %3120 = vadd.xlane.f32.xlu1 %v13543_v12  ;;  %v13641_v60 = vpop.f32.mrb[111].mxu0 }
 0x53f   : > { %v11045_v53 = vpop.eup %11044  ;;  %11054 = vrcp.f32 %v2955_v4  ;;  %17599 = vst [vmem:[#allocation58_spill] sm:$0xff] %v13641_v60  ;;  %v13648_v46 = vpop.f32.mrb[108].mxu1 }
 0x540   : > { %v13644_v9 = vmul.f32 %v11045_v53, %v13536_v19  ;;  %v13646_v28 = vpop.xlane.xlu1 %2932  ;;  %17600 = vst [vmem:[#allocation25_spill] sm:$0xff] %v13648_v46  ;;  %3122 = vadd.xlane.f32.xlu0 %v13547_v29  ;;  %v13651_v33 = vpop.f32.mrb[109].mxu1 }
 0x541   : > { %v11047_v56 = vpop.eup %11046  ;;  %17601 = vst [vmem:[#allocation53_spill] sm:$0xff] %v13651_v33  ;;  %v13662_v53 = vpop.f32.mrb[110].mxu1 }
 0x542   : > { %v13658_v4 = vmul.f32 %v11047_v56, %v13545_v57  ;;  %v13660_v19 = vpop.xlane.xlu0 %2934  ;;  %17602 = vst [vmem:[#allocation51_spill] sm:$0xff] %v13662_v53  ;;  %2968 = vadd.xlane.f32.xlu1 %v17603_v31  ;;  %v13665_v32 = vpop.f32.mrb[111].mxu1  ;;  %v17605_v56 = vld [vmem:[#allocation60_spill] sm:$0xff] }
 0x543   : > { %v11049_v50 = vpop.eup %11048  ;;  %17604 = vst [vmem:[#allocation59_spill] sm:$0xff] %v13665_v32 }
 0x544   : > { %v2965_v46 = vpop.xlane.xlu1 %2964  ;;  %v13672_v57 = vmul.f32 %v11049_v50, %v13520_v8  ;;  %2970 = vadd.xlane.f32.xlu0 %v17605_v56  ;;  %v17607_v56 = vld [vmem:[#allocation19_spill] sm:$0xff] }
 0x545   : > { %v11051_v12 = vpop.eup %11050  ;;  %11056 = vrcp.f32 %v2965_v46 }
 0x546   : > { %v13676_v53 = vmul.f32 %v11051_v12, %v13532_v34  ;;  %v2967_v31 = vpop.xlane.xlu0 %2966  ;;  %3000 = vadd.xlane.f32.xlu1 %v13197_v39  ;;  %v17606_v39 = vld [vmem:[#allocation33_spill] sm:$0xff] }
 0x547   : > { %v11053_v60 = vpop.eup %11052  ;;  %11058 = vrcp.f32 %v2967_v31 }
 0x548   : > { %v13680_v29 = vmul.f32 %v11053_v60, %v13540_v51  ;;  %v13682_v27 = vpop.xlane.xlu1 %2928  ;;  %3002 = vadd.xlane.f32.xlu0 %v13199_v37 }
 0x549   : > { %v11055_v32 = vpop.eup %11054 }
 0x54a   : > { %v13690_v50 = vmul.f32 %v11055_v32, %v13550_v42  ;;  %v13692_v46 = vpop.xlane.xlu0 %2930  ;;  %2972 = vadd.xlane.f32.xlu1 %v17606_v39 }
 0x54b   : > { %v13699_v12 = vpop.f32.mrb[112].mxu0 }
 0x54c   : > { %v2961_v37 = vpop.xlane.xlu1 %2960  ;;  %2974 = vadd.xlane.f32.xlu0 %v17607_v56  ;;  %v13702_v31 = vpop.f32.mrb[113].mxu0 }
 0x54d   : > { %11060 = vrcp.f32 %v2961_v37  ;;  %v13704_v32 = vpop.f32.mrb[114].mxu0 }
 0x54e   : > { %v2963_v42 = vpop.xlane.xlu0 %2962  ;;  %3004 = vadd.xlane.f32.xlu1 %v13202_v61  ;;  %v13707_v39 = vpop.f32.mrb[115].mxu0 }
 0x54f   : > { %v11057_v34 = vpop.eup %11056  ;;  %11062 = vrcp.f32 %v2963_v42  ;;  %v13714_v8 = vpop.f32.mrb[112].mxu1 }
 0x550   : > { %v13710_v51 = vmul.f32 %v11057_v34, %v13583_v48  ;;  %v13712_v60 = vpop.xlane.xlu1 %2940  ;;  %17608 = vst [vmem:[#allocation30_spill] sm:$0xff] %v13714_v8  ;;  %3006 = vadd.xlane.f32.xlu0 %v13193_v47  ;;  %v13717_v56 = vpop.f32.mrb[113].mxu1  ;;  %11064 = vrcp.f32 %v13527_v22 }
 0x551   : > { %v11059_v37 = vpop.eup %11058  ;;  %17609 = vst [vmem:[#allocation45_spill] sm:$0xff] %v13717_v56  ;;  %v13725_v30 = vpop.f32.mrb[114].mxu1  ;;  %11066 = vrcp.f32 %v13534_v58 }
 0x552   : > { %v13723_v42 = vpop.xlane.xlu0 %2942  ;;  %17611 = vst [vmem:[#allocation11_spill] sm:$0xff] %v13725_v30  ;;  %v13728_v48 = vmul.f32 %v11059_v37, %v13595_v21  ;;  %3032 = vadd.xlane.f32.xlu1 %v13213_v43  ;;  %v13731_v34 = vpop.f32.mrb[115].mxu1  ;;  %v11324_v43 = vmov 1983009808  }
 0x553   : > { %17610 = vst [vmem:[#allocation14_spill] sm:$0xff] %v13723_v42  ;;  %17612 = vst [vmem:[#allocation38_spill] sm:$0xff] %v13731_v34  ;;  %v4235_v18 = vunpack.c.l.s4 %v11324_v43 }
 0x554   : > { %v13734_v47 = vpop.xlane.xlu1 %2936  ;;  %3034 = vadd.xlane.f32.xlu0 %v13216_v15 }
 0x555   : > { %17613 = vst [vmem:[#allocation70_spill] sm:$0xff] %v13734_v47  ;;  %v4236_v42 = vunpack.c.0.s8 %v4235_v18 }
 0x556   : > { %v13742_v21 = vpop.xlane.xlu0 %2938  ;;  %3064 = vadd.xlane.f32.xlu1 %v13433_v35 }
 0x557   : > { %17614 = vst [vmem:[#allocation74_spill] sm:$0xff] %v13742_v21  ;;  %v11061_v37 = vpop.eup %11060  ;;  %v11325_v21 = vmov 1934713408  }
 0x558   : > { %v13746_v22 = vmul.f32 %v11061_v37, %v13592_v62  ;;  %v2981_v47 = vpop.xlane.xlu1 %2980  ;;  %3066 = vadd.xlane.f32.xlu0 %v13435_v14  ;;  %v4299_v35 = vunpack.c.l.s4 %v11325_v21  ;;  %v4238_v62 = vshrl.u32 %v4237_v17, 7 }
 0x559   : > { %v11063_v33 = vpop.eup %11062  ;;  %11068 = vrcp.f32 %v2981_v47 }
 0x55a   : > { %v13754_v61 = vmul.f32 %v11063_v33, %v13601_v6  ;;  %v2983_v43 = vpop.xlane.xlu0 %2982  ;;  %3096 = vadd.xlane.f32.xlu1 %v13449_v25  ;;  %v11065_v17 = vpop.eup %11064 }
 0x55b   : > { %11070 = vrcp.f32 %v2983_v43  ;;  %v13764_v6 = vpop.f32.mrb[116].mxu0  ;;  %v11067_v21 = vpop.eup %11066  ;;  %v13774_v43 = vsub.s32 %v4236_v42, %v4238_v62  ;;  %v4122_v58 = vmul.f32 %v11065_v17, %v13475_v52 }
 0x55c   : > { %11072 = vrcp.f32 %v13646_v28  ;;  %v13762_v37 = vpop.xlane.xlu1 %3012  ;;  %3098 = vadd.xlane.f32.xlu0 %v13451_v49  ;;  %v13767_v33 = vpop.f32.mrb[117].mxu0  ;;  %v4300_v28 = vunpack.c.0.s8 %v4299_v35  ;;  %v4123_v35 = vmul.f32 %v11067_v21, %v13485_v5  ;;  %v17620_v5 = vcombine.low %v13258_v26, %v13590_v20 }
 0x55d   : > { %11074 = vrcp.f32 %v13660_v19  ;;  %v13772_v18 = vpop.f32.mrb[118].mxu0 }
 0x55e   : > { %v13770_v25 = vpop.xlane.xlu0 %3014  ;;  %3128 = vadd.xlane.f32.xlu1 %v13559_v41  ;;  %v13777_v47 = vpop.f32.mrb[119].mxu0  ;;  %11076 = vrcp.f32 %v13682_v27  ;;  %v13790_v15 = vsub.s32 %v4300_v28, %v4238_v62  ;;  %v17621_v62 = vld [vmem:[#allocation61_spill] sm:$0xff]  ;;  %v17623_v28 = vcombine.high %v13258_v26, %v13590_v20  ;;  %v17626_v26 = vcombine.low %v13262_v54, %v13620_v24 }
 0x55f   : > { %v13780_v14 = vpop.f32.mrb[116].mxu1 }
 0x560   : > { %v2977_v49 = vpop.xlane.xlu1 %2976  ;;  %17615 = vst [vmem:[#allocation63_spill] sm:$0xff] %v13780_v14  ;;  %3130 = vadd.xlane.f32.xlu0 %v13561_v3  ;;  %v13783_v19 = vpop.f32.mrb[117].mxu1  ;;  %v17619_v3 = vcombine.high %v13248_v63, %v13576_v2  ;;  %v13815_v21 = vrot.slane %v17623_v28, %v13774_v43  ;;  %v13836_v20 = vrot.slane %v17626_v26, %v13774_v43 }
 0x561   : > { %11078 = vrcp.f32 %v2977_v49  ;;  %17616 = vst [vmem:[#allocation76_spill] sm:$0xff] %v13783_v19  ;;  %v13788_v41 = vpop.f32.mrb[118].mxu1  ;;  %v17618_v49 = vcombine.low %v13248_v63, %v13576_v2  ;;  %v17624_v63 = vcombine.low %v13252_v55, %v13612_v45  ;;  %v17627_v28 = vcombine.high %v13262_v54, %v13620_v24 }
 0x562   : > { %11080 = vrcp.f32 %v13692_v46  ;;  %v2979_v42 = vpop.xlane.xlu0 %2978  ;;  %17617 = vst [vmem:[#allocation73_spill] sm:$0xff] %v13788_v41  ;;  %v13800_v52 = vrot.slane %v17619_v3, %v13774_v43  ;;  %v13806_v46 = vrot.slane %v17620_v5, %v13774_v43  ;;  %3036 = vadd.xlane.f32.xlu1 %v17621_v62  ;;  %v13809_v17 = vpop.f32.mrb[119].mxu1  ;;  %v17631_v54 = vcombine.low %v13294_v40, %v13658_v4 }
 0x563   : > { %v11069_v27 = vpop.eup %11068  ;;  %v4512_v14 = vrot.slane %v17618_v49, %v13774_v43  ;;  %11082 = vrcp.f32 %v2979_v42  ;;  %17622 = vst [vmem:[#allocation66_spill] sm:$0xff] %v13809_v17  ;;  %v13821_v2 = vrot.slane %v17624_v63, %v13774_v43  ;;  %v17625_v42 = vcombine.high %v13252_v55, %v13612_v45 }
 0x564   : > { %v4154_v3 = vmul.f32 %v11069_v27, %v13699_v12  ;;  %v13830_v5 = vpop.xlane.xlu1 %3008  ;;  %v13842_v63 = vrot.slane %v17627_v28, %v13774_v43  ;;  %v17628_v55 = vcombine.low %v13286_v16, %v13644_v9  ;;  %v17629_v12 = vcombine.high %v13286_v16, %v13644_v9 }
 0x565   : > { %v13827_v49 = vrot.slane %v17625_v42, %v13774_v43  ;;  %v11071_v62 = vpop.eup %11070  ;;  %v17630_v42 = vld [vmem:[#allocation35_spill] sm:$0xff]  ;;  %v13861_v24 = vrot.slane %v17631_v54, %v13774_v43  ;;  %v17632_v16 = vcombine.high %v13294_v40, %v13658_v4  ;;  %11084 = vrcp.f32 %v13712_v60  ;;  %v17638_v60 = vld [vmem:[#allocation40_spill] sm:$0xff] }
 0x566   : > { %v13848_v45 = vrot.slane %v17628_v55, %v13774_v43  ;;  %v13854_v27 = vrot.slane %v17629_v12, %v13774_v43  ;;  %3038 = vadd.xlane.f32.xlu0 %v17630_v42  ;;  %v11073_v26 = vpop.eup %11072  ;;  %v4520_v28 = vcombine.low %v4122_v58, %v4154_v3  ;;  %v4521_v17 = vcombine.high %v4122_v58, %v4154_v3  ;;  %v13864_v41 = vpop.xlane.xlu0 %3010 }
 0x567   : > { %v4155_v55 = vmul.f32 %v11071_v62, %v13704_v32  ;;  %v13870_v9 = vrot.slane %v17632_v16, %v13774_v43  ;;  %v17633_v12 = vcombine.low %v13291_v38, %v13680_v29  ;;  %v17634_v58 = vcombine.high %v13291_v38, %v13680_v29  ;;  %v17635_v32 = vld [vmem:[#allocation15_spill] sm:$0xff]  ;;  %v11075_v62 = vpop.eup %11074 }
 0x568   : > { %3068 = vadd.xlane.f32.xlu1 %v17635_v32  ;;  %v4528_v40 = vrot.slane %v4520_v28, %v13774_v43  ;;  %v4535_v4 = vrot.slane %v4521_v17, %v13774_v43  ;;  %v2989_v19 = vpop.xlane.xlu1 %2988  ;;  %v17637_v38 = vcombine.high %v13300_v7, %v13690_v50  ;;  %v17639_v17 = vld [vmem:[#allocation43_spill] sm:$0xff] }
 0x569   : > { %v13876_v42 = vrot.slane %v17633_v12, %v13774_v43  ;;  %v13882_v3 = vrot.slane %v17634_v58, %v13774_v43  ;;  %v4656_v54 = vcombine.low %v4123_v35, %v4155_v55  ;;  %v4657_v16 = vcombine.high %v4123_v35, %v4155_v55  ;;  %v11077_v35 = vpop.eup %11076 }
 0x56a   : > { %v17636_v12 = vcombine.low %v13300_v7, %v13690_v50  ;;  %v13898_v29 = vrot.slane %v17637_v38, %v13774_v43  ;;  %v13901_v58 = vmul.f32 %v11073_v26, %v17638_v60  ;;  %11086 = vrcp.f32 %v2989_v19  ;;  %3070 = vadd.xlane.f32.xlu0 %v17639_v17  ;;  %v2991_v30 = vpop.xlane.xlu0 %2990  ;;  %v17640_v50 = vld [vmem:[#allocation48_spill] sm:$0xff]  ;;  %v17643_v17 = vld [vmem:[#allocation10_spill] sm:$0xff] }
 0x56b   : > { %v4568_v28 = vcombine.low %v4512_v14, %v4528_v40  ;;  %v4569_v55 = vcombine.high %v4512_v14, %v4528_v40  ;;  %v4584_v32 = vcombine.low %v13800_v52, %v4535_v4  ;;  %v11079_v56 = vpop.eup %11078  ;;  %v4664_v8 = vrot.slane %v4656_v54, %v13774_v43 }
 0x56c   : > { %v13892_v34 = vrot.slane %v17636_v12, %v13774_v43  ;;  %v4585_v12 = vcombine.high %v13800_v52, %v4535_v4  ;;  %v13908_v7 = vrot.slane %v4657_v16, %v13774_v43  ;;  %11088 = vrcp.f32 %v2991_v30  ;;  %3100 = vadd.xlane.f32.xlu1 %v17640_v50  ;;  %v11081_v26 = vpop.eup %11080  ;;  %v13921_v4 = vpop.xlane.xlu1 %3020  ;;  %v17646_v50 = vld [vmem:[#allocation34_spill] sm:$0xff] }
 0x56d   : > { %v13912_v19 = vmul.f32 %v11075_v62, %v13578_v10  ;;  %v17641_v14 = vcombine.low %v13312_v13, %v13710_v51  ;;  %v4152_v52 = vmul.f32 %v11079_v56, %v13702_v31  ;;  %17642 = vst [vmem:[#allocation126_spill] sm:$0xff] %v13921_v4  ;;  %v4576_v54 = vrot.slane %v4568_v28, %v13790_v15  ;;  %v11083_v16 = vpop.eup %11082 }
 0x56e   : > { %v4583_v30 = vrot.slane %v4569_v55, %v13790_v15  ;;  %v4704_v38 = vcombine.low %v13806_v46, %v4664_v8  ;;  %v4705_v10 = vcombine.high %v13806_v46, %v4664_v8  ;;  %v4720_v62 = vcombine.low %v13815_v21, %v13908_v7  ;;  %3102 = vadd.xlane.f32.xlu0 %v17643_v17  ;;  %v13941_v46 = vpop.xlane.xlu0 %3022  ;;  %v17648_v17 = vld [vmem:[#allocation62_spill] sm:$0xff] }
 0x56f   : > { %v13918_v40 = vrot.slane %v17641_v14, %v13774_v43  ;;  %v4721_v60 = vcombine.high %v13815_v21, %v13908_v7  ;;  %v17644_v31 = vcombine.high %v13312_v13, %v13710_v51  ;;  %v4248_v28 = vcombine.low %v13604_v23, %v4152_v52  ;;  %17645 = vst [vmem:[#allocation67_spill] sm:$0xff] %v13941_v46  ;;  %v17647_v21 = vld [vmem:[#allocation50_spill] sm:$0xff] }
 0x570   : > { %v4249_v55 = vcombine.high %v13604_v23, %v4152_v52  ;;  %v4153_v8 = vmul.f32 %v11083_v16, %v13707_v39  ;;  %v13944_v14 = vmul.f32 %v11077_v35, %v17646_v50  ;;  %v13947_v7 = vmul.f32 %v11081_v26, %v17647_v21  ;;  %3132 = vadd.xlane.f32.xlu1 %v17648_v17  ;;  %v2985_v52 = vpop.xlane.xlu1 %2984  ;;  %v13960_v16 = vpop.eup %11084  ;;  %v17650_v26 = vld [vmem:[#allocation27_spill] sm:$0xff] }
 0x571   : > { %v13936_v56 = vrot.slane %v17644_v31, %v13774_v43  ;;  %v4592_v13 = vrot.slane %v4584_v32, %v13790_v15  ;;  %v4599_v51 = vrot.slane %v4585_v12, %v13790_v15  ;;  %v13953_v31 = vrot.slane %v4248_v28, %v13774_v43  ;;  %17649 = vst [vmem:[#allocation65_spill] sm:$0xff] %v13960_v16 }
 0x572   : > { %v13956_v23 = vrot.slane %v4249_v55, %v13774_v43  ;;  %v4384_v39 = vcombine.low %v13608_v0, %v4153_v8  ;;  %v4385_v35 = vcombine.high %v13608_v0, %v4153_v8  ;;  %11090 = vrcp.f32 %v2985_v52  ;;  %3134 = vadd.xlane.f32.xlu0 %v17650_v26  ;;  %v2987_v21 = vpop.xlane.xlu0 %2986 }
 0x573   : > { %v13964_v32 = vrot.slane %v4704_v38, %v13790_v15  ;;  %v13967_v12 = vrot.slane %v4705_v10, %v13790_v15  ;;  %v9537_v28 = vcombine.low %v4576_v54, %v4583_v30  ;;  %11092 = vrcp.f32 %v2987_v21 }
 0x574   : > { %v11087_v17 = vpop.eup %11086  ;;  %v13978_v38 = vrot.slane %v4384_v39, %v13774_v43  ;;  %v13981_v10 = vrot.slane %v4385_v35, %v13774_v43  ;;  %v13987_v50 = vpop.xlane.xlu1 %3016  ;;  %v9539_v0 = vcombine.high %v4576_v54, %v4583_v30  ;;  %v9541_v55 = vcombine.low %v4592_v13, %v4599_v51 }
 0x575   : > { %v13984_v52 = vrot.slane %v9537_v28, %v13774_v43  ;;  %v4158_v26 = vmul.f32 %v11087_v17, %v13764_v6  ;;  %17651 = vst [vmem:[#allocation80_spill] sm:$0xff] %v13987_v50  ;;  %v9543_v16 = vcombine.high %v4592_v13, %v4599_v51  ;;  %v14003_v13 = vrot.slane %v4720_v62, %v13790_v15 }
 0x576   : > { %v11089_v8 = vpop.eup %11088  ;;  %v14000_v30 = vpop.xlane.xlu0 %3018  ;;  %v14006_v51 = vrot.slane %v4721_v60, %v13790_v15  ;;  %v14009_v17 = vrot.slane %v9539_v0, %v13774_v43  ;;  %v14012_v35 = vrot.slane %v9541_v55, %v13774_v43 }
 0x577   : > { %v5064_v6 = vcombine.low %v13630_v11, %v4158_v26  ;;  %v5065_v21 = vcombine.high %v13630_v11, %v4158_v26  ;;  %v4159_v54 = vmul.f32 %v11089_v8, %v13772_v18  ;;  %17652 = vst [vmem:[#allocation84_spill] sm:$0xff] %v14000_v30  ;;  %v14015_v28 = vrot.slane %v9543_v16, %v13774_v43  ;;  %v10195_v8 = vpop.f32.mrb[120].mxu0 }
 0x578   : > { %v2997_v26 = vpop.xlane.xlu1 %2996  ;;  %v14025_v0 = vpop.f32.mrb[121].mxu0  ;;  %v6745_v55 = vcombine.high %v13984_v52, %v14009_v17 }
 0x579   : > { %v14018_v11 = vrot.slane %v5064_v6, %v13774_v43  ;;  %v14021_v18 = vrot.slane %v5065_v21, %v13774_v43  ;;  %v5200_v62 = vcombine.low %v13636_v44, %v4159_v54  ;;  %v5201_v60 = vcombine.high %v13636_v44, %v4159_v54  ;;  %v10196_v46 = vpop.f32.mrb[122].mxu0 }
 0x57a   : > { %11094 = vrcp.f32 %v2997_v26  ;;  %v6777_v16 = vcombine.high %v14012_v35, %v14015_v28  ;;  %v9545_v6 = vcombine.low %v13964_v32, %v13967_v12  ;;  %v2999_v39 = vpop.xlane.xlu0 %2998  ;;  %v14047_v21 = vpop.f32.mrb[123].mxu0  ;;  %v14050_v44 = vrot.slane %v6745_v55, %v13790_v15 }
 0x57b   : > { %17653 = vst [vmem:[#allocation71_spill] sm:$0xff] %v14018_v11  ;;  %17654 = vst [vmem:[#allocation86_spill] sm:$0xff] %v14021_v18  ;;  %v14042_v50 = vrot.slane %v5200_v62, %v13774_v43  ;;  %v14045_v4 = vrot.slane %v5201_v60, %v13774_v43  ;;  %11096 = vrcp.f32 %v2999_v39  ;;  %v14053_v11 = vpop.f32.mrb[120].mxu1  ;;  %v9547_v39 = vcombine.high %v13964_v32, %v13967_v12 }
 0x57c   : > { %v11091_v30 = vpop.eup %11090  ;;  %17656 = vst [vmem:[#allocation75_spill] sm:$0xff] %v14053_v11  ;;  %v14055_v26 = vpop.xlane.xlu1 %3028  ;;  %v14058_v18 = vrot.slane %v6777_v16, %v13790_v15  ;;  %v14061_v62 = vrot.slane %v9545_v6, %v13774_v43  ;;  %v17659_v12 = vcombine.low %v13318_v1, %v13728_v48  ;;  %v17662_v16 = vcombine.high %v13318_v1, %v13728_v48 }
 0x57d   : > { %17655 = vst [vmem:[#allocation83_spill] sm:$0xff] %v14045_v4  ;;  %v4156_v54 = vmul.f32 %v11091_v30, %v13767_v33  ;;  %17657 = vst [vmem:[#allocation77_spill] sm:$0xff] %v14055_v26  ;;  %v11093_v60 = vpop.eup %11092  ;;  %v14073_v11 = vpop.f32.mrb[121].mxu1 }
 0x57e   : > { %17658 = vst [vmem:[#allocation41_spill] sm:$0xff] %v14073_v11  ;;  %v4157_v32 = vmul.f32 %v11093_v60, %v13777_v47  ;;  %v14082_v55 = vrot.slane %v17659_v12, %v13774_v43  ;;  %v14084_v33 = vpop.xlane.xlu0 %3030  ;;  %v14086_v30 = vpop.f32.mrb[122].mxu1  ;;  %v14092_v11 = vrot.slane %v17662_v16, %v13774_v43  ;;  %v6840_v47 = vrot.slane %v9547_v39, %v13774_v43 }
 0x57f   : > { %v4792_v6 = vcombine.low %v13672_v57, %v4156_v54  ;;  %v4793_v26 = vcombine.high %v13672_v57, %v4156_v54  ;;  %17660 = vst [vmem:[#allocation72_spill] sm:$0xff] %v14084_v33  ;;  %17661 = vst [vmem:[#allocation20_spill] sm:$0xff] %v14086_v30  ;;  %v14094_v4 = vpop.f32.mrb[123].mxu1  ;;  %v9549_v54 = vcombine.low %v14003_v13, %v14006_v51 }
 0x580   : > { %17663 = vst [vmem:[#allocation46_spill] sm:$0xff] %v14094_v4  ;;  %v4928_v1 = vcombine.low %v13676_v53, %v4157_v32  ;;  %v4929_v48 = vcombine.high %v13676_v53, %v4157_v32  ;;  %v2993_v16 = vpop.xlane.xlu1 %2992  ;;  %v9551_v39 = vcombine.high %v14003_v13, %v14006_v51  ;;  %v6881_v57 = vcombine.high %v14061_v62, %v6840_v47 }
 0x581   : > { %v14102_v60 = vrot.slane %v4792_v6, %v13774_v43  ;;  %v14105_v12 = vrot.slane %v4793_v26, %v13774_v43  ;;  %v14110_v4 = vrot.slane %v9549_v54, %v13774_v43  ;;  %11098 = vrcp.f32 %v2993_v16 }
 0x582   : > { %v2995_v32 = vpop.xlane.xlu0 %2994  ;;  %v17665_v13 = vcombine.low %v13314_v59, %v13746_v22  ;;  %v14130_v16 = vrot.slane %v4928_v1, %v13774_v43  ;;  %v14133_v6 = vrot.slane %v4929_v48, %v13774_v43  ;;  %v14136_v26 = vrot.slane %v9551_v39, %v13774_v43 }
 0x583   : > { %17664 = vst [vmem:[#allocation44_spill] sm:$0xff] %v14105_v12  ;;  %11100 = vrcp.f32 %v2995_v32  ;;  %v6811_v53 = vcombine.high %v14050_v44, %v14058_v18  ;;  %v6895_v48 = vrot.slane %v6881_v57, %v13790_v15  ;;  %v6776_v39 = vcombine.low %v14012_v35, %v14015_v28 }
 0x584   : > { %v11095_v54 = vpop.eup %11094  ;;  %v14127_v51 = vrot.slane %v17665_v13, %v13774_v43  ;;  %v14140_v33 = vpop.xlane.xlu1 %3024  ;;  %v6744_v13 = vcombine.low %v13984_v52, %v14009_v17  ;;  %v6913_v52 = vcombine.high %v14110_v4, %v14136_v26  ;;  %11102 = vrcp.f32 %v13762_v37 }
 0x585   : > { %v4162_v30 = vmul.f32 %v11095_v54, %v10195_v8  ;;  %17666 = vst [vmem:[#allocation26_spill] sm:$0xff] %v14140_v33  ;;  %v11097_v12 = vpop.eup %11096  ;;  %v6880_v1 = vcombine.low %v14061_v62, %v6840_v47  ;;  %v17667_v37 = vcombine.high %v13314_v59, %v13746_v22  ;;  %11104 = vrcp.f32 %v13770_v25 }
 0x586   : > { %v4163_v33 = vmul.f32 %v11097_v12, %v10196_v46  ;;  %v14156_v17 = vpop.xlane.xlu0 %3026  ;;  %v6927_v35 = vrot.slane %v6913_v52, %v13790_v15  ;;  %v14182_v28 = vrot.slane %v6744_v13, %v13790_v15  ;;  %v6912_v59 = vcombine.low %v14110_v4, %v14136_v26 }
 0x587   : > { %v5608_v32 = vcombine.low %v13901_v58, %v4162_v30  ;;  %v5609_v54 = vcombine.high %v13901_v58, %v4162_v30  ;;  %v14177_v57 = vrot.slane %v17667_v37, %v13774_v43  ;;  %11106 = vrcp.f32 %v13830_v5 }
 0x588   : > { %v5744_v46 = vcombine.low %v13912_v19, %v4163_v33  ;;  %v5745_v30 = vcombine.high %v13912_v19, %v4163_v33  ;;  %v14171_v12 = vpop.xlane.xlu1 %3044  ;;  %17668 = vst [vmem:[#allocation23_spill] sm:$0xff] %v14182_v28  ;;  %v6947_v37 = vcombine.high %v6895_v48, %v6927_v35  ;;  %v14201_v19 = vrot.slane %v6880_v1, %v13790_v15 }
 0x589   : > { %v14164_v8 = vrot.slane %v5608_v32, %v13774_v43  ;;  %v14167_v58 = vrot.slane %v5609_v54, %v13774_v43  ;;  %v6946_v32 = vcombine.low %v6895_v48, %v6927_v35  ;;  %v14197_v54 = vrot.slane %v6776_v39, %v13790_v15 }
 0x58a   : > { %v14192_v22 = vpop.xlane.xlu0 %3046  ;;  %v5752_v47 = vrot.slane %v5744_v46, %v13774_v43  ;;  %v5759_v13 = vrot.slane %v5745_v30, %v13774_v43  ;;  %17671 = vst [vmem:[#allocation31_spill] sm:$0xff] %v14201_v19  ;;  %v10422_v4 = vpack.i.bf16 %v6947_v37, %v6811_v53  ;;  %v14239_v53 = vrot.slane %v6912_v59, %v13790_v15 }
 0x58b   : > { %17669 = vst [vmem:[#allocation28_spill] sm:$0xff] %v14192_v22  ;;  %v11099_v25 = vpop.eup %11098  ;;  %17670 = vst [vmem:[#allocation42_spill] sm:$0xff] %v14197_v54  ;;  %11108 = vrcp.f32 %v13864_v41 }
 0x58c   : > { %v4160_v52 = vmul.f32 %v11099_v25, %v14025_v0  ;;  %v14205_v33 = vpop.xlane.xlu1 %3076  ;;  %v5792_v62 = vcombine.low %v14082_v55, %v5752_v47  ;;  %v5793_v46 = vcombine.high %v14082_v55, %v5752_v47  ;;  %v5808_v30 = vcombine.low %v14092_v11, %v5759_v13  ;;  %17673 = vst [vmem:[#allocation39_spill] sm:$0xff] %v14239_v53 }
 0x58d   : > { %v5809_v39 = vcombine.high %v14092_v11, %v5759_v13  ;;  %v11101_v22 = vpop.eup %11100  ;;  %v17672_v0 = vcombine.low %v14050_v44, %v14058_v18 }
 0x58e   : > { %v5336_v1 = vcombine.low %v13944_v14, %v4160_v52  ;;  %v5337_v35 = vcombine.high %v13944_v14, %v4160_v52  ;;  %v14216_v26 = vpop.xlane.xlu0 %3078  ;;  %v14219_v25 = vrot.slane %v5792_v62, %v13790_v15  ;;  %v14222_v55 = vrot.slane %v5793_v46, %v13790_v15 }
 0x58f   : > { %v10417_v48 = vpack.i.bf16 %v6946_v32, %v17672_v0  ;;  %v14225_v11 = vrot.slane %v5808_v30, %v13790_v15  ;;  %v14228_v47 = vrot.slane %v5809_v39, %v13790_v15  ;;  %v4161_v44 = vmul.f32 %v11101_v22, %v14047_v21  ;;  %v14241_v62 = vpop.f32.mrb[124].mxu0  ;;  %v14245_v32 = vpop.eup %11102 }
 0x590   : > { %v14232_v18 = vrot.slane %v5336_v1, %v13774_v43  ;;  %v14235_v14 = vrot.slane %v5337_v35, %v13774_v43  ;;  %17674 = vst [vmem:[#allocation64_spill] sm:$0xff] %v14241_v62  ;;  %v14243_v13 = vpop.xlane.xlu1 %3040  ;;  %v14255_v59 = vpop.f32.mrb[125].mxu0  ;;  %v17679_v21 = vcombine.low %v13322_v36, %v13754_v61  ;;  %v17680_v30 = vcombine.high %v13322_v36, %v13754_v61 }
 0x591   : > { %10418 = vrot.lane.b32.xlu1 %v10417_v48, %s11322_s8  ;;  %17675 = vst [vmem:[#allocation85_spill] sm:$0xff] %v14243_v13  ;;  %17676 = vst [vmem:[#allocation93_spill] sm:$0xff] %v14255_v59  ;;  %v14267_v1 = vpop.f32.mrb[126].mxu0  ;;  %v14269_v35 = vpop.eup %11104  ;;  %v6809_v0 = vcombine.high %v14182_v28, %v14197_v54  ;;  %v5472_v37 = vcombine.low %v13947_v7, %v4161_v44  ;;  %v5473_v52 = vcombine.high %v13947_v7, %v4161_v44 }
 0x592   : > { %v14265_v48 = vpop.xlane.xlu0 %3042  ;;  %17678 = vst [vmem:[#allocation82_spill] sm:$0xff] %v14267_v1  ;;  %v14275_v22 = vrot.slane %v17679_v21, %v13774_v43  ;;  %v14281_v39 = vrot.slane %v17680_v30, %v13774_v43  ;;  %v14286_v46 = vpop.f32.mrb[127].mxu0  ;;  %v6945_v21 = vcombine.high %v14201_v19, %v14239_v53  ;;  %v17682_v36 = vcombine.low %v13821_v2, %v13953_v31 }
 0x593   : > { %17677 = vst [vmem:[#allocation24_spill] sm:$0xff] %v14265_v48  ;;  %17681 = vst [vmem:[#allocation81_spill] sm:$0xff] %v14286_v46  ;;  %v14297_v5 = vpop.f32.mrb[124].mxu1  ;;  %v17684_v28 = vcombine.high %v13821_v2, %v13953_v31  ;;  %v17685_v7 = vcombine.low %v13827_v49, %v13956_v23  ;;  %v17686_v44 = vcombine.high %v13827_v49, %v13956_v23 }
 0x594   : > { %v4304_v61 = vrot.slane %v17682_v36, %v13790_v15  ;;  %17683 = vst [vmem:[#allocation29_spill] sm:$0xff] %v14297_v5  ;;  %v14299_v30 = vpop.xlane.xlu1 %3072  ;;  %v17687_v36 = vcombine.low %v13836_v20, %v13978_v38  ;;  %v14317_v5 = vpop.f32.mrb[125].mxu1  ;;  %v14320_v2 = vrot.slane %v5472_v37, %v13774_v43  ;;  %v14323_v31 = vrot.slane %v5473_v52, %v13774_v43 }
 0x595   : > { %10423 = vrot.lane.b32.xlu1 %v10422_v4, %s11321_s7  ;;  %v4311_v54 = vrot.slane %v17684_v28, %v13790_v15  ;;  %v4320_v4 = vrot.slane %v17685_v7, %v13790_v15  ;;  %v4327_v19 = vrot.slane %v17686_v44, %v13790_v15  ;;  %17688 = vst [vmem:[#allocation87_spill] sm:$0xff] %v14317_v5  ;;  %v14331_v44 = vpop.f32.mrb[126].mxu1 }
 0x596   : > { %v4440_v53 = vrot.slane %v17687_v36, %v13790_v15  ;;  %v10412_v28 = vpack.i.bf16 %v6945_v21, %v6809_v0  ;;  %v17689_v7 = vcombine.high %v13836_v20, %v13978_v38  ;;  %v14329_v23 = vpop.xlane.xlu0 %3074  ;;  %17690 = vst [vmem:[#allocation69_spill] sm:$0xff] %v14331_v44  ;;  %v17691_v36 = vcombine.low %v13842_v63, %v13981_v10  ;;  %v14341_v1 = vpop.f32.mrb[127].mxu1 }
 0x597   : > { %v17692_v52 = vcombine.high %v13842_v63, %v13981_v10  ;;  %v9521_v0 = vcombine.low %v4304_v61, %v4311_v54  ;;  %v9523_v21 = vcombine.high %v4304_v61, %v4311_v54  ;;  %17693 = vst [vmem:[#allocation68_spill] sm:$0xff] %v14341_v1  ;;  %v9525_v61 = vcombine.low %v4320_v4, %v4327_v19 }
 0x598   : > { %v4447_v49 = vrot.slane %v17689_v7, %v13790_v15  ;;  %v4456_v5 = vrot.slane %v17691_v36, %v13790_v15  ;;  %10413 = vrot.lane.b32.xlu0 %v10412_v28, %s11323_s10  ;;  %v14352_v63 = vpop.xlane.xlu1 %3052 }
 0x599   : > { %v4463_v37 = vrot.slane %v17692_v52, %v13790_v15  ;;  %17694 = vst [vmem:[#allocation100_spill] sm:$0xff] %v14352_v63  ;;  %v6416_v10 = vrot.slane %v9521_v0, %v13774_v43  ;;  %v6432_v54 = vrot.slane %v9523_v21, %v13774_v43  ;;  %v9527_v52 = vcombine.high %v4320_v4, %v4327_v19  ;;  %v17696_v4 = vld [vmem:[#allocation126_spill] sm:$0xff] }
 0x59a   : > { %v9529_v20 = vcombine.low %v4440_v53, %v4447_v49  ;;  %v9531_v1 = vcombine.high %v4440_v53, %v4447_v49  ;;  %v14356_v62 = vpop.xlane.xlu0 %3054  ;;  %v6448_v36 = vrot.slane %v9525_v61, %v13774_v43  ;;  %11110 = vrcp.f32 %v17696_v4 }
 0x59b   : > { %v9533_v44 = vcombine.low %v4456_v5, %v4463_v37  ;;  %v9535_v38 = vcombine.high %v4456_v5, %v4463_v37  ;;  %17695 = vst [vmem:[#allocation98_spill] sm:$0xff] %v14356_v62  ;;  %v6464_v28 = vrot.slane %v9527_v52, %v13774_v43  ;;  %v6472_v7 = vcombine.low %v6416_v10, %v6432_v54  ;;  %v14367_v5 = vpop.eup %11106 }
 0x59c   : > { %v6552_v46 = vrot.slane %v9529_v20, %v13774_v43  ;;  %v6568_v0 = vrot.slane %v9531_v1, %v13774_v43  ;;  %v14365_v53 = vpop.xlane.xlu1 %3084  ;;  %v6473_v37 = vcombine.high %v6416_v10, %v6432_v54  ;;  %v17703_v54 = vld [vmem:[#allocation80_spill] sm:$0xff] }
 0x59d   : > { %v6584_v21 = vrot.slane %v9533_v44, %v13774_v43  ;;  %v6600_v19 = vrot.slane %v9535_v38, %v13774_v43  ;;  %v14371_v41 = vrot.slane %v6472_v7, %v13790_v15  ;;  %v6504_v49 = vcombine.low %v6448_v36, %v6464_v28  ;;  %v17698_v44 = vld [vmem:[#allocation67_spill] sm:$0xff] }
 0x59e   : > { %v6608_v61 = vcombine.low %v6552_v46, %v6568_v0  ;;  %v6505_v20 = vcombine.high %v6448_v36, %v6464_v28  ;;  %v6609_v62 = vcombine.high %v6552_v46, %v6568_v0  ;;  %v14373_v1 = vpop.xlane.xlu0 %3086  ;;  %11112 = vrcp.f32 %v17698_v44 }
 0x59f   : > { %17697 = vst [vmem:[#allocation96_spill] sm:$0xff] %v14371_v41  ;;  %v6640_v52 = vcombine.low %v6584_v21, %v6600_v19  ;;  %v14377_v38 = vrot.slane %v6504_v49, %v13790_v15  ;;  %v6487_v59 = vrot.slane %v6473_v37, %v13790_v15  ;;  %v6641_v63 = vcombine.high %v6584_v21, %v6600_v19  ;;  %v17704_v21 = vld [vmem:[#allocation71_spill] sm:$0xff] }
 0x5a0   : > { %v14381_v4 = vrot.slane %v6608_v61, %v13790_v15  ;;  %v6519_v10 = vrot.slane %v6505_v20, %v13790_v15  ;;  %v6623_v46 = vrot.slane %v6609_v62, %v13790_v15  ;;  %v14388_v36 = vpop.xlane.xlu1 %3048  ;;  %11114 = vrcp.f32 %v17703_v54 }
 0x5a1   : > { %17699 = vst [vmem:[#allocation92_spill] sm:$0xff] %v14377_v38  ;;  %v14384_v7 = vrot.slane %v6640_v52, %v13790_v15  ;;  %17702 = vst [vmem:[#allocation90_spill] sm:$0xff] %v14388_v36  ;;  %v6537_v28 = vcombine.high %v14371_v41, %v14377_v38  ;;  %v6655_v0 = vrot.slane %v6641_v63, %v13790_v15  ;;  %v17708_v63 = vld [vmem:[#allocation86_spill] sm:$0xff] }
 0x5a2   : > { %17700 = vst [vmem:[#allocation102_spill] sm:$0xff] %v14381_v4  ;;  %v17705_v19 = vcombine.low %v13848_v45, %v17704_v21  ;;  %v6539_v61 = vcombine.high %v6487_v59, %v6519_v10  ;;  %v6538_v52 = vcombine.low %v6487_v59, %v6519_v10  ;;  %v17706_v62 = vcombine.high %v13848_v45, %v17704_v21  ;;  %v14404_v44 = vpop.xlane.xlu0 %3050  ;;  %v17713_v21 = vld [vmem:[#allocation83_spill] sm:$0xff] }
 0x5a3   : > { %17701 = vst [vmem:[#allocation91_spill] sm:$0xff] %v14384_v7  ;;  %v6673_v37 = vcombine.high %v14381_v4, %v14384_v7  ;;  %17707 = vst [vmem:[#allocation18_spill] sm:$0xff] %v14404_v44  ;;  %v6675_v54 = vcombine.high %v6623_v46, %v6655_v0  ;;  %v6674_v41 = vcombine.low %v6623_v46, %v6655_v0 }
 0x5a4   : > { %v5120_v49 = vrot.slane %v17705_v19, %v13790_v15  ;;  %v5127_v20 = vrot.slane %v17706_v62, %v13790_v15  ;;  %v17709_v38 = vcombine.low %v13854_v27, %v17708_v63  ;;  %v17710_v19 = vcombine.high %v13854_v27, %v17708_v63  ;;  %v14426_v7 = vpop.xlane.xlu1 %3080  ;;  %v14428_v27 = vpop.eup %11108 }
 0x5a5   : > { %v10427_v59 = vpack.i.bf16 %v6673_v37, %v6537_v28  ;;  %v17711_v45 = vcombine.low %v13861_v24, %v14042_v50  ;;  %v17712_v46 = vcombine.high %v13861_v24, %v14042_v50  ;;  %17715 = vst [vmem:[#allocation37_spill] sm:$0xff] %v14428_v27  ;;  %v10437_v28 = vpack.i.bf16 %v6675_v54, %v6539_v61 }
 0x5a6   : > { %v5136_v36 = vrot.slane %v17709_v38, %v13790_v15  ;;  %v5143_v4 = vrot.slane %v17710_v19, %v13790_v15  ;;  %v17714_v38 = vcombine.low %v13870_v9, %v17713_v21  ;;  %v10432_v37 = vpack.i.bf16 %v6674_v41, %v6538_v52  ;;  %v14435_v48 = vpop.xlane.xlu0 %3082 }
 0x5a7   : > { %v5256_v10 = vrot.slane %v17711_v45, %v13790_v15  ;;  %v5263_v0 = vrot.slane %v17712_v46, %v13790_v15  ;;  %v17716_v63 = vcombine.high %v13870_v9, %v17713_v21  ;;  %v9569_v45 = vcombine.low %v5120_v49, %v5127_v20  ;;  %10428 = vrot.lane.b32.xlu1 %v10427_v59, %s11323_s10 }
 0x5a8   : > { %v5272_v62 = vrot.slane %v17714_v38, %v13790_v15  ;;  %v9571_v24 = vcombine.high %v5120_v49, %v5127_v20  ;;  %v9573_v50 = vcombine.low %v5136_v36, %v5143_v4  ;;  %v9575_v46 = vcombine.high %v5136_v36, %v5143_v4  ;;  %v14437_v38 = vpop.eup %11110  ;;  %10438 = vrot.lane.b32.xlu0 %v10437_v28, %s11321_s7  ;;  %v14445_v36 = vpop.f32.mrb[128].mxu0  ;;  %v17721_v28 = vld [vmem:[#allocation84_spill] sm:$0xff] }
 0x5a9   : > { %v5279_v19 = vrot.slane %v17716_v63, %v13790_v15  ;;  %v9577_v44 = vcombine.low %v5256_v10, %v5263_v0  ;;  %17717 = vst [vmem:[#allocation105_spill] sm:$0xff] %v14437_v38  ;;  %v7232_v41 = vrot.slane %v9569_v45, %v13774_v43  ;;  %v9579_v61 = vcombine.high %v5256_v10, %v5263_v0  ;;  %v14447_v20 = vpop.xlane.xlu1 %3056  ;;  %v14449_v59 = vpop.eup %11112 }
 0x5aa   : > { %v7248_v9 = vrot.slane %v9571_v24, %v13774_v43  ;;  %v7264_v21 = vrot.slane %v9573_v50, %v13774_v43  ;;  %v7280_v49 = vrot.slane %v9575_v46, %v13774_v43  ;;  %17718 = vst [vmem:[#allocation55_spill] sm:$0xff] %v14445_v36  ;;  %17719 = vst [vmem:[#allocation109_spill] sm:$0xff] %v14447_v20  ;;  %11116 = vrcp.f32 %v17721_v28  ;;  %v14455_v63 = vpop.f32.mrb[129].mxu0  ;;  %v14459_v50 = vpop.xlane.xlu0 %3058 }
 0x5ab   : > { %v9581_v52 = vcombine.low %v5272_v62, %v5279_v19  ;;  %v9583_v54 = vcombine.high %v5272_v62, %v5279_v19  ;;  %v7368_v4 = vrot.slane %v9577_v44, %v13774_v43  ;;  %17720 = vst [vmem:[#allocation47_spill] sm:$0xff] %v14449_v59  ;;  %v7384_v10 = vrot.slane %v9579_v61, %v13774_v43  ;;  %v17723_v19 = vld [vmem:[#allocation77_spill] sm:$0xff]  ;;  %v14461_v46 = vpop.f32.mrb[130].mxu0  ;;  %v14463_v28 = vpop.eup %11114 }
 0x5ac   : > { %17722 = vst [vmem:[#allocation97_spill] sm:$0xff] %v14455_v63  ;;  %11118 = vrcp.f32 %v17723_v19  ;;  %10433 = vrot.lane.b32.xlu1 %v10432_v37, %s11322_s8  ;;  %v7288_v44 = vcombine.low %v7232_v41, %v7248_v9  ;;  %v7320_v45 = vcombine.low %v7264_v21, %v7280_v49  ;;  %v7289_v24 = vcombine.high %v7232_v41, %v7248_v9  ;;  %v14476_v19 = vpop.f32.mrb[128].mxu1 }
 0x5ad   : > { %v7400_v0 = vrot.slane %v9581_v52, %v13774_v43  ;;  %v7416_v62 = vrot.slane %v9583_v54, %v13774_v43  ;;  %17724 = vst [vmem:[#allocation8_spill] sm:$0xff] %v14459_v50  ;;  %17725 = vst [vmem:[#allocation101_spill] sm:$0xff] %v14461_v46  ;;  %v7424_v61 = vcombine.low %v7368_v4, %v7384_v10  ;;  %v14465_v54 = vpop.f32.mrb[131].mxu0  ;;  %v14478_v46 = vpop.xlane.xlu1 %3088 }
 0x5ae   : > { %17726 = vst [vmem:[#allocation56_spill] sm:$0xff] %v14463_v28  ;;  %v7321_v52 = vcombine.high %v7264_v21, %v7280_v49  ;;  %v7425_v36 = vcombine.high %v7368_v4, %v7384_v10  ;;  %17727 = vst [vmem:[#allocation107_spill] sm:$0xff] %v14465_v54  ;;  %v14468_v63 = vrot.slane %v7288_v44, %v13790_v15  ;;  %v14488_v10 = vpop.f32.mrb[129].mxu1 }
 0x5af   : > { %v7456_v20 = vcombine.low %v7400_v0, %v7416_v62  ;;  %v14471_v37 = vrot.slane %v7320_v45, %v13790_v15  ;;  %v14474_v41 = vrot.slane %v7289_v24, %v13790_v15  ;;  %v7457_v9 = vcombine.high %v7400_v0, %v7416_v62  ;;  %17730 = vst [vmem:[#allocation99_spill] sm:$0xff] %v14478_v46 }
 0x5b0   : > { %17728 = vst [vmem:[#allocation49_spill] sm:$0xff] %v14468_v63  ;;  %v14481_v59 = vrot.slane %v7424_v61, %v13790_v15  ;;  %v7335_v49 = vrot.slane %v7321_v52, %v13790_v15  ;;  %v7439_v4 = vrot.slane %v7425_v36, %v13790_v15  ;;  %v17733_v62 = vcombine.low %v13876_v42, %v14102_v60  ;;  %v14501_v61 = vpop.xlane.xlu0 %3090  ;;  %v14503_v36 = vpop.f32.mrb[130].mxu1 }
 0x5b1   : > { %17729 = vst [vmem:[#allocation112_spill] sm:$0xff] %v14471_v37  ;;  %v14484_v21 = vrot.slane %v7456_v20, %v13790_v15  ;;  %v7353_v44 = vcombine.high %v14468_v63, %v14471_v37  ;;  %v7471_v0 = vrot.slane %v7457_v9, %v13790_v15  ;;  %v17734_v20 = vcombine.high %v13876_v42, %v14102_v60  ;;  %v17736_v9 = vld [vmem:[#allocation44_spill] sm:$0xff]  ;;  %v14516_v60 = vpop.f32.mrb[131].mxu1 }
 0x5b2   : > { %17731 = vst [vmem:[#allocation103_spill] sm:$0xff] %v14481_v59  ;;  %v4848_v45 = vrot.slane %v17733_v62, %v13790_v15  ;;  %17735 = vst [vmem:[#allocation54_spill] sm:$0xff] %v14501_v61  ;;  %v7354_v63 = vcombine.low %v14474_v41, %v7335_v49  ;;  %v17737_v37 = vcombine.low %v13882_v3, %v17736_v9 }
 0x5b3   : > { %17732 = vst [vmem:[#allocation57_spill] sm:$0xff] %v14484_v21  ;;  %v4855_v24 = vrot.slane %v17734_v20, %v13790_v15  ;;  %v7489_v52 = vcombine.high %v14481_v59, %v14484_v21  ;;  %v17738_v62 = vcombine.high %v13882_v3, %v17736_v9  ;;  %17739 = vst [vmem:[#allocation113_spill] sm:$0xff] %v14516_v60  ;;  %v14530_v3 = vpop.xlane.xlu1 %3060 }
 0x5b4   : > { %v4864_v54 = vrot.slane %v17737_v37, %v13790_v15  ;;  %v7490_v20 = vcombine.low %v7439_v4, %v7471_v0  ;;  %v17740_v61 = vcombine.low %v13892_v34, %v14130_v16  ;;  %v17741_v21 = vcombine.high %v13892_v34, %v14130_v16  ;;  %17743 = vst [vmem:[#allocation117_spill] sm:$0xff] %v14530_v3  ;;  %v14536_v16 = vpop.xlane.xlu0 %3062 }
 0x5b5   : > { %v4871_v42 = vrot.slane %v17738_v62, %v13790_v15  ;;  %v17742_v37 = vcombine.low %v13898_v29, %v14133_v6  ;;  %v10442_v9 = vpack.i.bf16 %v7489_v52, %v7353_v44  ;;  %v17744_v62 = vcombine.high %v13898_v29, %v14133_v6 }
 0x5b6   : > { %v4984_v59 = vrot.slane %v17740_v61, %v13790_v15  ;;  %v4991_v28 = vrot.slane %v17741_v21, %v13790_v15  ;;  %v9553_v46 = vcombine.low %v4848_v45, %v4855_v24  ;;  %v9555_v61 = vcombine.high %v4848_v45, %v4855_v24  ;;  %v14538_v21 = vpop.eup %11116 }
 0x5b7   : > { %v5000_v13 = vrot.slane %v17742_v37, %v13790_v15  ;;  %v5007_v38 = vrot.slane %v17744_v62, %v13790_v15  ;;  %v10447_v50 = vpack.i.bf16 %v7490_v20, %v7354_v63  ;;  %v9557_v60 = vcombine.low %v4864_v54, %v4871_v42  ;;  %10443 = vrot.lane.b32.xlu1 %v10442_v9, %s11323_s10  ;;  %v14543_v29 = vpop.eup %11118  ;;  %v14548_v24 = vpop.xlane.xlu1 %3092 }
 0x5b8   : > { %v9559_v27 = vcombine.high %v4864_v54, %v4871_v42  ;;  %v9561_v34 = vcombine.low %v4984_v59, %v4991_v28  ;;  %v6960_v37 = vrot.slane %v9553_v46, %v13774_v43  ;;  %v6976_v44 = vrot.slane %v9555_v61, %v13774_v43  ;;  %17745 = vst [vmem:[#allocation106_spill] sm:$0xff] %v14543_v29  ;;  %v14566_v62 = vpop.xlane.xlu0 %3094 }
 0x5b9   : > { %v9563_v52 = vcombine.high %v4984_v59, %v4991_v28  ;;  %v9565_v3 = vcombine.low %v5000_v13, %v5007_v38  ;;  %v6992_v6 = vrot.slane %v9557_v60, %v13774_v43  ;;  %v9567_v45 = vcombine.high %v5000_v13, %v5007_v38 }
 0x5ba   : > { %v7008_v63 = vrot.slane %v9559_v27, %v13774_v43  ;;  %v7096_v54 = vrot.slane %v9561_v34, %v13774_v43  ;;  %v17746_v42 = vcombine.low %v14219_v25, %v14222_v55  ;;  %v7016_v20 = vcombine.low %v6960_v37, %v6976_v44 }
 0x5bb   : > { %v7112_v59 = vrot.slane %v9563_v52, %v13774_v43  ;;  %v7128_v28 = vrot.slane %v9565_v3, %v13774_v43  ;;  %v17747_v27 = vcombine.high %v14219_v25, %v14222_v55  ;;  %v7144_v38 = vrot.slane %v9567_v45, %v13774_v43  ;;  %10448 = vrot.lane.b32.xlu1 %v10447_v50, %s11322_s8  ;;  %v14575_v29 = vpop.xlane.xlu1 %3108 }
 0x5bc   : > { %v14554_v46 = vrot.slane %v17746_v42, %v13774_v43  ;;  %v7048_v13 = vcombine.low %v6992_v6, %v7008_v63  ;;  %v7355_v9 = vcombine.high %v14474_v41, %v7335_v49  ;;  %v14570_v61 = vrot.slane %v7016_v20, %v13790_v15 }
 0x5bd   : > { %v14562_v60 = vrot.slane %v17747_v27, %v13774_v43  ;;  %v7152_v34 = vcombine.low %v7096_v54, %v7112_v59  ;;  %v7491_v3 = vcombine.high %v7439_v4, %v7471_v0  ;;  %v7017_v52 = vcombine.high %v6960_v37, %v6976_v44 }
 0x5be   : > { %17748 = vst [vmem:[#allocation110_spill] sm:$0xff] %v14570_v61  ;;  %v14573_v42 = vrot.slane %v7048_v13, %v13790_v15  ;;  %v7184_v25 = vcombine.low %v7128_v28, %v7144_v38  ;;  %v7049_v55 = vcombine.high %v6992_v6, %v7008_v63  ;;  %v7153_v27 = vcombine.high %v7096_v54, %v7112_v59  ;;  %v14590_v63 = vpop.xlane.xlu0 %3110 }
 0x5bf   : > { %v14578_v41 = vrot.slane %v7152_v34, %v13790_v15  ;;  %v10452_v49 = vpack.i.bf16 %v7491_v3, %v7355_v9  ;;  %v7031_v50 = vrot.slane %v7017_v52, %v13790_v15  ;;  %v7185_v45 = vcombine.high %v7128_v28, %v7144_v38 }
 0x5c0   : > { %17749 = vst [vmem:[#allocation79_spill] sm:$0xff] %v14573_v42  ;;  %v17751_v4 = vcombine.low %v14225_v11, %v14228_v47  ;;  %v14586_v37 = vrot.slane %v7184_v25, %v13790_v15  ;;  %v7063_v44 = vrot.slane %v7049_v55, %v13790_v15  ;;  %v7167_v6 = vrot.slane %v7153_v27, %v13790_v15 }
 0x5c1   : > { %17750 = vst [vmem:[#allocation116_spill] sm:$0xff] %v14578_v41  ;;  %v17753_v54 = vcombine.high %v14225_v11, %v14228_v47  ;;  %10453 = vrot.lane.b32.xlu1 %v10452_v49, %s11321_s7  ;;  %v7199_v59 = vrot.slane %v7185_v45, %v13790_v15  ;;  %v17754_v28 = vcombine.low %v13918_v40, %v14164_v8  ;;  %v14618_v49 = vpop.xlane.xlu1 %3104 }
 0x5c2   : > { %v7944_v0 = vrot.slane %v17751_v4, %v13774_v43  ;;  %17752 = vst [vmem:[#allocation120_spill] sm:$0xff] %v14586_v37  ;;  %v17755_v38 = vcombine.high %v13918_v40, %v14164_v8  ;;  %v7081_v34 = vcombine.high %v14570_v61, %v14573_v42  ;;  %v7217_v11 = vcombine.high %v14578_v41, %v14586_v37  ;;  %v17800_v37 = vld [vmem:[#allocation14_spill] sm:$0xff] }
 0x5c3   : > { %v7960_v20 = vrot.slane %v17753_v54, %v13774_v43  ;;  %v5664_v13 = vrot.slane %v17754_v28, %v13790_v15  ;;  %v7082_v47 = vcombine.low %v7031_v50, %v7063_v44  ;;  %v7083_v3 = vcombine.high %v7031_v50, %v7063_v44  ;;  %v14622_v44 = vpop.xlane.xlu0 %3106 }
 0x5c4   : > { %v5671_v9 = vrot.slane %v17755_v38, %v13790_v15  ;;  %v7218_v52 = vcombine.low %v7167_v6, %v7199_v59  ;;  %v7219_v25 = vcombine.high %v7167_v6, %v7199_v59  ;;  %v17756_v55 = vcombine.low %v13936_v56, %v14167_v58 }
 0x5c5   : > { %v17757_v40 = vcombine.high %v13936_v56, %v14167_v58  ;;  %v10457_v45 = vpack.i.bf16 %v7217_v11, %v7081_v34  ;;  %v7968_v50 = vcombine.low %v14554_v46, %v14562_v60  ;;  %v8000_v34 = vcombine.low %v7944_v0, %v7960_v20  ;;  %v14628_v11 = vpop.f32.mrb[132].mxu0 }
 0x5c6   : > { %v5680_v27 = vrot.slane %v17756_v55, %v13790_v15  ;;  %v9601_v4 = vcombine.low %v5664_v13, %v5671_v9  ;;  %v9603_v54 = vcombine.high %v5664_v13, %v5671_v9  ;;  %v10462_v6 = vpack.i.bf16 %v7218_v52, %v7082_v47  ;;  %v17758_v55 = vld [vmem:[#allocation72_spill] sm:$0xff]  ;;  %v14637_v52 = vpop.f32.mrb[133].mxu0 }
 0x5c7   : > { %v5687_v8 = vrot.slane %v17757_v40, %v13790_v15  ;;  %v10467_v59 = vpack.i.bf16 %v7219_v25, %v7083_v3  ;;  %11120 = vrcp.f32 %v17758_v55  ;;  %10458 = vrot.lane.b32.xlu0 %v10457_v45, %s11323_s10  ;;  %v14633_v47 = vrot.slane %v7968_v50, %v13790_v15  ;;  %v14658_v55 = vpop.f32.mrb[132].mxu1 }
 0x5c8   : > { %v7776_v56 = vrot.slane %v9601_v4, %v13774_v43  ;;  %v7792_v58 = vrot.slane %v9603_v54, %v13774_v43  ;;  %v7969_v3 = vcombine.high %v14554_v46, %v14562_v60  ;;  %11122 = vrcp.f32 %v14205_v33  ;;  %v14656_v60 = vpop.xlane.xlu0 %3118 }
 0x5c9   : > { %v9605_v28 = vcombine.low %v5680_v27, %v5687_v8  ;;  %v9607_v38 = vcombine.high %v5680_v27, %v5687_v8  ;;  %17759 = vst [vmem:[#allocation78_spill] sm:$0xff] %v14633_v47  ;;  %v14641_v27 = vrot.slane %v8000_v34, %v13790_v15  ;;  %v14643_v8 = vpop.f32.mrb[134].mxu0  ;;  %v8001_v50 = vcombine.high %v7944_v0, %v7960_v20 }
 0x5ca   : > { %v7832_v25 = vcombine.low %v7776_v56, %v7792_v58  ;;  %v7833_v40 = vcombine.high %v7776_v56, %v7792_v58  ;;  %v7983_v54 = vrot.slane %v7969_v3, %v13790_v15  ;;  %11124 = vrcp.f32 %v14299_v30 }
 0x5cb   : > { %v7808_v13 = vrot.slane %v9605_v28, %v13774_v43  ;;  %v7824_v9 = vrot.slane %v9607_v38, %v13774_v43  ;;  %17760 = vst [vmem:[#allocation108_spill] sm:$0xff] %v14641_v27  ;;  %v14646_v28 = vpop.xlane.xlu1 %3116  ;;  %v14648_v38 = vpop.f32.mrb[135].mxu0  ;;  %10463 = vrot.lane.b32.xlu0 %v10462_v6, %s11322_s8  ;;  %v8033_v0 = vcombine.high %v14633_v47, %v14641_v27  ;;  %11126 = vrcp.f32 %v14216_v26 }
 0x5cc   : > { %v14653_v33 = vrot.slane %v7832_v25, %v13790_v15  ;;  %v7847_v46 = vrot.slane %v7833_v40, %v13790_v15  ;;  %v8015_v30 = vrot.slane %v8001_v50, %v13790_v15  ;;  %v14667_v6 = vpop.f32.mrb[133].mxu1  ;;  %v17763_v58 = vcombine.low %v14127_v51, %v14232_v18  ;;  %v14712_v42 = vpop.xlane.xlu0 %3114 }
 0x5cd   : > { %v7864_v45 = vcombine.low %v7808_v13, %v7824_v9  ;;  %v7865_v4 = vcombine.high %v7808_v13, %v7824_v9  ;;  %v17764_v13 = vcombine.high %v14127_v51, %v14232_v18  ;;  %v17765_v3 = vcombine.low %v14177_v57, %v14235_v14 }
 0x5ce   : > { %17761 = vst [vmem:[#allocation111_spill] sm:$0xff] %v14653_v33  ;;  %v5392_v34 = vrot.slane %v17763_v58, %v13790_v15  ;;  %v17766_v40 = vcombine.high %v14177_v57, %v14235_v14  ;;  %v8034_v47 = vcombine.low %v7983_v54, %v8015_v30  ;;  %v8035_v18 = vcombine.high %v7983_v54, %v8015_v30 }
 0x5cf   : > { %v14661_v56 = vrot.slane %v7864_v45, %v13790_v15  ;;  %v7879_v20 = vrot.slane %v7865_v4, %v13790_v15  ;;  %v5399_v9 = vrot.slane %v17764_v13, %v13790_v15  ;;  %v5408_v25 = vrot.slane %v17765_v3, %v13790_v15  ;;  %v14685_v4 = vpop.f32.mrb[134].mxu1  ;;  %10468 = vrot.lane.b32.xlu0 %v10467_v59, %s11321_s7 }
 0x5d0   : > { %v5415_v45 = vrot.slane %v17766_v40, %v13790_v15  ;;  %v14689_v51 = vpop.f32.mrb[135].mxu1  ;;  %v17767_v13 = vcombine.low %v14275_v22, %v14320_v2  ;;  %v17768_v57 = vcombine.high %v14275_v22, %v14320_v2  ;;  %v17769_v40 = vcombine.low %v14281_v39, %v14323_v31 }
 0x5d1   : > { %17762 = vst [vmem:[#allocation89_spill] sm:$0xff] %v14661_v56  ;;  %v7897_v50 = vcombine.high %v14653_v33, %v14661_v56  ;;  %v7898_v58 = vcombine.low %v7847_v46, %v7879_v20  ;;  %v7899_v27 = vcombine.high %v7847_v46, %v7879_v20  ;;  %v17770_v59 = vcombine.high %v14281_v39, %v14323_v31  ;;  %v14708_v56 = vpop.xlane.xlu1 %3112 }
 0x5d2   : > { %v5528_v3 = vrot.slane %v17767_v13, %v13790_v15  ;;  %v5535_v14 = vrot.slane %v17768_v57, %v13790_v15  ;;  %v5544_v46 = vrot.slane %v17769_v40, %v13790_v15  ;;  %v9585_v30 = vcombine.low %v5392_v34, %v5399_v9  ;;  %v14710_v13 = vpop.eup %11120 }
 0x5d3   : > { %v10472_v20 = vpack.i.bf16 %v8033_v0, %v7897_v50  ;;  %v10477_v33 = vpack.i.bf16 %v8034_v47, %v7898_v58  ;;  %v5551_v54 = vrot.slane %v17770_v59, %v13790_v15  ;;  %v10482_v61 = vpack.i.bf16 %v8035_v18, %v7899_v27  ;;  %v11123_v39 = vpop.eup %11122 }
 0x5d4   : > { %v9587_v22 = vcombine.high %v5392_v34, %v5399_v9  ;;  %v9589_v2 = vcombine.low %v5408_v25, %v5415_v45  ;;  %v9591_v57 = vcombine.high %v5408_v25, %v5415_v45  ;;  %v7504_v47 = vrot.slane %v9585_v30, %v13774_v43  ;;  %v11125_v45 = vpop.eup %11124 }
 0x5d5   : > { %10473 = vrot.lane.b32.xlu1 %v10472_v20, %s11323_s10  ;;  %v9593_v0 = vcombine.low %v5528_v3, %v5535_v14  ;;  %v9595_v50 = vcombine.high %v5528_v3, %v5535_v14  ;;  %v9597_v58 = vcombine.low %v5544_v46, %v5551_v54  ;;  %v9599_v27 = vcombine.high %v5544_v46, %v5551_v54  ;;  %v17771_v20 = vld [vmem:[#allocation26_spill] sm:$0xff]  ;;  %v14727_v30 = vpop.xlane.xlu1 %3124 }
 0x5d6   : > { %v7520_v31 = vrot.slane %v9587_v22, %v13774_v43  ;;  %v7536_v40 = vrot.slane %v9589_v2, %v13774_v43  ;;  %v7552_v59 = vrot.slane %v9591_v57, %v13774_v43  ;;  %11128 = vrcp.f32 %v14329_v23 }
 0x5d7   : > { %v7640_v34 = vrot.slane %v9593_v0, %v13774_v43  ;;  %v7656_v9 = vrot.slane %v9595_v50, %v13774_v43  ;;  %v7672_v25 = vrot.slane %v9597_v58, %v13774_v43  ;;  %v7688_v14 = vrot.slane %v9599_v27, %v13774_v43  ;;  %v14735_v0 = vpop.xlane.xlu0 %3126  ;;  %v14737_v50 = vpop.f32.mrb[136].mxu0 }
 0x5d8   : > { %v7560_v18 = vcombine.low %v7504_v47, %v7520_v31  ;;  %v7592_v3 = vcombine.low %v7536_v40, %v7552_v59  ;;  %11130 = vrcp.f32 %v17771_v20  ;;  %v7561_v54 = vcombine.high %v7504_v47, %v7520_v31 }
 0x5d9   : > { %10478 = vrot.lane.b32.xlu1 %v10477_v33, %s11322_s8  ;;  %v7696_v46 = vcombine.low %v7640_v34, %v7656_v9  ;;  %v7593_v26 = vcombine.high %v7536_v40, %v7552_v59  ;;  %v7728_v23 = vcombine.low %v7672_v25, %v7688_v14  ;;  %v7697_v57 = vcombine.high %v7640_v34, %v7656_v9  ;;  %v14744_v40 = vpop.f32.mrb[137].mxu0 }
 0x5da   : > { %v14730_v22 = vrot.slane %v7560_v18, %v13790_v15  ;;  %v14733_v2 = vrot.slane %v7592_v3, %v13790_v15  ;;  %v7575_v33 = vrot.slane %v7561_v54, %v13790_v15  ;;  %v7729_v31 = vcombine.high %v7672_v25, %v7688_v14  ;;  %17775 = vst [vmem:[#allocation114_spill] sm:$0xff] %v14744_v40  ;;  %v14751_v34 = vpop.f32.mrb[138].mxu0  ;;  %v17777_v3 = vld [vmem:[#allocation30_spill] sm:$0xff] }
 0x5db   : > { %v14740_v58 = vrot.slane %v7696_v46, %v13790_v15  ;;  %v7607_v47 = vrot.slane %v7593_v26, %v13790_v15  ;;  %11132 = vrcp.f32 %v14156_v17  ;;  %v14748_v59 = vrot.slane %v7728_v23, %v13790_v15  ;;  %v14760_v14 = vpop.f32.mrb[139].mxu0  ;;  %v14773_v26 = vpop.xlane.xlu1 %3120 }
 0x5dc   : > { %17772 = vst [vmem:[#allocation121_spill] sm:$0xff] %v14730_v22  ;;  %17773 = vst [vmem:[#allocation125_spill] sm:$0xff] %v14733_v2  ;;  %v7711_v27 = vrot.slane %v7697_v57, %v13790_v15  ;;  %11134 = vrcp.f32 %v14365_v53  ;;  %v7743_v18 = vrot.slane %v7729_v31, %v13790_v15  ;;  %v14758_v25 = vmul.f32 %v14245_v32, %v17777_v3 }
 0x5dd   : > { %17774 = vst [vmem:[#allocation88_spill] sm:$0xff] %v14740_v58  ;;  %17776 = vst [vmem:[#allocation118_spill] sm:$0xff] %v14748_v59  ;;  %10483 = vrot.lane.b32.xlu1 %v10482_v61, %s11321_s7  ;;  %v7626_v9 = vcombine.low %v7575_v33, %v7607_v47  ;;  %v7625_v17 = vcombine.high %v14730_v22, %v14733_v2  ;;  %v7761_v20 = vcombine.high %v14740_v58, %v14748_v59  ;;  %v14770_v61 = vpop.f32.mrb[136].mxu1  ;;  %v17801_v22 = vld [vmem:[#allocation66_spill] sm:$0xff] }
 0x5de   : > { %11136 = vrcp.f32 %v14426_v7  ;;  %v14768_v53 = vmul.f32 %v11123_v39, %v14476_v19  ;;  %v7762_v46 = vcombine.low %v7711_v27, %v7743_v18  ;;  %v7627_v32 = vcombine.high %v7575_v33, %v7607_v47  ;;  %17778 = vst [vmem:[#allocation95_spill] sm:$0xff] %v14773_v26  ;;  %v14775_v23 = vpop.f32.mrb[137].mxu1  ;;  %v14782_v39 = vpop.xlane.xlu0 %3122  ;;  %v17850_v26 = vld [vmem:[#allocation51_spill] sm:$0xff] }
 0x5df   : > { %11138 = vrcp.f32 %v14373_v1  ;;  %v7763_v54 = vcombine.high %v7711_v27, %v7743_v18  ;;  %v10487_v57 = vpack.i.bf16 %v7761_v20, %v7625_v17  ;;  %17779 = vst [vmem:[#allocation123_spill] sm:$0xff] %v14782_v39  ;;  %v14784_v31 = vpop.f32.mrb[138].mxu1  ;;  %v11127_v1 = vpop.eup %11126  ;;  %v17780_v27 = vld [vmem:[#allocation45_spill] sm:$0xff]  ;;  %v17781_v20 = vld [vmem:[#allocation11_spill] sm:$0xff] }
 0x5e0   : > { %11140 = vrcp.f32 %v14171_v12  ;;  %v10492_v33 = vpack.i.bf16 %v7762_v46, %v7626_v9  ;;  %v14788_v18 = vmul.f32 %v14367_v5, %v17780_v27  ;;  %v14791_v12 = vmul.f32 %v11125_v45, %v14488_v10  ;;  %v14793_v3 = vpop.f32.mrb[139].mxu1  ;;  %v11129_v17 = vpop.eup %11128  ;;  %v17782_v46 = vld [vmem:[#allocation38_spill] sm:$0xff]  ;;  %v17783_v5 = vld [vmem:[#allocation37_spill] sm:$0xff]  ;;  %v17786_v27 = vld [vmem:[#allocation8_spill] sm:$0xff] }
 0x5e1   : > { %v10497_v47 = vpack.i.bf16 %v7763_v54, %v7627_v32  ;;  %10488 = vrot.lane.b32.xlu0 %v10487_v57, %s11323_s10  ;;  %11142 = vrcp.f32 %v14435_v48  ;;  %v14799_v19 = vmul.f32 %v14269_v35, %v17781_v20  ;;  %v14802_v9 = vmul.f32 %v11127_v1, %v14503_v36  ;;  %v17784_v48 = vld [vmem:[#allocation113_spill] sm:$0xff]  ;;  %v17788_v20 = vld [vmem:[#allocation63_spill] sm:$0xff] }
 0x5e2   : > { %v14806_v32 = vmul.f32 %v17783_v5, %v17782_v46  ;;  %v14808_v10 = vpop.eup %11130  ;;  %v14815_v57 = vmul.f32 %v11129_v17, %v17784_v48  ;;  %v17785_v35 = vld [vmem:[#allocation117_spill] sm:$0xff]  ;;  %v14828_v17 = vpop.xlane.xlu1 %2968 }
 0x5e3   : > { %11144 = vrcp.f32 %v17785_v35  ;;  %v14834_v48 = vpop.xlane.xlu0 %2970  ;;  %v17789_v1 = vld [vmem:[#allocation105_spill] sm:$0xff] }
 0x5e4   : > { %11146 = vrcp.f32 %v14536_v16  ;;  %v17787_v16 = vld [vmem:[#allocation99_spill] sm:$0xff]  ;;  %v14840_v36 = vmul.f32 %v17789_v1, %v17788_v20  ;;  %v17790_v45 = vld [vmem:[#allocation85_spill] sm:$0xff]  ;;  %v14895_v58 = vpop.f32.mrb[140].mxu1 }
 0x5e5   : > { %11148 = vrcp.f32 %v17786_v27  ;;  %v14830_v5 = vpop.eup %11132  ;;  %10493 = vrot.lane.b32.xlu0 %v10492_v33, %s11322_s8  ;;  %v17791_v33 = vld [vmem:[#allocation76_spill] sm:$0xff]  ;;  %v17793_v1 = vld [vmem:[#allocation73_spill] sm:$0xff]  ;;  %v17794_v20 = vld [vmem:[#allocation47_spill] sm:$0xff]  ;;  %17805 = vst [vmem:[#allocation130_spill] sm:$0xff] %v14895_v58  ;;  %v14900_v59 = vpop.f32.mrb[141].mxu1 }
 0x5e6   : > { %11150 = vrcp.f32 %v14548_v24  ;;  %v11135_v35 = vpop.eup %11134  ;;  %v17792_v24 = vld [vmem:[#allocation56_spill] sm:$0xff]  ;;  %17807 = vst [vmem:[#allocation132_spill] sm:$0xff] %v14900_v59  ;;  %v17827_v58 = vld [vmem:[#allocation5_spill] sm:$0xff] }
 0x5e7   : > { %11152 = vrcp.f32 %v17787_v16  ;;  %v14843_v46 = vmul.f32 %v11135_v35, %v14658_v55  ;;  %v14848_v7 = vmul.f32 %v17792_v24, %v17791_v33  ;;  %v14860_v35 = vmul.f32 %v17794_v20, %v17793_v1  ;;  %v14865_v33 = vpop.f32.mrb[140].mxu0  ;;  %v3001_v24 = vpop.xlane.xlu1 %3000 }
 0x5e8   : > { %v11137_v27 = vpop.eup %11136  ;;  %11154 = vrcp.f32 %v14566_v62  ;;  %17795 = vst [vmem:[#allocation127_spill] sm:$0xff] %v14865_v33  ;;  %v14872_v62 = vpop.f32.mrb[141].mxu0 }
 0x5e9   : > { %v11139_v54 = vpop.eup %11138  ;;  %11156 = vrcp.f32 %v17790_v45  ;;  %v14851_v41 = vmul.f32 %v11137_v27, %v14667_v6  ;;  %10498 = vrot.lane.b32.xlu0 %v10497_v47, %s11321_s7  ;;  %v17796_v6 = vld [vmem:[#allocation54_spill] sm:$0xff]  ;;  %17797 = vst [vmem:[#allocation94_spill] sm:$0xff] %v14872_v62  ;;  %v14877_v1 = vpop.f32.mrb[142].mxu0 }
 0x5ea   : > { %v11141_v16 = vpop.eup %11140  ;;  %v14863_v45 = vmul.f32 %v11139_v54, %v14685_v4  ;;  %11158 = vrcp.f32 %v17796_v6  ;;  %v3003_v54 = vpop.xlane.xlu0 %3002  ;;  %17798 = vst [vmem:[#allocation115_spill] sm:$0xff] %v14877_v1 }
 0x5eb   : > { %v11143_v55 = vpop.eup %11142  ;;  %11160 = vrcp.f32 %v14575_v29  ;;  %v14882_v47 = vpop.f32.mrb[143].mxu0  ;;  %v14887_v29 = vmul.f32 %v14538_v21, %v17801_v22 }
 0x5ec   : > { %11162 = vrcp.f32 %v14618_v49  ;;  %17799 = vst [vmem:[#allocation119_spill] sm:$0xff] %v14882_v47  ;;  %v14890_v4 = vmul.f32 %v11143_v55, %v14689_v51  ;;  %v2973_v62 = vpop.xlane.xlu1 %2972 }
 0x5ed   : > { %v11145_v20 = vpop.eup %11144  ;;  %11164 = vrcp.f32 %v17800_v37  ;;  %17802 = vst [vmem:[#allocation104_spill] sm:$0xff] %v14887_v29  ;;  %v17808_v37 = vld [vmem:[#allocation70_spill] sm:$0xff] }
 0x5ee   : > { %v11147_v27 = vpop.eup %11146  ;;  %17803 = vst [vmem:[#allocation131_spill] sm:$0xff] %v14890_v4  ;;  %v14893_v2 = vmul.f32 %v11145_v20, %v14737_v50  ;;  %11166 = vrcp.f32 %v17808_v37  ;;  %v14910_v50 = vpop.f32.mrb[142].mxu1  ;;  %v17811_v20 = vld [vmem:[#allocation74_spill] sm:$0xff] }
 0x5ef   : > { %v11149_v49 = vpop.eup %11148  ;;  %v14898_v6 = vmul.f32 %v11147_v27, %v14751_v34  ;;  %17810 = vst [vmem:[#allocation124_spill] sm:$0xff] %v14910_v50  ;;  %11168 = vrcp.f32 %v17811_v20  ;;  %v17812_v34 = vld [vmem:[#allocation75_spill] sm:$0xff]  ;;  %v17813_v27 = vld [vmem:[#allocation106_spill] sm:$0xff]  ;;  %v14920_v21 = vpop.f32.mrb[143].mxu1 }
 0x5f0   : > { %17804 = vst [vmem:[#allocation129_spill] sm:$0xff] %v14893_v2  ;;  %v11151_v47 = vpop.eup %11150  ;;  %v14908_v22 = vmul.f32 %v11149_v49, %v14760_v14  ;;  %v14915_v1 = vmul.f32 %v17813_v27, %v17812_v34  ;;  %17816 = vst [vmem:[#allocation133_spill] sm:$0xff] %v14920_v21  ;;  %11170 = vrcp.f32 %v14590_v63  ;;  %v17817_v14 = vld [vmem:[#allocation41_spill] sm:$0xff]  ;;  %v2975_v20 = vpop.xlane.xlu0 %2974  ;;  %v17820_v34 = vld [vmem:[#allocation20_spill] sm:$0xff] }
 0x5f1   : > { %17806 = vst [vmem:[#allocation36_spill] sm:$0xff] %v14898_v6  ;;  %v11153_v55 = vpop.eup %11152  ;;  %v14918_v37 = vmul.f32 %v11151_v47, %v14770_v61  ;;  %v14925_v49 = vmul.f32 %v14808_v10, %v17817_v14  ;;  %v14932_v27 = vmul.f32 %v14710_v13, %v17820_v34  ;;  %11172 = vrcp.f32 %v14828_v17  ;;  %v17823_v34 = vld [vmem:[#allocation55_spill] sm:$0xff] }
 0x5f2   : > { %17809 = vst [vmem:[#allocation122_spill] sm:$0xff] %v14908_v22  ;;  %17814 = vst [vmem:[#allocation128_spill] sm:$0xff] %v14915_v1  ;;  %v11155_v59 = vpop.eup %11154  ;;  %v14928_v51 = vmul.f32 %v11153_v55, %v14775_v23  ;;  %11174 = vrcp.f32 %v14834_v48  ;;  %v4186_v47 = vmul.f32 %v11141_v16, %v17823_v34  ;;  %v17824_v23 = vld [vmem:[#allocation46_spill] sm:$0xff]  ;;  %v3005_v48 = vpop.xlane.xlu1 %3004  ;;  %v17828_v16 = vld [vmem:[#allocation65_spill] sm:$0xff] }
 0x5f3   : > { %17815 = vst [vmem:[#allocation9_spill] sm:$0xff] %v14918_v37  ;;  %17818 = vst [vmem:[#allocation16_spill] sm:$0xff] %v14925_v49  ;;  %v11157_v50 = vpop.eup %11156  ;;  %v14939_v63 = vmul.f32 %v11155_v59, %v14784_v31  ;;  %11176 = vrcp.f32 %v3001_v24  ;;  %v10315_v31 = vpop.f32.mrb[144].mxu0  ;;  %v14954_v61 = vmul.f32 %v14830_v5, %v17824_v23  ;;  %v14961_v24 = vmul.f32 %v17828_v16, %v17827_v58  ;;  %v17829_v34 = vld [vmem:[#allocation97_spill] sm:$0xff]  ;;  %v17846_v37 = vld [vmem:[#allocation7_spill] sm:$0xff] }
 0x5f4   : > { %17819 = vst [vmem:[#allocation134_spill] sm:$0xff] %v14928_v51  ;;  %17821 = vst [vmem:[#allocation12_spill] sm:$0xff] %v14932_v27  ;;  %v11159_v55 = vpop.eup %11158  ;;  %11178 = vrcp.f32 %v3003_v54  ;;  %v3913_v13 = vpop.f32.mrb[145].mxu0  ;;  %v14964_v59 = vmul.f32 %v11157_v50, %v17829_v34 }
 0x5f5   : > { %17822 = vst [vmem:[#allocation135_spill] sm:$0xff] %v14939_v63  ;;  %v11161_v14 = vpop.eup %11160  ;;  %17825 = vst [vmem:[#allocation32_spill] sm:$0xff] %v14954_v61  ;;  %v14957_v10 = vmul.f32 %v11159_v55, %v14793_v3  ;;  %11180 = vrcp.f32 %v2973_v62  ;;  %v3007_v54 = vpop.xlane.xlu0 %3006  ;;  %v17841_v63 = vld [vmem:[#allocation100_spill] sm:$0xff] }
 0x5f6   : > { %v11163_v17 = vpop.eup %11162  ;;  %v4218_v21 = vmul.f32 %v11161_v14, %v10315_v31  ;;  %v10316_v5 = vpop.f32.mrb[146].mxu0  ;;  %11182 = vrcp.f32 %v2975_v20  ;;  %v17831_v20 = vcombine.low %v14758_v25, %v14768_v53 }
 0x5f7   : > { %17826 = vst [vmem:[#allocation136_spill] sm:$0xff] %v14957_v10  ;;  %v11165_v33 = vpop.eup %11164  ;;  %v14966_v22 = vmul.f32 %v11163_v17, %v3913_v13  ;;  %v14972_v14 = vpop.f32.mrb[147].mxu0  ;;  %11184 = vrcp.f32 %v3005_v48  ;;  %v17830_v17 = vld [vmem:[#allocation6_spill] sm:$0xff] }
 0x5f8   : > { %v4552_v55 = vcombine.low %v4186_v47, %v4218_v21  ;;  %v11167_v58 = vpop.eup %11166  ;;  %v4553_v31 = vcombine.high %v4186_v47, %v4218_v21  ;;  %v14979_v16 = vmul.f32 %v11165_v33, %v17830_v17  ;;  %v4544_v34 = vrot.slane %v17831_v20, %v13774_v43 }
 0x5f9   : > { %v4280_v62 = vcombine.low %v14964_v59, %v14966_v22  ;;  %v11169_v13 = vpop.eup %11168  ;;  %11186 = vrcp.f32 %v3007_v54  ;;  %v17832_v21 = vcombine.high %v14758_v25, %v14768_v53  ;;  %v17833_v33 = vcombine.low %v14788_v18, %v14791_v12  ;;  %v17835_v53 = vld [vmem:[#allocation28_spill] sm:$0xff] }
 0x5fa   : > { %v4560_v23 = vrot.slane %v4552_v55, %v13774_v43  ;;  %v11171_v48 = vpop.eup %11170  ;;  %v14999_v3 = vrot.slane %v4553_v31, %v13774_v43  ;;  %v17834_v55 = vld [vmem:[#allocation22_spill] sm:$0xff]  ;;  %11188 = vrcp.f32 %v17835_v53  ;;  %v17842_v31 = vcombine.high %v14788_v18, %v14791_v12 }
 0x5fb   : > { %v14990_v47 = vrot.slane %v17832_v21, %v13774_v43  ;;  %v14996_v17 = vrot.slane %v17833_v33, %v13774_v43  ;;  %v15002_v54 = vrot.slane %v4280_v62, %v13774_v43  ;;  %v4132_v20 = vmul.f32 %v11167_v58, %v17834_v55  ;;  %v11173_v25 = vpop.eup %11172  ;;  %v15014_v62 = vpop.f32.mrb[148].mxu0  ;;  %v17836_v58 = vld [vmem:[#allocation24_spill] sm:$0xff]  ;;  %v17840_v33 = vld [vmem:[#allocation58_spill] sm:$0xff] }
 0x5fc   : > { %v4600_v50 = vcombine.low %v4544_v34, %v4560_v23  ;;  %v4601_v10 = vcombine.high %v4544_v34, %v4560_v23  ;;  %v15005_v61 = vmul.f32 %v11171_v48, %v10316_v5  ;;  %v11175_v6 = vpop.eup %11174  ;;  %11190 = vrcp.f32 %v17836_v58  ;;  %v17837_v23 = vld [vmem:[#allocation53_spill] sm:$0xff]  ;;  %v15024_v55 = vpop.f32.mrb[149].mxu0 }
 0x5fd   : > { %v4148_v5 = vmul.f32 %v11173_v25, %v17837_v23  ;;  %v11177_v53 = vpop.eup %11176  ;;  %v4133_v21 = vmul.f32 %v11169_v13, %v17840_v33  ;;  %11192 = vrcp.f32 %v17841_v63  ;;  %v15032_v58 = vrot.slane %v17842_v31, %v13774_v43  ;;  %v17843_v25 = vld [vmem:[#allocation59_spill] sm:$0xff]  ;;  %v17845_v13 = vld [vmem:[#allocation93_spill] sm:$0xff] }
 0x5fe   : > { %v15019_v34 = vrot.slane %v4600_v50, %v13790_v15  ;;  %v15022_v48 = vrot.slane %v4601_v10, %v13790_v15  ;;  %v4149_v23 = vmul.f32 %v11175_v6, %v17843_v25  ;;  %v15035_v50 = vpop.f32.mrb[150].mxu0  ;;  %v11179_v27 = vpop.eup %11178  ;;  %11194 = vrcp.f32 %v14622_v44  ;;  %v17844_v10 = vld [vmem:[#allocation52_spill] sm:$0xff]  ;;  %v17847_v31 = vld [vmem:[#allocation81_spill] sm:$0xff] }
 0x5ff   : > { %v5864_v51 = vcombine.low %v17844_v10, %v4148_v5  ;;  %v5865_v49 = vcombine.high %v17844_v10, %v4148_v5  ;;  %v4164_v33 = vmul.f32 %v11177_v53, %v17845_v13  ;;  %v15041_v63 = vpop.f32.mrb[151].mxu0  ;;  %v11181_v2 = vpop.eup %11180  ;;  %v4165_v6 = vmul.f32 %v11179_v27, %v17847_v31 }
 0x600   : > { %17838 = vst [vmem:[#allocation137_spill] sm:$0xff] %v15019_v34  ;;  %17839 = vst [vmem:[#allocation139_spill] sm:$0xff] %v15022_v48  ;;  %v6000_v18 = vcombine.low %v17846_v37, %v4149_v23  ;;  %v6001_v12 = vcombine.high %v17846_v37, %v4149_v23  ;;  %v11183_v1 = vpop.eup %11182  ;;  %v15076_v29 = vpop.f32.mrb[152].mxu0  ;;  %11196 = vrcp.f32 %v14646_v28 }
 0x601   : > { %v15049_v44 = vrot.slane %v5864_v51, %v13774_v43  ;;  %v15052_v5 = vrot.slane %v5865_v49, %v13774_v43  ;;  %v5880_v53 = vcombine.low %v4132_v20, %v4164_v33  ;;  %v5881_v10 = vcombine.high %v4132_v20, %v4164_v33  ;;  %v11185_v13 = vpop.eup %11184  ;;  %v17849_v49 = vld [vmem:[#allocation25_spill] sm:$0xff]  ;;  %17855 = vst [vmem:[#allocation141_spill] sm:$0xff] %v15076_v29 }
 0x602   : > { %v15055_v40 = vrot.slane %v6000_v18, %v13774_v43  ;;  %v15058_v37 = vrot.slane %v6001_v12, %v13774_v43  ;;  %v6016_v27 = vcombine.low %v4133_v21, %v4165_v6  ;;  %v6017_v23 = vcombine.high %v4133_v21, %v4165_v6  ;;  %v17853_v12 = vld [vmem:[#allocation64_spill] sm:$0xff]  ;;  %v17854_v21 = vld [vmem:[#allocation82_spill] sm:$0xff] }
 0x603   : > { %v11187_v31 = vpop.eup %11186  ;;  %v15061_v25 = vrot.slane %v5880_v53, %v13774_v43  ;;  %v15064_v51 = vrot.slane %v5881_v10, %v13774_v43  ;;  %v4150_v39 = vmul.f32 %v11181_v2, %v17849_v49  ;;  %v4151_v20 = vmul.f32 %v11183_v1, %v17850_v26  ;;  %v15086_v10 = vpop.f32.mrb[153].mxu0  ;;  %v17858_v26 = vld [vmem:[#allocation13_spill] sm:$0xff] }
 0x604   : > { %17848 = vst [vmem:[#allocation138_spill] sm:$0xff] %v15058_v37  ;;  %v15069_v33 = vrot.slane %v6016_v27, %v13774_v43  ;;  %v15072_v18 = vrot.slane %v6017_v23, %v13774_v43  ;;  %v4166_v4 = vmul.f32 %v11185_v13, %v17853_v12  ;;  %v4167_v6 = vmul.f32 %v11187_v31, %v17854_v21  ;;  %v11189_v27 = vpop.eup %11188  ;;  %v15096_v12 = vpop.f32.mrb[154].mxu0  ;;  %v17859_v53 = vld [vmem:[#allocation21_spill] sm:$0xff] }
 0x605   : > { %17856 = vst [vmem:[#allocation142_spill] sm:$0xff] %v15086_v10  ;;  %17857 = vst [vmem:[#allocation144_spill] sm:$0xff] %v15096_v12  ;;  %v6136_v1 = vcombine.low %v17858_v26, %v4150_v39  ;;  %v6137_v2 = vcombine.high %v17858_v26, %v4150_v39  ;;  %v6272_v10 = vcombine.low %v17859_v53, %v4151_v20  ;;  %v15102_v29 = vpop.f32.mrb[155].mxu0 }
 0x606   : > { %17851 = vst [vmem:[#allocation140_spill] sm:$0xff] %v15069_v33  ;;  %17852 = vst [vmem:[#allocation143_spill] sm:$0xff] %v15072_v18  ;;  %v11191_v21 = vpop.eup %11190  ;;  %v6273_v13 = vcombine.high %v17859_v53, %v4151_v20  ;;  %v6152_v33 = vcombine.low %v14961_v24, %v4166_v4  ;;  %v6153_v31 = vcombine.high %v14961_v24, %v4166_v4 }
 0x607   : > { %v11193_v23 = vpop.eup %11192  ;;  %v6288_v49 = vcombine.low %v14979_v16, %v4167_v6  ;;  %v6289_v12 = vcombine.high %v14979_v16, %v4167_v6  ;;  %v15109_v37 = vrot.slane %v6136_v1, %v13774_v43  ;;  %v15112_v39 = vrot.slane %v6137_v2, %v13774_v43 }
 0x608   : > { %v11195_v18 = vpop.eup %11194  ;;  %v17860_v20 = vcombine.low %v14990_v47, %v14999_v3  ;;  %v17862_v4 = vcombine.high %v14990_v47, %v14999_v3  ;;  %v15127_v16 = vrot.slane %v6152_v33, %v13774_v43  ;;  %v15130_v6 = vrot.slane %v6153_v31, %v13774_v43 }
 0x609   : > { %v15133_v2 = vrot.slane %v6288_v49, %v13774_v43  ;;  %v15136_v26 = vrot.slane %v6289_v12, %v13774_v43  ;;  %v15140_v1 = vrot.slane %v6272_v10, %v13774_v43  ;;  %v15143_v3 = vrot.slane %v6273_v13, %v13774_v43  ;;  %v15157_v12 = vpop.f32.mrb[156].mxu0  ;;  %v17867_v10 = vld [vmem:[#allocation98_spill] sm:$0xff]  ;;  %v17868_v13 = vld [vmem:[#allocation107_spill] sm:$0xff] }
 0x60a   : > { %v15118_v53 = vrot.slane %v17860_v20, %v13790_v15  ;;  %v15124_v24 = vrot.slane %v17862_v4, %v13790_v15  ;;  %v17864_v47 = vcombine.high %v14964_v59, %v14966_v22  ;;  %v15167_v4 = vpop.f32.mrb[157].mxu0  ;;  %v17865_v22 = vld [vmem:[#allocation101_spill] sm:$0xff]  ;;  %v4329_v59 = vcombine.high %v14996_v17, %v15002_v54 }
 0x60b   : > { %v15175_v28 = vpop.f32.mrb[158].mxu0  ;;  %v4187_v49 = vmul.f32 %v11189_v27, %v17865_v22  ;;  %v17866_v20 = vcombine.low %v14996_v17, %v15002_v54  ;;  %11198 = vrcp.f32 %v17867_v10  ;;  %v17869_v27 = vcombine.low %v14799_v19, %v14802_v9 }
 0x60c   : > { %17861 = vst [vmem:[#allocation17_spill] sm:$0xff] %v15118_v53  ;;  %17863 = vst [vmem:[#allocation60_spill] sm:$0xff] %v15124_v24  ;;  %v4295_v33 = vrot.slane %v17864_v47, %v13774_v43  ;;  %v15187_v48 = vpop.f32.mrb[159].mxu0  ;;  %v4185_v24 = vmul.f32 %v11191_v21, %v17868_v13  ;;  %v15197_v34 = vrot.slane %v4329_v59, %v13790_v15  ;;  %11200 = vrcp.f32 %v14708_v56 }
 0x60d   : > { %v15184_v31 = vrot.slane %v17866_v20, %v13790_v15  ;;  %v4680_v22 = vrot.slane %v17869_v27, %v13774_v43  ;;  %v4688_v54 = vcombine.low %v4187_v49, %v15005_v61  ;;  %v17870_v10 = vcombine.high %v14799_v19, %v14802_v9 }
 0x60e   : > { %v4344_v47 = vcombine.low %v15032_v58, %v4295_v33  ;;  %v4345_v53 = vcombine.high %v15032_v58, %v4295_v33  ;;  %v4689_v33 = vcombine.high %v4187_v49, %v15005_v61  ;;  %v4217_v13 = vmul.f32 %v11195_v18, %v14972_v14  ;;  %v11197_v14 = vpop.eup %11196  ;;  %v17871_v18 = vld [vmem:[#allocation90_spill] sm:$0xff] }
 0x60f   : > { %v4687_v21 = vrot.slane %v17870_v10, %v13774_v43  ;;  %11202 = vrcp.f32 %v17871_v18  ;;  %v4190_v56 = vmul.f32 %v11193_v23, %v14628_v11  ;;  %v17873_v19 = vcombine.high %v14806_v32, %v14815_v57 }
 0x610   : > { %v15200_v17 = vrot.slane %v4344_v47, %v13790_v15  ;;  %v15208_v58 = vrot.slane %v4345_v53, %v13790_v15  ;;  %v4696_v47 = vrot.slane %v4688_v54, %v13774_v43  ;;  %v4703_v61 = vrot.slane %v4689_v33, %v13774_v43 }
 0x611   : > { %v4416_v53 = vcombine.low %v4185_v24, %v4217_v13  ;;  %v17872_v54 = vcombine.low %v14806_v32, %v14815_v57  ;;  %v4415_v9 = vrot.slane %v17873_v19, %v13774_v43  ;;  %v4417_v11 = vcombine.high %v4185_v24, %v4217_v13 }
 0x612   : > { %v4736_v49 = vcombine.low %v4680_v22, %v4696_v47  ;;  %v4737_v27 = vcombine.high %v4680_v22, %v4696_v47  ;;  %v4752_v20 = vcombine.low %v4687_v21, %v4703_v61  ;;  %v4753_v33 = vcombine.high %v4687_v21, %v4703_v61 }
 0x613   : > { %v4408_v10 = vrot.slane %v17872_v54, %v13774_v43  ;;  %v4424_v23 = vrot.slane %v4416_v53, %v13774_v43  ;;  %11204 = vrcp.f32 %v14656_v60  ;;  %v4222_v32 = vmul.f32 %v11197_v14, %v15014_v62 }
 0x614   : > { %v15234_v59 = vrot.slane %v4736_v49, %v13790_v15  ;;  %v15237_v18 = vrot.slane %v4737_v27, %v13790_v15  ;;  %v15242_v22 = vrot.slane %v4752_v20, %v13790_v15  ;;  %v15245_v47 = vrot.slane %v4753_v33, %v13790_v15 }
 0x615   : > { %v4431_v24 = vrot.slane %v4417_v11, %v13774_v43  ;;  %v4464_v13 = vcombine.low %v4408_v10, %v4424_v23  ;;  %v11199_v19 = vpop.eup %11198  ;;  %v4465_v61 = vcombine.high %v4408_v10, %v4424_v23  ;;  %v5096_v53 = vcombine.low %v4190_v56, %v4222_v32 }
 0x616   : > { %v17874_v49 = vcombine.low %v14840_v36, %v14843_v46  ;;  %v11201_v11 = vpop.eup %11200  ;;  %v17875_v20 = vcombine.high %v14840_v36, %v14843_v46  ;;  %11206 = vrcp.f32 %v14712_v42 }
 0x617   : > { %v15258_v62 = vrot.slane %v4464_v13, %v13790_v15  ;;  %v4480_v14 = vcombine.low %v4415_v9, %v4431_v24  ;;  %v15265_v54 = vrot.slane %v4465_v61, %v13790_v15  ;;  %v4481_v33 = vcombine.high %v4415_v9, %v4431_v24 }
 0x618   : > { %v5088_v27 = vrot.slane %v17874_v49, %v13774_v43  ;;  %v5095_v10 = vrot.slane %v17875_v20, %v13774_v43  ;;  %v5097_v13 = vcombine.high %v4190_v56, %v4222_v32  ;;  %v5104_v60 = vrot.slane %v5096_v53, %v13774_v43  ;;  %v17876_v32 = vld [vmem:[#allocation18_spill] sm:$0xff] }
 0x619   : > { %v15272_v23 = vrot.slane %v4480_v14, %v13790_v15  ;;  %v15277_v49 = vrot.slane %v4481_v33, %v13790_v15  ;;  %v11203_v61 = vpop.eup %11202  ;;  %v4220_v56 = vmul.f32 %v11201_v11, %v15024_v55  ;;  %11208 = vrcp.f32 %v17876_v32 }
 0x61a   : > { %v5111_v36 = vrot.slane %v5097_v13, %v13774_v43  ;;  %v5144_v46 = vcombine.low %v5088_v27, %v5104_v60  ;;  %v5145_v20 = vcombine.high %v5088_v27, %v5104_v60  ;;  %v4188_v42 = vmul.f32 %v11203_v61, %v14637_v52 }
 0x61b   : > { %v17878_v55 = vcombine.low %v14848_v7, %v14851_v41 }
 0x61c   : > { %v15292_v33 = vrot.slane %v5144_v46, %v13790_v15  ;;  %v15295_v21 = vrot.slane %v5145_v20, %v13790_v15  ;;  %v5160_v13 = vcombine.low %v5095_v10, %v5111_v36  ;;  %v5161_v60 = vcombine.high %v5095_v10, %v5111_v36 }
 0x61d   : > { %v11205_v27 = vpop.eup %11204  ;;  %v4816_v52 = vrot.slane %v17878_v55, %v13774_v43  ;;  %v4824_v11 = vcombine.low %v4188_v42, %v4220_v56  ;;  %v4825_v61 = vcombine.high %v4188_v42, %v4220_v56  ;;  %v17881_v36 = vcombine.high %v14848_v7, %v14851_v41 }
 0x61e   : > { %17877 = vst [vmem:[#allocation33_spill] sm:$0xff] %v15295_v21  ;;  %v15302_v32 = vrot.slane %v5160_v13, %v13790_v15  ;;  %v15305_v57 = vrot.slane %v5161_v60, %v13790_v15  ;;  %v4223_v42 = vmul.f32 %v11205_v27, %v15035_v50  ;;  %v17882_v13 = vld [vmem:[#allocation109_spill] sm:$0xff]  ;;  %v4191_v60 = vmul.f32 %v11199_v19, %v14643_v8  ;;  %v15332_v19 = vpop.xlane.xlu1 %3032 }
 0x61f   : > { %v4823_v20 = vrot.slane %v17881_v36, %v13774_v43  ;;  %v4832_v55 = vrot.slane %v4824_v11, %v13774_v43  ;;  %v4839_v56 = vrot.slane %v4825_v61, %v13774_v43  ;;  %11210 = vrcp.f32 %v17882_v13 }
 0x620   : > { %17879 = vst [vmem:[#allocation19_spill] sm:$0xff] %v15302_v32  ;;  %17880 = vst [vmem:[#allocation61_spill] sm:$0xff] %v15305_v57  ;;  %v17883_v11 = vcombine.low %v14860_v35, %v14863_v45  ;;  %v17884_v50 = vcombine.high %v14860_v35, %v14863_v45  ;;  %v5232_v27 = vcombine.low %v4191_v60, %v4223_v42  ;;  %v11207_v13 = vpop.eup %11206  ;;  %11212 = vrcp.f32 %v14727_v30 }
 0x621   : > { %v4872_v14 = vcombine.low %v4816_v52, %v4832_v55  ;;  %v4873_v53 = vcombine.high %v4816_v52, %v4832_v55  ;;  %v4888_v41 = vcombine.low %v4823_v20, %v4839_v56  ;;  %v4889_v7 = vcombine.high %v4823_v20, %v4839_v56 }
 0x622   : > { %v5224_v61 = vrot.slane %v17883_v11, %v13774_v43  ;;  %v5231_v8 = vrot.slane %v17884_v50, %v13774_v43  ;;  %v5233_v36 = vcombine.high %v4191_v60, %v4223_v42  ;;  %v5240_v35 = vrot.slane %v5232_v27, %v13774_v43 }
 0x623   : > { %v15335_v10 = vrot.slane %v4872_v14, %v13790_v15  ;;  %v15338_v52 = vrot.slane %v4873_v53, %v13790_v15  ;;  %v15341_v20 = vrot.slane %v4888_v41, %v13790_v15  ;;  %v15344_v55 = vrot.slane %v4889_v7, %v13790_v15  ;;  %v11209_v42 = vpop.eup %11208 }
 0x624   : > { %v5247_v45 = vrot.slane %v5233_v36, %v13774_v43  ;;  %v4221_v56 = vmul.f32 %v11207_v13, %v15041_v63  ;;  %v5280_v30 = vcombine.low %v5224_v61, %v5240_v35  ;;  %v5281_v7 = vcombine.high %v5224_v61, %v5240_v35  ;;  %v15360_v63 = vpop.xlane.xlu1 %3064 }
 0x625   : > { %17885 = vst [vmem:[#allocation35_spill] sm:$0xff] %v15335_v10  ;;  %17886 = vst [vmem:[#allocation15_spill] sm:$0xff] %v15338_v52  ;;  %v4189_v27 = vmul.f32 %v11209_v42, %v14648_v38  ;;  %11214 = vrcp.f32 %v14735_v0  ;;  %v17893_v38 = vcombine.low %v15049_v44, %v15061_v25  ;;  %v17894_v35 = vcombine.high %v15049_v44, %v15061_v25 }
 0x626   : > { %17887 = vst [vmem:[#allocation40_spill] sm:$0xff] %v15341_v20  ;;  %17888 = vst [vmem:[#allocation43_spill] sm:$0xff] %v15344_v55  ;;  %v5296_v11 = vcombine.low %v5231_v8, %v5247_v45  ;;  %v5297_v50 = vcombine.high %v5231_v8, %v5247_v45  ;;  %v15363_v36 = vrot.slane %v5280_v30, %v13790_v15  ;;  %v17899_v30 = vld [vmem:[#allocation95_spill] sm:$0xff] }
 0x627   : > { %v15366_v13 = vrot.slane %v5281_v7, %v13790_v15  ;;  %v4960_v61 = vcombine.low %v4189_v27, %v4221_v56  ;;  %v4961_v8 = vcombine.high %v4189_v27, %v4221_v56  ;;  %v5936_v0 = vrot.slane %v17893_v38, %v13790_v15  ;;  %v17896_v27 = vld [vmem:[#allocation131_spill] sm:$0xff] }
 0x628   : > { %17889 = vst [vmem:[#allocation48_spill] sm:$0xff] %v15363_v36  ;;  %v15369_v60 = vrot.slane %v5296_v11, %v13790_v15  ;;  %v15372_v41 = vrot.slane %v5297_v50, %v13790_v15  ;;  %v5943_v45 = vrot.slane %v17894_v35, %v13790_v15  ;;  %v17895_v50 = vld [vmem:[#allocation104_spill] sm:$0xff]  ;;  %11216 = vrcp.f32 %v17899_v30 }
 0x629   : > { %17890 = vst [vmem:[#allocation10_spill] sm:$0xff] %v15366_v13  ;;  %v11211_v42 = vpop.eup %11210  ;;  %v17897_v38 = vcombine.low %v17895_v50, %v17896_v27  ;;  %v17898_v25 = vcombine.high %v17895_v50, %v17896_v27  ;;  %v4968_v35 = vrot.slane %v4960_v61, %v13774_v43  ;;  %v4975_v7 = vrot.slane %v4961_v8, %v13774_v43  ;;  %v17902_v50 = vld [vmem:[#allocation140_spill] sm:$0xff]  ;;  %v15413_v61 = vpop.xlane.xlu0 %3034 }
 0x62a   : > { %17891 = vst [vmem:[#allocation34_spill] sm:$0xff] %v15369_v60  ;;  %17892 = vst [vmem:[#allocation50_spill] sm:$0xff] %v15372_v41  ;;  %v17900_v11 = vcombine.low %v15052_v5, %v15064_v51  ;;  %v17903_v27 = vcombine.low %v15055_v40, %v17902_v50  ;;  %v11213_v9 = vpop.eup %11212  ;;  %v15415_v41 = vpop.xlane.xlu1 %3096 }
 0x62b   : > { %v4952_v53 = vrot.slane %v17897_v38, %v13774_v43  ;;  %v4959_v44 = vrot.slane %v17898_v25, %v13774_v43  ;;  %v17901_v38 = vcombine.high %v15052_v5, %v15064_v51  ;;  %v17905_v51 = vld [vmem:[#allocation138_spill] sm:$0xff] }
 0x62c   : > { %v5952_v56 = vrot.slane %v17900_v11, %v13790_v15  ;;  %v6072_v25 = vrot.slane %v17903_v27, %v13790_v15  ;;  %v17904_v11 = vcombine.high %v15055_v40, %v17902_v50 }
 0x62d   : > { %v5959_v14 = vrot.slane %v17901_v38, %v13790_v15  ;;  %v5008_v8 = vcombine.low %v4952_v53, %v4968_v35  ;;  %v5009_v46 = vcombine.high %v4952_v53, %v4968_v35  ;;  %v5024_v30 = vcombine.low %v4959_v44, %v4975_v7  ;;  %v17906_v38 = vld [vmem:[#allocation143_spill] sm:$0xff] }
 0x62e   : > { %v5025_v24 = vcombine.high %v4959_v44, %v4975_v7  ;;  %v6079_v5 = vrot.slane %v17904_v11, %v13790_v15  ;;  %v17907_v60 = vcombine.low %v17905_v51, %v17906_v38  ;;  %v17908_v27 = vcombine.high %v17905_v51, %v17906_v38 }
 0x62f   : > { %v9617_v35 = vcombine.low %v5936_v0, %v5943_v45  ;;  %v15430_v7 = vrot.slane %v5008_v8, %v13790_v15  ;;  %v15433_v44 = vrot.slane %v5009_v46, %v13790_v15  ;;  %v15436_v40 = vrot.slane %v5024_v30, %v13790_v15  ;;  %v15442_v51 = vpop.eup %11214  ;;  %v15459_v8 = vpop.xlane.xlu0 %3066 }
 0x630   : > { %v6088_v13 = vrot.slane %v17907_v60, %v13790_v15  ;;  %v6095_v53 = vrot.slane %v17908_v27, %v13790_v15  ;;  %v15439_v50 = vrot.slane %v5025_v24, %v13790_v15  ;;  %v9619_v11 = vcombine.high %v5936_v0, %v5943_v45  ;;  %v17914_v27 = vld [vmem:[#allocation114_spill] sm:$0xff]  ;;  %v15461_v46 = vpop.xlane.xlu1 %3128 }
 0x631   : > { %17909 = vst [vmem:[#allocation62_spill] sm:$0xff] %v15430_v7  ;;  %17910 = vst [vmem:[#allocation27_spill] sm:$0xff] %v15433_v44  ;;  %v8048_v60 = vrot.slane %v9617_v35, %v13774_v43  ;;  %v9621_v36 = vcombine.low %v5952_v56, %v5959_v14  ;;  %v9623_v55 = vcombine.high %v5952_v56, %v5959_v14  ;;  %v17913_v56 = vld [vmem:[#allocation123_spill] sm:$0xff] }
 0x632   : > { %17911 = vst [vmem:[#allocation126_spill] sm:$0xff] %v15436_v40  ;;  %17912 = vst [vmem:[#allocation67_spill] sm:$0xff] %v15439_v50  ;;  %v8064_v38 = vrot.slane %v9619_v11, %v13774_v43  ;;  %v9625_v45 = vcombine.low %v6072_v25, %v6079_v5  ;;  %11218 = vrcp.f32 %v17913_v56  ;;  %v15457_v35 = vmul.f32 %v11211_v42, %v17914_v27  ;;  %v17915_v11 = vld [vmem:[#allocation128_spill] sm:$0xff]  ;;  %v17918_v56 = vld [vmem:[#allocation141_spill] sm:$0xff]  ;;  %v11217_v42 = vpop.eup %11216 }
 0x633   : > { %v8080_v0 = vrot.slane %v9621_v36, %v13774_v43  ;;  %v8096_v14 = vrot.slane %v9623_v55, %v13774_v43  ;;  %v9627_v50 = vcombine.high %v6072_v25, %v6079_v5  ;;  %v17916_v36 = vld [vmem:[#allocation9_spill] sm:$0xff]  ;;  %v9629_v7 = vcombine.low %v6088_v13, %v6095_v53 }
 0x634   : > { %v8104_v30 = vcombine.low %v8048_v60, %v8064_v38  ;;  %v8184_v24 = vrot.slane %v9625_v45, %v13774_v43  ;;  %v17917_v40 = vcombine.low %v17915_v11, %v17916_v36  ;;  %v9631_v20 = vcombine.high %v6088_v13, %v6095_v53  ;;  %v17922_v53 = vld [vmem:[#allocation129_spill] sm:$0xff]  ;;  %v15490_v21 = vpop.xlane.xlu1 %3036 }
 0x635   : > { %v8136_v44 = vcombine.low %v8080_v0, %v8096_v14  ;;  %v4226_v52 = vmul.f32 %v11213_v9, %v17918_v56  ;;  %v17919_v27 = vcombine.high %v17915_v11, %v17916_v36  ;;  %v8200_v5 = vrot.slane %v9627_v50, %v13774_v43 }
 0x636   : > { %v5632_v55 = vrot.slane %v17917_v40, %v13774_v43  ;;  %v15474_v57 = vrot.slane %v8104_v30, %v13790_v15  ;;  %v8216_v40 = vrot.slane %v9629_v7, %v13774_v43  ;;  %v8232_v13 = vrot.slane %v9631_v20, %v13774_v43 }
 0x637   : > { %v5639_v10 = vrot.slane %v17919_v27, %v13774_v43  ;;  %v15477_v25 = vrot.slane %v8136_v44, %v13790_v15  ;;  %v5640_v9 = vcombine.low %v17922_v53, %v4226_v52  ;;  %v5641_v45 = vcombine.high %v17922_v53, %v4226_v52  ;;  %v15486_v27 = vpop.xlane.xlu0 %3098 }
 0x638   : > { %17920 = vst [vmem:[#allocation80_spill] sm:$0xff] %v15474_v57  ;;  %v8240_v36 = vcombine.low %v8184_v24, %v8200_v5  ;;  %v8105_v56 = vcombine.high %v8048_v60, %v8064_v38  ;;  %v8137_v30 = vcombine.high %v8080_v0, %v8096_v14  ;;  %v8272_v44 = vcombine.low %v8216_v40, %v8232_v13 }
 0x639   : > { %17921 = vst [vmem:[#allocation71_spill] sm:$0xff] %v15477_v25  ;;  %v8169_v11 = vcombine.high %v15474_v57, %v15477_v25  ;;  %v5648_v32 = vrot.slane %v5640_v9, %v13774_v43  ;;  %v5655_v50 = vrot.slane %v5641_v45, %v13774_v43  ;;  %v8241_v7 = vcombine.high %v8184_v24, %v8200_v5  ;;  %v17928_v57 = vld [vmem:[#allocation142_spill] sm:$0xff] }
 0x63a   : > { %v15493_v20 = vrot.slane %v8240_v36, %v13790_v15  ;;  %v15496_v52 = vrot.slane %v8105_v56, %v13790_v15  ;;  %v15499_v53 = vrot.slane %v8137_v30, %v13790_v15  ;;  %v8273_v60 = vcombine.high %v8216_v40, %v8232_v13  ;;  %v17926_v30 = vld [vmem:[#allocation134_spill] sm:$0xff] }
 0x63b   : > { %v15502_v38 = vrot.slane %v8272_v44, %v13790_v15  ;;  %v5688_v0 = vcombine.low %v5632_v55, %v5648_v32  ;;  %v5689_v14 = vcombine.high %v5632_v55, %v5648_v32  ;;  %v5704_v9 = vcombine.low %v5639_v10, %v5655_v50  ;;  %v17925_v55 = vld [vmem:[#allocation16_spill] sm:$0xff] }
 0x63c   : > { %17923 = vst [vmem:[#allocation86_spill] sm:$0xff] %v15493_v20  ;;  %v5705_v45 = vcombine.high %v5639_v10, %v5655_v50  ;;  %v8170_v24 = vcombine.low %v15496_v52, %v15499_v53  ;;  %v15507_v5 = vrot.slane %v8241_v7, %v13790_v15  ;;  %v15510_v36 = vrot.slane %v8273_v60, %v13790_v15  ;;  %v11219_v56 = vpop.eup %11218 }
 0x63d   : > { %17924 = vst [vmem:[#allocation83_spill] sm:$0xff] %v15502_v38  ;;  %v8305_v40 = vcombine.high %v15493_v20, %v15502_v38  ;;  %v15515_v13 = vrot.slane %v5688_v0, %v13790_v15  ;;  %v15518_v32 = vrot.slane %v5689_v14, %v13790_v15  ;;  %v15521_v10 = vrot.slane %v5704_v9, %v13790_v15  ;;  %v15534_v14 = vpop.xlane.xlu0 %3130  ;;  %v17931_v9 = vld [vmem:[#allocation135_spill] sm:$0xff] }
 0x63e   : > { %v17927_v44 = vcombine.low %v17925_v55, %v17926_v30  ;;  %v15528_v7 = vrot.slane %v5705_v45, %v13790_v15  ;;  %v8306_v60 = vcombine.low %v15507_v5, %v15510_v36  ;;  %v4224_v0 = vmul.f32 %v11217_v42, %v17928_v57  ;;  %v15541_v45 = vpop.xlane.xlu1 %3068 }
 0x63f   : > { %11220 = vrcp.f32 %v15332_v19  ;;  %v10517_v25 = vpack.i.bf16 %v8305_v40, %v8169_v11  ;;  %v17929_v42 = vcombine.high %v17925_v55, %v17926_v30  ;;  %v17930_v40 = vld [vmem:[#allocation12_spill] sm:$0xff]  ;;  %v8307_v57 = vcombine.high %v15507_v5, %v15510_v36 }
 0x640   : > { %v5360_v50 = vrot.slane %v17927_v44, %v13774_v43  ;;  %11222 = vrcp.f32 %v15413_v61  ;;  %v10522_v19 = vpack.i.bf16 %v8306_v60, %v8170_v24  ;;  %v17932_v20 = vcombine.low %v17930_v40, %v17931_v9  ;;  %v17934_v30 = vld [vmem:[#allocation144_spill] sm:$0xff] }
 0x641   : > { %v5367_v11 = vrot.slane %v17929_v42, %v13774_v43  ;;  %11224 = vrcp.f32 %v15360_v63  ;;  %10518 = vrot.lane.b32.xlu0 %v10517_v25, %s11323_s10  ;;  %v5368_v61 = vcombine.low %v15457_v35, %v4224_v0  ;;  %v17933_v24 = vcombine.high %v17930_v40, %v17931_v9 }
 0x642   : > { %v5768_v38 = vrot.slane %v17932_v20, %v13774_v43  ;;  %11226 = vrcp.f32 %v15459_v8  ;;  %v5369_v55 = vcombine.high %v15457_v35, %v4224_v0  ;;  %v4227_v42 = vmul.f32 %v15442_v51, %v17934_v30  ;;  %v17935_v8 = vld [vmem:[#allocation36_spill] sm:$0xff]  ;;  %v15576_v0 = vpop.xlane.xlu0 %3038 }
 0x643   : > { %v5775_v60 = vrot.slane %v17933_v24, %v13774_v43  ;;  %v5376_v20 = vrot.slane %v5368_v61, %v13774_v43  ;;  %v4225_v63 = vmul.f32 %v11219_v56, %v15102_v29  ;;  %v8171_v25 = vcombine.high %v15496_v52, %v15499_v53  ;;  %v17936_v56 = vld [vmem:[#allocation122_spill] sm:$0xff]  ;;  %v3101_v53 = vpop.xlane.xlu1 %3100 }
 0x644   : > { %11228 = vrcp.f32 %v15415_v41  ;;  %v5383_v9 = vrot.slane %v5369_v55, %v13774_v43  ;;  %v5776_v40 = vcombine.low %v17935_v8, %v4227_v42  ;;  %v5777_v35 = vcombine.high %v17935_v8, %v4227_v42 }
 0x645   : > { %10523 = vrot.lane.b32.xlu0 %v10522_v19, %s11322_s8  ;;  %v5416_v51 = vcombine.low %v5360_v50, %v5376_v20  ;;  %v5417_v29 = vcombine.high %v5360_v50, %v5376_v20  ;;  %v5504_v61 = vcombine.low %v17936_v56, %v4225_v63  ;;  %v5505_v52 = vcombine.high %v17936_v56, %v4225_v63 }
 0x646   : > { %v5432_v5 = vcombine.low %v5367_v11, %v5383_v9  ;;  %v5433_v36 = vcombine.high %v5367_v11, %v5383_v9  ;;  %v5784_v41 = vrot.slane %v5776_v40, %v13774_v43  ;;  %v5791_v24 = vrot.slane %v5777_v35, %v13774_v43  ;;  %v15621_v40 = vpop.xlane.xlu0 %3070 }
 0x647   : > { %v15584_v55 = vrot.slane %v5416_v51, %v13790_v15  ;;  %v15587_v30 = vrot.slane %v5417_v29, %v13790_v15  ;;  %v5512_v19 = vrot.slane %v5504_v61, %v13774_v43  ;;  %v5519_v50 = vrot.slane %v5505_v52, %v13774_v43  ;;  %v3133_v44 = vpop.xlane.xlu1 %3132 }
 0x648   : > { %v15592_v42 = vrot.slane %v5432_v5, %v13790_v15  ;;  %v15595_v20 = vrot.slane %v5433_v36, %v13790_v15  ;;  %v5824_v11 = vcombine.low %v5768_v38, %v5784_v41  ;;  %v5825_v63 = vcombine.high %v5768_v38, %v5784_v41  ;;  %v17940_v36 = vld [vmem:[#allocation32_spill] sm:$0xff] }
 0x649   : > { %17937 = vst [vmem:[#allocation84_spill] sm:$0xff] %v15587_v30  ;;  %v15597_v9 = vpop.eup %11220  ;;  %v5840_v35 = vcombine.low %v5775_v60, %v5791_v24  ;;  %v5841_v51 = vcombine.high %v5775_v60, %v5791_v24  ;;  %v17941_v41 = vld [vmem:[#allocation136_spill] sm:$0xff]  ;;  %11230 = vrcp.f32 %v3101_v53 }
 0x64a   : > { %17938 = vst [vmem:[#allocation77_spill] sm:$0xff] %v15592_v42  ;;  %17939 = vst [vmem:[#allocation44_spill] sm:$0xff] %v15595_v20  ;;  %v15603_v29 = vpop.eup %11222  ;;  %v15610_v38 = vrot.slane %v5824_v11, %v13790_v15  ;;  %v15613_v52 = vrot.slane %v5825_v63, %v13790_v15  ;;  %v17942_v60 = vcombine.low %v17940_v36, %v17941_v41  ;;  %11232 = vrcp.f32 %v15490_v21 }
 0x64b   : > { %v15615_v5 = vpop.eup %11224  ;;  %v15624_v56 = vrot.slane %v5840_v35, %v13790_v15  ;;  %v15627_v61 = vrot.slane %v5841_v51, %v13790_v15  ;;  %v17944_v63 = vcombine.high %v17940_v36, %v17941_v41  ;;  %11234 = vrcp.f32 %v15541_v45 }
 0x64c   : > { %v5496_v24 = vrot.slane %v17942_v60, %v13774_v43  ;;  %v15629_v11 = vpop.eup %11226  ;;  %11236 = vrcp.f32 %v3133_v44  ;;  %v17947_v35 = vcombine.low %v15109_v37, %v15127_v16  ;;  %v10527_v45 = vpack.i.bf16 %v8307_v57, %v8171_v25 }
 0x64d   : > { %17943 = vst [vmem:[#allocation72_spill] sm:$0xff] %v15627_v61  ;;  %v5503_v8 = vrot.slane %v17944_v63, %v13774_v43  ;;  %v17950_v44 = vcombine.high %v15109_v37, %v15127_v16  ;;  %v17952_v57 = vcombine.high %v15112_v39, %v15130_v6  ;;  %11238 = vrcp.f32 %v15461_v46 }
 0x64e   : > { %v5552_v20 = vcombine.low %v5496_v24, %v5512_v19  ;;  %v5553_v42 = vcombine.high %v5496_v24, %v5512_v19  ;;  %v15644_v30 = vpop.eup %11228  ;;  %v6208_v51 = vrot.slane %v17947_v35, %v13790_v15  ;;  %v17951_v35 = vcombine.low %v15112_v39, %v15130_v6  ;;  %10528 = vrot.lane.b32.xlu0 %v10527_v45, %s11321_s7  ;;  %v10732_v39 = vld [vmem:[%s16813_s2] sm:$0xff]  }
 0x64f   : > { %v5568_v21 = vcombine.low %v5503_v8, %v5519_v50  ;;  %v5569_v36 = vcombine.high %v5503_v8, %v5519_v50  ;;  %v6215_v50 = vrot.slane %v17950_v44, %v13790_v15  ;;  %v6231_v25 = vrot.slane %v17952_v57, %v13790_v15  ;;  %10329 = vmatprep.subr.bf16.mxu1 %v10732_v39 }
 0x650   : > { %v15648_v41 = vrot.slane %v5552_v20, %v13790_v15  ;;  %v15651_v63 = vrot.slane %v5553_v42, %v13790_v15  ;;  %v3103_v20 = vpop.xlane.xlu0 %3102  ;;  %v17955_v6 = vcombine.low %v15143_v3, %v15136_v26  ;;  %v17956_v57 = vcombine.high %v15143_v3, %v15136_v26  ;;  %10330 = vmatpush3.bf16.msra.mxu1 %v10732_v39 }
 0x651   : > { %v15658_v19 = vrot.slane %v5568_v21, %v13790_v15  ;;  %v15661_v24 = vrot.slane %v5569_v36, %v13790_v15  ;;  %v6224_v21 = vrot.slane %v17951_v35, %v13790_v15  ;;  %v17953_v36 = vcombine.low %v15140_v1, %v15133_v2 }
 0x652   : > { %17945 = vst [vmem:[#allocation26_spill] sm:$0xff] %v15648_v41  ;;  %17946 = vst [vmem:[#allocation30_spill] sm:$0xff] %v15651_v63  ;;  %v17954_v35 = vcombine.high %v15140_v1, %v15133_v2  ;;  %v6360_v45 = vrot.slane %v17955_v6, %v13790_v15  ;;  %11240 = vrcp.f32 %v3103_v20  ;;  %v9633_v16 = vcombine.low %v6208_v51, %v6215_v50  ;;  %v10733_v20 = vld [vmem:[%s16813_s2 + $0x8] sm:$0xff]  }
 0x653   : > { %17948 = vst [vmem:[#allocation45_spill] sm:$0xff] %v15658_v19  ;;  %17949 = vst [vmem:[#allocation11_spill] sm:$0xff] %v15661_v24  ;;  %v6344_v44 = vrot.slane %v17953_v36, %v13790_v15  ;;  %v6367_v36 = vrot.slane %v17956_v57, %v13790_v15  ;;  %v9635_v2 = vcombine.high %v6208_v51, %v6215_v50  ;;  %v11231_v1 = vpop.eup %11230  ;;  %11242 = vrcp.f32 %v15576_v0 }
 0x654   : > { %v6351_v8 = vrot.slane %v17954_v35, %v13790_v15  ;;  %v9637_v35 = vcombine.low %v6224_v21, %v6231_v25  ;;  %v9639_v37 = vcombine.high %v6224_v21, %v6231_v25  ;;  %v11233_v46 = vpop.eup %11232  ;;  %v8320_v60 = vrot.slane %v9633_v16, %v13774_v43  ;;  %v17957_v21 = vld [vmem:[#allocation130_spill] sm:$0xff]  ;;  %v3135_v16 = vpop.xlane.xlu0 %3134  ;;  %10331 = vmatprep.subr.bf16.mxu1 %v10733_v20 }
 0x655   : > { %v8336_v6 = vrot.slane %v9635_v2, %v13774_v43  ;;  %v9645_v24 = vcombine.low %v6360_v45, %v6367_v36  ;;  %v9647_v19 = vcombine.high %v6360_v45, %v6367_v36  ;;  %v4214_v25 = vmul.f32 %v11231_v1, %v17957_v21  ;;  %10332 = vmatpush3.bf16.msra.mxu1 %v10733_v20 }
 0x656   : > { %v9641_v42 = vcombine.low %v6344_v44, %v6351_v8  ;;  %v9643_v53 = vcombine.high %v6344_v44, %v6351_v8  ;;  %v8352_v26 = vrot.slane %v9637_v35, %v13774_v43  ;;  %v8368_v3 = vrot.slane %v9639_v37, %v13774_v43  ;;  %v11235_v8 = vpop.eup %11234  ;;  %v17963_v35 = vld [vmem:[#allocation127_spill] sm:$0xff] }
 0x657   : > { %v8376_v44 = vcombine.low %v8320_v60, %v8336_v6  ;;  %v8488_v39 = vrot.slane %v9645_v24, %v13774_v43  ;;  %v8504_v45 = vrot.slane %v9647_v19, %v13774_v43  ;;  %v11237_v57 = vpop.eup %11236  ;;  %11244 = vrcp.f32 %v15621_v40 }
 0x658   : > { %v8456_v51 = vrot.slane %v9641_v42, %v13774_v43  ;;  %v8472_v50 = vrot.slane %v9643_v53, %v13774_v43  ;;  %v8408_v37 = vcombine.low %v8352_v26, %v8368_v3  ;;  %v17958_v53 = vld [vmem:[#allocation29_spill] sm:$0xff]  ;;  %11246 = vrcp.f32 %v3135_v16 }
 0x659   : > { %v4182_v36 = vmul.f32 %v11233_v46, %v17958_v53  ;;  %v15720_v2 = vrot.slane %v8376_v44, %v13790_v15  ;;  %v8544_v1 = vcombine.low %v8488_v39, %v8504_v45  ;;  %v4198_v21 = vmul.f32 %v11235_v8, %v17963_v35  ;;  %v11239_v53 = vpop.eup %11238  ;;  %v17964_v35 = vld [vmem:[#allocation87_spill] sm:$0xff] }
 0x65a   : > { %v8512_v42 = vcombine.low %v8456_v51, %v8472_v50  ;;  %v15723_v24 = vrot.slane %v8408_v37, %v13790_v15  ;;  %v4230_v46 = vmul.f32 %v11237_v57, %v15157_v12  ;;  %v8377_v16 = vcombine.high %v8320_v60, %v8336_v6  ;;  %v10734_v12 = vld [vmem:[%s16813_s2 + $0x10] sm:$0xff]  }
 0x65b   : > { %17959 = vst [vmem:[#allocation38_spill] sm:$0xff] %v15720_v2  ;;  %v15729_v0 = vrot.slane %v8544_v1, %v13790_v15  ;;  %v6168_v40 = vcombine.low %v4182_v36, %v4214_v25  ;;  %v6169_v20 = vcombine.high %v4182_v36, %v4214_v25  ;;  %v8409_v63 = vcombine.high %v8352_v26, %v8368_v3 }
 0x65c   : > { %17960 = vst [vmem:[#allocation37_spill] sm:$0xff] %v15723_v24  ;;  %v15726_v19 = vrot.slane %v8512_v42, %v13790_v15  ;;  %v8441_v44 = vcombine.high %v15720_v2, %v15723_v24  ;;  %v11241_v37 = vpop.eup %11240  ;;  %v6184_v1 = vcombine.low %v4198_v21, %v4230_v46  ;;  %v6185_v61 = vcombine.high %v4198_v21, %v4230_v46 }
 0x65d   : > { %17962 = vst [vmem:[#allocation117_spill] sm:$0xff] %v15729_v0  ;;  %v6176_v41 = vrot.slane %v6168_v40, %v13774_v43  ;;  %v6183_v8 = vrot.slane %v6169_v20, %v13774_v43  ;;  %v15743_v57 = vrot.slane %v8377_v16, %v13790_v15  ;;  %v15746_v60 = vrot.slane %v8409_v63, %v13790_v15 }
 0x65e   : > { %17961 = vst [vmem:[#allocation113_spill] sm:$0xff] %v15726_v19  ;;  %v8577_v42 = vcombine.high %v15726_v19, %v15729_v0  ;;  %v8513_v6 = vcombine.high %v8456_v51, %v8472_v50  ;;  %v6192_v3 = vrot.slane %v6184_v1, %v13774_v43  ;;  %v6199_v25 = vrot.slane %v6185_v61, %v13774_v43  ;;  %v17992_v0 = vld [vmem:[#allocation119_spill] sm:$0xff] }
 0x65f   : > { %v8545_v36 = vcombine.high %v8488_v39, %v8504_v45  ;;  %10333 = vmatprep.subr.bf16.mxu1 %v10734_v12  ;;  %v4180_v21 = vmul.f32 %v15597_v9, %v17964_v35  ;;  %11248 = vrcp.f32 %v15486_v27  ;;  %v8442_v46 = vcombine.low %v15743_v57, %v15746_v60  ;;  %v11243_v39 = vpop.eup %11242  ;;  %v17965_v45 = vld [vmem:[#allocation132_spill] sm:$0xff] }
 0x660   : > { %v10502_v26 = vpack.i.bf16 %v8577_v42, %v8441_v44  ;;  %v15756_v40 = vrot.slane %v8513_v6, %v13790_v15  ;;  %10334 = vmatpush3.bf16.msra.mxu1 %v10734_v12  ;;  %v6232_v63 = vcombine.low %v6176_v41, %v6192_v3  ;;  %v6233_v51 = vcombine.high %v6176_v41, %v6192_v3  ;;  %v17969_v3 = vld [vmem:[#allocation124_spill] sm:$0xff] }
 0x661   : > { %v6248_v50 = vcombine.low %v6183_v8, %v6199_v25  ;;  %v6249_v61 = vcombine.high %v6183_v8, %v6199_v25  ;;  %v4212_v44 = vmul.f32 %v15644_v30, %v17965_v45  ;;  %v17966_v27 = vcombine.low %v15184_v31, %v15197_v34  ;;  %v11245_v16 = vpop.eup %11244  ;;  %v17989_v35 = vld [vmem:[#allocation60_spill] sm:$0xff] }
 0x662   : > { %10503 = vrot.lane.b32.xlu1 %v10502_v26, %s11323_s10  ;;  %11250 = vrcp.f32 %v15534_v14  ;;  %v15769_v20 = vrot.slane %v8545_v36, %v13790_v15  ;;  %v15772_v41 = vrot.slane %v6232_v63, %v13790_v15  ;;  %v15775_v42 = vrot.slane %v6233_v51, %v13790_v15  ;;  %v11247_v12 = vpop.eup %11246 }
 0x663   : > { %v15765_v9 = vrot.slane %v17966_v27, %v13774_v43  ;;  %v15778_v30 = vrot.slane %v6248_v50, %v13790_v15  ;;  %v15781_v1 = vrot.slane %v6249_v61, %v13790_v15  ;;  %v17967_v14 = vcombine.high %v15184_v31, %v15197_v34  ;;  %v17970_v50 = vld [vmem:[#allocation94_spill] sm:$0xff] }
 0x664   : > { %v17968_v6 = vcombine.low %v15200_v17, %v15208_v58  ;;  %v4215_v25 = vmul.f32 %v11241_v37, %v17969_v3  ;;  %v8578_v36 = vcombine.low %v15756_v40, %v15769_v20  ;;  %v4196_v61 = vmul.f32 %v15615_v5, %v17970_v50 }
 0x665   : > { %v15787_v8 = vrot.slane %v17967_v14, %v13774_v43  ;;  %v4228_v37 = vmul.f32 %v11239_v53, %v15167_v4  ;;  %v5896_v45 = vcombine.low %v4180_v21, %v4212_v44  ;;  %v17971_v27 = vcombine.high %v15200_v17, %v15208_v58  ;;  %v17974_v4 = vld [vmem:[#allocation69_spill] sm:$0xff] }
 0x666   : > { %v15793_v26 = vrot.slane %v17968_v6, %v13774_v43  ;;  %v10507_v51 = vpack.i.bf16 %v8578_v36, %v8442_v46  ;;  %v17972_v6 = vcombine.low %v15258_v62, %v15265_v54  ;;  %v17973_v46 = vcombine.high %v15258_v62, %v15265_v54 }
 0x667   : > { %v15813_v14 = vrot.slane %v17971_v27, %v13774_v43  ;;  %v4183_v53 = vmul.f32 %v11243_v39, %v17974_v4  ;;  %v17975_v17 = vcombine.low %v15272_v23, %v15277_v49  ;;  %v5897_v36 = vcombine.high %v4180_v21, %v4212_v44 }
 0x668   : > { %v15819_v3 = vrot.slane %v17972_v6, %v13774_v43  ;;  %v15825_v5 = vrot.slane %v17973_v46, %v13774_v43  ;;  %10508 = vrot.lane.b32.xlu1 %v10507_v51, %s11322_s8  ;;  %v5912_v50 = vcombine.low %v4196_v61, %v4228_v37  ;;  %v5913_v27 = vcombine.high %v4196_v61, %v4228_v37  ;;  %v17976_v6 = vld [vmem:[#allocation115_spill] sm:$0xff] }
 0x669   : > { %v15832_v58 = vrot.slane %v17975_v17, %v13774_v43  ;;  %v4199_v31 = vmul.f32 %v11245_v16, %v17976_v6  ;;  %v4231_v34 = vmul.f32 %v11247_v12, %v15175_v28  ;;  %v6304_v62 = vcombine.low %v4183_v53, %v4215_v25  ;;  %v11249_v46 = vpop.eup %11248 }
 0x66a   : > { %v6305_v54 = vcombine.high %v4183_v53, %v4215_v25  ;;  %v5904_v39 = vrot.slane %v5896_v45, %v13774_v43  ;;  %v5911_v4 = vrot.slane %v5897_v36, %v13774_v43  ;;  %v5920_v63 = vrot.slane %v5912_v50, %v13774_v43 }
 0x66b   : > { %v5927_v17 = vrot.slane %v5913_v27, %v13774_v43  ;;  %v17977_v21 = vcombine.high %v15272_v23, %v15277_v49  ;;  %v6312_v16 = vrot.slane %v6304_v62, %v13774_v43  ;;  %v6320_v28 = vcombine.low %v4199_v31, %v4231_v34 }
 0x66c   : > { %v6321_v12 = vcombine.high %v4199_v31, %v4231_v34  ;;  %v11251_v25 = vpop.eup %11250  ;;  %v5960_v51 = vcombine.low %v5904_v39, %v5920_v63  ;;  %v5961_v61 = vcombine.high %v5904_v39, %v5920_v63  ;;  %v6319_v53 = vrot.slane %v6305_v54, %v13774_v43  ;;  %v15865_v31 = vpop.permute.xlu0 %10413 }
 0x66d   : > { %v15845_v44 = vrot.slane %v17977_v21, %v13774_v43  ;;  %v5976_v37 = vcombine.low %v5911_v4, %v5927_v17  ;;  %v5977_v45 = vcombine.high %v5911_v4, %v5927_v17  ;;  %v6328_v36 = vrot.slane %v6320_v28, %v13774_v43  ;;  %17978 = vst [vmem:[#allocation8_spill] sm:$0xff] %v15865_v31  ;;  %v17988_v4 = vld [vmem:[#allocation17_spill] sm:$0xff] }
 0x66e   : > { %v6335_v50 = vrot.slane %v6321_v12, %v13774_v43  ;;  %v6488_v23 = vcombine.low %v15765_v9, %v15787_v8  ;;  %v15854_v49 = vrot.slane %v5960_v51, %v13790_v15  ;;  %v15857_v27 = vrot.slane %v5961_v61, %v13790_v15 }
 0x66f   : > { %v15860_v34 = vrot.slane %v5976_v37, %v13790_v15  ;;  %v15863_v63 = vrot.slane %v5977_v45, %v13790_v15  ;;  %v6368_v6 = vcombine.low %v6312_v16, %v6328_v36  ;;  %v6369_v62 = vcombine.high %v6312_v16, %v6328_v36  ;;  %v10735_v37 = vld [vmem:[%s16813_s2 + $0x18] sm:$0xff]   ;;  %v17982_v45 = vld [vmem:[#allocation133_spill] sm:$0xff] }
 0x670   : > { %v6384_v54 = vcombine.low %v6319_v53, %v6335_v50  ;;  %v6385_v39 = vcombine.high %v6319_v53, %v6335_v50  ;;  %v4213_v53 = vmul.f32 %v11249_v46, %v17982_v45  ;;  %10335 = vmatprep.subr.bf16.mxu1 %v10735_v37  ;;  %v6624_v46 = vcombine.low %v15819_v3, %v15825_v5  ;;  %v17983_v50 = vld [vmem:[#allocation68_spill] sm:$0xff]  ;;  %v17984_v36 = vld [vmem:[#allocation137_spill] sm:$0xff]  ;;  %v15928_v19 = vpop.permute.xlu0 %10438 }
 0x671   : > { %v15876_v12 = vrot.slane %v6368_v6, %v13790_v15  ;;  %v15879_v51 = vrot.slane %v6369_v62, %v13790_v15  ;;  %v6656_v45 = vcombine.low %v15832_v58, %v15845_v44  ;;  %10336 = vmatpush3.bf16.msra.mxu1 %v10735_v37  ;;  %v4181_v6 = vmul.f32 %v15603_v29, %v17983_v50  ;;  %v17985_v62 = vld [vmem:[#allocation139_spill] sm:$0xff] }
 0x672   : > { %v15882_v16 = vrot.slane %v6384_v54, %v13790_v15  ;;  %v15885_v61 = vrot.slane %v6385_v39, %v13790_v15  ;;  %v15900_v54 = vrot.slane %v6488_v23, %v13790_v15  ;;  %v6520_v39 = vcombine.low %v15793_v26, %v15813_v14  ;;  %17991 = vst [vmem:[#allocation85_spill] sm:$0xff] %v15928_v19 }
 0x673   : > { %17979 = vst [vmem:[#allocation99_spill] sm:$0xff] %v15879_v51  ;;  %v17986_v28 = vcombine.low %v17984_v36, %v17985_v62  ;;  %v17987_v23 = vcombine.high %v17984_v36, %v17985_v62  ;;  %v17990_v31 = vcombine.low %v17988_v4, %v17989_v35  ;;  %v6632_v50 = vrot.slane %v6624_v46, %v13790_v15 }
 0x674   : > { %17980 = vst [vmem:[#allocation63_spill] sm:$0xff] %v15882_v16  ;;  %17981 = vst [vmem:[#allocation105_spill] sm:$0xff] %v15885_v61  ;;  %v6528_v29 = vrot.slane %v6520_v39, %v13790_v15  ;;  %v4197_v2 = vmul.f32 %v15629_v11, %v17992_v0  ;;  %v4229_v36 = vmul.f32 %v11251_v25, %v15187_v48 }
 0x675   : > { %v15914_v21 = vrot.slane %v17986_v28, %v13774_v43  ;;  %v15920_v17 = vrot.slane %v17987_v23, %v13774_v43  ;;  %v15926_v37 = vrot.slane %v17990_v31, %v13774_v43  ;;  %v6664_v28 = vrot.slane %v6656_v45, %v13790_v15 }
 0x676   : > { %v6032_v62 = vcombine.low %v4181_v6, %v4213_v53  ;;  %v6033_v23 = vcombine.high %v4181_v6, %v4213_v53  ;;  %v8443_v24 = vcombine.high %v15743_v57, %v15746_v60  ;;  %v17993_v31 = vcombine.high %v17988_v4, %v17989_v35 }
 0x677   : > { %v6540_v39 = vcombine.low %v15900_v54, %v6528_v29  ;;  %v6676_v46 = vcombine.low %v6632_v50, %v6664_v28  ;;  %v8579_v45 = vcombine.high %v15756_v40, %v15769_v20  ;;  %v17994_v48 = vcombine.low %v15234_v59, %v15237_v18 }
 0x678   : > { %v15942_v19 = vrot.slane %v17993_v31, %v13774_v43  ;;  %v17995_v0 = vcombine.high %v15234_v59, %v15237_v18  ;;  %v6048_v60 = vcombine.low %v4197_v2, %v4229_v36  ;;  %v6049_v35 = vcombine.high %v4197_v2, %v4229_v36  ;;  %v15975_v31 = vpop.permute.xlu0 %10458 }
 0x679   : > { %v15951_v11 = vrot.slane %v17994_v48, %v13774_v43  ;;  %v17996_v25 = vcombine.low %v15242_v22, %v15245_v47  ;;  %v17997_v40 = vcombine.high %v15242_v22, %v15245_v47  ;;  %v10552_v53 = vpack.i.bf16 %v6676_v46, %v6540_v39  ;;  %17998 = vst [vmem:[#allocation76_spill] sm:$0xff] %v15975_v31  ;;  %v17999_v48 = vld [vmem:[#allocation33_spill] sm:$0xff]  ;;  %v18019_v31 = vld [vmem:[#allocation48_spill] sm:$0xff] }
 0x67a   : > { %v15957_v57 = vrot.slane %v17995_v0, %v13774_v43  ;;  %v10512_v6 = vpack.i.bf16 %v8579_v45, %v8443_v24  ;;  %v6040_v59 = vrot.slane %v6032_v62, %v13774_v43  ;;  %v6047_v18 = vrot.slane %v6033_v23, %v13774_v43  ;;  %v18002_v24 = vld [vmem:[#allocation19_spill] sm:$0xff]  ;;  %v18003_v62 = vld [vmem:[#allocation61_spill] sm:$0xff] }
 0x67b   : > { %v15963_v4 = vrot.slane %v17996_v25, %v13774_v43  ;;  %v15969_v20 = vrot.slane %v17997_v40, %v13774_v43  ;;  %v6056_v2 = vrot.slane %v6048_v60, %v13774_v43  ;;  %v6063_v36 = vrot.slane %v6049_v35, %v13774_v43  ;;  %10553 = vrot.lane.b32.xlu0 %v10552_v53, %s11320_s6 }
 0x67c   : > { %v18000_v0 = vcombine.low %v15292_v33, %v17999_v48  ;;  %v18001_v22 = vcombine.high %v15292_v33, %v17999_v48  ;;  %v18004_v23 = vcombine.low %v18002_v24, %v18003_v62  ;;  %10513 = vrot.lane.b32.xlu1 %v10512_v6, %s11321_s7  ;;  %v18005_v33 = vcombine.high %v18002_v24, %v18003_v62  ;;  %v18006_v48 = vld [vmem:[#allocation35_spill] sm:$0xff]  ;;  %s11326_s7 = smov [#allocation2]  }
 0x67d   : > { %v6096_v46 = vcombine.low %v6040_v59, %v6056_v2  ;;  %v6097_v45 = vcombine.high %v6040_v59, %v6056_v2  ;;  %v6112_v60 = vcombine.low %v6047_v18, %v6063_v36  ;;  %v6113_v35 = vcombine.high %v6047_v18, %v6063_v36  ;;  %s11256_s8 = sshll.u32 %s11326_s7, 4  ;;  %s11257_s8 = int_to_ptr.vmem [resolvable:$false] %s11256_s8 }
 0x67e   : > { %v15981_v25 = vrot.slane %v18000_v0, %v13774_v43  ;;  %v15987_v47 = vrot.slane %v18001_v22, %v13774_v43  ;;  %v15993_v39 = vrot.slane %v18004_v23, %v13774_v43  ;;  %v16001_v40 = vrot.slane %v18005_v33, %v13774_v43  ;;  %v18007_v0 = vld [vmem:[#allocation15_spill] sm:$0xff]  ;;  %s11258_s10 = scalar_lea.vmem %s11257_s8, 4096 }
 0x67f   : > { %v18008_v22 = vcombine.low %v18006_v48, %v18007_v0  ;;  %v18009_v53 = vcombine.high %v18006_v48, %v18007_v0  ;;  %v6541_v59 = vcombine.high %v15900_v54, %v6528_v29  ;;  %v16017_v18 = vrot.slane %v6096_v46, %v13790_v15  ;;  %v18016_v0 = vld [vmem:[#allocation43_spill] sm:$0xff] }
 0x680   : > { %v16020_v2 = vrot.slane %v6097_v45, %v13790_v15  ;;  %v16023_v36 = vrot.slane %v6112_v60, %v13790_v15  ;;  %v16026_v24 = vrot.slane %v6113_v35, %v13790_v15  ;;  %v6677_v62 = vcombine.high %v6632_v50, %v6664_v28  ;;  %v16042_v28 = vpop.permute.xlu0 %10463  ;;  %v10736_v60 = vld [vmem:[%s16813_s2 + $0x20] sm:$0xff]   ;;  %v18015_v35 = vld [vmem:[#allocation40_spill] sm:$0xff] }
 0x681   : > { %v16007_v23 = vrot.slane %v18008_v22, %v13774_v43  ;;  %v16013_v6 = vrot.slane %v18009_v53, %v13774_v43  ;;  %18010 = vst [vmem:[#allocation56_spill] sm:$0xff] %v16017_v18  ;;  %v6760_v33 = vcombine.low %v15914_v21, %v15920_v17  ;;  %v6792_v48 = vcombine.low %v15926_v37, %v15942_v19 }
 0x682   : > { %18011 = vst [vmem:[#allocation73_spill] sm:$0xff] %v16020_v2  ;;  %18012 = vst [vmem:[#allocation47_spill] sm:$0xff] %v16023_v36  ;;  %v6896_v54 = vcombine.low %v15951_v11, %v15957_v57  ;;  %v18017_v22 = vcombine.low %v18015_v35, %v18016_v0  ;;  %v10557_v29 = vpack.i.bf16 %v6677_v62, %v6541_v59  ;;  %10337 = vmatprep.subr.bf16.mxu1 %v10736_v60 }
 0x683   : > { %18013 = vst [vmem:[#allocation54_spill] sm:$0xff] %v16026_v24  ;;  %18014 = vst [vmem:[#allocation14_spill] sm:$0xff] %v16042_v28  ;;  %v6768_v46 = vrot.slane %v6760_v33, %v13790_v15  ;;  %v6800_v45 = vrot.slane %v6792_v48, %v13790_v15  ;;  %v18018_v50 = vcombine.high %v18015_v35, %v18016_v0  ;;  %v18020_v24 = vld [vmem:[#allocation10_spill] sm:$0xff]  ;;  %10338 = vmatpush3.bf16.msra.mxu1 %v10736_v60 }
 0x684   : > { %v16051_v53 = vrot.slane %v18017_v22, %v13774_v43  ;;  %v18021_v36 = vcombine.low %v18019_v31, %v18020_v24  ;;  %v18022_v59 = vcombine.high %v18019_v31, %v18020_v24  ;;  %v18023_v33 = vld [vmem:[#allocation34_spill] sm:$0xff]  ;;  %10558 = vrot.lane.b32.xlu0 %v10557_v29, %s11319_s5  ;;  %v6904_v35 = vrot.slane %v6896_v54, %v13790_v15 }
 0x685   : > { %v16059_v28 = vrot.slane %v18018_v50, %v13774_v43  ;;  %v18024_v48 = vld [vmem:[#allocation50_spill] sm:$0xff]  ;;  %v6812_v50 = vcombine.low %v6768_v46, %v6800_v45  ;;  %v6489_v29 = vcombine.high %v15765_v9, %v15787_v8  ;;  %v6521_v54 = vcombine.high %v15793_v26, %v15813_v14 }
 0x686   : > { %v16065_v2 = vrot.slane %v18021_v36, %v13774_v43  ;;  %v16071_v62 = vrot.slane %v18022_v59, %v13774_v43  ;;  %v18025_v22 = vcombine.low %v18023_v33, %v18024_v48  ;;  %v6928_v36 = vcombine.low %v15963_v4, %v15969_v20  ;;  %v18027_v0 = vld [vmem:[#allocation62_spill] sm:$0xff]  ;;  %v18028_v59 = vld [vmem:[#allocation27_spill] sm:$0xff] }
 0x687   : > { %v18026_v31 = vcombine.high %v18023_v33, %v18024_v48  ;;  %v10737_v60 = vld [vmem:[%s16813_s2 + $0x28] sm:$0xff]   ;;  %v18030_v33 = vcombine.high %v18027_v0, %v18028_v59  ;;  %v6625_v8 = vcombine.high %v15819_v3, %v15825_v5 }
 0x688   : > { %v16077_v18 = vrot.slane %v18025_v22, %v13774_v43  ;;  %v18029_v22 = vcombine.low %v18027_v0, %v18028_v59  ;;  %v6936_v9 = vrot.slane %v6928_v36, %v13790_v15  ;;  %v18035_v0 = vcombine.low %v15515_v13, %v15518_v32  ;;  %v16131_v36 = vpop.permute.xlu0 %10468  ;;  %10339 = vmatprep.subr.bf16.mxu1 %v10737_v60 }
 0x689   : > { %v16087_v24 = vrot.slane %v18026_v31, %v13774_v43  ;;  %v16106_v48 = vrot.slane %v18030_v33, %v13774_v43  ;;  %v18031_v31 = vld [vmem:[#allocation126_spill] sm:$0xff]  ;;  %v6535_v33 = vrot.slane %v6521_v54, %v13790_v15  ;;  %18037 = vst [vmem:[#allocation70_spill] sm:$0xff] %v16131_v36  ;;  %v6639_v5 = vrot.slane %v6625_v8, %v13790_v15 }
 0x68a   : > { %v16093_v61 = vrot.slane %v18029_v22, %v13774_v43  ;;  %v18032_v22 = vld [vmem:[#allocation67_spill] sm:$0xff]  ;;  %v16127_v59 = vrot.slane %v18035_v0, %v13774_v43  ;;  %v6948_v3 = vcombine.low %v6904_v35, %v6936_v9  ;;  %10340 = vmatpush3.bf16.msra.mxu1 %v10737_v60 }
 0x68b   : > { %v18033_v16 = vcombine.low %v18031_v31, %v18032_v22  ;;  %v18034_v26 = vcombine.high %v18031_v31, %v18032_v22  ;;  %v6657_v31 = vcombine.high %v15832_v58, %v15845_v44  ;;  %v6813_v22 = vcombine.high %v6768_v46, %v6800_v45  ;;  %v18041_v46 = vld [vmem:[#allocation84_spill] sm:$0xff] }
 0x68c   : > { %18036 = vst [vmem:[#allocation66_spill] sm:$0xff] %v16127_v59  ;;  %v6949_v59 = vcombine.high %v6904_v35, %v6936_v9  ;;  %v18040_v58 = vcombine.high %v15521_v10, %v15528_v7  ;;  %v10532_v45 = vpack.i.bf16 %v6948_v3, %v6812_v50  ;;  %v18043_v8 = vcombine.high %v15584_v55, %v18041_v46  ;;  %v18044_v9 = vld [vmem:[#allocation77_spill] sm:$0xff]  ;;  %v10738_v50 = vld [vmem:[%s16813_s2 + $0x30] sm:$0xff]  }
 0x68d   : > { %v16112_v51 = vrot.slane %v18033_v16, %v13774_v43  ;;  %v16121_v14 = vrot.slane %v18034_v26, %v13774_v43  ;;  %v6503_v16 = vrot.slane %v6489_v29, %v13790_v15  ;;  %v18038_v26 = vcombine.high %v15515_v13, %v15518_v32  ;;  %10341 = vmatprep.subr.bf16.mxu1 %v10738_v50 }
 0x68e   : > { %v18039_v29 = vcombine.low %v15521_v10, %v15528_v7  ;;  %v16152_v44 = vrot.slane %v18040_v58, %v13774_v43  ;;  %v18042_v13 = vcombine.low %v15584_v55, %v18041_v46  ;;  %v6671_v60 = vrot.slane %v6657_v31, %v13790_v15  ;;  %v18045_v10 = vld [vmem:[#allocation44_spill] sm:$0xff]  ;;  %10533 = vrot.lane.b32.xlu1 %v10532_v45, %s11320_s6 }
 0x68f   : > { %v16140_v0 = vrot.slane %v18038_v26, %v13774_v43  ;;  %v6542_v36 = vcombine.low %v6503_v16, %v6535_v33  ;;  %v16165_v35 = vrot.slane %v18043_v8, %v13774_v43  ;;  %v18046_v7 = vcombine.low %v18044_v9, %v18045_v10  ;;  %10342 = vmatpush3.bf16.msra.mxu1 %v10738_v50  ;;  %v18057_v50 = vld [vmem:[#allocation45_spill] sm:$0xff] }
 0x690   : > { %v16146_v54 = vrot.slane %v18039_v29, %v13774_v43  ;;  %v16158_v32 = vrot.slane %v18042_v13, %v13774_v43  ;;  %v10537_v29 = vpack.i.bf16 %v6949_v59, %v6813_v22  ;;  %v6543_v58 = vcombine.high %v6503_v16, %v6535_v33  ;;  %v18050_v13 = vld [vmem:[#allocation72_spill] sm:$0xff] }
 0x691   : > { %v16171_v26 = vrot.slane %v18046_v7, %v13774_v43  ;;  %v18047_v3 = vcombine.high %v18044_v9, %v18045_v10  ;;  %v18048_v55 = vcombine.low %v15610_v38, %v15613_v52  ;;  %v6678_v59 = vcombine.low %v6639_v5, %v6671_v60  ;;  %v16205_v7 = vpop.permute.xlu0 %10488 }
 0x692   : > { %v6679_v16 = vcombine.high %v6639_v5, %v6671_v60  ;;  %v18049_v33 = vcombine.high %v15610_v38, %v15613_v52  ;;  %v18051_v8 = vcombine.low %v15624_v56, %v18050_v13  ;;  %v6761_v10 = vcombine.high %v15914_v21, %v15920_v17  ;;  %v18054_v21 = vld [vmem:[#allocation30_spill] sm:$0xff]  ;;  %10538 = vrot.lane.b32.xlu1 %v10537_v29, %s11319_s5 }
 0x693   : > { %v16180_v31 = vrot.slane %v18047_v3, %v13774_v43  ;;  %v16186_v46 = vrot.slane %v18048_v55, %v13774_v43  ;;  %v6793_v45 = vcombine.high %v15926_v37, %v15942_v19  ;;  %v10562_v5 = vpack.i.bf16 %v6678_v59, %v6542_v36  ;;  %v18053_v19 = vld [vmem:[#allocation26_spill] sm:$0xff]  ;;  %v18058_v59 = vld [vmem:[#allocation11_spill] sm:$0xff] }
 0x694   : > { %v16193_v22 = vrot.slane %v18049_v33, %v13774_v43  ;;  %v16199_v9 = vrot.slane %v18051_v8, %v13774_v43  ;;  %v10567_v60 = vpack.i.bf16 %v6679_v16, %v6543_v58  ;;  %v6897_v38 = vcombine.high %v15951_v11, %v15957_v57  ;;  %v10739_v58 = vld [vmem:[%s16813_s2 + $0x38] sm:$0xff]  }
 0x695   : > { %v6929_v52 = vcombine.high %v15963_v4, %v15969_v20  ;;  %v18052_v3 = vcombine.high %v15624_v56, %v18050_v13  ;;  %v18055_v37 = vcombine.low %v18053_v19, %v18054_v21  ;;  %v6775_v36 = vrot.slane %v6761_v10, %v13790_v15  ;;  %10563 = vrot.lane.b32.xlu0 %v10562_v5, %s11317_s29 }
 0x696   : > { %v6807_v11 = vrot.slane %v6793_v45, %v13790_v15  ;;  %v18056_v57 = vcombine.high %v18053_v19, %v18054_v21  ;;  %v6911_v56 = vrot.slane %v6897_v38, %v13790_v15  ;;  %v18059_v16 = vcombine.low %v18057_v50, %v18058_v59  ;;  %10343 = vmatprep.subr.bf16.mxu1 %v10739_v58 }
 0x697   : > { %v16215_v17 = vrot.slane %v18052_v3, %v13774_v43  ;;  %v16221_v55 = vrot.slane %v18055_v37, %v13774_v43  ;;  %v6943_v20 = vrot.slane %v6929_v52, %v13790_v15  ;;  %v18060_v13 = vcombine.high %v18057_v50, %v18058_v59  ;;  %v10494_v50 = vpop.permute.xlu0 %10493  ;;  %10344 = vmatpush3.bf16.msra.mxu1 %v10739_v58 }
 0x698   : > { %v16229_v4 = vrot.slane %v18056_v57, %v13774_v43  ;;  %v16242_v33 = vrot.slane %v18059_v16, %v13774_v43  ;;  %v18061_v29 = vcombine.low %v15772_v41, %v15775_v42  ;;  %v6814_v45 = vcombine.low %v6775_v36, %v6807_v11 }
 0x699   : > { %v16248_v8 = vrot.slane %v18060_v13, %v13774_v43  ;;  %v18063_v5 = vcombine.high %v15772_v41, %v15775_v42  ;;  %v18064_v52 = vcombine.low %v15778_v30, %v15781_v1  ;;  %v6950_v19 = vcombine.low %v6911_v56, %v6943_v20  ;;  %10568 = vrot.lane.b32.xlu0 %v10567_v60, %s11318_s30 }
 0x69a   : > { %v16254_v10 = vrot.slane %v18061_v29, %v13774_v43  ;;  %v7032_v21 = vcombine.low %v16007_v23, %v16013_v6  ;;  %v7064_v37 = vcombine.low %v16051_v53, %v16059_v28  ;;  %v7168_v41 = vcombine.low %v16093_v61, %v16106_v48 }
 0x69b   : > { %v16260_v38 = vrot.slane %v18063_v5, %v13774_v43  ;;  %v16266_v3 = vrot.slane %v18064_v52, %v13774_v43  ;;  %v7200_v42 = vcombine.low %v16112_v51, %v16121_v14  ;;  %v6815_v57 = vcombine.high %v6775_v36, %v6807_v11 }
 0x69c   : > { %18062 = vst [vmem:[#allocation74_spill] sm:$0xff] %v16254_v10  ;;  %v18066_v59 = vcombine.high %v15778_v30, %v15781_v1  ;;  %v10542_v13 = vpack.i.bf16 %v6950_v19, %v6814_v45  ;;  %v7040_v29 = vrot.slane %v7032_v21, %v13790_v15  ;;  %v6951_v5 = vcombine.high %v6911_v56, %v6943_v20  ;;  %v18070_v56 = vld [vmem:[#allocation118_spill] sm:$0xff]  ;;  %v18071_v20 = vld [vmem:[#allocation88_spill] sm:$0xff] }
 0x69d   : > { %18065 = vst [vmem:[#allocation75_spill] sm:$0xff] %v16266_v3  ;;  %v18068_v52 = vcombine.low %v15854_v49, %v15857_v27  ;;  %v7072_v11 = vrot.slane %v7064_v37, %v13790_v15  ;;  %v7176_v58 = vrot.slane %v7168_v41, %v13790_v15  ;;  %v7208_v30 = vrot.slane %v7200_v42, %v13790_v15  ;;  %v18072_v42 = vld [vmem:[#allocation125_spill] sm:$0xff] }
 0x69e   : > { %v16280_v16 = vrot.slane %v18066_v59, %v13774_v43  ;;  %v18069_v1 = vcombine.high %v15854_v49, %v15857_v27  ;;  %10543 = vrot.lane.b32.xlu1 %v10542_v13, %s11317_s29  ;;  %v7760_v45 = vcombine.low %v18071_v20, %v18070_v56  ;;  %v10491_v19 = vunpack.i.h.bf16 %v16205_v7  ;;  %v18073_v3 = vld [vmem:[#allocation121_spill] sm:$0xff] }
 0x69f   : > { %v16288_v36 = vrot.slane %v18068_v52, %v13774_v43  ;;  %v10547_v21 = vpack.i.bf16 %v6951_v5, %v6815_v57  ;;  %v10490_v37 = vunpack.i.l.bf16 %v16205_v7  ;;  %v7084_v59 = vcombine.low %v7040_v29, %v7072_v11  ;;  %v10499_v7 = vpop.permute.xlu0 %10498  ;;  %v16312_v5 = vpop.permute.xlu1 %10418 }
 0x6a0   : > { %18067 = vst [vmem:[#allocation106_spill] sm:$0xff] %v16280_v16  ;;  %v16297_v60 = vrot.slane %v18069_v1, %v13774_v43  ;;  %v7220_v41 = vcombine.low %v7176_v58, %v7208_v30  ;;  %v7085_v52 = vcombine.high %v7040_v29, %v7072_v11  ;;  %v7624_v16 = vcombine.low %v18073_v3, %v18072_v42 }
 0x6a1   : > { %v10496_v10 = vunpack.i.h.bf16 %v10494_v50  ;;  %v10495_v49 = vunpack.i.l.bf16 %v10494_v50  ;;  %v7221_v27 = vcombine.high %v7176_v58, %v7208_v30  ;;  %v7304_v13 = vcombine.low %v15981_v25, %v15987_v47 }
 0x6a2   : > { %v10592_v1 = vpack.i.bf16 %v7220_v41, %v7084_v59  ;;  %v7336_v56 = vcombine.low %v15993_v39, %v16001_v40  ;;  %v7440_v57 = vcombine.low %v16065_v2, %v16071_v62  ;;  %v18074_v3 = vcombine.low %v15860_v34, %v15863_v63  ;;  %10548 = vrot.lane.b32.xlu1 %v10547_v21, %s11318_s30 }
 0x6a3   : > { %v9041_v50 = vsel %vm1271_vm0, %v7760_v45, %v10491_v19  ;;  %v10597_v11 = vpack.i.bf16 %v7221_v27, %v7085_v52  ;;  %v7472_v58 = vcombine.low %v16077_v18, %v16087_v24  ;;  %v9040_v30 = vsel %vm1271_vm0, %v7624_v16, %v10490_v37 }
 0x6a4   : > { %v16318_v29 = vrot.slane %v18074_v3, %v13774_v43  ;;  %10593 = vrot.lane.b32.xlu0 %v10592_v1, %s11320_s6  ;;  %v7312_v20 = vrot.slane %v7304_v13, %v13790_v15  ;;  %v7344_v59 = vrot.slane %v7336_v56, %v13790_v15  ;;  %v7448_v41 = vrot.slane %v7440_v57, %v13790_v15 }
 0x6a5   : > { %v9057_v42 = vsel %vm9048_vm1, %v9040_v30, %v10495_v49  ;;  %v7480_v45 = vrot.slane %v7472_v58, %v13790_v15  ;;  %v10501_v19 = vunpack.i.h.bf16 %v10499_v7  ;;  %v10500_v21 = vunpack.i.l.bf16 %v10499_v7 }
 0x6a6   : > { %v9058_v52 = vsel %vm9048_vm1, %v9041_v50, %v10496_v10  ;;  %v7356_v27 = vcombine.low %v7312_v20, %v7344_v59  ;;  %v7033_v16 = vcombine.high %v16007_v23, %v16013_v6  ;;  %v7065_v37 = vcombine.high %v16051_v53, %v16059_v28  ;;  %v18076_v53 = vld [vmem:[#allocation99_spill] sm:$0xff] }
 0x6a7   : > { %v18075_v1 = vcombine.high %v15860_v34, %v15863_v63  ;;  %v7492_v49 = vcombine.low %v7448_v41, %v7480_v45  ;;  %v16343_v56 = vsel %vm9065_vm2, %v9057_v42, %v10500_v21  ;;  %v16346_v57 = vsel %vm9065_vm2, %v9058_v52, %v10501_v19  ;;  %v16355_v63 = vpop.permute.xlu1 %10423  ;;  %v18080_v42 = vld [vmem:[#allocation105_spill] sm:$0xff] }
 0x6a8   : > { %10598 = vrot.lane.b32.xlu0 %v10597_v11, %s11319_s5  ;;  %v7047_v23 = vrot.slane %v7033_v16, %v13790_v15  ;;  %v7079_v6 = vrot.slane %v7065_v37, %v13790_v15  ;;  %v7169_v28 = vcombine.high %v16093_v61, %v16106_v48  ;;  %v7201_v34 = vcombine.high %v16112_v51, %v16121_v14  ;;  %v18079_v14 = vld [vmem:[#allocation63_spill] sm:$0xff]  ;;  %v18083_v37 = vld [vmem:[#allocation56_spill] sm:$0xff] }
 0x6a9   : > { %v16340_v13 = vrot.slane %v18075_v1, %v13774_v43  ;;  %v18077_v10 = vcombine.low %v15876_v12, %v18076_v53  ;;  %v10572_v3 = vpack.i.bf16 %v7492_v49, %v7356_v27  ;;  %v7357_v50 = vcombine.high %v7312_v20, %v7344_v59  ;;  %v18084_v1 = vld [vmem:[#allocation73_spill] sm:$0xff] }
 0x6aa   : > { %v7493_v11 = vcombine.high %v7448_v41, %v7480_v45  ;;  %v18078_v58 = vcombine.high %v15876_v12, %v18076_v53  ;;  %v7086_v61 = vcombine.low %v7047_v23, %v7079_v6  ;;  %v7183_v51 = vrot.slane %v7169_v28, %v13790_v15 }
 0x6ab   : > { %v16361_v7 = vrot.slane %v18077_v10, %v13774_v43  ;;  %v7215_v48 = vrot.slane %v7201_v34, %v13790_v15  ;;  %v18081_v19 = vcombine.low %v18079_v14, %v18080_v42  ;;  %10573 = vrot.lane.b32.xlu1 %v10572_v3, %s11320_s6  ;;  %v7087_v59 = vcombine.high %v7047_v23, %v7079_v6  ;;  %v18087_v10 = vld [vmem:[#allocation47_spill] sm:$0xff]  ;;  %v18088_v3 = vld [vmem:[#allocation54_spill] sm:$0xff] }
 0x6ac   : > { %v16367_v30 = vrot.slane %v18078_v58, %v13774_v43  ;;  %v10577_v20 = vpack.i.bf16 %v7493_v11, %v7357_v50  ;;  %v7305_v12 = vcombine.high %v15981_v25, %v15987_v47  ;;  %v18082_v41 = vcombine.high %v18079_v14, %v18080_v42 }
 0x6ad   : > { %v16375_v21 = vrot.slane %v18081_v19, %v13774_v43  ;;  %v7222_v52 = vcombine.low %v7183_v51, %v7215_v48  ;;  %v7223_v27 = vcombine.high %v7183_v51, %v7215_v48  ;;  %v7337_v16 = vcombine.high %v15993_v39, %v16001_v40 }
 0x6ae   : > { %v16384_v45 = vrot.slane %v18082_v41, %v13774_v43  ;;  %v18085_v49 = vcombine.low %v18083_v37, %v18084_v1  ;;  %v7319_v23 = vrot.slane %v7305_v12, %v13790_v15  ;;  %v7441_v25 = vcombine.high %v16065_v2, %v16071_v62  ;;  %v16412_v2 = vpop.permute.xlu1 %10428 }
 0x6af   : > { %v7473_v47 = vcombine.high %v16077_v18, %v16087_v24  ;;  %v18086_v6 = vcombine.high %v18083_v37, %v18084_v1  ;;  %v10602_v39 = vpack.i.bf16 %v7222_v52, %v7086_v61  ;;  %v10607_v40 = vpack.i.bf16 %v7223_v27, %v7087_v59  ;;  %10578 = vrot.lane.b32.xlu1 %v10577_v20, %s11319_s5  ;;  %v18091_v52 = vld [vmem:[#allocation66_spill] sm:$0xff] }
 0x6b0   : > { %v16392_v28 = vrot.slane %v18085_v49, %v13774_v43  ;;  %v7351_v53 = vrot.slane %v7337_v16, %v13790_v15  ;;  %v18089_v50 = vcombine.low %v18087_v10, %v18088_v3  ;;  %v7455_v18 = vrot.slane %v7441_v25, %v13790_v15 }
 0x6b1   : > { %v16403_v34 = vrot.slane %v18086_v6, %v13774_v43  ;;  %v7487_v62 = vrot.slane %v7473_v47, %v13790_v15  ;;  %v7576_v24 = vcombine.low %v16158_v32, %v16165_v35  ;;  %v18090_v58 = vcombine.high %v18087_v10, %v18088_v3  ;;  %10603 = vrot.lane.b32.xlu0 %v10602_v39, %s11317_s29 }
 0x6b2   : > { %v16410_v11 = vrot.slane %v18089_v50, %v13774_v43  ;;  %v7358_v51 = vcombine.low %v7319_v23, %v7351_v53  ;;  %v7608_v48 = vcombine.low %v16171_v26, %v16180_v31  ;;  %v7712_v14 = vcombine.low %v16221_v55, %v16229_v4  ;;  %v16444_v39 = vpop.permute.xlu1 %10433 }
 0x6b3   : > { %v16423_v61 = vrot.slane %v18090_v58, %v13774_v43  ;;  %v7494_v42 = vcombine.low %v7455_v18, %v7487_v62  ;;  %v7584_v19 = vrot.slane %v7576_v24, %v13790_v15  ;;  %v7744_v20 = vcombine.low %v16242_v33, %v16248_v8 }
 0x6b4   : > { %v7359_v59 = vcombine.high %v7319_v23, %v7351_v53  ;;  %v7616_v12 = vrot.slane %v7608_v48, %v13790_v15  ;;  %v7720_v43 = vrot.slane %v7712_v14, %v13790_v15  ;;  %v7495_v41 = vcombine.high %v7455_v18, %v7487_v62 }
 0x6b5   : > { %v7848_v27 = vcombine.low %v18091_v52, %v16140_v0  ;;  %v10582_v16 = vpack.i.bf16 %v7494_v42, %v7358_v51  ;;  %v7752_v37 = vrot.slane %v7744_v20, %v13790_v15  ;;  %v7880_v1 = vcombine.low %v16146_v54, %v16152_v44  ;;  %10608 = vrot.lane.b32.xlu0 %v10607_v40, %s11318_s30 }
 0x6b6   : > { %v7984_v49 = vcombine.low %v16186_v46, %v16193_v22  ;;  %v7628_v23 = vcombine.low %v7584_v19, %v7616_v12  ;;  %v10587_v25 = vpack.i.bf16 %v7495_v41, %v7359_v59  ;;  %v7629_v47 = vcombine.high %v7584_v19, %v7616_v12  ;;  %v16468_v59 = vpop.permute.xlu1 %10443 }
 0x6b7   : > { %v7856_v6 = vrot.slane %v7848_v27, %v13790_v15  ;;  %10583 = vrot.lane.b32.xlu1 %v10582_v16, %s11317_s29  ;;  %v7764_v53 = vcombine.low %v7720_v43, %v7752_v37  ;;  %v7765_v10 = vcombine.high %v7720_v43, %v7752_v37  ;;  %v7888_v3 = vrot.slane %v7880_v1, %v13790_v15 }
 0x6b8   : > { %v7992_v50 = vrot.slane %v7984_v49, %v13790_v15  ;;  %v8016_v18 = vcombine.low %v16199_v9, %v16215_v17  ;;  %v7577_v40 = vcombine.high %v16158_v32, %v16165_v35  ;;  %v7609_v62 = vcombine.high %v16171_v26, %v16180_v31 }
 0x6b9   : > { %v7713_v24 = vcombine.high %v16221_v55, %v16229_v4  ;;  %v10632_v58 = vpack.i.bf16 %v7764_v53, %v7628_v23  ;;  %v10637_v51 = vpack.i.bf16 %v7765_v10, %v7629_v47  ;;  %v7900_v48 = vcombine.low %v7856_v6, %v7888_v3 }
 0x6ba   : > { %v7745_v14 = vcombine.high %v16242_v33, %v16248_v8  ;;  %v8024_v42 = vrot.slane %v8016_v18, %v13790_v15  ;;  %v7591_v19 = vrot.slane %v7577_v40, %v13790_v15  ;;  %v7623_v20 = vrot.slane %v7609_v62, %v13790_v15  ;;  %v16493_v18 = vpop.permute.xlu0 %10518  ;;  %v16495_v40 = vpop.permute.xlu1 %10448 }
 0x6bb   : > { %v7727_v32 = vrot.slane %v7713_v24, %v13790_v15  ;;  %10633 = vrot.lane.b32.xlu0 %v10632_v58, %s11320_s6  ;;  %10588 = vrot.lane.b32.xlu1 %v10587_v25, %s11318_s30  ;;  %v7901_v26 = vcombine.high %v7856_v6, %v7888_v3  ;;  %v7849_v31 = vcombine.high %v18091_v52, %v16140_v0  ;;  %v18092_v24 = vld [vmem:[#allocation74_spill] sm:$0xff] }
 0x6bc   : > { %v7759_v35 = vrot.slane %v7745_v14, %v13790_v15  ;;  %v8036_v55 = vcombine.low %v7992_v50, %v8024_v42  ;;  %v7630_v4 = vcombine.low %v7591_v19, %v7623_v20  ;;  %v8037_v33 = vcombine.high %v7992_v50, %v8024_v42 }
 0x6bd   : > { %v7631_v8 = vcombine.high %v7591_v19, %v7623_v20  ;;  %v7863_v41 = vrot.slane %v7849_v31, %v13790_v15  ;;  %v7881_v27 = vcombine.high %v16146_v54, %v16152_v44  ;;  %v7985_v1 = vcombine.high %v16186_v46, %v16193_v22 }
 0x6be   : > { %v7766_v12 = vcombine.low %v7727_v32, %v7759_v35  ;;  %v7767_v43 = vcombine.high %v7727_v32, %v7759_v35  ;;  %v10612_v16 = vpack.i.bf16 %v8036_v55, %v7900_v48  ;;  %v10617_v37 = vpack.i.bf16 %v8037_v33, %v7901_v26  ;;  %v18094_v48 = vld [vmem:[#allocation75_spill] sm:$0xff] }
 0x6bf   : > { %v8017_v0 = vcombine.high %v16199_v9, %v16215_v17  ;;  %10638 = vrot.lane.b32.xlu0 %v10637_v51, %s11319_s5  ;;  %v7895_v23 = vrot.slane %v7881_v27, %v13790_v15  ;;  %v8120_v25 = vcombine.low %v16288_v36, %v16297_v60  ;;  %v7999_v54 = vrot.slane %v7985_v1, %v13790_v15  ;;  %v18093_v51 = vld [vmem:[#allocation106_spill] sm:$0xff] }
 0x6c0   : > { %v10642_v52 = vpack.i.bf16 %v7766_v12, %v7630_v4  ;;  %v10647_v49 = vpack.i.bf16 %v7767_v43, %v7631_v8  ;;  %10613 = vrot.lane.b32.xlu1 %v10612_v16, %s11320_s6  ;;  %v8152_v46 = vcombine.low %v16318_v29, %v16340_v13  ;;  %v8256_v22 = vcombine.low %v16392_v28, %v16403_v34 }
 0x6c1   : > { %v8031_v44 = vrot.slane %v8017_v0, %v13790_v15  ;;  %v7902_v9 = vcombine.low %v7863_v41, %v7895_v23  ;;  %v8128_v17 = vrot.slane %v8120_v25, %v13790_v15  ;;  %v8288_v47 = vcombine.low %v16410_v11, %v16423_v61 }
 0x6c2   : > { %v7903_v6 = vcombine.high %v7863_v41, %v7895_v23  ;;  %v8160_v10 = vrot.slane %v8152_v46, %v13790_v15  ;;  %v8264_v3 = vrot.slane %v8256_v22, %v13790_v15  ;;  %v8392_v58 = vcombine.low %v18092_v24, %v16260_v38 }
 0x6c3   : > { %v8038_v53 = vcombine.low %v7999_v54, %v8031_v44  ;;  %v8039_v50 = vcombine.high %v7999_v54, %v8031_v44  ;;  %10643 = vrot.lane.b32.xlu0 %v10642_v52, %s11317_s29  ;;  %v8296_v62 = vrot.slane %v8288_v47, %v13790_v15  ;;  %v8424_v14 = vcombine.low %v18094_v48, %v18093_v51 }
 0x6c4   : > { %v8528_v42 = vcombine.low %v16361_v7, %v16367_v30  ;;  %10618 = vrot.lane.b32.xlu1 %v10617_v37, %s11319_s5  ;;  %v8172_v20 = vcombine.low %v8128_v17, %v8160_v10  ;;  %v8173_v35 = vcombine.high %v8128_v17, %v8160_v10  ;;  %v8400_v55 = vrot.slane %v8392_v58, %v13790_v15  ;;  %v18096_v58 = vld [vmem:[#allocation86_spill] sm:$0xff] }
 0x6c5   : > { %v10622_v19 = vpack.i.bf16 %v8038_v53, %v7902_v9  ;;  %v10627_v32 = vpack.i.bf16 %v8039_v50, %v7903_v6  ;;  %v8308_v26 = vcombine.low %v8264_v3, %v8296_v62  ;;  %v8309_v31 = vcombine.high %v8264_v3, %v8296_v62 }
 0x6c6   : > { %v8432_v4 = vrot.slane %v8424_v14, %v13790_v15  ;;  %v8536_v33 = vrot.slane %v8528_v42, %v13790_v15  ;;  %v8560_v8 = vcombine.low %v16375_v21, %v16384_v45  ;;  %v8121_v12 = vcombine.high %v16288_v36, %v16297_v60  ;;  %v10524_v60 = vpop.permute.xlu0 %10523 }
 0x6c7   : > { %v8153_v43 = vcombine.high %v16318_v29, %v16340_v13  ;;  %10648 = vrot.lane.b32.xlu0 %v10647_v49, %s11318_s30  ;;  %v10667_v41 = vpack.i.bf16 %v8308_v26, %v8172_v20  ;;  %v10672_v27 = vpack.i.bf16 %v8309_v31, %v8173_v35  ;;  %v8257_v37 = vcombine.high %v16392_v28, %v16403_v34  ;;  %v16524_v29 = vpop.permute.xlu1 %10453  ;;  %v18098_v20 = vld [vmem:[#allocation80_spill] sm:$0xff] }
 0x6c8   : > { %v8444_v16 = vcombine.low %v8400_v55, %v8432_v4  ;;  %10623 = vrot.lane.b32.xlu1 %v10622_v19, %s11317_s29  ;;  %v8568_v1 = vrot.slane %v8560_v8, %v13790_v15  ;;  %v8135_v0 = vrot.slane %v8121_v12, %v13790_v15  ;;  %v8289_v36 = vcombine.high %v16410_v11, %v16423_v61  ;;  %v18097_v19 = vld [vmem:[#allocation71_spill] sm:$0xff] }
 0x6c9   : > { %v8167_v52 = vrot.slane %v8153_v43, %v13790_v15  ;;  %v8271_v13 = vrot.slane %v8257_v37, %v13790_v15  ;;  %v8445_v49 = vcombine.high %v8400_v55, %v8432_v4  ;;  %v8393_v28 = vcombine.high %v18092_v24, %v16260_v38  ;;  %v18095_v24 = vld [vmem:[#allocation83_spill] sm:$0xff] }
 0x6ca   : > { %v8425_v34 = vcombine.high %v18094_v48, %v18093_v51  ;;  %v8580_v23 = vcombine.low %v8536_v33, %v8568_v1  ;;  %v8303_v54 = vrot.slane %v8289_v36, %v13790_v15  ;;  %v8581_v44 = vcombine.high %v8536_v33, %v8568_v1  ;;  %v18100_v36 = vld [vmem:[#allocation38_spill] sm:$0xff] }
 0x6cb   : > { %v8174_v25 = vcombine.low %v8135_v0, %v8167_v52  ;;  %10668 = vrot.lane.b32.xlu0 %v10667_v41, %s11320_s6  ;;  %v8175_v11 = vcombine.high %v8135_v0, %v8167_v52  ;;  %v8407_v61 = vrot.slane %v8393_v28, %v13790_v15  ;;  %v8529_v22 = vcombine.high %v16361_v7, %v16367_v30  ;;  %v10529_v30 = vpop.permute.xlu0 %10528  ;;  %v16544_v48 = vpop.permute.xlu1 %10473  ;;  %v18099_v52 = vld [vmem:[#allocation37_spill] sm:$0xff] }
 0x6cc   : > { %v8439_v46 = vrot.slane %v8425_v34, %v13790_v15  ;;  %10628 = vrot.lane.b32.xlu1 %v10627_v32, %s11318_s30  ;;  %v10652_v38 = vpack.i.bf16 %v8580_v23, %v8444_v16  ;;  %v8310_v9 = vcombine.low %v8271_v13, %v8303_v54  ;;  %v10657_v17 = vpack.i.bf16 %v8581_v44, %v8445_v49  ;;  %v18102_v49 = vld [vmem:[#allocation113_spill] sm:$0xff] }
 0x6cd   : > { %v8311_v47 = vcombine.high %v8271_v13, %v8303_v54  ;;  %v8543_v53 = vrot.slane %v8529_v22, %v13790_v15  ;;  %v8561_v10 = vcombine.high %v16375_v21, %v16384_v45  ;;  %v8304_v51 = vcombine.low %v18096_v58, %v18095_v24  ;;  %v18101_v13 = vld [vmem:[#allocation117_spill] sm:$0xff]  ;;  %v18104_v24 = vld [vmem:[#allocation39_spill] sm:$0xff] }
 0x6ce   : > { %v8446_v6 = vcombine.low %v8407_v61, %v8439_v46  ;;  %v8447_v3 = vcombine.high %v8407_v61, %v8439_v46  ;;  %v10677_v50 = vpack.i.bf16 %v8310_v9, %v8174_v25  ;;  %v10521_v7 = vunpack.i.h.bf16 %v16493_v18  ;;  %v18105_v58 = vld [vmem:[#allocation31_spill] sm:$0xff] }
 0x6cf   : > { %v10682_v62 = vpack.i.bf16 %v8311_v47, %v8175_v11  ;;  %10673 = vrot.lane.b32.xlu0 %v10672_v27, %s11319_s5  ;;  %v8575_v14 = vrot.slane %v8561_v10, %v13790_v15  ;;  %v10520_v42 = vunpack.i.l.bf16 %v16493_v18  ;;  %v8168_v21 = vcombine.low %v18098_v20, %v18097_v19  ;;  %v16564_v27 = vpop.permute.xlu1 %10478 }
 0x6d0   : > { %v10526_v45 = vunpack.i.h.bf16 %v10524_v60  ;;  %10653 = vrot.lane.b32.xlu1 %v10652_v38, %s11320_s6  ;;  %v9045_v32 = vsel %vm1271_vm0, %v8304_v51, %v10521_v7  ;;  %v10525_v35 = vunpack.i.l.bf16 %v10524_v60  ;;  %v10531_v26 = vunpack.i.h.bf16 %v10529_v30  ;;  %v18106_v7 = vld [vmem:[#allocation42_spill] sm:$0xff] }
 0x6d1   : > { %v10530_v31 = vunpack.i.l.bf16 %v10529_v30  ;;  %v8582_v55 = vcombine.low %v8543_v53, %v8575_v14  ;;  %v8583_v4 = vcombine.high %v8543_v53, %v8575_v14  ;;  %v9044_v33 = vsel %vm1271_vm0, %v8168_v21, %v10520_v42  ;;  %v18107_v30 = vld [vmem:[#allocation23_spill] sm:$0xff]  ;;  %v18108_v21 = vld [vmem:[#allocation92_spill] sm:$0xff] }
 0x6d2   : > { %v9062_v8 = vsel %vm9048_vm1, %v9045_v32, %v10526_v45  ;;  %v9061_v15 = vsel %vm9048_vm1, %v9044_v33, %v10525_v35  ;;  %v8440_v60 = vcombine.low %v18100_v36, %v18099_v52  ;;  %v8576_v28 = vcombine.low %v18102_v49, %v18101_v13  ;;  %v18109_v45 = vld [vmem:[#allocation96_spill] sm:$0xff]  ;;  %v18110_v35 = vld [vmem:[#allocation91_spill] sm:$0xff] }
 0x6d3   : > { %v16557_v18 = vsel %vm9065_vm2, %v9062_v8, %v10531_v26  ;;  %10678 = vrot.lane.b32.xlu0 %v10677_v50, %s11317_s29  ;;  %v10662_v12 = vpack.i.bf16 %v8582_v55, %v8446_v6  ;;  %v10687_v43 = vpack.i.bf16 %v8583_v4, %v8447_v3  ;;  %v16561_v41 = vsel %vm9065_vm2, %v9061_v15, %v10530_v31  ;;  %v16568_v16 = vpop.permute.xlu1 %10483  ;;  %v18103_v6 = vld [vmem:[#allocation8_spill] sm:$0xff]  ;;  %v18111_v26 = vld [vmem:[#allocation102_spill] sm:$0xff]  ;;  %v18112_v15 = vld [vmem:[#allocation85_spill] sm:$0xff] }
 0x6d4   : > { %10658 = vrot.lane.b32.xlu1 %v10657_v17, %s11319_s5  ;;  %v10416_v53 = vunpack.i.h.bf16 %v18103_v6  ;;  %v10415_v10 = vunpack.i.l.bf16 %v18103_v6  ;;  %v10431_v50 = vunpack.i.h.bf16 %v16412_v2  ;;  %v6944_v51 = vcombine.low %v18105_v58, %v18104_v24 }
 0x6d5   : > { %v6808_v14 = vcombine.low %v18107_v30, %v18106_v7  ;;  %v10436_v42 = vunpack.i.h.bf16 %v16444_v39  ;;  %v10435_v19 = vunpack.i.l.bf16 %v16444_v39  ;;  %v6536_v32 = vcombine.low %v18109_v45, %v18108_v21 }
 0x6d6   : > { %v6672_v31 = vcombine.low %v18111_v26, %v18110_v35  ;;  %v10421_v55 = vunpack.i.h.bf16 %v16312_v5  ;;  %v9035_v4 = vsel %vm1271_vm0, %v6944_v51, %v10416_v53  ;;  %v10426_v8 = vunpack.i.h.bf16 %v16355_v63 }
 0x6d7   : > { %10683 = vrot.lane.b32.xlu0 %v10682_v62, %s11318_s30  ;;  %v10504_v37 = vpop.permute.xlu1 %10503  ;;  %v10430_v62 = vunpack.i.l.bf16 %v16412_v2  ;;  %v10420_v2 = vunpack.i.l.bf16 %v16312_v5  ;;  %v9034_v33 = vsel %vm1271_vm0, %v6808_v14, %v10415_v10 }
 0x6d8   : > { %10663 = vrot.lane.b32.xlu1 %v10662_v12, %s11317_s29  ;;  %v10506_v1 = vunpack.i.h.bf16 %v10504_v37  ;;  %v10505_v0 = vunpack.i.l.bf16 %v10504_v37  ;;  %v10441_v12 = vunpack.i.h.bf16 %v18112_v15  ;;  %v9033_v39 = vsel %vm1271_vm0, %v6672_v31, %v10431_v50  ;;  %s188_s29 = sand.u32 1, %s11306_s16  }
 0x6d9   : > { %s16770_s19 = scalar_lea.sflag [#allocation3], %s188_s29 }
 0x6da   : > { %v9047_v54 = vsel %vm1271_vm0, %v8576_v28, %v10506_v1  ;;  %v9046_v44 = vsel %vm1271_vm0, %v8440_v60, %v10505_v0  ;;  %v9050_v1 = vsel %vm9048_vm1, %v9033_v39, %v10436_v42  ;;  %v10440_v60 = vunpack.i.l.bf16 %v18112_v15 }
 0x6db   : > { %v10509_v34 = vpop.permute.xlu1 %10508  ;;  %v10425_v28 = vunpack.i.l.bf16 %v16355_v63 }
 0x6dc   : > { %10688 = vrot.lane.b32.xlu1 %v10687_v43, %s11318_s30  ;;  %v10511_v23 = vunpack.i.h.bf16 %v10509_v34  ;;  %v10510_v25 = vunpack.i.l.bf16 %v10509_v34  ;;  %v9032_v43 = vsel %vm1271_vm0, %v6536_v32, %v10430_v62  ;;  %s9422_s30 = sshll.u32 %s188_s29, 7 }
 0x6dd   : > { %v9049_v37 = vsel %vm9048_vm1, %v9032_v43, %v10435_v19  ;;  %s16741_s13 = scalar_lea.vmem [#allocation2], %s9422_s30 }
 0x6de   : > { %v9063_v11 = vsel %vm9048_vm1, %v9046_v44, %v10510_v25  ;;  %v9064_v61 = vsel %vm9048_vm1, %v9047_v54, %v10511_v23  ;;  %v9051_v25 = vsel %vm9048_vm1, %v9034_v33, %v10420_v2  ;;  %v9066_v54 = vsel %vm9065_vm2, %v9049_v37, %v10440_v60  ;;  %v18113_v37 = vld [vmem:[#allocation120_spill] sm:$0xff]  ;;  %v18116_v60 = vld [vmem:[#allocation79_spill] sm:$0xff]  ;;  %s9356_s20 = sshll.u32 %s16741_s13, 4  ;;  %s16763_s20 = int_to_ptr.vmem [resolvable:$true] %s9356_s20 }
 0x6df   : > { %v9067_v44 = vsel %vm9065_vm2, %v9050_v1, %v10441_v12  ;;  %v9068_v19 = vsel %vm9065_vm2, %v9051_v25, %v10425_v28  ;;  %v18114_v1 = vld [vmem:[#allocation116_spill] sm:$0xff]  ;;  %v18118_v28 = vld [vmem:[#allocation14_spill] sm:$0xff]  ;;  %v10446_v25 = vunpack.i.h.bf16 %v16468_v59  ;;  %s11252_s28 = scalar_lea.vmem %s16763_s20, 2048  ;;  %p11259_p0 = scmp.lt.s32.totalorder %s16763_s20, %s11257_s8 }
 0x6e0   : > { %p11253_p11 = scmp.ne.s32.totalorder %s16763_s20, %s11252_s28  ;;  %p11260_p1 = scmp.lt.s32.totalorder %s11258_s10, %s11252_s28 }
 0x6e2   : > { %p11254_p12 = pnand %p11253_p11, %p11392_p5  ;;  %p11261_p2 = por %p11260_p1, %p11259_p0 }
 0x6e4   : > { %p11255_p13 = pneg %p11254_p12 }
 0x6e6   : > { %p11262_p3 = pnand %p11261_p2, %p11255_p13 }
 0x6ed   : > { %v10554_v47 = vpop.permute.xlu0 %10553 }
 0x6ee   : > { %v10514_v46 = vpop.permute.xlu1 %10513  ;;  %v10556_v0 = vunpack.i.h.bf16 %v10554_v47  ;;  %v10555_v52 = vunpack.i.l.bf16 %v10554_v47 }
 0x6ef   : > { %v10516_v22 = vunpack.i.h.bf16 %v10514_v46  ;;  %v10515_v38 = vunpack.i.l.bf16 %v10514_v46 }
 0x6f0   : > { %v9084_v46 = vsel %vm9082_vm3, %v9067_v44, %v10556_v0  ;;  %v7216_v0 = vcombine.low %v18114_v1, %v18113_v37  ;;  %v18119_v44 = vld [vmem:[#allocation112_spill] sm:$0xff] }
 0x6f1   : > { %v16580_v9 = vsel %vm9065_vm2, %v9063_v11, %v10515_v38  ;;  %v16583_v17 = vsel %vm9065_vm2, %v9064_v61, %v10516_v22  ;;  %v9052_v11 = vsel %vm9048_vm1, %v9035_v4, %v10421_v55  ;;  %v9083_v61 = vsel %vm9082_vm3, %v9066_v54, %v10555_v52  ;;  %v18115_v52 = vld [vmem:[#allocation76_spill] sm:$0xff] }
 0x6f2   : > { %v9069_v21 = vsel %vm9065_vm2, %v9052_v11, %v10426_v8  ;;  %v10445_v54 = vunpack.i.l.bf16 %v16468_v59  ;;  %v18120_v11 = vld [vmem:[#allocation49_spill] sm:$0xff] }
 0x6f6   : > { %v10559_v3 = vpop.permute.xlu0 %10558 }
 0x6f7   : > { %v10561_v13 = vunpack.i.h.bf16 %v10559_v3  ;;  %v10560_v49 = vunpack.i.l.bf16 %v10559_v3 }
 0x6f9   : > { %v9100_v63 = vsel %vm9099_vm4, %v9083_v61, %v10560_v49  ;;  %v9101_v38 = vsel %vm9099_vm4, %v9084_v46, %v10561_v13  ;;  %v18117_v13 = vld [vmem:[#allocation110_spill] sm:$0xff]  ;;  %v7352_v61 = vcombine.low %v18120_v11, %v18119_v44  ;;  %v18121_v46 = vld [vmem:[#allocation57_spill] sm:$0xff] }
 0x6fa   : > { %v7080_v49 = vcombine.low %v18117_v13, %v18116_v60 }
 0x700   : > { %v10534_v20 = vpop.permute.xlu1 %10533 }
 0x701   : > { %v10536_v53 = vunpack.i.h.bf16 %v10534_v20  ;;  %v10535_v10 = vunpack.i.l.bf16 %v10534_v20 }
 0x703   : > { %v9085_v20 = vsel %vm9082_vm3, %v9068_v19, %v10535_v10  ;;  %v9086_v45 = vsel %vm9082_vm3, %v9069_v21, %v10536_v53  ;;  %v10451_v53 = vunpack.i.h.bf16 %v16495_v40  ;;  %v10450_v10 = vunpack.i.l.bf16 %v16495_v40 }
 0x704   : > { %v10539_v5 = vpop.permute.xlu1 %10538  ;;  %v9038_v19 = vsel %vm1271_vm0, %v7352_v61, %v10445_v54 }
 0x705   : > { %v10541_v24 = vunpack.i.h.bf16 %v10539_v5  ;;  %v10540_v58 = vunpack.i.l.bf16 %v10539_v5  ;;  %v10460_v5 = vunpack.i.l.bf16 %v18115_v52 }
 0x707   : > { %v10564_v36 = vpop.permute.xlu0 %10563  ;;  %v9102_v35 = vsel %vm9099_vm4, %v9085_v20, %v10540_v58  ;;  %v9103_v26 = vsel %vm9099_vm4, %v9086_v45, %v10541_v24  ;;  %v9036_v59 = vsel %vm1271_vm0, %v7080_v49, %v10460_v5 }
 0x708   : > { %v10566_v34 = vunpack.i.h.bf16 %v10564_v36  ;;  %v10565_v23 = vunpack.i.l.bf16 %v10564_v36  ;;  %v10461_v36 = vunpack.i.h.bf16 %v18115_v52 }
 0x70a   : > { %v9117_v3 = vsel %vm9116_vm5, %v9100_v63, %v10565_v23  ;;  %v9118_v50 = vsel %vm9116_vm5, %v9101_v38, %v10566_v34  ;;  %v10466_v34 = vunpack.i.h.bf16 %v18118_v28  ;;  %v10465_v23 = vunpack.i.l.bf16 %v18118_v28  ;;  %v18123_v38 = vld [vmem:[#allocation70_spill] sm:$0xff] }
 0x70b   : > { %v10569_v22 = vpop.permute.xlu0 %10568  ;;  %v9037_v24 = vsel %vm1271_vm0, %v7216_v0, %v10461_v36 }
 0x70c   : > { %v10571_v47 = vunpack.i.h.bf16 %v10569_v22  ;;  %v10570_v6 = vunpack.i.l.bf16 %v10569_v22  ;;  %v18122_v22 = vld [vmem:[#allocation103_spill] sm:$0xff] }
 0x70d   : > { %v7488_v63 = vcombine.low %v18122_v22, %v18121_v46 }
 0x70e   : > { %v9134_v51 = vsel %vm9133_vm6, %v9117_v3, %v10570_v6  ;;  %v9135_v7 = vsel %vm9133_vm6, %v9118_v50, %v10571_v47  ;;  %v10471_v47 = vunpack.i.h.bf16 %v18123_v38  ;;  %v10470_v6 = vunpack.i.l.bf16 %v18123_v38 }
 0x70f   : > { %v9150_v42 = vpack.c.bf16 %v9135_v7, %v9134_v51 }
 0x710   : > { %v10544_v62 = vpop.permute.xlu1 %10543 }
 0x711   : > { %v10546_v30 = vunpack.i.h.bf16 %v10544_v62  ;;  %v10545_v14 = vunpack.i.l.bf16 %v10544_v62  ;;  %10345 = vmatprep.mubr.bf16.mxu1 %v9150_v42  ;;  %v9039_v42 = vsel %vm1271_vm0, %v7488_v63, %v10446_v25 }
 0x713   : > { %v9119_v4 = vsel %vm9116_vm5, %v9102_v35, %v10545_v14  ;;  %v9120_v33 = vsel %vm9116_vm5, %v9103_v26, %v10546_v30  ;;  %v9053_v30 = vsel %vm9048_vm1, %v9036_v59, %v10465_v23  ;;  %v9054_v14 = vsel %vm9048_vm1, %v9037_v24, %v10466_v34 }
 0x714   : > { %v10549_v32 = vpop.permute.xlu1 %10548  ;;  %v9070_v40 = vsel %vm9065_vm2, %v9053_v30, %v10470_v6  ;;  %v9071_v21 = vsel %vm9065_vm2, %v9054_v14, %v10471_v47  ;;  %v9056_v35 = vsel %vm9048_vm1, %v9039_v42, %v10451_v53  ;;  %v10481_v24 = vunpack.i.h.bf16 %v16564_v27  ;;  %v18126_v30 = vld [vmem:[#allocation108_spill] sm:$0xff]  ;;  %v18127_v14 = vld [vmem:[#allocation78_spill] sm:$0xff] }
 0x715   : > { %v10551_v55 = vunpack.i.h.bf16 %v10549_v32  ;;  %v10550_v2 = vunpack.i.l.bf16 %v10549_v32  ;;  %v9055_v32 = vsel %vm9048_vm1, %v9038_v19, %v10450_v10  ;;  %v10480_v59 = vunpack.i.l.bf16 %v16564_v27 }
 0x716   : > { %v10594_v31 = vpop.permute.xlu0 %10593  ;;  %v8032_v42 = vcombine.low %v18127_v14, %v18126_v30 }
 0x717   : > { %v9136_v15 = vsel %vm9133_vm6, %v9119_v4, %v10550_v2  ;;  %v9137_v8 = vsel %vm9133_vm6, %v9120_v33, %v10551_v55  ;;  %v10596_v3 = vunpack.i.h.bf16 %v10594_v31  ;;  %v10595_v50 = vunpack.i.l.bf16 %v10594_v31 }
 0x718   : > { %v9151_v12 = vpack.c.bf16 %v9137_v8, %v9136_v15  ;;  %v10456_v55 = vunpack.i.h.bf16 %v16524_v29  ;;  %v10455_v2 = vunpack.i.l.bf16 %v16524_v29 }
 0x719   : > { %v9088_v26 = vsel %vm9082_vm3, %v9071_v21, %v10596_v3  ;;  %v9087_v31 = vsel %vm9082_vm3, %v9070_v40, %v10595_v50  ;;  %v10476_v50 = vunpack.i.h.bf16 %v16544_v48 }
 0x71a   : > { %10346 = vmatmul.mubr.bf16.vlgmr.msra.gmra.mrb[144].mxu1 %v9151_v12  ;;  %v10599_v39 = vpop.permute.xlu0 %10598  ;;  %v9072_v28 = vsel %vm9065_vm2, %v9055_v32, %v10455_v2  ;;  %v9073_v34 = vsel %vm9065_vm2, %v9056_v35, %v10456_v55  ;;  %v10486_v2 = vunpack.i.h.bf16 %v16568_v16 }
 0x71b   : > { %v10601_v58 = vunpack.i.h.bf16 %v10599_v39  ;;  %v10600_v51 = vunpack.i.l.bf16 %v10599_v39  ;;  %v9043_v35 = vsel %vm1271_vm0, %v8032_v42, %v10476_v50 }
 0x71c   : > { %v9060_v55 = vsel %vm9048_vm1, %v9043_v35, %v10481_v24 }
 0x71d   : > { %v10574_v43 = vpop.permute.xlu1 %10573  ;;  %v9104_v4 = vsel %vm9099_vm4, %v9087_v31, %v10600_v51  ;;  %v9105_v33 = vsel %vm9099_vm4, %v9088_v26, %v10601_v58  ;;  %v18124_v58 = vld [vmem:[#allocation89_spill] sm:$0xff]  ;;  %v18125_v51 = vld [vmem:[#allocation111_spill] sm:$0xff] }
 0x71e   : > { %v10576_v8 = vunpack.i.h.bf16 %v10574_v43  ;;  %v10575_v12 = vunpack.i.l.bf16 %v10574_v43 }
 0x720   : > { %v9089_v23 = vsel %vm9082_vm3, %v9072_v28, %v10575_v12  ;;  %v9090_v25 = vsel %vm9082_vm3, %v9073_v34, %v10576_v8  ;;  %v9077_v34 = vsel %vm9065_vm2, %v9060_v55, %v10486_v2 }
 0x721   : > { %v10579_v62 = vpop.permute.xlu1 %10578 }
 0x722   : > { %v10581_v36 = vunpack.i.h.bf16 %v10579_v62  ;;  %v10580_v5 = vunpack.i.l.bf16 %v10579_v62  ;;  %v10475_v62 = vunpack.i.l.bf16 %v16544_v48 }
 0x723   : > { %v10604_v7 = vpop.permute.xlu0 %10603 }
 0x724   : > { %v10606_v20 = vunpack.i.h.bf16 %v10604_v7  ;;  %v10605_v45 = vunpack.i.l.bf16 %v10604_v7  ;;  %v9106_v11 = vsel %vm9099_vm4, %v9089_v23, %v10580_v5  ;;  %v9107_v61 = vsel %vm9099_vm4, %v9090_v25, %v10581_v36 }
 0x725   : > { %v7896_v7 = vcombine.low %v18125_v51, %v18124_v58 }
 0x726   : > { %v9121_v0 = vsel %vm9116_vm5, %v9104_v4, %v10605_v45  ;;  %v9122_v52 = vsel %vm9116_vm5, %v9105_v33, %v10606_v20  ;;  %v10485_v4 = vunpack.i.l.bf16 %v16568_v16 }
 0x727   : > { %v10609_v15 = vpop.permute.xlu0 %10608  ;;  %v9042_v48 = vsel %vm1271_vm0, %v7896_v7, %v10475_v62 }
 0x728   : > { %v10611_v39 = vunpack.i.h.bf16 %v10609_v15  ;;  %v10610_v37 = vunpack.i.l.bf16 %v10609_v15  ;;  %v9059_v27 = vsel %vm9048_vm1, %v9042_v48, %v10480_v59 }
 0x729   : > { %v10584_v1 = vpop.permute.xlu1 %10583  ;;  %v9076_v28 = vsel %vm9065_vm2, %v9059_v27, %v10485_v4 }
 0x72a   : > { %v10586_v60 = vunpack.i.h.bf16 %v10584_v1  ;;  %v10585_v13 = vunpack.i.l.bf16 %v10584_v1  ;;  %v9138_v29 = vsel %vm9133_vm6, %v9121_v0, %v10610_v37  ;;  %v9139_v49 = vsel %vm9133_vm6, %v9122_v52, %v10611_v39 }
 0x72b   : > { %v9152_v43 = vpack.c.bf16 %v9139_v49, %v9138_v29 }
 0x72c   : > { %v9123_v63 = vsel %vm9116_vm5, %v9106_v11, %v10585_v13  ;;  %v9124_v38 = vsel %vm9116_vm5, %v9107_v61, %v10586_v60 }
 0x72d   : > { %v10634_v54 = vpop.permute.xlu0 %10633  ;;  %v10589_v44 = vpop.permute.xlu1 %10588  ;;  %10349 = vmatprep.mubr.bf16.mxu1 %v9152_v43 }
 0x72e   : > { %v10591_v46 = vunpack.i.h.bf16 %v10589_v44  ;;  %v10590_v22 = vunpack.i.l.bf16 %v10589_v44  ;;  %v10636_v19 = vunpack.i.h.bf16 %v10634_v54  ;;  %v10635_v40 = vunpack.i.l.bf16 %v10634_v54 }
 0x730   : > { %v9140_v47 = vsel %vm9133_vm6, %v9123_v63, %v10590_v22  ;;  %v9141_v6 = vsel %vm9133_vm6, %v9124_v38, %v10591_v46  ;;  %v9092_v33 = vsel %vm9082_vm3, %v16346_v57, %v10636_v19  ;;  %v9091_v15 = vsel %vm9082_vm3, %v16343_v56, %v10635_v40 }
 0x731   : > { %v10639_v53 = vpop.permute.xlu0 %10638  ;;  %v9153_v10 = vpack.c.bf16 %v9141_v6, %v9140_v47 }
 0x732   : > { %v10614_v3 = vpop.permute.xlu1 %10613  ;;  %v10641_v20 = vunpack.i.h.bf16 %v10639_v53  ;;  %v10640_v45 = vunpack.i.l.bf16 %v10639_v53 }
 0x733   : > { %10350 = vmatmul.mubr.bf16.gmra.mrb[148].mxu1 %v9153_v10  ;;  %v10616_v8 = vunpack.i.h.bf16 %v10614_v3  ;;  %v10615_v12 = vunpack.i.l.bf16 %v10614_v3 }
 0x734   : > { %v9108_v37 = vsel %vm9099_vm4, %v9091_v15, %v10640_v45  ;;  %v9109_v1 = vsel %vm9099_vm4, %v9092_v33, %v10641_v20 }
 0x735   : > { %v10644_v21 = vpop.permute.xlu0 %10643  ;;  %v9093_v25 = vsel %vm9082_vm3, %v9076_v28, %v10615_v12  ;;  %v9094_v54 = vsel %vm9082_vm3, %v9077_v34, %v10616_v8 }
 0x736   : > { %v10619_v32 = vpop.permute.xlu1 %10618  ;;  %v10646_v26 = vunpack.i.h.bf16 %v10644_v21  ;;  %v10645_v31 = vunpack.i.l.bf16 %v10644_v21 }
 0x737   : > { %v10621_v60 = vunpack.i.h.bf16 %v10619_v32  ;;  %v10620_v13 = vunpack.i.l.bf16 %v10619_v32 }
 0x738   : > { %v9125_v5 = vsel %vm9116_vm5, %v9108_v37, %v10645_v31  ;;  %v9126_v16 = vsel %vm9116_vm5, %v9109_v1, %v10646_v26 }
 0x739   : > { %v10649_v39 = vpop.permute.xlu0 %10648  ;;  %v9110_v11 = vsel %vm9099_vm4, %v9093_v25, %v10620_v13  ;;  %v9111_v61 = vsel %vm9099_vm4, %v9094_v54, %v10621_v60 }
 0x73a   : > { %v10651_v0 = vunpack.i.h.bf16 %v10649_v39  ;;  %v10650_v52 = vunpack.i.l.bf16 %v10649_v39  ;;  %v10624_v36 = vpop.permute.xlu1 %10623 }
 0x73b   : > { %v10626_v57 = vunpack.i.h.bf16 %v10624_v36  ;;  %v10625_v29 = vunpack.i.l.bf16 %v10624_v36 }
 0x73c   : > { %v9142_v56 = vsel %vm9133_vm6, %v9125_v5, %v10650_v52  ;;  %v9143_v49 = vsel %vm9133_vm6, %v9126_v16, %v10651_v0 }
 0x73d   : > { %v10669_v43 = vpop.permute.xlu0 %10668  ;;  %v9154_v23 = vpack.c.bf16 %v9143_v49, %v9142_v56  ;;  %v9127_v63 = vsel %vm9116_vm5, %v9110_v11, %v10625_v29  ;;  %v9128_v38 = vsel %vm9116_vm5, %v9111_v61, %v10626_v57 }
 0x73e   : > { %v10629_v44 = vpop.permute.xlu1 %10628  ;;  %v10671_v50 = vunpack.i.h.bf16 %v10669_v43  ;;  %v10670_v62 = vunpack.i.l.bf16 %v10669_v43 }
 0x73f   : > { %v10631_v46 = vunpack.i.h.bf16 %v10629_v44  ;;  %v10630_v22 = vunpack.i.l.bf16 %v10629_v44  ;;  %10353 = vmatprep.mubr.bf16.mxu1 %v9154_v23 }
 0x740   : > { %v9096_v14 = vsel %vm9082_vm3, %v16557_v18, %v10671_v50  ;;  %v9095_v42 = vsel %vm9082_vm3, %v16561_v41, %v10670_v62 }
 0x741   : > { %v10674_v47 = vpop.permute.xlu0 %10673  ;;  %v9144_v6 = vsel %vm9133_vm6, %v9127_v63, %v10630_v22  ;;  %v9145_v53 = vsel %vm9133_vm6, %v9128_v38, %v10631_v46 }
 0x742   : > { %v10654_v10 = vpop.permute.xlu1 %10653  ;;  %v9155_v3 = vpack.c.bf16 %v9145_v53, %v9144_v6  ;;  %v10676_v59 = vunpack.i.h.bf16 %v10674_v47  ;;  %v10675_v58 = vunpack.i.l.bf16 %v10674_v47 }
 0x743   : > { %v10656_v19 = vunpack.i.h.bf16 %v10654_v10  ;;  %v10655_v40 = vunpack.i.l.bf16 %v10654_v10 }
 0x744   : > { %10354 = vmatmul.mubr.bf16.gmra.mrb[152].mxu1 %v9155_v3  ;;  %v9112_v20 = vsel %vm9099_vm4, %v9095_v42, %v10675_v58  ;;  %v9113_v45 = vsel %vm9099_vm4, %v9096_v14, %v10676_v59 }
 0x745   : > { %v10679_v24 = vpop.permute.xlu0 %10678  ;;  %v9097_v15 = vsel %vm9082_vm3, %v16580_v9, %v10655_v40  ;;  %v9098_v8 = vsel %vm9082_vm3, %v16583_v17, %v10656_v19  ;;  %v9649_v17 = vld [vmem:[%s16814_s3] ss:$0 sm:$0xff] }
 0x746   : > { %v10659_v51 = vpop.permute.xlu1 %10658  ;;  %v10681_v7 = vunpack.i.h.bf16 %v10679_v24  ;;  %v10680_v30 = vunpack.i.l.bf16 %v10679_v24 }
 0x747   : > { %v10661_v27 = vunpack.i.h.bf16 %v10659_v51  ;;  %v10660_v55 = vunpack.i.l.bf16 %v10659_v51 }
 0x748   : > { %v9129_v26 = vsel %vm9116_vm5, %v9112_v20, %v10680_v30  ;;  %v9130_v31 = vsel %vm9116_vm5, %v9113_v45, %v10681_v7 }
 0x749   : > { %v10684_v21 = vpop.permute.xlu0 %10683  ;;  %v9114_v39 = vsel %vm9099_vm4, %v9097_v15, %v10660_v55  ;;  %v9115_v37 = vsel %vm9099_vm4, %v9098_v8, %v10661_v27 }
 0x74a   : > { %v10686_v32 = vunpack.i.h.bf16 %v10684_v21  ;;  %v10685_v35 = vunpack.i.l.bf16 %v10684_v21  ;;  %v10664_v48 = vpop.permute.xlu1 %10663 }
 0x74b   : > { %v10666_v18 = vunpack.i.h.bf16 %v10664_v48  ;;  %v10665_v2 = vunpack.i.l.bf16 %v10664_v48 }
 0x74c   : > { %v9146_v41 = vsel %vm9133_vm6, %v9129_v26, %v10685_v35  ;;  %v9147_v4 = vsel %vm9133_vm6, %v9130_v31, %v10686_v32 }
 0x74d   : > { %v9156_v33 = vpack.c.bf16 %v9147_v4, %v9146_v41  ;;  %v9131_v52 = vsel %vm9116_vm5, %v9114_v39, %v10665_v2  ;;  %v9132_v36 = vsel %vm9116_vm5, %v9115_v37, %v10666_v18 }
 0x74e   : > { %v10689_v12 = vpop.permute.xlu1 %10688 }
 0x74f   : > { %v10691_v1 = vunpack.i.h.bf16 %v10689_v12  ;;  %v10690_v0 = vunpack.i.l.bf16 %v10689_v12  ;;  %10357 = vmatprep.mubr.bf16.mxu1 %v9156_v33 }
 0x751   : > { %v9148_v5 = vsel %vm9133_vm6, %v9131_v52, %v10690_v0  ;;  %v9149_v16 = vsel %vm9133_vm6, %v9132_v36, %v10691_v1 }
 0x752   : > { %v9157_v9 = vpack.c.bf16 %v9149_v16, %v9148_v5 }
 0x754   : > { %10358 = vmatmul.mubr.bf16.gmra.mrb[156].mxu1 %v9157_v9 }
 0x7ed   : > { %v10347_v60 = vpop.f32.mrb[144].mxu1 }
 0x7ee   : > { %v9272_v13 = vadd.f32 %v10347_v60, %v9649_v17  ;;  %v9263_v57 = vpop.f32.mrb[145].mxu1 }
 0x7ef   : > { %v9264_v29 = vadd.f32 %v9649_v17, %v9263_v57  ;;  %v10348_v56 = vpop.f32.mrb[146].mxu1 }
 0x7f0   : > { %9328 = vst [vmem:[%s16741_s13 + $0x10] sm:$0xff] %v9272_v13  ;;  %v9275_v49 = vadd.f32 %v10348_v56, %v9649_v17  ;;  %v9266_v28 = vpop.f32.mrb[147].mxu1 }
 0x7f1   : > { %9326 = vst [vmem:[%s16741_s13] sm:$0xff] %v9264_v29  ;;  %v9267_v34 = vadd.f32 %v9649_v17, %v9266_v28 }
 0x7f2   : > { %9329 = vst [vmem:[%s16741_s13 + $0x18] sm:$0xff] %v9275_v49 }
 0x7f3   : > { %9327 = vst [vmem:[%s16741_s13 + $0x8] sm:$0xff] %v9267_v34 }
 0x806   : > { %v10351_v43 = vpop.f32.mrb[148].mxu1 }
 0x807   : > { %v9288_v23 = vadd.f32 %v10351_v43, %v9649_v17  ;;  %v9279_v25 = vpop.f32.mrb[149].mxu1 }
 0x808   : > { %v9280_v54 = vadd.f32 %v9649_v17, %v9279_v25  ;;  %v10352_v44 = vpop.f32.mrb[150].mxu1 }
 0x809   : > { %9332 = vst [vmem:[%s16741_s13 + $0x30] sm:$0xff] %v9288_v23  ;;  %v9291_v11 = vadd.f32 %v10352_v44, %v9649_v17  ;;  %v9282_v61 = vpop.f32.mrb[151].mxu1 }
 0x80a   : > { %9330 = vst [vmem:[%s16741_s13 + $0x20] sm:$0xff] %v9280_v54  ;;  %v9283_v46 = vadd.f32 %v9649_v17, %v9282_v61 }
 0x80b   : > { %9333 = vst [vmem:[%s16741_s13 + $0x38] sm:$0xff] %v9291_v11 }
 0x80c   : > { %9331 = vst [vmem:[%s16741_s13 + $0x28] sm:$0xff] %v9283_v46 }
 0x817   : > { %v10355_v22 = vpop.f32.mrb[152].mxu1 }
 0x818   : > { %v9304_v63 = vadd.f32 %v10355_v22, %v9649_v17  ;;  %v9295_v38 = vpop.f32.mrb[153].mxu1 }
 0x819   : > { %v9296_v47 = vadd.f32 %v9649_v17, %v9295_v38  ;;  %v10356_v6 = vpop.f32.mrb[154].mxu1 }
 0x81a   : > { %9336 = vst [vmem:[%s16741_s13 + $0x50] sm:$0xff] %v9304_v63  ;;  %v9307_v53 = vadd.f32 %v10356_v6, %v9649_v17  ;;  %v9298_v10 = vpop.f32.mrb[155].mxu1 }
 0x81b   : > { %9334 = vst [vmem:[%s16741_s13 + $0x40] sm:$0xff] %v9296_v47  ;;  %v9299_v3 = vadd.f32 %v9649_v17, %v9298_v10 }
 0x81c   : > { %9337 = vst [vmem:[%s16741_s13 + $0x58] sm:$0xff] %v9307_v53 }
 0x81d   : > { %9335 = vst [vmem:[%s16741_s13 + $0x48] sm:$0xff] %v9299_v3 }
 0x827   : > { %v10359_v50 = vpop.f32.mrb[156].mxu1 }
 0x828   : > { %v9320_v62 = vadd.f32 %v10359_v50, %v9649_v17  ;;  %v9311_v24 = vpop.f32.mrb[157].mxu1 }
 0x829   : > { %v9312_v59 = vadd.f32 %v9649_v17, %v9311_v24  ;;  %v10360_v58 = vpop.f32.mrb[158].mxu1 }
 0x82a   : > { %9340 = vst [vmem:[%s16741_s13 + $0x70] sm:$0xff] %v9320_v62  ;;  %v9323_v51 = vadd.f32 %v10360_v58, %v9649_v17  ;;  %v9314_v7 = vpop.f32.mrb[159].mxu1 }
 0x82b   : > { %9338 = vst [vmem:[%s16741_s13 + $0x60] sm:$0xff] %v9312_v59  ;;  %v9315_v30 = vadd.f32 %v9649_v17, %v9314_v7 }
 0x82c   : > { %9341 = vst [vmem:[%s16741_s13 + $0x78] sm:$0xff] %v9323_v51 }
 0x82d   : > { %9339 = vst [vmem:[%s16741_s13 + $0x68] sm:$0xff] %v9315_v30 }
 0x82e   : > { %11265 = shalt.err (!%p11262_p3)
}
 0x82f   : > { %s11266_s9 = scalar_lea.hbm %s16761_s27, 2048  ;;  %s11270_s29 = scalar_lea.hbm %s16815_s4, 4096 }
 0x830   : > { %p11267_p4 = scmp.ne.s32.totalorder %s16761_s27, %s11266_s9  ;;  %p11271_p9 = scmp.lt.u32.totalorder %s16761_s27, %s16815_s4 }
 0x831   : > { %p11272_p10 = scmp.lt.u32.totalorder %s11270_s29, %s11266_s9  ;;  %p11274_p12 = scmp.lt.u32.totalorder %s11266_s9, %s16761_s27 }
 0x832   : > { %p11268_p7 = pnand %p11267_p4, %p11392_p5 }
 0x833   : > { %p11273_p11 = por %p11272_p10, %p11271_p9 }
 0x834   : > { %p11269_p8 = pneg %p11268_p7 }
 0x835   : > { %p11275_p13 = por %p11274_p12, %p11273_p11 }
 0x837   : > { %p11276_p0 = pnand %p11275_p13, %p11269_p8 }
 0x839   : > { %11279 = shalt.err (!%p11276_p0)
}
 0x83a   : > { %s11327_s6 = smov 128   ;;  %s11328_s13 = smov 8  }
 0x83b   : > { %10361 = dma.vmem_to_hbm [thread:$0]  (%p11392_p5), %s16763_s20, 2048, %s16761_s27, %s16770_s19, %s11327_s6, %s11327_s6, %s11328_s13  }
 0x83c PF: > { %p10367_p1 = scmp.ge.s32.totalorder %s11314_s18, 2  ;;  %s9371_s14 = sand.u32 1, %s11302_s15  }
 0x83d   : > { %s9372_s22 = scalar_lea.sflag [#allocation3], %s9371_s14 }
 0x83e   : > { %p10364_p2 = pnand %p10367_p1, %p11396_p6 }
 0x840   : > { %11297 = dma.done.wait (!%p10364_p2), %s9372_s22, 2048  }
 0x841   : > { %11299 = vsyncadd (!%p10364_p2), %s9372_s22, 4294965248  ;;  %p14_p3 = scmp.ge.s32.totalorder %s11379_s21, 4   ;;  %s18128_s15 = smov %s11306_s16 }
 0x842   : > { %s18129_s16 = smov %s11310_s17  ;;  %s18130_s17 = smov %s11390_s24 }
 0x843   : > { %s18131_s18 = smov %s11379_s21  ;;  %16 = sbr.rel (!%p14_p3) target bundleno = 3 (0x3), region = 71 }
 0x84a   :  { %9377 = vsyncpa [#allocation3], 1 }
 0x84b   :  { %9379 = vsyncpa [#allocation3 + $0x1], 1 }

</bundles_post_ra>
